<compile_context>
chip_gen: v5e
topology: v5e:2x2
jax: 0.10.0
libtpu: 0.0.40
codegen_flags: <defaults>
</compile_context>

<pallas_src>
import jax
import jax.numpy as jnp
from jax.experimental import pallas as pl
from jax.experimental.pallas import tpu as pltpu


def _round_up(x, m):
    return (x + m - 1) // m * m


def _pick_tile_t(T, cap=16):
    """Largest multiple of 8 that divides T (<= cap); falls back to T."""
    best = None
    for cand in range(8, min(cap, T) + 1, 8):
        if T % cand == 0:
            best = cand
    return best if best is not None else T


def _sigmoid(x):
    # One-pass EUP sigmoid (single tanh) instead of exp + divide.
    return 0.5 * jnp.tanh(0.5 * x) + 0.5


def bilstm_classifier_kernel(x_ref, wxf_ref, bxf_ref, whh_ref, wxb_ref, bxb_ref,
                             w1f_ref, w1b_ref, b1_ref, w2_ref, b2_ref,
                             out_ref, xg_ref, h_ref, c_ref):
    # x_ref  : (B_pad, tile_T, H) f32   current sequence tile (clamped at end)
    # wxf_ref: (H, 4*Hl) bf16  forward  input weights, gate order [i, f, o, g]
    # bxf_ref: (1, 4*Hl) f32   forward  combined bias (b_ih + b_hh)
    # whh_ref: (Hl, 4*Hl) bf16 forward  recurrent weights
    # wxb_ref/bxb_ref: backward-direction input weights / bias (one step only)
    # xg_ref : (2*tile_T, B_pad, 4*Hl) f32 double-buffered projection scratch
    # h_ref/c_ref: (B_pad, Hl) f32 forward LSTM state carried across tiles
    B, tile_T, H = x_ref.shape
    Hl, G4 = whh_ref.shape
    t = pl.program_id(0)
    last = pl.num_programs(0) - 1

    # Hoisted bias broadcast (JAX does not CSE broadcast_in_dim inside loops).
    bxf = jnp.broadcast_to(bxf_ref[...], (B, G4))

    def project_row(s, slot):
        # Project timestep `s` of the tile resident in x_ref into scratch
        # `slot` (time-major).  Independent of the recurrence chain -> the
        # scheduler can use it as MXU filler.  `s` is a static Python int.
        xrow = x_ref[:, s, :].astype(jnp.bfloat16)                    # (B, H)
        xg_ref[slot * tile_T + s] = (
            jnp.dot(xrow, wxf_ref[...], preferred_element_type=jnp.float32)
            + bxf)

    @pl.when(t == 0)
    def _prologue():
        h_ref[...] = jnp.zeros_like(h_ref)
        c_ref[...] = jnp.zeros_like(c_ref)
        for s in range(tile_T):                     # prime slot 0 with tile 0
            project_row(s, 0)

    @pl.when(t > 0)
    def _body():
        wslot = t % 2            # slot receiving tile t's projection
        rslot = 1 - wslot        # slot holding tile t-1's projection
        whh = whh_ref[...]       # hoisted once per tile
        h = h_ref[...]
        c = c_ref[...]
        # Static unroll bounded by tile_T: recurrence over tile t-1
        # interleaved with the projection of tile t (same basic block).
        for s in range(tile_T):
            gates = (xg_ref[rslot * tile_T + s]
                     + jnp.dot(h.astype(jnp.bfloat16), whh,
                               preferred_element_type=jnp.float32))
            sfo = _sigmoid(gates[:, :3 * Hl])        # [i | f | o] slab
            g = jnp.tanh(gates[:, 3 * Hl:])          # [g] slab
            c = sfo[:, Hl:2 * Hl] * c + sfo[:, :Hl] * g
            h = sfo[:, 2 * Hl:3 * Hl] * jnp.tanh(c)
            # Projection of the NEXT tile's timestep s (at t == last this
            # redundantly re-projects the final tile into a dead slot).
            project_row(s, wslot)
        h_ref[...] = h
        c_ref[...] = c

        @pl.when(t == last)
        def _epilogue():
            # Backward direction of lstm_output[:, -1, Hl:]: a single reverse
            # step from zero state on the global last timestep (f*c0 == 0,
            # h0 @ whh_b == 0, so whh_b is never needed).
            xlast = x_ref[:, tile_T - 1, :].astype(jnp.bfloat16)
            gb = (jnp.dot(xlast, wxb_ref[...],
                          preferred_element_type=jnp.float32) + bxb_ref[...])
            sb = _sigmoid(gb[:, :3 * Hl])
            ggb = jnp.tanh(gb[:, 3 * Hl:])
            c_b = sb[:, :Hl] * ggb
            h_b = sb[:, 2 * Hl:3 * Hl] * jnp.tanh(c_b)

            # Classifier head (w1 split -> no lane concat of h / h_b).
            hidden = jnp.maximum(
                jnp.dot(h.astype(jnp.bfloat16), w1f_ref[...],
                        preferred_element_type=jnp.float32)
                + jnp.dot(h_b.astype(jnp.bfloat16), w1b_ref[...],
                          preferred_element_type=jnp.float32)
                + b1_ref[...], 0.0)
            # TODO(synk): Dropout(p=0.1) is identity in eval mode.
            out_ref[...] = (jnp.dot(hidden.astype(jnp.bfloat16), w2_ref[...],
                                    preferred_element_type=jnp.float32)
                            + b2_ref[...]).astype(out_ref.dtype)


def bilstm_classifier(sequence_output, params, *, max_tile_t=16):
    """sequence_output: (B, T, H) f32 -> logits (B, num_labels) f32."""
    B, T, H = sequence_output.shape
    Hl = params["whh_f"].shape[0]
    L = params["w2"].shape[1]
    G4 = 4 * Hl

    B_pad = max(8, _round_up(B, 8))          # full sublane tile
    L_pad = max(128, _round_up(L, 128))      # lane-dense output store
    tile_T = _pick_tile_t(T, max_tile_t)
    n_tiles = T // tile_T
    last_tile = n_tiles - 1

    x = sequence_output
    if B_pad != B:
        x = jnp.pad(x, ((0, B_pad - B), (0, 0), (0, 0)))
    # x stays batch-major f32: the Pallas pipeline streams (B_pad, tile_T, H)
    # slabs; no wrapper-side transpose/reshape/astype HBM round trip.

    def reorder(w):  # PyTorch gate order [i, f, g, o] -> kernel order [i, f, o, g]
        i, f, g, o = jnp.split(w, 4, axis=1)
        return jnp.concatenate([i, f, o, g], axis=1)

    wxf = reorder(params["wih_f"]).astype(jnp.bfloat16)          # (H, 4*Hl)
    bxf = reorder(params["b_f"]).astype(jnp.float32)             # (1, 4*Hl)
    whh = reorder(params["whh_f"]).astype(jnp.bfloat16)          # (Hl, 4*Hl)
    wxb = reorder(params["wih_b"]).astype(jnp.bfloat16)          # (H, 4*Hl)
    bxb = reorder(params["b_b"]).astype(jnp.float32)             # (1, 4*Hl)
    # whh_b never contributes (backward h0 == 0) -> not shipped to the kernel.
    w1f = params["w1"][:Hl].astype(jnp.bfloat16)                 # (Hl, Hl)
    w1b = params["w1"][Hl:].astype(jnp.bfloat16)                 # (Hl, Hl)
    b1 = params["b1"].astype(jnp.float32)                        # (1, Hl)
    w2 = jnp.pad(params["w2"], ((0, 0), (0, L_pad - L))).astype(jnp.bfloat16)
    b2 = jnp.pad(params["b2"], ((0, 0), (0, L_pad - L))).astype(jnp.float32)

    weights = (wxf, bxf, whh, wxb, bxb, w1f, w1b, b1, w2, b2)

    def const_spec(a):
        return pl.BlockSpec(a.shape, lambda t, nd=a.ndim: (0,) * nd)

    x_spec = pl.BlockSpec((B_pad, tile_T, H),
                          lambda t: (0, jnp.minimum(t, last_tile), 0))

    # VMEM budget derived from the actual shapes (no hardcoded 32 MiB).
    weight_bytes = sum(int(a.size) * a.dtype.itemsize for a in weights)
    x_tile_bytes = B_pad * tile_T * H * 4
    scratch_bytes = (2 * tile_T * B_pad * G4 + 2 * B_pad * Hl) * 4
    out_bytes = B_pad * L_pad * 4
    vmem_limit = (2 * (x_tile_bytes + weight_bytes + out_bytes)
                  + scratch_bytes + (8 << 20))
    vmem_limit = int(min(max(vmem_limit, 32 << 20), 112 << 20))

    out = pl.pallas_call(
        bilstm_classifier_kernel,
        out_shape=jax.ShapeDtypeStruct((B_pad, L_pad), jnp.float32),
        grid=(n_tiles + 1,),                       # +1: skewed pipeline drain
        in_specs=[x_spec] + [const_spec(a) for a in weights],
        out_specs=pl.BlockSpec((B_pad, L_pad), lambda t: (0, 0)),
        scratch_shapes=[
            pltpu.VMEM((2 * tile_T, B_pad, G4), jnp.float32),   # xg (2 slots)
            pltpu.VMEM((B_pad, Hl), jnp.float32),               # h carry
            pltpu.VMEM((B_pad, Hl), jnp.float32),               # c carry
        ],
        compiler_params=pltpu.CompilerParams(
            dimension_semantics=("arbitrary",),    # serial carry across tiles
            vmem_limit_bytes=vmem_limit),
    )(x, *weights)
    return out[:B, :L]


def init_params(key, hidden_size, lstm_hidden, num_labels):
    """PyTorch-faithful parameters: LSTM weights pre-transposed to (in, 4*Hl)
    with PyTorch gate order [i, f, g, o]; b_* = b_ih + b_hh combined."""
    ks = jax.random.split(key, 10)
    s = 0.1
    return {
        "wih_f": s * jax.random.normal(ks[0], (hidden_size, 4 * lstm_hidden), jnp.float32),
        "whh_f": s * jax.random.normal(ks[1], (lstm_hidden, 4 * lstm_hidden), jnp.float32),
        "b_f":   s * jax.random.normal(ks[2], (1, 4 * lstm_hidden), jnp.float32),
        "wih_b": s * jax.random.normal(ks[3], (hidden_size, 4 * lstm_hidden), jnp.float32),
        "whh_b": s * jax.random.normal(ks[4], (lstm_hidden, 4 * lstm_hidden), jnp.float32),
        "b_b":   s * jax.random.normal(ks[5], (1, 4 * lstm_hidden), jnp.float32),
        "w1": s * jax.random.normal(ks[6], (2 * lstm_hidden, lstm_hidden), jnp.float32),
        "b1": s * jax.random.normal(ks[7], (1, lstm_hidden), jnp.float32),
        "w2": s * jax.random.normal(ks[8], (lstm_hidden, num_labels), jnp.float32),
        "b2": s * jax.random.normal(ks[9], (1, num_labels), jnp.float32),
    }


def reference_forward(sequence_output, params):
    """Pure-JAX mirror of the module numerics (PyTorch i,f,g,o gate order,
    combined biases; bf16 matmul operands with f32 accumulation, matching the
    kernel's quantization)."""
    B, T, H = sequence_output.shape
    Hl = params["whh_f"].shape[0]
    bf = jnp.bfloat16

    def mm(a, b):
        return jnp.dot(a.astype(bf), b.astype(bf),
                       preferred_element_type=jnp.float32)

    def cell(x_t, h, c, wih, whh, b):
        g = mm(x_t, wih) + mm(h, whh) + b
        i = jax.nn.sigmoid(g[:, 0 * Hl:1 * Hl])
        f = jax.nn.sigmoid(g[:, 1 * Hl:2 * Hl])
        gg = jnp.tanh(g[:, 2 * Hl:3 * Hl])
        o = jax.nn.sigmoid(g[:, 3 * Hl:4 * Hl])
        c = f * c + i * gg
        return o * jnp.tanh(c), c

    h = jnp.zeros((B, Hl), jnp.float32)
    c = jnp.zeros((B, Hl), jnp.float32)
    for t in range(T):
        h, c = cell(sequence_output[:, t, :], h, c,
                    params["wih_f"], params["whh_f"], params["b_f"])
    hb, _ = cell(sequence_output[:, T - 1, :],
                 jnp.zeros((B, Hl), jnp.float32), jnp.zeros((B, Hl), jnp.float32),
                 params["wih_b"], params["whh_b"], params["b_b"])
    pooled = jnp.concatenate([h, hb], axis=-1)
    hidden = jnp.maximum(mm(pooled, params["w1"]) + params["b1"], 0.0)
    return mm(hidden, params["w2"]) + params["b2"]


if __name__ == "__main__":
    # Small but lane/sublane-friendly demo shapes (real model: H=768, Hl=256).
    # T=24 with tile_T=8 -> 3 tiles + 1 drain step: exercises prologue, both
    # double-buffer slots, and the epilogue.
    B, T, H = 2, 24, 128          # batch, seq len, transformer hidden size
    Hl, L = 128, 4                # lstm_hidden_size, num_labels

    key = jax.random.PRNGKey(0)
    k_x, k_p = jax.random.split(key)
    sequence_output = jax.random.normal(k_x, (B, T, H), jnp.float32)
    params = init_params(k_p, H, Hl, L)

    fwd = jax.jit(bilstm_classifier)
    logits = jax.block_until_ready(fwd(sequence_output, params))

    ref = reference_forward(sequence_output, params)
    assert logits.shape == (B, L)
    assert jnp.allclose(logits, ref, atol=2e-2, rtol=2e-2), (logits, ref)

    print("KERNEL_OK")
</pallas_src>

<mosaic_0001>
module attributes {stable_mosaic.version = 11 : i64} {
  func.func @bilstm_classifier_kernel(%arg0: i32, %arg1: memref<8x8x128xf32, #tpu.memory_space<vmem>>, %arg2: memref<128x512xbf16, #tpu.memory_space<vmem>>, %arg3: memref<1x512xf32, #tpu.memory_space<vmem>>, %arg4: memref<128x512xbf16, #tpu.memory_space<vmem>>, %arg5: memref<128x512xbf16, #tpu.memory_space<vmem>>, %arg6: memref<1x512xf32, #tpu.memory_space<vmem>>, %arg7: memref<128x128xbf16, #tpu.memory_space<vmem>>, %arg8: memref<128x128xbf16, #tpu.memory_space<vmem>>, %arg9: memref<1x128xf32, #tpu.memory_space<vmem>>, %arg10: memref<128x128xbf16, #tpu.memory_space<vmem>>, %arg11: memref<1x128xf32, #tpu.memory_space<vmem>>, %arg12: memref<8x128xf32, #tpu.memory_space<vmem>>, %arg13: memref<16x8x512xf32, #tpu.memory_space<vmem>>, %arg14: memref<8x128xf32, #tpu.memory_space<vmem>>, %arg15: memref<8x128xf32, #tpu.memory_space<vmem>>) attributes {dimension_semantics = [#tpu.dimension_semantics<arbitrary>], iteration_bounds = array<i64: 4>, scalar_prefetch = 0 : i64, scratch_operands = 3 : i64, tpu.core_type = #tpu.core_type<tc>, window_params = [{transform_indices = @transform_0, window_bounds = array<i64: 8, 8, 128>}, {pipeline_mode = #tpu.pipeline_mode<synchronous>, transform_indices = @transform_1, window_bounds = array<i64: 128, 512>}, {pipeline_mode = #tpu.pipeline_mode<synchronous>, transform_indices = @transform_2, window_bounds = array<i64: 1, 512>}, {pipeline_mode = #tpu.pipeline_mode<synchronous>, transform_indices = @transform_3, window_bounds = array<i64: 128, 512>}, {pipeline_mode = #tpu.pipeline_mode<synchronous>, transform_indices = @transform_4, window_bounds = array<i64: 128, 512>}, {pipeline_mode = #tpu.pipeline_mode<synchronous>, transform_indices = @transform_5, window_bounds = array<i64: 1, 512>}, {pipeline_mode = #tpu.pipeline_mode<synchronous>, transform_indices = @transform_6, window_bounds = array<i64: 128, 128>}, {pipeline_mode = #tpu.pipeline_mode<synchronous>, transform_indices = @transform_7, window_bounds = array<i64: 128, 128>}, {pipeline_mode = #tpu.pipeline_mode<synchronous>, transform_indices = @transform_8, window_bounds = array<i64: 1, 128>}, {pipeline_mode = #tpu.pipeline_mode<synchronous>, transform_indices = @transform_9, window_bounds = array<i64: 128, 128>}, {pipeline_mode = #tpu.pipeline_mode<synchronous>, transform_indices = @transform_10, window_bounds = array<i64: 1, 128>}, {pipeline_mode = #tpu.pipeline_mode<synchronous>, transform_indices = @transform_11, window_bounds = array<i64: 8, 128>}]} {
    %c0 = arith.constant 0 : index
    %c0_0 = arith.constant 0 : index
    %0 = vector.load %arg3[%c0, %c0_0] : memref<1x512xf32, #tpu.memory_space<vmem>>, vector<1x512xf32>
    %1 = vector.shape_cast %0 : vector<1x512xf32> to vector<1x512xf32>
    %2 = vector.broadcast %1 : vector<1x512xf32> to vector<8x512xf32>
    %c0_i32 = arith.constant 0 : i32
    %3 = arith.cmpi eq, %arg0, %c0_i32 : i32
    %4 = arith.extui %3 : i1 to i32
    %c0_i32_1 = arith.constant 0 : i32
    %5 = arith.cmpi ne, %4, %c0_i32_1 : i32
    scf.if %5 {
      %cst = arith.constant 0.000000e+00 : f32
      %9 = vector.broadcast %cst : f32 to vector<8x128xf32>
      %c0_4 = arith.constant 0 : index
      %c0_5 = arith.constant 0 : index
      %10 = vector.load %arg14[%c0_4, %c0_5] : memref<8x128xf32, #tpu.memory_space<vmem>>, vector<8x128xf32>
      tpu.vector_store %arg14[%c0_4, %c0_5], %9 {strides = array<i32>} : memref<8x128xf32, #tpu.memory_space<vmem>>, vector<8x128xf32>,
      %cst_6 = arith.constant 0.000000e+00 : f32
      %11 = vector.broadcast %cst_6 : f32 to vector<8x128xf32>
      %c0_7 = arith.constant 0 : index
      %c0_8 = arith.constant 0 : index
      %12 = vector.load %arg15[%c0_7, %c0_8] : memref<8x128xf32, #tpu.memory_space<vmem>>, vector<8x128xf32>
      tpu.vector_store %arg15[%c0_7, %c0_8], %11 {strides = array<i32>} : memref<8x128xf32, #tpu.memory_space<vmem>>, vector<8x128xf32>,
      %c0_9 = arith.constant 0 : index
      %c0_10 = arith.constant 0 : index
      %c0_11 = arith.constant 0 : index
      %13 = vector.load %arg1[%c0_9, %c0_10, %c0_11] : memref<8x8x128xf32, #tpu.memory_space<vmem>>, vector<8x1x128xf32>
      %14 = vector.shape_cast %13 : vector<8x1x128xf32> to vector<8x128xf32>
      %15 = arith.truncf %14 : vector<8x128xf32> to vector<8x128xbf16>
      %c0_12 = arith.constant 0 : index
      %c0_13 = arith.constant 0 : index
      %16 = vector.load %arg2[%c0_12, %c0_13] : memref<128x512xbf16, #tpu.memory_space<vmem>>, vector<128x512xbf16>
      %cst_14 = arith.constant dense<0.000000e+00> : vector<8x512xf32>
      %17 = tpu.matmul %15, %16, %cst_14 {dimension_numbers = #tpu.dot_dimension_numbers<[1], [0], [0], [1], [0, 0, 1, 1], [], []>} : vector<8x128xbf16>, vector<128x512xbf16>, vector<8x512xf32> -> vector<8x512xf32>
      %18 = arith.addf %17, %2 : vector<8x512xf32>
      %c0_15 = arith.constant 0 : index
      %c0_16 = arith.constant 0 : index
      %c0_17 = arith.constant 0 : index
      %19 = vector.load %arg13[%c0_15, %c0_16, %c0_17] : memref<16x8x512xf32, #tpu.memory_space<vmem>>, vector<1x8x512xf32>
      %20 = vector.shape_cast %19 : vector<1x8x512xf32> to vector<8x512xf32>
      %21 = vector.shape_cast %18 : vector<8x512xf32> to vector<1x8x512xf32>
      tpu.vector_store %arg13[%c0_15, %c0_16, %c0_17], %21 {strides = array<i32>} : memref<16x8x512xf32, #tpu.memory_space<vmem>>, vector<1x8x512xf32>,
      %c0_18 = arith.constant 0 : index
      %c1 = arith.constant 1 : index
      %c0_19 = arith.constant 0 : index
      %22 = vector.load %arg1[%c0_18, %c1, %c0_19] : memref<8x8x128xf32, #tpu.memory_space<vmem>>, vector<8x1x128xf32>
      %23 = vector.shape_cast %22 : vector<8x1x128xf32> to vector<8x128xf32>
      %24 = arith.truncf %23 : vector<8x128xf32> to vector<8x128xbf16>
      %c0_20 = arith.constant 0 : index
      %c0_21 = arith.constant 0 : index
      %25 = vector.load %arg2[%c0_20, %c0_21] : memref<128x512xbf16, #tpu.memory_space<vmem>>, vector<128x512xbf16>
      %cst_22 = arith.constant dense<0.000000e+00> : vector<8x512xf32>
      %26 = tpu.matmul %24, %25, %cst_22 {dimension_numbers = #tpu.dot_dimension_numbers<[1], [0], [0], [1], [0, 0, 1, 1], [], []>} : vector<8x128xbf16>, vector<128x512xbf16>, vector<8x512xf32> -> vector<8x512xf32>
      %27 = arith.addf %26, %2 : vector<8x512xf32>
      %c1_23 = arith.constant 1 : index
      %c0_24 = arith.constant 0 : index
      %c0_25 = arith.constant 0 : index
      %28 = vector.load %arg13[%c1_23, %c0_24, %c0_25] : memref<16x8x512xf32, #tpu.memory_space<vmem>>, vector<1x8x512xf32>
      %29 = vector.shape_cast %28 : vector<1x8x512xf32> to vector<8x512xf32>
      %30 = vector.shape_cast %27 : vector<8x512xf32> to vector<1x8x512xf32>
      tpu.vector_store %arg13[%c1_23, %c0_24, %c0_25], %30 {strides = array<i32>} : memref<16x8x512xf32, #tpu.memory_space<vmem>>, vector<1x8x512xf32>,
      %c0_26 = arith.constant 0 : index
      %c2 = arith.constant 2 : index
      %c0_27 = arith.constant 0 : index
      %31 = vector.load %arg1[%c0_26, %c2, %c0_27] : memref<8x8x128xf32, #tpu.memory_space<vmem>>, vector<8x1x128xf32>
      %32 = vector.shape_cast %31 : vector<8x1x128xf32> to vector<8x128xf32>
      %33 = arith.truncf %32 : vector<8x128xf32> to vector<8x128xbf16>
      %c0_28 = arith.constant 0 : index
      %c0_29 = arith.constant 0 : index
      %34 = vector.load %arg2[%c0_28, %c0_29] : memref<128x512xbf16, #tpu.memory_space<vmem>>, vector<128x512xbf16>
      %cst_30 = arith.constant dense<0.000000e+00> : vector<8x512xf32>
      %35 = tpu.matmul %33, %34, %cst_30 {dimension_numbers = #tpu.dot_dimension_numbers<[1], [0], [0], [1], [0, 0, 1, 1], [], []>} : vector<8x128xbf16>, vector<128x512xbf16>, vector<8x512xf32> -> vector<8x512xf32>
      %36 = arith.addf %35, %2 : vector<8x512xf32>
      %c2_31 = arith.constant 2 : index
      %c0_32 = arith.constant 0 : index
      %c0_33 = arith.constant 0 : index
      %37 = vector.load %arg13[%c2_31, %c0_32, %c0_33] : memref<16x8x512xf32, #tpu.memory_space<vmem>>, vector<1x8x512xf32>
      %38 = vector.shape_cast %37 : vector<1x8x512xf32> to vector<8x512xf32>
      %39 = vector.shape_cast %36 : vector<8x512xf32> to vector<1x8x512xf32>
      tpu.vector_store %arg13[%c2_31, %c0_32, %c0_33], %39 {strides = array<i32>} : memref<16x8x512xf32, #tpu.memory_space<vmem>>, vector<1x8x512xf32>,
      %c0_34 = arith.constant 0 : index
      %c3 = arith.constant 3 : index
      %c0_35 = arith.constant 0 : index
      %40 = vector.load %arg1[%c0_34, %c3, %c0_35] : memref<8x8x128xf32, #tpu.memory_space<vmem>>, vector<8x1x128xf32>
      %41 = vector.shape_cast %40 : vector<8x1x128xf32> to vector<8x128xf32>
      %42 = arith.truncf %41 : vector<8x128xf32> to vector<8x128xbf16>
      %c0_36 = arith.constant 0 : index
      %c0_37 = arith.constant 0 : index
      %43 = vector.load %arg2[%c0_36, %c0_37] : memref<128x512xbf16, #tpu.memory_space<vmem>>, vector<128x512xbf16>
      %cst_38 = arith.constant dense<0.000000e+00> : vector<8x512xf32>
      %44 = tpu.matmul %42, %43, %cst_38 {dimension_numbers = #tpu.dot_dimension_numbers<[1], [0], [0], [1], [0, 0, 1, 1], [], []>} : vector<8x128xbf16>, vector<128x512xbf16>, vector<8x512xf32> -> vector<8x512xf32>
      %45 = arith.addf %44, %2 : vector<8x512xf32>
      %c3_39 = arith.constant 3 : index
      %c0_40 = arith.constant 0 : index
      %c0_41 = arith.constant 0 : index
      %46 = vector.load %arg13[%c3_39, %c0_40, %c0_41] : memref<16x8x512xf32, #tpu.memory_space<vmem>>, vector<1x8x512xf32>
      %47 = vector.shape_cast %46 : vector<1x8x512xf32> to vector<8x512xf32>
      %48 = vector.shape_cast %45 : vector<8x512xf32> to vector<1x8x512xf32>
      tpu.vector_store %arg13[%c3_39, %c0_40, %c0_41], %48 {strides = array<i32>} : memref<16x8x512xf32, #tpu.memory_space<vmem>>, vector<1x8x512xf32>,
      %c0_42 = arith.constant 0 : index
      %c4 = arith.constant 4 : index
      %c0_43 = arith.constant 0 : index
      %49 = vector.load %arg1[%c0_42, %c4, %c0_43] : memref<8x8x128xf32, #tpu.memory_space<vmem>>, vector<8x1x128xf32>
      %50 = vector.shape_cast %49 : vector<8x1x128xf32> to vector<8x128xf32>
      %51 = arith.truncf %50 : vector<8x128xf32> to vector<8x128xbf16>
      %c0_44 = arith.constant 0 : index
      %c0_45 = arith.constant 0 : index
      %52 = vector.load %arg2[%c0_44, %c0_45] : memref<128x512xbf16, #tpu.memory_space<vmem>>, vector<128x512xbf16>
      %cst_46 = arith.constant dense<0.000000e+00> : vector<8x512xf32>
      %53 = tpu.matmul %51, %52, %cst_46 {dimension_numbers = #tpu.dot_dimension_numbers<[1], [0], [0], [1], [0, 0, 1, 1], [], []>} : vector<8x128xbf16>, vector<128x512xbf16>, vector<8x512xf32> -> vector<8x512xf32>
      %54 = arith.addf %53, %2 : vector<8x512xf32>
      %c4_47 = arith.constant 4 : index
      %c0_48 = arith.constant 0 : index
      %c0_49 = arith.constant 0 : index
      %55 = vector.load %arg13[%c4_47, %c0_48, %c0_49] : memref<16x8x512xf32, #tpu.memory_space<vmem>>, vector<1x8x512xf32>
      %56 = vector.shape_cast %55 : vector<1x8x512xf32> to vector<8x512xf32>
      %57 = vector.shape_cast %54 : vector<8x512xf32> to vector<1x8x512xf32>
      tpu.vector_store %arg13[%c4_47, %c0_48, %c0_49], %57 {strides = array<i32>} : memref<16x8x512xf32, #tpu.memory_space<vmem>>, vector<1x8x512xf32>,
      %c0_50 = arith.constant 0 : index
      %c5 = arith.constant 5 : index
      %c0_51 = arith.constant 0 : index
      %58 = vector.load %arg1[%c0_50, %c5, %c0_51] : memref<8x8x128xf32, #tpu.memory_space<vmem>>, vector<8x1x128xf32>
      %59 = vector.shape_cast %58 : vector<8x1x128xf32> to vector<8x128xf32>
      %60 = arith.truncf %59 : vector<8x128xf32> to vector<8x128xbf16>
      %c0_52 = arith.constant 0 : index
      %c0_53 = arith.constant 0 : index
      %61 = vector.load %arg2[%c0_52, %c0_53] : memref<128x512xbf16, #tpu.memory_space<vmem>>, vector<128x512xbf16>
      %cst_54 = arith.constant dense<0.000000e+00> : vector<8x512xf32>
      %62 = tpu.matmul %60, %61, %cst_54 {dimension_numbers = #tpu.dot_dimension_numbers<[1], [0], [0], [1], [0, 0, 1, 1], [], []>} : vector<8x128xbf16>, vector<128x512xbf16>, vector<8x512xf32> -> vector<8x512xf32>
      %63 = arith.addf %62, %2 : vector<8x512xf32>
      %c5_55 = arith.constant 5 : index
      %c0_56 = arith.constant 0 : index
      %c0_57 = arith.constant 0 : index
      %64 = vector.load %arg13[%c5_55, %c0_56, %c0_57] : memref<16x8x512xf32, #tpu.memory_space<vmem>>, vector<1x8x512xf32>
      %65 = vector.shape_cast %64 : vector<1x8x512xf32> to vector<8x512xf32>
      %66 = vector.shape_cast %63 : vector<8x512xf32> to vector<1x8x512xf32>
      tpu.vector_store %arg13[%c5_55, %c0_56, %c0_57], %66 {strides = array<i32>} : memref<16x8x512xf32, #tpu.memory_space<vmem>>, vector<1x8x512xf32>,
      %c0_58 = arith.constant 0 : index
      %c6 = arith.constant 6 : index
      %c0_59 = arith.constant 0 : index
      %67 = vector.load %arg1[%c0_58, %c6, %c0_59] : memref<8x8x128xf32, #tpu.memory_space<vmem>>, vector<8x1x128xf32>
      %68 = vector.shape_cast %67 : vector<8x1x128xf32> to vector<8x128xf32>
      %69 = arith.truncf %68 : vector<8x128xf32> to vector<8x128xbf16>
      %c0_60 = arith.constant 0 : index
      %c0_61 = arith.constant 0 : index
      %70 = vector.load %arg2[%c0_60, %c0_61] : memref<128x512xbf16, #tpu.memory_space<vmem>>, vector<128x512xbf16>
      %cst_62 = arith.constant dense<0.000000e+00> : vector<8x512xf32>
      %71 = tpu.matmul %69, %70, %cst_62 {dimension_numbers = #tpu.dot_dimension_numbers<[1], [0], [0], [1], [0, 0, 1, 1], [], []>} : vector<8x128xbf16>, vector<128x512xbf16>, vector<8x512xf32> -> vector<8x512xf32>
      %72 = arith.addf %71, %2 : vector<8x512xf32>
      %c6_63 = arith.constant 6 : index
      %c0_64 = arith.constant 0 : index
      %c0_65 = arith.constant 0 : index
      %73 = vector.load %arg13[%c6_63, %c0_64, %c0_65] : memref<16x8x512xf32, #tpu.memory_space<vmem>>, vector<1x8x512xf32>
      %74 = vector.shape_cast %73 : vector<1x8x512xf32> to vector<8x512xf32>
      %75 = vector.shape_cast %72 : vector<8x512xf32> to vector<1x8x512xf32>
      tpu.vector_store %arg13[%c6_63, %c0_64, %c0_65], %75 {strides = array<i32>} : memref<16x8x512xf32, #tpu.memory_space<vmem>>, vector<1x8x512xf32>,
      %c0_66 = arith.constant 0 : index
      %c7 = arith.constant 7 : index
      %c0_67 = arith.constant 0 : index
      %76 = vector.load %arg1[%c0_66, %c7, %c0_67] : memref<8x8x128xf32, #tpu.memory_space<vmem>>, vector<8x1x128xf32>
      %77 = vector.shape_cast %76 : vector<8x1x128xf32> to vector<8x128xf32>
      %78 = arith.truncf %77 : vector<8x128xf32> to vector<8x128xbf16>
      %c0_68 = arith.constant 0 : index
      %c0_69 = arith.constant 0 : index
      %79 = vector.load %arg2[%c0_68, %c0_69] : memref<128x512xbf16, #tpu.memory_space<vmem>>, vector<128x512xbf16>
      %cst_70 = arith.constant dense<0.000000e+00> : vector<8x512xf32>
      %80 = tpu.matmul %78, %79, %cst_70 {dimension_numbers = #tpu.dot_dimension_numbers<[1], [0], [0], [1], [0, 0, 1, 1], [], []>} : vector<8x128xbf16>, vector<128x512xbf16>, vector<8x512xf32> -> vector<8x512xf32>
      %81 = arith.addf %80, %2 : vector<8x512xf32>
      %c7_71 = arith.constant 7 : index
      %c0_72 = arith.constant 0 : index
      %c0_73 = arith.constant 0 : index
      %82 = vector.load %arg13[%c7_71, %c0_72, %c0_73] : memref<16x8x512xf32, #tpu.memory_space<vmem>>, vector<1x8x512xf32>
      %83 = vector.shape_cast %82 : vector<1x8x512xf32> to vector<8x512xf32>
      %84 = vector.shape_cast %81 : vector<8x512xf32> to vector<1x8x512xf32>
      tpu.vector_store %arg13[%c7_71, %c0_72, %c0_73], %84 {strides = array<i32>} : memref<16x8x512xf32, #tpu.memory_space<vmem>>, vector<1x8x512xf32>,
    } else {
    }
    %c0_i32_2 = arith.constant 0 : i32
    %6 = arith.cmpi sgt, %arg0, %c0_i32_2 : i32
    %7 = arith.extui %6 : i1 to i32
    %c0_i32_3 = arith.constant 0 : i32
    %8 = arith.cmpi ne, %7, %c0_i32_3 : i32
    scf.if %8 {
      %c2_i32 = arith.constant 2 : i32
      %c0_i32_4 = arith.constant 0 : i32
      %9 = arith.cmpi eq, %c2_i32, %c0_i32_4 : i32
      %c1_i32 = arith.constant 1 : i32
      %10 = arith.select %9, %c1_i32, %c2_i32 : i32
      %11 = arith.remsi %arg0, %10 : i32
      %c0_i32_5 = arith.constant 0 : i32
      %12 = arith.cmpi ne, %11, %c0_i32_5 : i32
      %c0_i32_6 = arith.constant 0 : i32
      %13 = arith.cmpi slt, %11, %c0_i32_6 : i32
      %c0_i32_7 = arith.constant 0 : i32
      %14 = arith.cmpi slt, %10, %c0_i32_7 : i32
      %15 = arith.xori %13, %14 : i1
      %16 = arith.andi %15, %12 : i1
      %17 = arith.addi %11, %10 : i32
      %18 = arith.select %16, %17, %11 : i32
      %c1_i32_8 = arith.constant 1 : i32
      %19 = arith.subi %c1_i32_8, %18 : i32
      %c0_9 = arith.constant 0 : index
      %c0_10 = arith.constant 0 : index
      %20 = vector.load %arg4[%c0_9, %c0_10] : memref<128x512xbf16, #tpu.memory_space<vmem>>, vector<128x512xbf16>
      %c0_11 = arith.constant 0 : index
      %c0_12 = arith.constant 0 : index
      %21 = vector.load %arg14[%c0_11, %c0_12] : memref<8x128xf32, #tpu.memory_space<vmem>>, vector<8x128xf32>
      %c0_13 = arith.constant 0 : index
      %c0_14 = arith.constant 0 : index
      %22 = vector.load %arg15[%c0_13, %c0_14] : memref<8x128xf32, #tpu.memory_space<vmem>>, vector<8x128xf32>
      %c8_i32 = arith.constant 8 : i32
      %23 = arith.muli %19, %c8_i32 : i32
      %c0_i32_15 = arith.constant 0 : i32
      %24 = arith.addi %23, %c0_i32_15 : i32
      %25 = arith.index_cast %24 : i32 to index
      %c0_16 = arith.constant 0 : index
      %c0_17 = arith.constant 0 : index
      %26 = vector.load %arg13[%25, %c0_16, %c0_17] : memref<16x8x512xf32, #tpu.memory_space<vmem>>, vector<1x8x512xf32>
      %27 = vector.shape_cast %26 : vector<1x8x512xf32> to vector<8x512xf32>
      %28 = arith.truncf %21 : vector<8x128xf32> to vector<8x128xbf16>
      %cst = arith.constant dense<0.000000e+00> : vector<8x512xf32>
      %29 = tpu.matmul %28, %20, %cst {dimension_numbers = #tpu.dot_dimension_numbers<[1], [0], [0], [1], [0, 0, 1, 1], [], []>} : vector<8x128xbf16>, vector<128x512xbf16>, vector<8x512xf32> -> vector<8x512xf32>
      %30 = arith.addf %27, %29 : vector<8x512xf32>
      %31 = vector.extract_strided_slice %30 {offsets = [0, 0], sizes = [8, 384], strides = [1, 1]} : vector<8x512xf32> to vector<8x384xf32>
      %cst_18 = arith.constant 5.000000e-01 : f32
      %32 = vector.broadcast %cst_18 : f32 to vector<8x384xf32>
      %33 = arith.mulf %32, %31 : vector<8x384xf32>
      %34 = math.tanh %33 : vector<8x384xf32>
      %cst_19 = arith.constant 5.000000e-01 : f32
      %35 = vector.broadcast %cst_19 : f32 to vector<8x384xf32>
      %36 = arith.mulf %35, %34 : vector<8x384xf32>
      %cst_20 = arith.constant 5.000000e-01 : f32
      %37 = vector.broadcast %cst_20 : f32 to vector<8x384xf32>
      %38 = arith.addf %36, %37 : vector<8x384xf32>
      %39 = vector.extract_strided_slice %30 {offsets = [0, 384], sizes = [8, 128], strides = [1, 1]} : vector<8x512xf32> to vector<8x128xf32>
      %40 = math.tanh %39 : vector<8x128xf32>
      %41 = vector.extract_strided_slice %38 {offsets = [0, 128], sizes = [8, 128], strides = [1, 1]} : vector<8x384xf32> to vector<8x128xf32>
      %42 = arith.mulf %41, %22 : vector<8x128xf32>
      %43 = vector.extract_strided_slice %38 {offsets = [0, 0], sizes = [8, 128], strides = [1, 1]} : vector<8x384xf32> to vector<8x128xf32>
      %44 = arith.mulf %43, %40 : vector<8x128xf32>
      %45 = arith.addf %42, %44 : vector<8x128xf32>
      %46 = vector.extract_strided_slice %38 {offsets = [0, 256], sizes = [8, 128], strides = [1, 1]} : vector<8x384xf32> to vector<8x128xf32>
      %47 = math.tanh %45 : vector<8x128xf32>
      %48 = arith.mulf %46, %47 : vector<8x128xf32>
      %c0_21 = arith.constant 0 : index
      %c0_22 = arith.constant 0 : index
      %c0_23 = arith.constant 0 : index
      %49 = vector.load %arg1[%c0_21, %c0_22, %c0_23] : memref<8x8x128xf32, #tpu.memory_space<vmem>>, vector<8x1x128xf32>
      %50 = vector.shape_cast %49 : vector<8x1x128xf32> to vector<8x128xf32>
      %51 = arith.truncf %50 : vector<8x128xf32> to vector<8x128xbf16>
      %c0_24 = arith.constant 0 : index
      %c0_25 = arith.constant 0 : index
      %52 = vector.load %arg2[%c0_24, %c0_25] : memref<128x512xbf16, #tpu.memory_space<vmem>>, vector<128x512xbf16>
      %cst_26 = arith.constant dense<0.000000e+00> : vector<8x512xf32>
      %53 = tpu.matmul %51, %52, %cst_26 {dimension_numbers = #tpu.dot_dimension_numbers<[1], [0], [0], [1], [0, 0, 1, 1], [], []>} : vector<8x128xbf16>, vector<128x512xbf16>, vector<8x512xf32> -> vector<8x512xf32>
      %54 = arith.addf %53, %2 : vector<8x512xf32>
      %c8_i32_27 = arith.constant 8 : i32
      %55 = arith.muli %18, %c8_i32_27 : i32
      %c0_i32_28 = arith.constant 0 : i32
      %56 = arith.addi %55, %c0_i32_28 : i32
      %57 = arith.index_cast %56 : i32 to index
      %c0_29 = arith.constant 0 : index
      %c0_30 = arith.constant 0 : index
      %58 = vector.load %arg13[%57, %c0_29, %c0_30] : memref<16x8x512xf32, #tpu.memory_space<vmem>>, vector<1x8x512xf32>
      %59 = vector.shape_cast %58 : vector<1x8x512xf32> to vector<8x512xf32>
      %60 = vector.shape_cast %54 : vector<8x512xf32> to vector<1x8x512xf32>
      tpu.vector_store %arg13[%57, %c0_29, %c0_30], %60 {strides = array<i32>} : memref<16x8x512xf32, #tpu.memory_space<vmem>>, vector<1x8x512xf32>,
      %c8_i32_31 = arith.constant 8 : i32
      %61 = arith.muli %19, %c8_i32_31 : i32
      %c1_i32_32 = arith.constant 1 : i32
      %62 = arith.addi %61, %c1_i32_32 : i32
      %63 = arith.index_cast %62 : i32 to index
      %c0_33 = arith.constant 0 : index
      %c0_34 = arith.constant 0 : index
      %64 = vector.load %arg13[%63, %c0_33, %c0_34] : memref<16x8x512xf32, #tpu.memory_space<vmem>>, vector<1x8x512xf32>
      %65 = vector.shape_cast %64 : vector<1x8x512xf32> to vector<8x512xf32>
      %66 = arith.truncf %48 : vector<8x128xf32> to vector<8x128xbf16>
      %cst_35 = arith.constant dense<0.000000e+00> : vector<8x512xf32>
      %67 = tpu.matmul %66, %20, %cst_35 {dimension_numbers = #tpu.dot_dimension_numbers<[1], [0], [0], [1], [0, 0, 1, 1], [], []>} : vector<8x128xbf16>, vector<128x512xbf16>, vector<8x512xf32> -> vector<8x512xf32>
      %68 = arith.addf %65, %67 : vector<8x512xf32>
      %69 = vector.extract_strided_slice %68 {offsets = [0, 0], sizes = [8, 384], strides = [1, 1]} : vector<8x512xf32> to vector<8x384xf32>
      %cst_36 = arith.constant 5.000000e-01 : f32
      %70 = vector.broadcast %cst_36 : f32 to vector<8x384xf32>
      %71 = arith.mulf %70, %69 : vector<8x384xf32>
      %72 = math.tanh %71 : vector<8x384xf32>
      %cst_37 = arith.constant 5.000000e-01 : f32
      %73 = vector.broadcast %cst_37 : f32 to vector<8x384xf32>
      %74 = arith.mulf %73, %72 : vector<8x384xf32>
      %cst_38 = arith.constant 5.000000e-01 : f32
      %75 = vector.broadcast %cst_38 : f32 to vector<8x384xf32>
      %76 = arith.addf %74, %75 : vector<8x384xf32>
      %77 = vector.extract_strided_slice %68 {offsets = [0, 384], sizes = [8, 128], strides = [1, 1]} : vector<8x512xf32> to vector<8x128xf32>
      %78 = math.tanh %77 : vector<8x128xf32>
      %79 = vector.extract_strided_slice %76 {offsets = [0, 128], sizes = [8, 128], strides = [1, 1]} : vector<8x384xf32> to vector<8x128xf32>
      %80 = arith.mulf %79, %45 : vector<8x128xf32>
      %81 = vector.extract_strided_slice %76 {offsets = [0, 0], sizes = [8, 128], strides = [1, 1]} : vector<8x384xf32> to vector<8x128xf32>
      %82 = arith.mulf %81, %78 : vector<8x128xf32>
      %83 = arith.addf %80, %82 : vector<8x128xf32>
      %84 = vector.extract_strided_slice %76 {offsets = [0, 256], sizes = [8, 128], strides = [1, 1]} : vector<8x384xf32> to vector<8x128xf32>
      %85 = math.tanh %83 : vector<8x128xf32>
      %86 = arith.mulf %84, %85 : vector<8x128xf32>
      %c0_39 = arith.constant 0 : index
      %c1 = arith.constant 1 : index
      %c0_40 = arith.constant 0 : index
      %87 = vector.load %arg1[%c0_39, %c1, %c0_40] : memref<8x8x128xf32, #tpu.memory_space<vmem>>, vector<8x1x128xf32>
      %88 = vector.shape_cast %87 : vector<8x1x128xf32> to vector<8x128xf32>
      %89 = arith.truncf %88 : vector<8x128xf32> to vector<8x128xbf16>
      %c0_41 = arith.constant 0 : index
      %c0_42 = arith.constant 0 : index
      %90 = vector.load %arg2[%c0_41, %c0_42] : memref<128x512xbf16, #tpu.memory_space<vmem>>, vector<128x512xbf16>
      %cst_43 = arith.constant dense<0.000000e+00> : vector<8x512xf32>
      %91 = tpu.matmul %89, %90, %cst_43 {dimension_numbers = #tpu.dot_dimension_numbers<[1], [0], [0], [1], [0, 0, 1, 1], [], []>} : vector<8x128xbf16>, vector<128x512xbf16>, vector<8x512xf32> -> vector<8x512xf32>
      %92 = arith.addf %91, %2 : vector<8x512xf32>
      %c8_i32_44 = arith.constant 8 : i32
      %93 = arith.muli %18, %c8_i32_44 : i32
      %c1_i32_45 = arith.constant 1 : i32
      %94 = arith.addi %93, %c1_i32_45 : i32
      %95 = arith.index_cast %94 : i32 to index
      %c0_46 = arith.constant 0 : index
      %c0_47 = arith.constant 0 : index
      %96 = vector.load %arg13[%95, %c0_46, %c0_47] : memref<16x8x512xf32, #tpu.memory_space<vmem>>, vector<1x8x512xf32>
      %97 = vector.shape_cast %96 : vector<1x8x512xf32> to vector<8x512xf32>
      %98 = vector.shape_cast %92 : vector<8x512xf32> to vector<1x8x512xf32>
      tpu.vector_store %arg13[%95, %c0_46, %c0_47], %98 {strides = array<i32>} : memref<16x8x512xf32, #tpu.memory_space<vmem>>, vector<1x8x512xf32>,
      %c8_i32_48 = arith.constant 8 : i32
      %99 = arith.muli %19, %c8_i32_48 : i32
      %c2_i32_49 = arith.constant 2 : i32
      %100 = arith.addi %99, %c2_i32_49 : i32
      %101 = arith.index_cast %100 : i32 to index
      %c0_50 = arith.constant 0 : index
      %c0_51 = arith.constant 0 : index
      %102 = vector.load %arg13[%101, %c0_50, %c0_51] : memref<16x8x512xf32, #tpu.memory_space<vmem>>, vector<1x8x512xf32>
      %103 = vector.shape_cast %102 : vector<1x8x512xf32> to vector<8x512xf32>
      %104 = arith.truncf %86 : vector<8x128xf32> to vector<8x128xbf16>
      %cst_52 = arith.constant dense<0.000000e+00> : vector<8x512xf32>
      %105 = tpu.matmul %104, %20, %cst_52 {dimension_numbers = #tpu.dot_dimension_numbers<[1], [0], [0], [1], [0, 0, 1, 1], [], []>} : vector<8x128xbf16>, vector<128x512xbf16>, vector<8x512xf32> -> vector<8x512xf32>
      %106 = arith.addf %103, %105 : vector<8x512xf32>
      %107 = vector.extract_strided_slice %106 {offsets = [0, 0], sizes = [8, 384], strides = [1, 1]} : vector<8x512xf32> to vector<8x384xf32>
      %cst_53 = arith.constant 5.000000e-01 : f32
      %108 = vector.broadcast %cst_53 : f32 to vector<8x384xf32>
      %109 = arith.mulf %108, %107 : vector<8x384xf32>
      %110 = math.tanh %109 : vector<8x384xf32>
      %cst_54 = arith.constant 5.000000e-01 : f32
      %111 = vector.broadcast %cst_54 : f32 to vector<8x384xf32>
      %112 = arith.mulf %111, %110 : vector<8x384xf32>
      %cst_55 = arith.constant 5.000000e-01 : f32
      %113 = vector.broadcast %cst_55 : f32 to vector<8x384xf32>
      %114 = arith.addf %112, %113 : vector<8x384xf32>
      %115 = vector.extract_strided_slice %106 {offsets = [0, 384], sizes = [8, 128], strides = [1, 1]} : vector<8x512xf32> to vector<8x128xf32>
      %116 = math.tanh %115 : vector<8x128xf32>
      %117 = vector.extract_strided_slice %114 {offsets = [0, 128], sizes = [8, 128], strides = [1, 1]} : vector<8x384xf32> to vector<8x128xf32>
      %118 = arith.mulf %117, %83 : vector<8x128xf32>
      %119 = vector.extract_strided_slice %114 {offsets = [0, 0], sizes = [8, 128], strides = [1, 1]} : vector<8x384xf32> to vector<8x128xf32>
      %120 = arith.mulf %119, %116 : vector<8x128xf32>
      %121 = arith.addf %118, %120 : vector<8x128xf32>
      %122 = vector.extract_strided_slice %114 {offsets = [0, 256], sizes = [8, 128], strides = [1, 1]} : vector<8x384xf32> to vector<8x128xf32>
      %123 = math.tanh %121 : vector<8x128xf32>
      %124 = arith.mulf %122, %123 : vector<8x128xf32>
      %c0_56 = arith.constant 0 : index
      %c2 = arith.constant 2 : index
      %c0_57 = arith.constant 0 : index
      %125 = vector.load %arg1[%c0_56, %c2, %c0_57] : memref<8x8x128xf32, #tpu.memory_space<vmem>>, vector<8x1x128xf32>
      %126 = vector.shape_cast %125 : vector<8x1x128xf32> to vector<8x128xf32>
      %127 = arith.truncf %126 : vector<8x128xf32> to vector<8x128xbf16>
      %c0_58 = arith.constant 0 : index
      %c0_59 = arith.constant 0 : index
      %128 = vector.load %arg2[%c0_58, %c0_59] : memref<128x512xbf16, #tpu.memory_space<vmem>>, vector<128x512xbf16>
      %cst_60 = arith.constant dense<0.000000e+00> : vector<8x512xf32>
      %129 = tpu.matmul %127, %128, %cst_60 {dimension_numbers = #tpu.dot_dimension_numbers<[1], [0], [0], [1], [0, 0, 1, 1], [], []>} : vector<8x128xbf16>, vector<128x512xbf16>, vector<8x512xf32> -> vector<8x512xf32>
      %130 = arith.addf %129, %2 : vector<8x512xf32>
      %c8_i32_61 = arith.constant 8 : i32
      %131 = arith.muli %18, %c8_i32_61 : i32
      %c2_i32_62 = arith.constant 2 : i32
      %132 = arith.addi %131, %c2_i32_62 : i32
      %133 = arith.index_cast %132 : i32 to index
      %c0_63 = arith.constant 0 : index
      %c0_64 = arith.constant 0 : index
      %134 = vector.load %arg13[%133, %c0_63, %c0_64] : memref<16x8x512xf32, #tpu.memory_space<vmem>>, vector<1x8x512xf32>
      %135 = vector.shape_cast %134 : vector<1x8x512xf32> to vector<8x512xf32>
      %136 = vector.shape_cast %130 : vector<8x512xf32> to vector<1x8x512xf32>
      tpu.vector_store %arg13[%133, %c0_63, %c0_64], %136 {strides = array<i32>} : memref<16x8x512xf32, #tpu.memory_space<vmem>>, vector<1x8x512xf32>,
      %c8_i32_65 = arith.constant 8 : i32
      %137 = arith.muli %19, %c8_i32_65 : i32
      %c3_i32 = arith.constant 3 : i32
      %138 = arith.addi %137, %c3_i32 : i32
      %139 = arith.index_cast %138 : i32 to index
      %c0_66 = arith.constant 0 : index
      %c0_67 = arith.constant 0 : index
      %140 = vector.load %arg13[%139, %c0_66, %c0_67] : memref<16x8x512xf32, #tpu.memory_space<vmem>>, vector<1x8x512xf32>
      %141 = vector.shape_cast %140 : vector<1x8x512xf32> to vector<8x512xf32>
      %142 = arith.truncf %124 : vector<8x128xf32> to vector<8x128xbf16>
      %cst_68 = arith.constant dense<0.000000e+00> : vector<8x512xf32>
      %143 = tpu.matmul %142, %20, %cst_68 {dimension_numbers = #tpu.dot_dimension_numbers<[1], [0], [0], [1], [0, 0, 1, 1], [], []>} : vector<8x128xbf16>, vector<128x512xbf16>, vector<8x512xf32> -> vector<8x512xf32>
      %144 = arith.addf %141, %143 : vector<8x512xf32>
      %145 = vector.extract_strided_slice %144 {offsets = [0, 0], sizes = [8, 384], strides = [1, 1]} : vector<8x512xf32> to vector<8x384xf32>
      %cst_69 = arith.constant 5.000000e-01 : f32
      %146 = vector.broadcast %cst_69 : f32 to vector<8x384xf32>
      %147 = arith.mulf %146, %145 : vector<8x384xf32>
      %148 = math.tanh %147 : vector<8x384xf32>
      %cst_70 = arith.constant 5.000000e-01 : f32
      %149 = vector.broadcast %cst_70 : f32 to vector<8x384xf32>
      %150 = arith.mulf %149, %148 : vector<8x384xf32>
      %cst_71 = arith.constant 5.000000e-01 : f32
      %151 = vector.broadcast %cst_71 : f32 to vector<8x384xf32>
      %152 = arith.addf %150, %151 : vector<8x384xf32>
      %153 = vector.extract_strided_slice %144 {offsets = [0, 384], sizes = [8, 128], strides = [1, 1]} : vector<8x512xf32> to vector<8x128xf32>
      %154 = math.tanh %153 : vector<8x128xf32>
      %155 = vector.extract_strided_slice %152 {offsets = [0, 128], sizes = [8, 128], strides = [1, 1]} : vector<8x384xf32> to vector<8x128xf32>
      %156 = arith.mulf %155, %121 : vector<8x128xf32>
      %157 = vector.extract_strided_slice %152 {offsets = [0, 0], sizes = [8, 128], strides = [1, 1]} : vector<8x384xf32> to vector<8x128xf32>
      %158 = arith.mulf %157, %154 : vector<8x128xf32>
      %159 = arith.addf %156, %158 : vector<8x128xf32>
      %160 = vector.extract_strided_slice %152 {offsets = [0, 256], sizes = [8, 128], strides = [1, 1]} : vector<8x384xf32> to vector<8x128xf32>
      %161 = math.tanh %159 : vector<8x128xf32>
      %162 = arith.mulf %160, %161 : vector<8x128xf32>
      %c0_72 = arith.constant 0 : index
      %c3 = arith.constant 3 : index
      %c0_73 = arith.constant 0 : index
      %163 = vector.load %arg1[%c0_72, %c3, %c0_73] : memref<8x8x128xf32, #tpu.memory_space<vmem>>, vector<8x1x128xf32>
      %164 = vector.shape_cast %163 : vector<8x1x128xf32> to vector<8x128xf32>
      %165 = arith.truncf %164 : vector<8x128xf32> to vector<8x128xbf16>
      %c0_74 = arith.constant 0 : index
      %c0_75 = arith.constant 0 : index
      %166 = vector.load %arg2[%c0_74, %c0_75] : memref<128x512xbf16, #tpu.memory_space<vmem>>, vector<128x512xbf16>
      %cst_76 = arith.constant dense<0.000000e+00> : vector<8x512xf32>
      %167 = tpu.matmul %165, %166, %cst_76 {dimension_numbers = #tpu.dot_dimension_numbers<[1], [0], [0], [1], [0, 0, 1, 1], [], []>} : vector<8x128xbf16>, vector<128x512xbf16>, vector<8x512xf32> -> vector<8x512xf32>
      %168 = arith.addf %167, %2 : vector<8x512xf32>
      %c8_i32_77 = arith.constant 8 : i32
      %169 = arith.muli %18, %c8_i32_77 : i32
      %c3_i32_78 = arith.constant 3 : i32
      %170 = arith.addi %169, %c3_i32_78 : i32
      %171 = arith.index_cast %170 : i32 to index
      %c0_79 = arith.constant 0 : index
      %c0_80 = arith.constant 0 : index
      %172 = vector.load %arg13[%171, %c0_79, %c0_80] : memref<16x8x512xf32, #tpu.memory_space<vmem>>, vector<1x8x512xf32>
      %173 = vector.shape_cast %172 : vector<1x8x512xf32> to vector<8x512xf32>
      %174 = vector.shape_cast %168 : vector<8x512xf32> to vector<1x8x512xf32>
      tpu.vector_store %arg13[%171, %c0_79, %c0_80], %174 {strides = array<i32>} : memref<16x8x512xf32, #tpu.memory_space<vmem>>, vector<1x8x512xf32>,
      %c8_i32_81 = arith.constant 8 : i32
      %175 = arith.muli %19, %c8_i32_81 : i32
      %c4_i32 = arith.constant 4 : i32
      %176 = arith.addi %175, %c4_i32 : i32
      %177 = arith.index_cast %176 : i32 to index
      %c0_82 = arith.constant 0 : index
      %c0_83 = arith.constant 0 : index
      %178 = vector.load %arg13[%177, %c0_82, %c0_83] : memref<16x8x512xf32, #tpu.memory_space<vmem>>, vector<1x8x512xf32>
      %179 = vector.shape_cast %178 : vector<1x8x512xf32> to vector<8x512xf32>
      %180 = arith.truncf %162 : vector<8x128xf32> to vector<8x128xbf16>
      %cst_84 = arith.constant dense<0.000000e+00> : vector<8x512xf32>
      %181 = tpu.matmul %180, %20, %cst_84 {dimension_numbers = #tpu.dot_dimension_numbers<[1], [0], [0], [1], [0, 0, 1, 1], [], []>} : vector<8x128xbf16>, vector<128x512xbf16>, vector<8x512xf32> -> vector<8x512xf32>
      %182 = arith.addf %179, %181 : vector<8x512xf32>
      %183 = vector.extract_strided_slice %182 {offsets = [0, 0], sizes = [8, 384], strides = [1, 1]} : vector<8x512xf32> to vector<8x384xf32>
      %cst_85 = arith.constant 5.000000e-01 : f32
      %184 = vector.broadcast %cst_85 : f32 to vector<8x384xf32>
      %185 = arith.mulf %184, %183 : vector<8x384xf32>
      %186 = math.tanh %185 : vector<8x384xf32>
      %cst_86 = arith.constant 5.000000e-01 : f32
      %187 = vector.broadcast %cst_86 : f32 to vector<8x384xf32>
      %188 = arith.mulf %187, %186 : vector<8x384xf32>
      %cst_87 = arith.constant 5.000000e-01 : f32
      %189 = vector.broadcast %cst_87 : f32 to vector<8x384xf32>
      %190 = arith.addf %188, %189 : vector<8x384xf32>
      %191 = vector.extract_strided_slice %182 {offsets = [0, 384], sizes = [8, 128], strides = [1, 1]} : vector<8x512xf32> to vector<8x128xf32>
      %192 = math.tanh %191 : vector<8x128xf32>
      %193 = vector.extract_strided_slice %190 {offsets = [0, 128], sizes = [8, 128], strides = [1, 1]} : vector<8x384xf32> to vector<8x128xf32>
      %194 = arith.mulf %193, %159 : vector<8x128xf32>
      %195 = vector.extract_strided_slice %190 {offsets = [0, 0], sizes = [8, 128], strides = [1, 1]} : vector<8x384xf32> to vector<8x128xf32>
      %196 = arith.mulf %195, %192 : vector<8x128xf32>
      %197 = arith.addf %194, %196 : vector<8x128xf32>
      %198 = vector.extract_strided_slice %190 {offsets = [0, 256], sizes = [8, 128], strides = [1, 1]} : vector<8x384xf32> to vector<8x128xf32>
      %199 = math.tanh %197 : vector<8x128xf32>
      %200 = arith.mulf %198, %199 : vector<8x128xf32>
      %c0_88 = arith.constant 0 : index
      %c4 = arith.constant 4 : index
      %c0_89 = arith.constant 0 : index
      %201 = vector.load %arg1[%c0_88, %c4, %c0_89] : memref<8x8x128xf32, #tpu.memory_space<vmem>>, vector<8x1x128xf32>
      %202 = vector.shape_cast %201 : vector<8x1x128xf32> to vector<8x128xf32>
      %203 = arith.truncf %202 : vector<8x128xf32> to vector<8x128xbf16>
      %c0_90 = arith.constant 0 : index
      %c0_91 = arith.constant 0 : index
      %204 = vector.load %arg2[%c0_90, %c0_91] : memref<128x512xbf16, #tpu.memory_space<vmem>>, vector<128x512xbf16>
      %cst_92 = arith.constant dense<0.000000e+00> : vector<8x512xf32>
      %205 = tpu.matmul %203, %204, %cst_92 {dimension_numbers = #tpu.dot_dimension_numbers<[1], [0], [0], [1], [0, 0, 1, 1], [], []>} : vector<8x128xbf16>, vector<128x512xbf16>, vector<8x512xf32> -> vector<8x512xf32>
      %206 = arith.addf %205, %2 : vector<8x512xf32>
      %c8_i32_93 = arith.constant 8 : i32
      %207 = arith.muli %18, %c8_i32_93 : i32
      %c4_i32_94 = arith.constant 4 : i32
      %208 = arith.addi %207, %c4_i32_94 : i32
      %209 = arith.index_cast %208 : i32 to index
      %c0_95 = arith.constant 0 : index
      %c0_96 = arith.constant 0 : index
      %210 = vector.load %arg13[%209, %c0_95, %c0_96] : memref<16x8x512xf32, #tpu.memory_space<vmem>>, vector<1x8x512xf32>
      %211 = vector.shape_cast %210 : vector<1x8x512xf32> to vector<8x512xf32>
      %212 = vector.shape_cast %206 : vector<8x512xf32> to vector<1x8x512xf32>
      tpu.vector_store %arg13[%209, %c0_95, %c0_96], %212 {strides = array<i32>} : memref<16x8x512xf32, #tpu.memory_space<vmem>>, vector<1x8x512xf32>,
      %c8_i32_97 = arith.constant 8 : i32
      %213 = arith.muli %19, %c8_i32_97 : i32
      %c5_i32 = arith.constant 5 : i32
      %214 = arith.addi %213, %c5_i32 : i32
      %215 = arith.index_cast %214 : i32 to index
      %c0_98 = arith.constant 0 : index
      %c0_99 = arith.constant 0 : index
      %216 = vector.load %arg13[%215, %c0_98, %c0_99] : memref<16x8x512xf32, #tpu.memory_space<vmem>>, vector<1x8x512xf32>
      %217 = vector.shape_cast %216 : vector<1x8x512xf32> to vector<8x512xf32>
      %218 = arith.truncf %200 : vector<8x128xf32> to vector<8x128xbf16>
      %cst_100 = arith.constant dense<0.000000e+00> : vector<8x512xf32>
      %219 = tpu.matmul %218, %20, %cst_100 {dimension_numbers = #tpu.dot_dimension_numbers<[1], [0], [0], [1], [0, 0, 1, 1], [], []>} : vector<8x128xbf16>, vector<128x512xbf16>, vector<8x512xf32> -> vector<8x512xf32>
      %220 = arith.addf %217, %219 : vector<8x512xf32>
      %221 = vector.extract_strided_slice %220 {offsets = [0, 0], sizes = [8, 384], strides = [1, 1]} : vector<8x512xf32> to vector<8x384xf32>
      %cst_101 = arith.constant 5.000000e-01 : f32
      %222 = vector.broadcast %cst_101 : f32 to vector<8x384xf32>
      %223 = arith.mulf %222, %221 : vector<8x384xf32>
      %224 = math.tanh %223 : vector<8x384xf32>
      %cst_102 = arith.constant 5.000000e-01 : f32
      %225 = vector.broadcast %cst_102 : f32 to vector<8x384xf32>
      %226 = arith.mulf %225, %224 : vector<8x384xf32>
      %cst_103 = arith.constant 5.000000e-01 : f32
      %227 = vector.broadcast %cst_103 : f32 to vector<8x384xf32>
      %228 = arith.addf %226, %227 : vector<8x384xf32>
      %229 = vector.extract_strided_slice %220 {offsets = [0, 384], sizes = [8, 128], strides = [1, 1]} : vector<8x512xf32> to vector<8x128xf32>
      %230 = math.tanh %229 : vector<8x128xf32>
      %231 = vector.extract_strided_slice %228 {offsets = [0, 128], sizes = [8, 128], strides = [1, 1]} : vector<8x384xf32> to vector<8x128xf32>
      %232 = arith.mulf %231, %197 : vector<8x128xf32>
      %233 = vector.extract_strided_slice %228 {offsets = [0, 0], sizes = [8, 128], strides = [1, 1]} : vector<8x384xf32> to vector<8x128xf32>
      %234 = arith.mulf %233, %230 : vector<8x128xf32>
      %235 = arith.addf %232, %234 : vector<8x128xf32>
      %236 = vector.extract_strided_slice %228 {offsets = [0, 256], sizes = [8, 128], strides = [1, 1]} : vector<8x384xf32> to vector<8x128xf32>
      %237 = math.tanh %235 : vector<8x128xf32>
      %238 = arith.mulf %236, %237 : vector<8x128xf32>
      %c0_104 = arith.constant 0 : index
      %c5 = arith.constant 5 : index
      %c0_105 = arith.constant 0 : index
      %239 = vector.load %arg1[%c0_104, %c5, %c0_105] : memref<8x8x128xf32, #tpu.memory_space<vmem>>, vector<8x1x128xf32>
      %240 = vector.shape_cast %239 : vector<8x1x128xf32> to vector<8x128xf32>
      %241 = arith.truncf %240 : vector<8x128xf32> to vector<8x128xbf16>
      %c0_106 = arith.constant 0 : index
      %c0_107 = arith.constant 0 : index
      %242 = vector.load %arg2[%c0_106, %c0_107] : memref<128x512xbf16, #tpu.memory_space<vmem>>, vector<128x512xbf16>
      %cst_108 = arith.constant dense<0.000000e+00> : vector<8x512xf32>
      %243 = tpu.matmul %241, %242, %cst_108 {dimension_numbers = #tpu.dot_dimension_numbers<[1], [0], [0], [1], [0, 0, 1, 1], [], []>} : vector<8x128xbf16>, vector<128x512xbf16>, vector<8x512xf32> -> vector<8x512xf32>
      %244 = arith.addf %243, %2 : vector<8x512xf32>
      %c8_i32_109 = arith.constant 8 : i32
      %245 = arith.muli %18, %c8_i32_109 : i32
      %c5_i32_110 = arith.constant 5 : i32
      %246 = arith.addi %245, %c5_i32_110 : i32
      %247 = arith.index_cast %246 : i32 to index
      %c0_111 = arith.constant 0 : index
      %c0_112 = arith.constant 0 : index
      %248 = vector.load %arg13[%247, %c0_111, %c0_112] : memref<16x8x512xf32, #tpu.memory_space<vmem>>, vector<1x8x512xf32>
      %249 = vector.shape_cast %248 : vector<1x8x512xf32> to vector<8x512xf32>
      %250 = vector.shape_cast %244 : vector<8x512xf32> to vector<1x8x512xf32>
      tpu.vector_store %arg13[%247, %c0_111, %c0_112], %250 {strides = array<i32>} : memref<16x8x512xf32, #tpu.memory_space<vmem>>, vector<1x8x512xf32>,
      %c8_i32_113 = arith.constant 8 : i32
      %251 = arith.muli %19, %c8_i32_113 : i32
      %c6_i32 = arith.constant 6 : i32
      %252 = arith.addi %251, %c6_i32 : i32
      %253 = arith.index_cast %252 : i32 to index
      %c0_114 = arith.constant 0 : index
      %c0_115 = arith.constant 0 : index
      %254 = vector.load %arg13[%253, %c0_114, %c0_115] : memref<16x8x512xf32, #tpu.memory_space<vmem>>, vector<1x8x512xf32>
      %255 = vector.shape_cast %254 : vector<1x8x512xf32> to vector<8x512xf32>
      %256 = arith.truncf %238 : vector<8x128xf32> to vector<8x128xbf16>
      %cst_116 = arith.constant dense<0.000000e+00> : vector<8x512xf32>
      %257 = tpu.matmul %256, %20, %cst_116 {dimension_numbers = #tpu.dot_dimension_numbers<[1], [0], [0], [1], [0, 0, 1, 1], [], []>} : vector<8x128xbf16>, vector<128x512xbf16>, vector<8x512xf32> -> vector<8x512xf32>
      %258 = arith.addf %255, %257 : vector<8x512xf32>
      %259 = vector.extract_strided_slice %258 {offsets = [0, 0], sizes = [8, 384], strides = [1, 1]} : vector<8x512xf32> to vector<8x384xf32>
      %cst_117 = arith.constant 5.000000e-01 : f32
      %260 = vector.broadcast %cst_117 : f32 to vector<8x384xf32>
      %261 = arith.mulf %260, %259 : vector<8x384xf32>
      %262 = math.tanh %261 : vector<8x384xf32>
      %cst_118 = arith.constant 5.000000e-01 : f32
      %263 = vector.broadcast %cst_118 : f32 to vector<8x384xf32>
      %264 = arith.mulf %263, %262 : vector<8x384xf32>
      %cst_119 = arith.constant 5.000000e-01 : f32
      %265 = vector.broadcast %cst_119 : f32 to vector<8x384xf32>
      %266 = arith.addf %264, %265 : vector<8x384xf32>
      %267 = vector.extract_strided_slice %258 {offsets = [0, 384], sizes = [8, 128], strides = [1, 1]} : vector<8x512xf32> to vector<8x128xf32>
      %268 = math.tanh %267 : vector<8x128xf32>
      %269 = vector.extract_strided_slice %266 {offsets = [0, 128], sizes = [8, 128], strides = [1, 1]} : vector<8x384xf32> to vector<8x128xf32>
      %270 = arith.mulf %269, %235 : vector<8x128xf32>
      %271 = vector.extract_strided_slice %266 {offsets = [0, 0], sizes = [8, 128], strides = [1, 1]} : vector<8x384xf32> to vector<8x128xf32>
      %272 = arith.mulf %271, %268 : vector<8x128xf32>
      %273 = arith.addf %270, %272 : vector<8x128xf32>
      %274 = vector.extract_strided_slice %266 {offsets = [0, 256], sizes = [8, 128], strides = [1, 1]} : vector<8x384xf32> to vector<8x128xf32>
      %275 = math.tanh %273 : vector<8x128xf32>
      %276 = arith.mulf %274, %275 : vector<8x128xf32>
      %c0_120 = arith.constant 0 : index
      %c6 = arith.constant 6 : index
      %c0_121 = arith.constant 0 : index
      %277 = vector.load %arg1[%c0_120, %c6, %c0_121] : memref<8x8x128xf32, #tpu.memory_space<vmem>>, vector<8x1x128xf32>
      %278 = vector.shape_cast %277 : vector<8x1x128xf32> to vector<8x128xf32>
      %279 = arith.truncf %278 : vector<8x128xf32> to vector<8x128xbf16>
      %c0_122 = arith.constant 0 : index
      %c0_123 = arith.constant 0 : index
      %280 = vector.load %arg2[%c0_122, %c0_123] : memref<128x512xbf16, #tpu.memory_space<vmem>>, vector<128x512xbf16>
      %cst_124 = arith.constant dense<0.000000e+00> : vector<8x512xf32>
      %281 = tpu.matmul %279, %280, %cst_124 {dimension_numbers = #tpu.dot_dimension_numbers<[1], [0], [0], [1], [0, 0, 1, 1], [], []>} : vector<8x128xbf16>, vector<128x512xbf16>, vector<8x512xf32> -> vector<8x512xf32>
      %282 = arith.addf %281, %2 : vector<8x512xf32>
      %c8_i32_125 = arith.constant 8 : i32
      %283 = arith.muli %18, %c8_i32_125 : i32
      %c6_i32_126 = arith.constant 6 : i32
      %284 = arith.addi %283, %c6_i32_126 : i32
      %285 = arith.index_cast %284 : i32 to index
      %c0_127 = arith.constant 0 : index
      %c0_128 = arith.constant 0 : index
      %286 = vector.load %arg13[%285, %c0_127, %c0_128] : memref<16x8x512xf32, #tpu.memory_space<vmem>>, vector<1x8x512xf32>
      %287 = vector.shape_cast %286 : vector<1x8x512xf32> to vector<8x512xf32>
      %288 = vector.shape_cast %282 : vector<8x512xf32> to vector<1x8x512xf32>
      tpu.vector_store %arg13[%285, %c0_127, %c0_128], %288 {strides = array<i32>} : memref<16x8x512xf32, #tpu.memory_space<vmem>>, vector<1x8x512xf32>,
      %c8_i32_129 = arith.constant 8 : i32
      %289 = arith.muli %19, %c8_i32_129 : i32
      %c7_i32 = arith.constant 7 : i32
      %290 = arith.addi %289, %c7_i32 : i32
      %291 = arith.index_cast %290 : i32 to index
      %c0_130 = arith.constant 0 : index
      %c0_131 = arith.constant 0 : index
      %292 = vector.load %arg13[%291, %c0_130, %c0_131] : memref<16x8x512xf32, #tpu.memory_space<vmem>>, vector<1x8x512xf32>
      %293 = vector.shape_cast %292 : vector<1x8x512xf32> to vector<8x512xf32>
      %294 = arith.truncf %276 : vector<8x128xf32> to vector<8x128xbf16>
      %cst_132 = arith.constant dense<0.000000e+00> : vector<8x512xf32>
      %295 = tpu.matmul %294, %20, %cst_132 {dimension_numbers = #tpu.dot_dimension_numbers<[1], [0], [0], [1], [0, 0, 1, 1], [], []>} : vector<8x128xbf16>, vector<128x512xbf16>, vector<8x512xf32> -> vector<8x512xf32>
      %296 = arith.addf %293, %295 : vector<8x512xf32>
      %297 = vector.extract_strided_slice %296 {offsets = [0, 0], sizes = [8, 384], strides = [1, 1]} : vector<8x512xf32> to vector<8x384xf32>
      %cst_133 = arith.constant 5.000000e-01 : f32
      %298 = vector.broadcast %cst_133 : f32 to vector<8x384xf32>
      %299 = arith.mulf %298, %297 : vector<8x384xf32>
      %300 = math.tanh %299 : vector<8x384xf32>
      %cst_134 = arith.constant 5.000000e-01 : f32
      %301 = vector.broadcast %cst_134 : f32 to vector<8x384xf32>
      %302 = arith.mulf %301, %300 : vector<8x384xf32>
      %cst_135 = arith.constant 5.000000e-01 : f32
      %303 = vector.broadcast %cst_135 : f32 to vector<8x384xf32>
      %304 = arith.addf %302, %303 : vector<8x384xf32>
      %305 = vector.extract_strided_slice %296 {offsets = [0, 384], sizes = [8, 128], strides = [1, 1]} : vector<8x512xf32> to vector<8x128xf32>
      %306 = math.tanh %305 : vector<8x128xf32>
      %307 = vector.extract_strided_slice %304 {offsets = [0, 128], sizes = [8, 128], strides = [1, 1]} : vector<8x384xf32> to vector<8x128xf32>
      %308 = arith.mulf %307, %273 : vector<8x128xf32>
      %309 = vector.extract_strided_slice %304 {offsets = [0, 0], sizes = [8, 128], strides = [1, 1]} : vector<8x384xf32> to vector<8x128xf32>
      %310 = arith.mulf %309, %306 : vector<8x128xf32>
      %311 = arith.addf %308, %310 : vector<8x128xf32>
      %312 = vector.extract_strided_slice %304 {offsets = [0, 256], sizes = [8, 128], strides = [1, 1]} : vector<8x384xf32> to vector<8x128xf32>
      %313 = math.tanh %311 : vector<8x128xf32>
      %314 = arith.mulf %312, %313 : vector<8x128xf32>
      %c0_136 = arith.constant 0 : index
      %c7 = arith.constant 7 : index
      %c0_137 = arith.constant 0 : index
      %315 = vector.load %arg1[%c0_136, %c7, %c0_137] : memref<8x8x128xf32, #tpu.memory_space<vmem>>, vector<8x1x128xf32>
      %316 = vector.shape_cast %315 : vector<8x1x128xf32> to vector<8x128xf32>
      %317 = arith.truncf %316 : vector<8x128xf32> to vector<8x128xbf16>
      %c0_138 = arith.constant 0 : index
      %c0_139 = arith.constant 0 : index
      %318 = vector.load %arg2[%c0_138, %c0_139] : memref<128x512xbf16, #tpu.memory_space<vmem>>, vector<128x512xbf16>
      %cst_140 = arith.constant dense<0.000000e+00> : vector<8x512xf32>
      %319 = tpu.matmul %317, %318, %cst_140 {dimension_numbers = #tpu.dot_dimension_numbers<[1], [0], [0], [1], [0, 0, 1, 1], [], []>} : vector<8x128xbf16>, vector<128x512xbf16>, vector<8x512xf32> -> vector<8x512xf32>
      %320 = arith.addf %319, %2 : vector<8x512xf32>
      %c8_i32_141 = arith.constant 8 : i32
      %321 = arith.muli %18, %c8_i32_141 : i32
      %c7_i32_142 = arith.constant 7 : i32
      %322 = arith.addi %321, %c7_i32_142 : i32
      %323 = arith.index_cast %322 : i32 to index
      %c0_143 = arith.constant 0 : index
      %c0_144 = arith.constant 0 : index
      %324 = vector.load %arg13[%323, %c0_143, %c0_144] : memref<16x8x512xf32, #tpu.memory_space<vmem>>, vector<1x8x512xf32>
      %325 = vector.shape_cast %324 : vector<1x8x512xf32> to vector<8x512xf32>
      %326 = vector.shape_cast %320 : vector<8x512xf32> to vector<1x8x512xf32>
      tpu.vector_store %arg13[%323, %c0_143, %c0_144], %326 {strides = array<i32>} : memref<16x8x512xf32, #tpu.memory_space<vmem>>, vector<1x8x512xf32>,
      %c0_145 = arith.constant 0 : index
      %c0_146 = arith.constant 0 : index
      %327 = vector.load %arg14[%c0_145, %c0_146] : memref<8x128xf32, #tpu.memory_space<vmem>>, vector<8x128xf32>
      tpu.vector_store %arg14[%c0_145, %c0_146], %314 {strides = array<i32>} : memref<8x128xf32, #tpu.memory_space<vmem>>, vector<8x128xf32>,
      %c0_147 = arith.constant 0 : index
      %c0_148 = arith.constant 0 : index
      %328 = vector.load %arg15[%c0_147, %c0_148] : memref<8x128xf32, #tpu.memory_space<vmem>>, vector<8x128xf32>
      tpu.vector_store %arg15[%c0_147, %c0_148], %311 {strides = array<i32>} : memref<8x128xf32, #tpu.memory_space<vmem>>, vector<8x128xf32>,
      %c3_i32_149 = arith.constant 3 : i32
      %329 = arith.cmpi eq, %arg0, %c3_i32_149 : i32
      %330 = arith.extui %329 : i1 to i32
      %c0_i32_150 = arith.constant 0 : i32
      %331 = arith.cmpi ne, %330, %c0_i32_150 : i32
      scf.if %331 {
        %c0_151 = arith.constant 0 : index
        %c7_152 = arith.constant 7 : index
        %c0_153 = arith.constant 0 : index
        %332 = vector.load %arg1[%c0_151, %c7_152, %c0_153] : memref<8x8x128xf32, #tpu.memory_space<vmem>>, vector<8x1x128xf32>
        %333 = vector.shape_cast %332 : vector<8x1x128xf32> to vector<8x128xf32>
        %334 = arith.truncf %333 : vector<8x128xf32> to vector<8x128xbf16>
        %c0_154 = arith.constant 0 : index
        %c0_155 = arith.constant 0 : index
        %335 = vector.load %arg5[%c0_154, %c0_155] : memref<128x512xbf16, #tpu.memory_space<vmem>>, vector<128x512xbf16>
        %cst_156 = arith.constant dense<0.000000e+00> : vector<8x512xf32>
        %336 = tpu.matmul %334, %335, %cst_156 {dimension_numbers = #tpu.dot_dimension_numbers<[1], [0], [0], [1], [0, 0, 1, 1], [], []>} : vector<8x128xbf16>, vector<128x512xbf16>, vector<8x512xf32> -> vector<8x512xf32>
        %c0_157 = arith.constant 0 : index
        %c0_158 = arith.constant 0 : index
        %337 = vector.load %arg6[%c0_157, %c0_158] : memref<1x512xf32, #tpu.memory_space<vmem>>, vector<1x512xf32>
        %338 = vector.broadcast %337 : vector<1x512xf32> to vector<8x512xf32>
        %339 = arith.addf %336, %338 : vector<8x512xf32>
        %340 = vector.extract_strided_slice %339 {offsets = [0, 0], sizes = [8, 384], strides = [1, 1]} : vector<8x512xf32> to vector<8x384xf32>
        %cst_159 = arith.constant 5.000000e-01 : f32
        %341 = vector.broadcast %cst_159 : f32 to vector<8x384xf32>
        %342 = arith.mulf %341, %340 : vector<8x384xf32>
        %343 = math.tanh %342 : vector<8x384xf32>
        %cst_160 = arith.constant 5.000000e-01 : f32
        %344 = vector.broadcast %cst_160 : f32 to vector<8x384xf32>
        %345 = arith.mulf %344, %343 : vector<8x384xf32>
        %cst_161 = arith.constant 5.000000e-01 : f32
        %346 = vector.broadcast %cst_161 : f32 to vector<8x384xf32>
        %347 = arith.addf %345, %346 : vector<8x384xf32>
        %348 = vector.extract_strided_slice %339 {offsets = [0, 384], sizes = [8, 128], strides = [1, 1]} : vector<8x512xf32> to vector<8x128xf32>
        %349 = math.tanh %348 : vector<8x128xf32>
        %350 = vector.extract_strided_slice %347 {offsets = [0, 0], sizes = [8, 128], strides = [1, 1]} : vector<8x384xf32> to vector<8x128xf32>
        %351 = arith.mulf %350, %349 : vector<8x128xf32>
        %352 = vector.extract_strided_slice %347 {offsets = [0, 256], sizes = [8, 128], strides = [1, 1]} : vector<8x384xf32> to vector<8x128xf32>
        %353 = math.tanh %351 : vector<8x128xf32>
        %354 = arith.mulf %352, %353 : vector<8x128xf32>
        %355 = arith.truncf %314 : vector<8x128xf32> to vector<8x128xbf16>
        %c0_162 = arith.constant 0 : index
        %c0_163 = arith.constant 0 : index
        %356 = vector.load %arg7[%c0_162, %c0_163] : memref<128x128xbf16, #tpu.memory_space<vmem>>, vector<128x128xbf16>
        %cst_164 = arith.constant dense<0.000000e+00> : vector<8x128xf32>
        %357 = tpu.matmul %355, %356, %cst_164 {dimension_numbers = #tpu.dot_dimension_numbers<[1], [0], [0], [1], [0, 0, 1, 1], [], []>} : vector<8x128xbf16>, vector<128x128xbf16>, vector<8x128xf32> -> vector<8x128xf32>
        %358 = arith.truncf %354 : vector<8x128xf32> to vector<8x128xbf16>
        %c0_165 = arith.constant 0 : index
        %c0_166 = arith.constant 0 : index
        %359 = vector.load %arg8[%c0_165, %c0_166] : memref<128x128xbf16, #tpu.memory_space<vmem>>, vector<128x128xbf16>
        %cst_167 = arith.constant dense<0.000000e+00> : vector<8x128xf32>
        %360 = tpu.matmul %358, %359, %cst_167 {dimension_numbers = #tpu.dot_dimension_numbers<[1], [0], [0], [1], [0, 0, 1, 1], [], []>} : vector<8x128xbf16>, vector<128x128xbf16>, vector<8x128xf32> -> vector<8x128xf32>
        %361 = arith.addf %357, %360 : vector<8x128xf32>
        %c0_168 = arith.constant 0 : index
        %c0_169 = arith.constant 0 : index
        %362 = vector.load %arg9[%c0_168, %c0_169] : memref<1x128xf32, #tpu.memory_space<vmem>>, vector<1x128xf32>
        %363 = vector.broadcast %362 : vector<1x128xf32> to vector<8x128xf32>
        %364 = arith.addf %361, %363 : vector<8x128xf32>
        %cst_170 = arith.constant 0.000000e+00 : f32
        %365 = vector.broadcast %cst_170 : f32 to vector<8x128xf32>
        %366 = arith.maximumf %364, %365 : vector<8x128xf32>
        %367 = arith.truncf %366 : vector<8x128xf32> to vector<8x128xbf16>
        %c0_171 = arith.constant 0 : index
        %c0_172 = arith.constant 0 : index
        %368 = vector.load %arg10[%c0_171, %c0_172] : memref<128x128xbf16, #tpu.memory_space<vmem>>, vector<128x128xbf16>
        %cst_173 = arith.constant dense<0.000000e+00> : vector<8x128xf32>
        %369 = tpu.matmul %367, %368, %cst_173 {dimension_numbers = #tpu.dot_dimension_numbers<[1], [0], [0], [1], [0, 0, 1, 1], [], []>} : vector<8x128xbf16>, vector<128x128xbf16>, vector<8x128xf32> -> vector<8x128xf32>
        %c0_174 = arith.constant 0 : index
        %c0_175 = arith.constant 0 : index
        %370 = vector.load %arg11[%c0_174, %c0_175] : memref<1x128xf32, #tpu.memory_space<vmem>>, vector<1x128xf32>
        %371 = vector.broadcast %370 : vector<1x128xf32> to vector<8x128xf32>
        %372 = arith.addf %369, %371 : vector<8x128xf32>
        %c0_176 = arith.constant 0 : index
        %c0_177 = arith.constant 0 : index
        %373 = vector.load %arg12[%c0_176, %c0_177] : memref<8x128xf32, #tpu.memory_space<vmem>>, vector<8x128xf32>
        tpu.vector_store %arg12[%c0_176, %c0_177], %372 {strides = array<i32>} : memref<8x128xf32, #tpu.memory_space<vmem>>, vector<8x128xf32>,
      } else {
      }
    } else {
    }
    return
  }
  func.func @transform_0(%arg0: i32) -> (i32, i32, i32) {
    %c2_i32 = arith.constant 2 : i32
    %0 = arith.minsi %arg0, %c2_i32 : i32
    %c0_i32 = arith.constant 0 : i32
    %c0_i32_0 = arith.constant 0 : i32
    %c0_i32_1 = arith.constant 0 : i32
    return %c0_i32, %0, %c0_i32_0 : i32, i32, i32
  }
  func.func @transform_1(%arg0: i32) -> (i32, i32) {
    %c0_i32 = arith.constant 0 : i32
    %c0_i32_0 = arith.constant 0 : i32
    %c0_i32_1 = arith.constant 0 : i32
    return %c0_i32, %c0_i32_0 : i32, i32
  }
  func.func @transform_2(%arg0: i32) -> (i32, i32) {
    %c0_i32 = arith.constant 0 : i32
    %c0_i32_0 = arith.constant 0 : i32
    %c0_i32_1 = arith.constant 0 : i32
    return %c0_i32, %c0_i32_0 : i32, i32
  }
  func.func @transform_3(%arg0: i32) -> (i32, i32) {
    %c0_i32 = arith.constant 0 : i32
    %c0_i32_0 = arith.constant 0 : i32
    %c0_i32_1 = arith.constant 0 : i32
    return %c0_i32, %c0_i32_0 : i32, i32
  }
  func.func @transform_4(%arg0: i32) -> (i32, i32) {
    %c0_i32 = arith.constant 0 : i32
    %c0_i32_0 = arith.constant 0 : i32
    %c0_i32_1 = arith.constant 0 : i32
    return %c0_i32, %c0_i32_0 : i32, i32
  }
  func.func @transform_5(%arg0: i32) -> (i32, i32) {
    %c0_i32 = arith.constant 0 : i32
    %c0_i32_0 = arith.constant 0 : i32
    %c0_i32_1 = arith.constant 0 : i32
    return %c0_i32, %c0_i32_0 : i32, i32
  }
  func.func @transform_6(%arg0: i32) -> (i32, i32) {
    %c0_i32 = arith.constant 0 : i32
    %c0_i32_0 = arith.constant 0 : i32
    %c0_i32_1 = arith.constant 0 : i32
    return %c0_i32, %c0_i32_0 : i32, i32
  }
  func.func @transform_7(%arg0: i32) -> (i32, i32) {
    %c0_i32 = arith.constant 0 : i32
    %c0_i32_0 = arith.constant 0 : i32
    %c0_i32_1 = arith.constant 0 : i32
    return %c0_i32, %c0_i32_0 : i32, i32
  }
  func.func @transform_8(%arg0: i32) -> (i32, i32) {
    %c0_i32 = arith.constant 0 : i32
    %c0_i32_0 = arith.constant 0 : i32
    %c0_i32_1 = arith.constant 0 : i32
    return %c0_i32, %c0_i32_0 : i32, i32
  }
  func.func @transform_9(%arg0: i32) -> (i32, i32) {
    %c0_i32 = arith.constant 0 : i32
    %c0_i32_0 = arith.constant 0 : i32
    %c0_i32_1 = arith.constant 0 : i32
    return %c0_i32, %c0_i32_0 : i32, i32
  }
  func.func @transform_10(%arg0: i32) -> (i32, i32) {
    %c0_i32 = arith.constant 0 : i32
    %c0_i32_0 = arith.constant 0 : i32
    %c0_i32_1 = arith.constant 0 : i32
    return %c0_i32, %c0_i32_0 : i32, i32
  }
  func.func @transform_11(%arg0: i32) -> (i32, i32) {
    %c0_i32 = arith.constant 0 : i32
    %c0_i32_0 = arith.constant 0 : i32
    %c0_i32_1 = arith.constant 0 : i32
    return %c0_i32, %c0_i32_0 : i32, i32
  }
}

</mosaic_0001>

<bundles_post_ra>
// kernel: bilstm_classifier.1
= control target key start
LH: loop header
LB: loop body
LE: loop exit
PB: predicated region body
PF: predicated region fallthrough
CT: control target
= control target key end

     0   :  { %s10018_s17 = smov 0   ;;  %s10020_s18 = smov 0   ;;  %s14443_s0 = inlined_call_operand.vmem [shape: f32[8,24,128], index: 0, kind: input, shape index: {}]   ;;  %s14444_s1 = inlined_call_operand.vmem [shape: bf16[128,512], index: 1, kind: input, shape index: {}]   ;;  %s14445_s2 = inlined_call_operand.vmem [shape: f32[1,512], index: 2, kind: input, shape index: {}]   ;;  %s14446_s3 = inlined_call_operand.vmem [shape: bf16[128,512], index: 3, kind: input, shape index: {}]   ;;  %s14447_s4 = inlined_call_operand.vmem [shape: bf16[128,512], index: 4, kind: input, shape index: {}]   ;;  %s14448_s5 = inlined_call_operand.vmem [shape: f32[1,512], index: 5, kind: input, shape index: {}]   ;;  %s14449_s6 = inlined_call_operand.vmem [shape: bf16[128,128], index: 6, kind: input, shape index: {}]   ;;  %s14450_s7 = inlined_call_operand.vmem [shape: bf16[128,128], index: 7, kind: input, shape index: {}]   ;;  %s14451_s8 = inlined_call_operand.vmem [shape: f32[1,128], index: 8, kind: input, shape index: {}]   ;;  %s14452_s9 = inlined_call_operand.vmem [shape: bf16[128,128], index: 9, kind: input, shape index: {}]   ;;  %s14453_s10 = inlined_call_operand.vmem [shape: f32[1,128], index: 10, kind: input, shape index: {}]   ;;  %s14454_s11 = inlined_call_operand.vmem [shape: f32[8,128], index: 11, kind: output, shape index: {}]  }
   0x1   :  { %s10022_s19 = smov 0  }
   0x2 LB: > { %s10034_s20 = sadd.s32 4294967295, %s9955_s19   ;;  %s10037_s21 = sadd.s32 1, %s9955_s19   ;;  %s9955_s19 = sphi %s10022_s19, %s14457_s19   ;;  %s9951_s18 = sphi %s10020_s18, %s14456_s18   ;;  %s9947_s17 = sphi %s10018_s17, %s14455_s17  }
   0x3   : > { %p25_p0 = scmp.lt.s32.totalorder %s9955_s19, 2  ;;  %p27_p1 = scmp.lt.s32.totalorder %s10037_s21, 2 }
   0x4   : > { %p39_p2 = scmp.ne.s32.totalorder %s9951_s18, %s9947_s17  ;;  %p40_p3 = scmp.eq.s32.totalorder %s9955_s19, 0 }
   0x5   : > { %s26_s22 = scalar_select %p25_p0, %s9955_s19, 2 }
   0x6   : > { %s28_s23 = scalar_select %p27_p1, %s10037_s21, 2 }
   0x7   : > { %s32_s25 = sadd.s32 1, %s9951_s18  ;;  %p41_p5 = por %p40_p3, %p39_p2 }
   0x8   : > { %s29_s24 = ssub.s32 %s26_s22, %s28_s23  ;;  %p6737_p6 = scmp.ge.s32.totalorder %s9955_s19, 4 }
   0x9   : > { %p30_p4 = scmp.eq.s32.totalorder %s29_s24, 0 }
   0xa   : > { %326 = sbr.rel (%p6737_p6) target bundleno = 27 (0x1b), region = 56 }
   0xb   : > { %s10048_s26 = scalar_select %p30_p4, %s9951_s18, %s32_s25  }
   0xf   : > { %329 = sbr.rel (!%p41_p5) target bundleno = 27 (0x1b), region = 60  ;;  %s331_s27 = sand.u32 (%p41_p5), 1, %s9951_s18  }
  0x10   : > { %s6739_s28 = sshll.u32 (%p41_p5), %s26_s22, 3  ;;  %s6738_s29 = sshll.u32 (%p41_p5), %s331_s27, 6 }
  0x11   : > { %s337_s13 = scalar_lea.vmem (%p41_p5), %s14443_s0, %s6739_s28  ;;  %s333_s14 = scalar_lea.vmem (%p41_p5), [#allocation5], %s6738_s29 }
  0x12   : > { %v380_v0 = vld [vmem:[%s337_s13] sm:$0xff] (%p41_p5)  ;;  %v382_v1 = vld [vmem:[%s337_s13 + $0x18] sm:$0xff] (%p41_p5)  ;;  %v384_v2 = vld [vmem:[%s337_s13 + $0x30] sm:$0xff] (%p41_p5) }
  0x13   : > { %381 = vst [vmem:[%s333_s14] sm:$0xff] (%p41_p5), %v380_v0  ;;  %v386_v3 = vld [vmem:[%s337_s13 + $0x48] sm:$0xff] (%p41_p5)  ;;  %v388_v4 = vld [vmem:[%s337_s13 + $0x60] sm:$0xff] (%p41_p5)  ;;  %v390_v5 = vld [vmem:[%s337_s13 + $0x78] sm:$0xff] (%p41_p5) }
  0x14   : > { %383 = vst [vmem:[%s333_s14 + $0x8] sm:$0xff] %v382_v1  ;;  %v392_v6 = vld [vmem:[%s337_s13 + $0x90] sm:$0xff]  ;;  %v394_v7 = vld [vmem:[%s337_s13 + $0xa8] sm:$0xff] }
  0x15   : > { %385 = vst [vmem:[%s333_s14 + $0x10] sm:$0xff] %v384_v2 }
  0x16   : > { %387 = vst [vmem:[%s333_s14 + $0x18] sm:$0xff] %v386_v3 }
  0x17   : > { %389 = vst [vmem:[%s333_s14 + $0x20] sm:$0xff] %v388_v4 }
  0x18   : > { %391 = vst [vmem:[%s333_s14 + $0x28] sm:$0xff] %v390_v5 }
  0x19   : > { %393 = vst [vmem:[%s333_s14 + $0x30] sm:$0xff] %v392_v6 }
  0x1a   : > { %395 = vst [vmem:[%s333_s14 + $0x38] sm:$0xff] %v394_v7 }
  0x1b PF: > { %p6740_p7 = scmp.ge.s32.totalorder %s9955_s19, 1  ;;  %p400_p8 = scmp.lt.s32.totalorder %s9955_s19, 5 }
  0x1d   : > { %p401_p9 = pnand %p6740_p7, %p400_p8 }
  0x1e   : > { %s407_s15 = sand.u32 (!%p401_p9), 1, %s9947_s17   ;;  %p6742_p10 = scmp.ne.s32.totalorder (!%p401_p9), %s10034_s20, 0 }
  0x1f   : > { %404 = sbr.rel (%p401_p9) target bundleno = 2204 (0x89c), region = 98  ;;  %s6741_s23 = sshll.u32 (!%p401_p9), %s407_s15, 6 }
  0x20   : > { %s10069_s24 = scalar_lea.vmem (!%p401_p9), [#allocation5], %s6741_s23 }
  0x24   : > { %v443_v8 = vld [vmem:[%s14445_s2] sm:$0xf]  ;;  %456 = sbr.rel (%p6742_p10) target bundleno = 442 (0x1ba), region = 106 }
  0x25   : > { %v10061_v9 = vperm.slane %v443_v8, 0  ;;  %v10063_v10 = vperm.slane %v443_v8, 1  ;;  %v10065_v11 = vperm.slane %v443_v8, 2  ;;  %v10067_v12 = vperm.slane %v443_v8, 3 }
  0x29   : > { %v6857_v13 = vld [vmem:[%s14444_s1 + $0xe0] sm:$0xf]  ;;  %v9238_v14 = vld [vmem:[%s14444_s1 + $0xec] sm:$0xf0]  ;;  %v9957_v15 = vmov 0.0   ;;  %vm524_vm0 = vcmask 1041409  }
  0x2a   : > { %457 = vst [vmem:[#allocation3] sm:$0xff] %v9957_v15  ;;  %v6858_v16 = vor.u32 %v9238_v14, %v6857_v13  ;;  %v9236_v17 = vld [vmem:[%s14444_s1 + $0xe4] sm:$0xf]  ;;  %v6859_v18 = vld [vmem:[%s14444_s1 + $0xf0] sm:$0xf0]  ;;  %vm527_vm1 = vcmask 1042434  }
  0x2b   : > { %458 = vst [vmem:[#allocation4] sm:$0xff] %v9957_v15  ;;  %v6862_v19 = vor.u32 %v9236_v17, %v6859_v18  ;;  %v6865_v20 = vld [vmem:[%s14444_s1 + $0xe8] sm:$0xf]  ;;  %v9239_v21 = vld [vmem:[%s14444_s1 + $0xf4] sm:$0xf0]  ;;  %vm530_vm2 = vcmask 1043459  }
  0x2c   : > { %706 = vmatpush.bf16.msra.mxu0 %v6858_v16  ;;  %v6866_v22 = vor.u32 %v9239_v21, %v6865_v20  ;;  %v9237_v23 = vld [vmem:[%s14444_s1 + $0xec] sm:$0xf]  ;;  %v6867_v24 = vld [vmem:[%s14444_s1 + $0xf8] sm:$0xf0]  ;;  %v6841_v25 = vld [vmem:[%s14444_s1 + $0xc0] sm:$0xf] }
  0x2d   : > { %719 = vmatpush.bf16.msra.mxu1 %v6862_v19  ;;  %v6870_v26 = vor.u32 %v9237_v23, %v6867_v24  ;;  %v9234_v27 = vld [vmem:[%s14444_s1 + $0xcc] sm:$0xf0]  ;;  %v9232_v28 = vld [vmem:[%s14444_s1 + $0xc4] sm:$0xf]  ;;  %v6843_v29 = vld [vmem:[%s14444_s1 + $0xd0] sm:$0xf0] }
  0x2e   : > { %732 = vmatpush.bf16.msra.mxu2 %v6866_v22  ;;  %v6842_v30 = vor.u32 %v9234_v27, %v6841_v25  ;;  %v6846_v31 = vor.u32 %v9232_v28, %v6843_v29  ;;  %v6849_v32 = vld [vmem:[%s14444_s1 + $0xc8] sm:$0xf]  ;;  %v9235_v33 = vld [vmem:[%s14444_s1 + $0xd4] sm:$0xf0]  ;;  %v9233_v34 = vld [vmem:[%s14444_s1 + $0xcc] sm:$0xf] }
  0x2f   : > { %745 = vmatpush.bf16.msra.mxu3 %v6870_v26  ;;  %v6850_v35 = vor.u32 %v9235_v33, %v6849_v32  ;;  %v6851_v36 = vld [vmem:[%s14444_s1 + $0xd8] sm:$0xf0]  ;;  %v6825_v37 = vld [vmem:[%s14444_s1 + $0xa0] sm:$0xf]  ;;  %v9230_v38 = vld [vmem:[%s14444_s1 + $0xac] sm:$0xf0] }
  0x30   : > { %707 = vmatpush.bf16.msra.mxu0 %v6842_v30  ;;  %v6854_v39 = vor.u32 %v9233_v34, %v6851_v36  ;;  %v6826_v40 = vor.u32 %v9230_v38, %v6825_v37  ;;  %v9228_v41 = vld [vmem:[%s14444_s1 + $0xa4] sm:$0xf]  ;;  %v6827_v42 = vld [vmem:[%s14444_s1 + $0xb0] sm:$0xf0]  ;;  %v6833_v43 = vld [vmem:[%s14444_s1 + $0xa8] sm:$0xf] }
  0x31   : > { %720 = vmatpush.bf16.msra.mxu1 %v6846_v31  ;;  %v6830_v44 = vor.u32 %v9228_v41, %v6827_v42  ;;  %v9231_v45 = vld [vmem:[%s14444_s1 + $0xb4] sm:$0xf0]  ;;  %v9229_v46 = vld [vmem:[%s14444_s1 + $0xac] sm:$0xf]  ;;  %v6835_v47 = vld [vmem:[%s14444_s1 + $0xb8] sm:$0xf0] }
  0x32   : > { %733 = vmatpush.bf16.msra.mxu2 %v6850_v35  ;;  %v6834_v48 = vor.u32 %v9231_v45, %v6833_v43  ;;  %v6809_v49 = vld [vmem:[%s14444_s1 + $0x80] sm:$0xf]  ;;  %v9226_v50 = vld [vmem:[%s14444_s1 + $0x8c] sm:$0xf0]  ;;  %v9224_v51 = vld [vmem:[%s14444_s1 + $0x84] sm:$0xf]  ;;  %v6838_v52 = vor.u32 %v9229_v46, %v6835_v47 }
  0x33   : > { %746 = vmatpush.bf16.msra.mxu3 %v6854_v39  ;;  %v6811_v53 = vld [vmem:[%s14444_s1 + $0x90] sm:$0xf0]  ;;  %v6817_v54 = vld [vmem:[%s14444_s1 + $0x88] sm:$0xf]  ;;  %v9227_v55 = vld [vmem:[%s14444_s1 + $0x94] sm:$0xf0]  ;;  %v6810_v56 = vor.u32 %v9226_v50, %v6809_v49 }
  0x34   : > { %708 = vmatpush.bf16.msra.mxu0 %v6826_v40  ;;  %v9225_v57 = vld [vmem:[%s14444_s1 + $0x8c] sm:$0xf]  ;;  %v6819_v58 = vld [vmem:[%s14444_s1 + $0x98] sm:$0xf0]  ;;  %v6814_v59 = vor.u32 %v9224_v51, %v6811_v53  ;;  %v6793_v60 = vld [vmem:[%s14444_s1 + $0x60] sm:$0xf]  ;;  %v6818_v62 = vor.u32 %v9227_v55, %v6817_v54 }
  0x35   : > { %721 = vmatpush.bf16.msra.mxu1 %v6830_v44  ;;  %v9222_v61 = vld [vmem:[%s14444_s1 + $0x6c] sm:$0xf0]  ;;  %v9220_v63 = vld [vmem:[%s14444_s1 + $0x64] sm:$0xf]  ;;  %v6795_v0 = vld [vmem:[%s14444_s1 + $0x70] sm:$0xf0]  ;;  %v6822_v1 = vor.u32 %v9225_v57, %v6819_v58 }
  0x36   : > { %734 = vmatpush.bf16.msra.mxu2 %v6834_v48  ;;  %v6801_v2 = vld [vmem:[%s14444_s1 + $0x68] sm:$0xf]  ;;  %v9223_v3 = vld [vmem:[%s14444_s1 + $0x74] sm:$0xf0]  ;;  %v6794_v4 = vor.u32 %v9222_v61, %v6793_v60  ;;  %v9221_v5 = vld [vmem:[%s14444_s1 + $0x6c] sm:$0xf]  ;;  %v6798_v7 = vor.u32 %v9220_v63, %v6795_v0 }
  0x37   : > { %747 = vmatpush.bf16.msra.mxu3 %v6838_v52  ;;  %v6803_v6 = vld [vmem:[%s14444_s1 + $0x78] sm:$0xf0]  ;;  %v6777_v8 = vld [vmem:[%s14444_s1 + $0x40] sm:$0xf]  ;;  %v9218_v13 = vld [vmem:[%s14444_s1 + $0x4c] sm:$0xf0]  ;;  %v6802_v14 = vor.u32 %v9223_v3, %v6801_v2 }
  0x38   : > { %709 = vmatpush.bf16.msra.mxu0 %v6810_v56  ;;  %v9216_v15 = vld [vmem:[%s14444_s1 + $0x44] sm:$0xf]  ;;  %v6779_v16 = vld [vmem:[%s14444_s1 + $0x50] sm:$0xf0]  ;;  %v6806_v17 = vor.u32 %v9221_v5, %v6803_v6  ;;  %v6785_v18 = vld [vmem:[%s14444_s1 + $0x48] sm:$0xf]  ;;  %v6778_v20 = vor.u32 %v9218_v13, %v6777_v8 }
  0x39   : > { %722 = vmatpush.bf16.msra.mxu1 %v6814_v59  ;;  %v9219_v19 = vld [vmem:[%s14444_s1 + $0x54] sm:$0xf0]  ;;  %v9217_v21 = vld [vmem:[%s14444_s1 + $0x4c] sm:$0xf]  ;;  %v6787_v22 = vld [vmem:[%s14444_s1 + $0x58] sm:$0xf0]  ;;  %v6782_v23 = vor.u32 %v9216_v15, %v6779_v16 }
  0x3a   : > { %735 = vmatpush.bf16.msra.mxu2 %v6818_v62  ;;  %v6761_v24 = vld [vmem:[%s14444_s1 + $0x20] sm:$0xf]  ;;  %v9214_v25 = vld [vmem:[%s14444_s1 + $0x2c] sm:$0xf0]  ;;  %v6786_v26 = vor.u32 %v9219_v19, %v6785_v18  ;;  %v9212_v27 = vld [vmem:[%s14444_s1 + $0x24] sm:$0xf]  ;;  %v6790_v29 = vor.u32 %v9217_v21, %v6787_v22 }
  0x3b   : > { %748 = vmatpush.bf16.msra.mxu3 %v6822_v1  ;;  %v6763_v28 = vld [vmem:[%s14444_s1 + $0x30] sm:$0xf0]  ;;  %v6769_v30 = vld [vmem:[%s14444_s1 + $0x28] sm:$0xf]  ;;  %v9215_v31 = vld [vmem:[%s14444_s1 + $0x34] sm:$0xf0]  ;;  %v6762_v33 = vor.u32 %v9214_v25, %v6761_v24 }
  0x3c   : > { %710 = vmatpush.bf16.msra.mxu0 %v6794_v4  ;;  %v9213_v32 = vld [vmem:[%s14444_s1 + $0x2c] sm:$0xf]  ;;  %v6771_v34 = vld [vmem:[%s14444_s1 + $0x38] sm:$0xf0]  ;;  %v6745_v35 = vld [vmem:[%s14444_s1] sm:$0xf]  ;;  %v6766_v37 = vor.u32 %v9212_v27, %v6763_v28  ;;  %v6770_v41 = vor.u32 %v9215_v31, %v6769_v30 }
  0x3d   : > { %723 = vmatpush.bf16.msra.mxu1 %v6798_v7  ;;  %v9210_v36 = vld [vmem:[%s14444_s1 + $0xc] sm:$0xf0]  ;;  %v9208_v38 = vld [vmem:[%s14444_s1 + $0x4] sm:$0xf]  ;;  %v6747_v39 = vld [vmem:[%s14444_s1 + $0x10] sm:$0xf0]  ;;  %v6774_v45 = vor.u32 %v9213_v32, %v6771_v34 }
  0x3e   : > { %736 = vmatpush.bf16.msra.mxu2 %v6802_v14  ;;  %v6753_v40 = vld [vmem:[%s14444_s1 + $0x8] sm:$0xf]  ;;  %v9211_v42 = vld [vmem:[%s14444_s1 + $0x14] sm:$0xf0]  ;;  %v6985_v43 = vld [vmem:[%s14444_s1 + $0xe0] sm:$0xf]  ;;  %v6746_v49 = vor.u32 %v9210_v36, %v6745_v35  ;;  %v6750_v53 = vor.u32 %v9208_v38, %v6747_v39 }
  0x3f   : > { %749 = vmatpush.bf16.msra.mxu3 %v6806_v17  ;;  %v9270_v44 = vld [vmem:[%s14444_s1 + $0xec] sm:$0xf0]  ;;  %v9209_v46 = vld [vmem:[%s14444_s1 + $0xc] sm:$0xf]  ;;  %v9268_v47 = vld [vmem:[%s14444_s1 + $0xe4] sm:$0xf]  ;;  %v6754_v57 = vor.u32 %v9211_v42, %v6753_v40 }
  0x40   : > { %711 = vmatpush.bf16.msra.mxu0 %v6778_v20  ;;  %v6987_v48 = vld [vmem:[%s14444_s1 + $0xf0] sm:$0xf0]  ;;  %v6755_v50 = vld [vmem:[%s14444_s1 + $0x18] sm:$0xf0]  ;;  %v6993_v51 = vld [vmem:[%s14444_s1 + $0xe8] sm:$0xf]  ;;  %v6986_v54 = vor.u32 %v9270_v44, %v6985_v43 }
  0x41   : > { %724 = vmatpush.bf16.msra.mxu1 %v6782_v23  ;;  %v9271_v52 = vld [vmem:[%s14444_s1 + $0xf4] sm:$0xf0]  ;;  %v9269_v55 = vld [vmem:[%s14444_s1 + $0xec] sm:$0xf]  ;;  %v6995_v56 = vld [vmem:[%s14444_s1 + $0xf8] sm:$0xf0]  ;;  %v6990_v58 = vor.u32 %v9268_v47, %v6987_v48  ;;  %v6758_v62 = vor.u32 %v9209_v46, %v6755_v50 }
  0x42   : > { %737 = vmatpush.bf16.msra.mxu2 %v6786_v26  ;;  %v6969_v59 = vld [vmem:[%s14444_s1 + $0xc0] sm:$0xf]  ;;  %v9266_v60 = vld [vmem:[%s14444_s1 + $0xcc] sm:$0xf0]  ;;  %v9264_v61 = vld [vmem:[%s14444_s1 + $0xc4] sm:$0xf]  ;;  %v6994_v63 = vor.u32 %v9271_v52, %v6993_v51  ;;  %v6998_v3 = vor.u32 %v9269_v55, %v6995_v56 }
  0x43   : > { %750 = vmatpush.bf16.msra.mxu3 %v6790_v29  ;;  %v6971_v0 = vld [vmem:[%s14444_s1 + $0xd0] sm:$0xf0]  ;;  %v6977_v1 = vld [vmem:[%s14444_s1 + $0xc8] sm:$0xf]  ;;  %v9267_v2 = vld [vmem:[%s14444_s1 + $0xd4] sm:$0xf0]  ;;  %v6970_v7 = vor.u32 %v9266_v60, %v6969_v59 }
  0x44   : > { %712 = vmatpush.bf16.msra.mxu0 %v6762_v33  ;;  %v9265_v4 = vld [vmem:[%s14444_s1 + $0xcc] sm:$0xf]  ;;  %v6979_v5 = vld [vmem:[%s14444_s1 + $0xd8] sm:$0xf0]  ;;  %v6953_v6 = vld [vmem:[%s14444_s1 + $0xa0] sm:$0xf]  ;;  %v6974_v15 = vor.u32 %v9264_v61, %v6971_v0  ;;  %v6978_v19 = vor.u32 %v9267_v2, %v6977_v1 }
  0x45   : > { %725 = vmatpush.bf16.msra.mxu1 %v6766_v37  ;;  %v9262_v8 = vld [vmem:[%s14444_s1 + $0xac] sm:$0xf0]  ;;  %v9260_v13 = vld [vmem:[%s14444_s1 + $0xa4] sm:$0xf]  ;;  %v6955_v14 = vld [vmem:[%s14444_s1 + $0xb0] sm:$0xf0]  ;;  %v6982_v23 = vor.u32 %v9265_v4, %v6979_v5 }
  0x46   : > { %738 = vmatpush.bf16.msra.mxu2 %v6770_v41  ;;  %v6961_v16 = vld [vmem:[%s14444_s1 + $0xa8] sm:$0xf]  ;;  %v9263_v17 = vld [vmem:[%s14444_s1 + $0xb4] sm:$0xf0]  ;;  %v9261_v18 = vld [vmem:[%s14444_s1 + $0xac] sm:$0xf]  ;;  %v6954_v27 = vor.u32 %v9262_v8, %v6953_v6  ;;  %v6958_v31 = vor.u32 %v9260_v13, %v6955_v14 }
  0x47   : > { %751 = vmatpush.bf16.msra.mxu3 %v6774_v45  ;;  %v6963_v20 = vld [vmem:[%s14444_s1 + $0xb8] sm:$0xf0]  ;;  %v6937_v21 = vld [vmem:[%s14444_s1 + $0x80] sm:$0xf]  ;;  %v9258_v22 = vld [vmem:[%s14444_s1 + $0x8c] sm:$0xf0]  ;;  %v6962_v34 = vor.u32 %v9263_v17, %v6961_v16 }
  0x48   : > { %713 = vmatpush.bf16.msra.mxu0 %v6746_v49  ;;  %v9256_v24 = vld [vmem:[%s14444_s1 + $0x84] sm:$0xf]  ;;  %v6939_v25 = vld [vmem:[%s14444_s1 + $0x90] sm:$0xf0]  ;;  %v10351_v26 = vld [vmem:[%s14444_s1 + $0x88] sm:$0xf]  ;;  %v6966_v35 = vor.u32 %v9261_v18, %v6963_v20  ;;  %v6938_v36 = vor.u32 %v9258_v22, %v6937_v21 }
  0x49   : > { %726 = vmatpush.bf16.msra.mxu1 %v6750_v53  ;;  %v9259_v28 = vld [vmem:[%s14444_s1 + $0x94] sm:$0xf0]  ;;  %v10359_v29 = vld [vmem:[%s14444_s1 + $0x8c] sm:$0xf]  ;;  %v10364_v30 = vld [vmem:[%s14444_s1 + $0x98] sm:$0xf0]  ;;  %v6942_v37 = vor.u32 %v9256_v24, %v6939_v25 }
  0x4a   : > { %739 = vmatpush.bf16.msra.mxu2 %v6754_v57  ;;  %v10369_v32 = vld [vmem:[%s14444_s1 + $0x60] sm:$0xf]  ;;  %v10374_v33 = vld [vmem:[%s14444_s1 + $0x6c] sm:$0xf0]  ;;  %v460_v39 = vld [vmem:[%s10069_s24 + $0x8] sm:$0x1]  ;;  %v6946_v40 = vor.u32 %v9259_v28, %v10351_v26  ;;  %v6950_v41 = vor.u32 %v10359_v29, %v10364_v30 }
  0x4b   : > { %752 = vmatpush.bf16.msra.mxu3 %v6758_v62  ;;  %v459_v38 = vld [vmem:[%s10069_s24] sm:$0x1]  ;;  %v461_v42 = vld [vmem:[%s10069_s24 + $0x10] sm:$0x1]  ;;  %v462_v43 = vld [vmem:[%s10069_s24 + $0x18] sm:$0x1]  ;;  %v468_v46 = vpack.c.bf16 %v460_v39, %v460_v39  ;;  %v6922_v47 = vor.u32 %v10374_v33, %v10369_v32 }
  0x4c   : > { %1002 = vmatpush.bf16.msrb.mxu0 %v6986_v54  ;;  %v463_v44 = vld [vmem:[%s10069_s24 + $0x20] sm:$0x1]  ;;  %v467_v45 = vpack.c.bf16 %v459_v38, %v459_v38  ;;  %v464_v48 = vld [vmem:[%s10069_s24 + $0x28] sm:$0x1]  ;;  %v465_v49 = vld [vmem:[%s10069_s24 + $0x30] sm:$0x1]  ;;  %v469_v51 = vpack.c.bf16 %v461_v42, %v461_v42  ;;  %v470_v52 = vpack.c.bf16 %v462_v43, %v462_v43 }
  0x4d   : > { %1015 = vmatpush.bf16.msrb.mxu1 %v6990_v58  ;;  %v466_v50 = vld [vmem:[%s10069_s24 + $0x38] sm:$0x1]  ;;  %v471_v53 = vpack.c.bf16 %v463_v44, %v463_v44  ;;  %v472_v54 = vpack.c.bf16 %v464_v48, %v464_v48  ;;  %v473_v55 = vpack.c.bf16 %v465_v49, %v465_v49  ;;  %v9252_v58 = vld [vmem:[%s14444_s1 + $0x64] sm:$0xf]  ;;  %v6923_v59 = vld [vmem:[%s14444_s1 + $0x70] sm:$0xf0]  ;;  %v516_v61 = vunpack.c.l.b16 %v468_v46 }
  0x4e   : > { %1028 = vmatpush.bf16.msrb.mxu2 %v6994_v63  ;;  %v474_v56 = vpack.c.bf16 %v466_v50, %v466_v50  ;;  %v515_v57 = vunpack.c.l.b16 %v467_v45  ;;  %v6929_v60 = vld [vmem:[%s14444_s1 + $0x68] sm:$0xf]  ;;  %v517_v62 = vunpack.c.l.b16 %v469_v51  ;;  %v518_v63 = vunpack.c.l.b16 %v470_v52  ;;  %v9255_v1 = vld [vmem:[%s14444_s1 + $0x74] sm:$0xf0]  ;;  %v9253_v2 = vld [vmem:[%s14444_s1 + $0x6c] sm:$0xf] }
  0x4f   : > { %1041 = vmatpush.bf16.msrb.mxu3 %v6998_v3  ;;  %v519_v0 = vunpack.c.l.b16 %v471_v53  ;;  %v520_v3 = vunpack.c.l.b16 %v472_v54  ;;  %v521_v4 = vunpack.c.l.b16 %v473_v55  ;;  %v6931_v6 = vld [vmem:[%s14444_s1 + $0x78] sm:$0xf0]  ;;  %v6926_v14 = vor.u32 %v9252_v58, %v6923_v59  ;;  %v9250_v16 = vld [vmem:[%s14444_s1 + $0x4c] sm:$0xf0]  ;;  %v6907_v20 = vld [vmem:[%s14444_s1 + $0x50] sm:$0xf0] }
  0x50   : > { %1003 = vmatpush.bf16.msrb.mxu0 %v6970_v7  ;;  %v522_v5 = vunpack.c.l.b16 %v474_v56  ;;  %v523_v7 = vrot.slane %v516_v61, 7  ;;  %v526_v8 = vrot.slane %v517_v62, 6  ;;  %v529_v13 = vrot.slane %v518_v63, 5  ;;  %v6913_v24 = vld [vmem:[%s14444_s1 + $0x48] sm:$0xf] }
  0x51   : > { %1016 = vmatpush.bf16.msrb.mxu1 %v6974_v15  ;;  %v6905_v15 = vld [vmem:[%s14444_s1 + $0x40] sm:$0xf]  ;;  %v532_v17 = vrot.slane %v519_v0, 4  ;;  %v6930_v18 = vor.u32 %v9255_v1, %v6929_v60  ;;  %vm533_vm3 = vcmask 1044484   ;;  %v535_v22 = vrot.slane %v520_v3, 3 }
  0x52   : > { %1029 = vmatpush.bf16.msrb.mxu2 %v6978_v19  ;;  %v9248_v19 = vld [vmem:[%s14444_s1 + $0x44] sm:$0xf]  ;;  %v525_v21 = vsel %vm524_vm0, %v523_v7, %v515_v57  ;;  %v9251_v25 = vld [vmem:[%s14444_s1 + $0x54] sm:$0xf0]  ;;  %vm536_vm4 = vcmask 1045509   ;;  %v6906_v28 = vor.u32 %v9250_v16, %v6905_v15  ;;  %vm539_vm5 = vcmask 1046534  }
  0x53   : > { %1042 = vmatpush.bf16.msrb.mxu3 %v6982_v23  ;;  %v6934_v23 = vor.u32 %v9253_v2, %v6931_v6  ;;  %v528_v26 = vsel %vm527_vm1, %v526_v8, %v525_v21  ;;  %v9249_v29 = vld [vmem:[%s14444_s1 + $0x4c] sm:$0xf]  ;;  %v6915_v30 = vld [vmem:[%s14444_s1 + $0x58] sm:$0xf0]  ;;  %v541_v32 = vrot.slane %v522_v5, 1  ;;  %v6910_v33 = vor.u32 %v9248_v19, %v6907_v20 }
  0x54   : > { %1004 = vmatpush.bf16.msrb.mxu0 %v6954_v27  ;;  %v538_v27 = vrot.slane %v521_v4, 2  ;;  %vm542_vm6 = vcmask 1047559   ;;  %v9244_v39 = vld [vmem:[%s14444_s1 + $0x24] sm:$0xf]  ;;  %v6897_v43 = vld [vmem:[%s14444_s1 + $0x28] sm:$0xf] }
  0x55   : > { %1017 = vmatpush.bf16.msrb.mxu1 %v6958_v31  ;;  %v531_v31 = vsel %vm530_vm2, %v529_v13, %v528_v26  ;;  %v9247_v44 = vld [vmem:[%s14444_s1 + $0x34] sm:$0xf0]  ;;  %v9245_v45 = vld [vmem:[%s14444_s1 + $0x2c] sm:$0xf]  ;;  %v6899_v48 = vld [vmem:[%s14444_s1 + $0x38] sm:$0xf0] }
  0x56   : > { %1030 = vmatpush.bf16.msrb.mxu2 %v6962_v34  ;;  %v534_v34 = vsel %vm533_vm3, %v532_v17, %v531_v31  ;;  %v6873_v49 = vld [vmem:[%s14444_s1] sm:$0xf]  ;;  %v9242_v50 = vld [vmem:[%s14444_s1 + $0xc] sm:$0xf0]  ;;  %v9240_v53 = vld [vmem:[%s14444_s1 + $0x4] sm:$0xf]  ;;  %v6898_v56 = vor.u32 %v9247_v44, %v6897_v43  ;;  %v6902_v60 = vor.u32 %v9245_v45, %v6899_v48 }
  0x57   : > { %1043 = vmatpush.bf16.msrb.mxu3 %v6966_v35  ;;  %v6889_v35 = vld [vmem:[%s14444_s1 + $0x20] sm:$0xf]  ;;  %v537_v38 = vsel %vm536_vm4, %v535_v22, %v534_v34  ;;  %v6875_v54 = vld [vmem:[%s14444_s1 + $0x10] sm:$0xf0]  ;;  %v6881_v55 = vld [vmem:[%s14444_s1 + $0x8] sm:$0xf]  ;;  %v6874_v0 = vor.u32 %v9242_v50, %v6873_v49 }
  0x58   : > { %1005 = vmatpush.bf16.msrb.mxu0 %v6938_v36  ;;  %v9246_v36 = vld [vmem:[%s14444_s1 + $0x2c] sm:$0xf0]  ;;  %v540_v42 = vsel %vm539_vm5, %v538_v27, %v537_v38  ;;  %v9243_v57 = vld [vmem:[%s14444_s1 + $0x14] sm:$0xf0]  ;;  %v7113_v58 = vld [vmem:[%s14444_s1 + $0xe0] sm:$0xf]  ;;  %v6878_v4 = vor.u32 %v9240_v53, %v6875_v54 }
  0x59   : > { %1018 = vmatpush.bf16.msrb.mxu1 %v6942_v37  ;;  %v6914_v37 = vor.u32 %v9251_v25, %v6913_v24  ;;  %v543_v46 = vsel %vm542_vm6, %v541_v32, %v540_v42  ;;  %v9302_v59 = vld [vmem:[%s14444_s1 + $0xec] sm:$0xf0]  ;;  %v9241_v61 = vld [vmem:[%s14444_s1 + $0xc] sm:$0xf]  ;;  %v9300_v62 = vld [vmem:[%s14444_s1 + $0xe4] sm:$0xf]  ;;  %v6882_v8 = vor.u32 %v9243_v57, %v6881_v55 }
  0x5a   : > { %1031 = vmatpush.bf16.msrb.mxu2 %v6946_v40  ;;  %v6891_v40 = vld [vmem:[%s14444_s1 + $0x30] sm:$0xf0]  ;;  %v544_v51 = vpack.c.b16 %v543_v46, %v543_v46  ;;  %v6883_v1 = vld [vmem:[%s14444_s1 + $0x18] sm:$0xf0]  ;;  %v7121_v2 = vld [vmem:[%s14444_s1 + $0xe8] sm:$0xf]  ;;  %v7114_v5 = vor.u32 %v9302_v59, %v7113_v58 }
  0x5b   : > { %1044 = vmatpush.bf16.msrb.mxu3 %v6950_v41  ;;  %v6918_v41 = vor.u32 %v9249_v29, %v6915_v30  ;;  %v6894_v52 = vor.u32 %v9244_v39, %v6891_v40  ;;  %v7115_v63 = vld [vmem:[%s14444_s1 + $0xf0] sm:$0xf0]  ;;  %v9303_v3 = vld [vmem:[%s14444_s1 + $0xf4] sm:$0xf0]  ;;  %v9301_v6 = vld [vmem:[%s14444_s1 + $0xec] sm:$0xf]  ;;  %v6886_v16 = vor.u32 %v9241_v61, %v6883_v1 }
  0x5c   : > { %1006 = vmatpush.bf16.msrb.mxu0 %v6922_v47  ;;  %v6890_v47 = vor.u32 %v9246_v36, %v6889_v35  ;;  %740 = vmatmul.bf16.vlgmr.msra.gmra.mxu2 %v544_v51  ;;  %v7123_v7 = vld [vmem:[%s14444_s1 + $0xf8] sm:$0xf0]  ;;  %v7118_v13 = vor.u32 %v9300_v62, %v7115_v63  ;;  %v9298_v15 = vld [vmem:[%s14444_s1 + $0xcc] sm:$0xf0]  ;;  %v7122_v17 = vor.u32 %v9303_v3, %v7121_v2  ;;  %v7099_v19 = vld [vmem:[%s14444_s1 + $0xd0] sm:$0xf0] }
  0x5d   : > { %1019 = vmatpush.bf16.msrb.mxu1 %v6926_v14  ;;  %753 = vmatmul.bf16.vlgmr.msra.gmra.mxu3 %v544_v51  ;;  %v7097_v14 = vld [vmem:[%s14444_s1 + $0xc0] sm:$0xf]  ;;  %v7105_v20 = vld [vmem:[%s14444_s1 + $0xc8] sm:$0xf]  ;;  %v7126_v21 = vor.u32 %v9301_v6, %v7123_v7  ;;  %v9299_v22 = vld [vmem:[%s14444_s1 + $0xd4] sm:$0xf0] }
  0x5e   : > { %1032 = vmatpush.bf16.msrb.mxu2 %v6930_v18  ;;  %714 = vmatmul.bf16.vlgmr.msra.gmra.mxu0 %v544_v51  ;;  %v9296_v18 = vld [vmem:[%s14444_s1 + $0xc4] sm:$0xf]  ;;  %v7107_v24 = vld [vmem:[%s14444_s1 + $0xd8] sm:$0xf0]  ;;  %v7098_v25 = vor.u32 %v9298_v15, %v7097_v14  ;;  %v7081_v26 = vld [vmem:[%s14444_s1 + $0xa0] sm:$0xf] }
  0x5f   : > { %1045 = vmatpush.bf16.msrb.mxu3 %v6934_v23  ;;  %727 = vmatmul.bf16.vlgmr.msra.gmra.mxu1 %v544_v51  ;;  %v9297_v23 = vld [vmem:[%s14444_s1 + $0xcc] sm:$0xf]  ;;  %v9294_v27 = vld [vmem:[%s14444_s1 + $0xac] sm:$0xf0]  ;;  %v7102_v29 = vor.u32 %v9296_v18, %v7099_v19  ;;  %v7083_v30 = vld [vmem:[%s14444_s1 + $0xb0] sm:$0xf0] }
  0x60   : > { %1007 = vmatpush.bf16.msrb.mxu0 %v6906_v28  ;;  %v9292_v28 = vld [vmem:[%s14444_s1 + $0xa4] sm:$0xf]  ;;  %v7089_v31 = vld [vmem:[%s14444_s1 + $0xa8] sm:$0xf]  ;;  %v9295_v32 = vld [vmem:[%s14444_s1 + $0xb4] sm:$0xf0]  ;;  %v7110_v36 = vor.u32 %v9297_v23, %v7107_v24  ;;  %v7082_v39 = vor.u32 %v9294_v27, %v7081_v26 }
  0x61   : > { %1020 = vmatpush.bf16.msrb.mxu1 %v6910_v33  ;;  %v7106_v33 = vor.u32 %v9299_v22, %v7105_v20  ;;  %v9293_v34 = vld [vmem:[%s14444_s1 + $0xac] sm:$0xf]  ;;  %v7091_v35 = vld [vmem:[%s14444_s1 + $0xb8] sm:$0xf0]  ;;  %v9290_v38 = vld [vmem:[%s14444_s1 + $0x8c] sm:$0xf0]  ;;  %v7086_v40 = vor.u32 %v9292_v28, %v7083_v30 }
  0x62   : > { %1033 = vmatpush.bf16.msrb.mxu2 %v6914_v37  ;;  %v7065_v37 = vld [vmem:[%s14444_s1 + $0x80] sm:$0xf]  ;;  %v9288_v42 = vld [vmem:[%s14444_s1 + $0x84] sm:$0xf]  ;;  %v762_v43 = vld [vmem:[%s10069_s24 + $0x1] sm:$0x1]  ;;  %v7094_v46 = vor.u32 %v9293_v34, %v7091_v35 }
  0x63   : > { %1046 = vmatpush.bf16.msrb.mxu3 %v6918_v41  ;;  %v7090_v41 = vor.u32 %v9295_v32, %v7089_v31  ;;  %v763_v44 = vld [vmem:[%s10069_s24 + $0x9] sm:$0x1]  ;;  %v764_v45 = vld [vmem:[%s10069_s24 + $0x11] sm:$0x1]  ;;  %v766_v48 = vld [vmem:[%s10069_s24 + $0x21] sm:$0x1]  ;;  %v770_v50 = vpack.c.bf16 %v762_v43, %v762_v43  ;;  %v7066_v53 = vor.u32 %v9290_v38, %v7065_v37 }
  0x64   : > { %1008 = vmatpush.bf16.msrb.mxu0 %v6890_v47  ;;  %v765_v47 = vld [vmem:[%s10069_s24 + $0x19] sm:$0x1]  ;;  %v767_v49 = vld [vmem:[%s10069_s24 + $0x29] sm:$0x1]  ;;  %v771_v51 = vpack.c.bf16 %v763_v44, %v763_v44  ;;  %v7067_v54 = vld [vmem:[%s14444_s1 + $0x90] sm:$0xf0]  ;;  %v774_v58 = vpack.c.bf16 %v766_v48, %v766_v48 }
  0x65   : > { %1021 = vmatpush.bf16.msrb.mxu1 %v6894_v52  ;;  %v772_v52 = vpack.c.bf16 %v764_v45, %v764_v45  ;;  %v768_v55 = vld [vmem:[%s10069_s24 + $0x31] sm:$0x1]  ;;  %v773_v57 = vpack.c.bf16 %v765_v47, %v765_v47  ;;  %v775_v59 = vpack.c.bf16 %v767_v49, %v767_v49  ;;  %v9291_v61 = vld [vmem:[%s14444_s1 + $0x94] sm:$0xf0]  ;;  %v9289_v2 = vld [vmem:[%s14444_s1 + $0x8c] sm:$0xf] }
  0x66   : > { %1034 = vmatpush.bf16.msrb.mxu2 %v6898_v56  ;;  %v769_v56 = vld [vmem:[%s10069_s24 + $0x39] sm:$0x1]  ;;  %v776_v62 = vpack.c.bf16 %v768_v55, %v768_v55  ;;  %v819_v1 = vunpack.c.l.b16 %v771_v51  ;;  %v7075_v3 = vld [vmem:[%s14444_s1 + $0x98] sm:$0xf0]  ;;  %v822_v7 = vunpack.c.l.b16 %v774_v58  ;;  %v9286_v14 = vld [vmem:[%s14444_s1 + $0x6c] sm:$0xf0] }
  0x67   : > { %1047 = vmatpush.bf16.msrb.mxu3 %v6902_v60  ;;  %v7073_v60 = vld [vmem:[%s14444_s1 + $0x88] sm:$0xf]  ;;  %v777_v63 = vpack.c.bf16 %v769_v56, %v769_v56  ;;  %v821_v6 = vunpack.c.l.b16 %v773_v57  ;;  %v9284_v15 = vld [vmem:[%s14444_s1 + $0x64] sm:$0xf]  ;;  %v7051_v20 = vld [vmem:[%s14444_s1 + $0x70] sm:$0xf0]  ;;  %v7078_v24 = vor.u32 %v9289_v2, %v7075_v3 }
  0x68   : > { %1009 = vmatpush.bf16.msrb.mxu0 %v6874_v0  ;;  %v818_v0 = vunpack.c.l.b16 %v770_v50  ;;  %v826_v18 = vrot.slane %v819_v1, 7  ;;  %v7074_v19 = vor.u32 %v9291_v61, %v7073_v60  ;;  %v832_v23 = vrot.slane %v822_v7, 4  ;;  %v9287_v26 = vld [vmem:[%s14444_s1 + $0x74] sm:$0xf0]  ;;  %v9285_v30 = vld [vmem:[%s14444_s1 + $0x6c] sm:$0xf] }
  0x69   : > { %1022 = vmatpush.bf16.msrb.mxu1 %v6878_v4  ;;  %v7049_v4 = vld [vmem:[%s14444_s1 + $0x60] sm:$0xf]  ;;  %v830_v22 = vrot.slane %v821_v6, 5  ;;  %v7059_v31 = vld [vmem:[%s14444_s1 + $0x78] sm:$0xf0]  ;;  %v7054_v34 = vor.u32 %v9284_v15, %v7051_v20 }
  0x6a   : > { %1035 = vmatpush.bf16.msrb.mxu2 %v6882_v8  ;;  %v823_v8 = vunpack.c.l.b16 %v775_v59  ;;  %v827_v27 = vsel %vm524_vm0, %v826_v18, %v818_v0  ;;  %v7033_v35 = vld [vmem:[%s14444_s1 + $0x40] sm:$0xf]  ;;  %v7062_v43 = vor.u32 %v9285_v30, %v7059_v31  ;;  %v7041_v44 = vld [vmem:[%s14444_s1 + $0x48] sm:$0xf]  ;;  %v9283_v45 = vld [vmem:[%s14444_s1 + $0x54] sm:$0xf0] }
  0x6b   : > { %1048 = vmatpush.bf16.msrb.mxu3 %v6886_v16  ;;  %v824_v16 = vunpack.c.l.b16 %v776_v62  ;;  %v9281_v48 = vld [vmem:[%s14444_s1 + $0x4c] sm:$0xf]  ;;  %v7043_v49 = vld [vmem:[%s14444_s1 + $0x58] sm:$0xf0]  ;;  %v9276_v55 = vld [vmem:[%s14444_s1 + $0x24] sm:$0xf]  ;;  %v7042_v56 = vor.u32 %v9283_v45, %v7041_v44 }
  0x6c   : > { %1299 = vmatpush.bf16.msra.mxu0 %v7114_v5  ;;  %v820_v5 = vunpack.c.l.b16 %v772_v52  ;;  %v834_v28 = vrot.slane %v823_v8, 3  ;;  %v7019_v58 = vld [vmem:[%s14444_s1 + $0x30] sm:$0xf0]  ;;  %v7025_v59 = vld [vmem:[%s14444_s1 + $0x28] sm:$0xf]  ;;  %v7046_v61 = vor.u32 %v9281_v48, %v7043_v49 }
  0x6d   : > { %1312 = vmatpush.bf16.msra.mxu1 %v7118_v13  ;;  %v7070_v13 = vor.u32 %v9288_v42, %v7067_v54  ;;  %v9278_v54 = vld [vmem:[%s14444_s1 + $0x2c] sm:$0xf0]  ;;  %v9279_v60 = vld [vmem:[%s14444_s1 + $0x34] sm:$0xf0]  ;;  %v9277_v62 = vld [vmem:[%s14444_s1 + $0x2c] sm:$0xf] }
  0x6e   : > { %1325 = vmatpush.bf16.msra.mxu2 %v7122_v17  ;;  %v825_v17 = vunpack.c.l.b16 %v777_v63  ;;  %v7027_v63 = vld [vmem:[%s14444_s1 + $0x38] sm:$0xf0]  ;;  %v7001_v0 = vld [vmem:[%s14444_s1] sm:$0xf]  ;;  %v9274_v2 = vld [vmem:[%s14444_s1 + $0xc] sm:$0xf0] }
  0x6f   : > { %1338 = vmatpush.bf16.msra.mxu3 %v7126_v21  ;;  %v828_v21 = vrot.slane %v820_v5, 6  ;;  %v9272_v3 = vld [vmem:[%s14444_s1 + $0x4] sm:$0xf]  ;;  %v7022_v5 = vor.u32 %v9276_v55, %v7019_v58  ;;  %v7009_v6 = vld [vmem:[%s14444_s1 + $0x8] sm:$0xf] }
  0x70   : > { %1300 = vmatpush.bf16.msra.mxu0 %v7098_v25  ;;  %v7057_v25 = vld [vmem:[%s14444_s1 + $0x68] sm:$0xf]  ;;  %v838_v38 = vrot.slane %v825_v17, 1  ;;  %v9275_v7 = vld [vmem:[%s14444_s1 + $0x14] sm:$0xf0] }
  0x71   : > { %1313 = vmatpush.bf16.msra.mxu1 %v7102_v29  ;;  %v7050_v29 = vor.u32 %v9286_v14, %v7049_v4  ;;  %v829_v32 = vsel %vm527_vm1, %v828_v21, %v827_v27  ;;  %v7003_v4 = vld [vmem:[%s14444_s1 + $0x10] sm:$0xf0]  ;;  %v7241_v8 = vld [vmem:[%s14444_s1 + $0xe0] sm:$0xf]  ;;  %v9273_v14 = vld [vmem:[%s14444_s1 + $0xc] sm:$0xf] }
  0x72   : > { %1326 = vmatpush.bf16.msra.mxu2 %v7106_v33  ;;  %v836_v33 = vrot.slane %v824_v16, 2  ;;  %v831_v37 = vsel %vm530_vm2, %v830_v22, %v829_v32  ;;  %v7011_v15 = vld [vmem:[%s14444_s1 + $0x18] sm:$0xf0]  ;;  %v9334_v16 = vld [vmem:[%s14444_s1 + $0xec] sm:$0xf0]  ;;  %v7006_v27 = vor.u32 %v9272_v3, %v7003_v4  ;;  %v7010_v32 = vor.u32 %v9275_v7, %v7009_v6 }
  0x73   : > { %1339 = vmatpush.bf16.msra.mxu3 %v7110_v36  ;;  %v9282_v36 = vld [vmem:[%s14444_s1 + $0x4c] sm:$0xf0]  ;;  %v833_v42 = vsel %vm533_vm3, %v832_v23, %v831_v37  ;;  %v9332_v17 = vld [vmem:[%s14444_s1 + $0xe4] sm:$0xf]  ;;  %v7243_v18 = vld [vmem:[%s14444_s1 + $0xf0] sm:$0xf0]  ;;  %v7002_v23 = vor.u32 %v9274_v2, %v7001_v0  ;;  %v7014_v37 = vor.u32 %v9273_v14, %v7011_v15 }
  0x74   : > { %1301 = vmatpush.bf16.msra.mxu0 %v7082_v39  ;;  %v7058_v39 = vor.u32 %v9287_v26, %v7057_v25  ;;  %v7034_v47 = vor.u32 %v9282_v36, %v7033_v35  ;;  %v7249_v20 = vld [vmem:[%s14444_s1 + $0xe8] sm:$0xf]  ;;  %v9335_v21 = vld [vmem:[%s14444_s1 + $0xf4] sm:$0xf0]  ;;  %v9333_v22 = vld [vmem:[%s14444_s1 + $0xec] sm:$0xf] }
  0x75   : > { %1314 = vmatpush.bf16.msra.mxu1 %v7086_v40  ;;  %v9280_v40 = vld [vmem:[%s14444_s1 + $0x44] sm:$0xf]  ;;  %v7225_v25 = vld [vmem:[%s14444_s1 + $0xc0] sm:$0xf]  ;;  %v9330_v26 = vld [vmem:[%s14444_s1 + $0xcc] sm:$0xf0] }
  0x76   : > { %1327 = vmatpush.bf16.msra.mxu2 %v7090_v41  ;;  %v7035_v41 = vld [vmem:[%s14444_s1 + $0x50] sm:$0xf0]  ;;  %v7233_v31 = vld [vmem:[%s14444_s1 + $0xc8] sm:$0xf]  ;;  %v10738_v35 = vld [vmem:[%s14444_s1 + $0xcc] sm:$0xf] }
  0x77   : > { %1340 = vmatpush.bf16.msra.mxu3 %v7094_v46  ;;  %v835_v46 = vsel %vm536_vm4, %v834_v28, %v833_v42  ;;  %v7038_v51 = vor.u32 %v9280_v40, %v7035_v41  ;;  %v7242_v28 = vor.u32 %v9334_v16, %v7241_v8  ;;  %v7227_v30 = vld [vmem:[%s14444_s1 + $0xd0] sm:$0xf0]  ;;  %v7235_v36 = vld [vmem:[%s14444_s1 + $0xd8] sm:$0xf0]  ;;  %v9326_v40 = vld [vmem:[%s14444_s1 + $0xac] sm:$0xf0]  ;;  %v7226_v42 = vor.u32 %v9330_v26, %v7225_v25 }
  0x78   : > { %1302 = vmatpush.bf16.msra.mxu0 %v7066_v53  ;;  %v837_v50 = vsel %vm539_vm5, %v836_v33, %v835_v46  ;;  %v7017_v53 = vld [vmem:[%s14444_s1 + $0x20] sm:$0xf]  ;;  %v7246_v33 = vor.u32 %v9332_v17, %v7243_v18  ;;  %v7238_v45 = vor.u32 %v10738_v35, %v7235_v36  ;;  %v9324_v46 = vld [vmem:[%s14444_s1 + $0xa4] sm:$0xf]  ;;  %v10761_v48 = vld [vmem:[%s14444_s1 + $0xa8] sm:$0xf] }
  0x79   : > { %1315 = vmatpush.bf16.msra.mxu1 %v7070_v13  ;;  %v839_v52 = vsel %vm542_vm6, %v838_v38, %v837_v50  ;;  %v7018_v1 = vor.u32 %v9278_v54, %v7017_v53  ;;  %v7026_v13 = vor.u32 %v9279_v60, %v7025_v59  ;;  %v7250_v38 = vor.u32 %v9335_v21, %v7249_v20  ;;  %v9327_v49 = vld [vmem:[%s14444_s1 + $0xb4] sm:$0xf0]  ;;  %v1059_v50 = vld [vmem:[%s10069_s24 + $0x2] sm:$0x1]  ;;  %v1061_v53 = vld [vmem:[%s10069_s24 + $0x12] sm:$0x1] }
  0x7a   : > { %1328 = vmatpush.bf16.msra.mxu2 %v7074_v19  ;;  %v840_v57 = vpack.c.b16 %v839_v52, %v839_v52  ;;  %v7030_v19 = vor.u32 %v9277_v62, %v7027_v63  ;;  %v1062_v54 = vld [vmem:[%s10069_s24 + $0x1a] sm:$0x1]  ;;  %v1063_v55 = vld [vmem:[%s10069_s24 + $0x22] sm:$0x1]  ;;  %v1064_v58 = vld [vmem:[%s10069_s24 + $0x2a] sm:$0x1]  ;;  %v7218_v15 = vor.u32 %v9327_v49, %v10761_v48 }
  0x7b   : > { %1341 = vmatpush.bf16.msra.mxu3 %v7078_v24  ;;  %v7251_v24 = vld [vmem:[%s14444_s1 + $0xf8] sm:$0xf0]  ;;  %v1065_v59 = vld [vmem:[%s10069_s24 + $0x32] sm:$0x1]  ;;  %v1066_v60 = vld [vmem:[%s10069_s24 + $0x3a] sm:$0x1]  ;;  %v1070_v62 = vpack.c.bf16 %v1062_v54, %v1062_v54  ;;  %v1071_v63 = vpack.c.bf16 %v1063_v55, %v1063_v55  ;;  %v1072_v0 = vpack.c.bf16 %v1064_v58, %v1064_v58 }
  0x7c   : > { %1303 = vmatpush.bf16.msra.mxu0 %v7050_v29  ;;  %1036 = vmatmul.bf16.vlgmr.msrb.gmra.mxu2 %v840_v57  ;;  %v9328_v29 = vld [vmem:[%s14444_s1 + $0xc4] sm:$0xf]  ;;  %v7254_v41 = vor.u32 %v9333_v22, %v7251_v24  ;;  %v1074_v2 = vpack.c.bf16 %v1066_v60, %v1066_v60  ;;  %v9325_v4 = vld [vmem:[%s14444_s1 + $0xac] sm:$0xf]  ;;  %v7193_v16 = vld [vmem:[%s14444_s1 + $0x80] sm:$0xf] }
  0x7d   : > { %1316 = vmatpush.bf16.msra.mxu1 %v7054_v34  ;;  %1049 = vmatmul.bf16.vlgmr.msrb.gmra.mxu3 %v840_v57  ;;  %v9331_v34 = vld [vmem:[%s14444_s1 + $0xd4] sm:$0xf0]  ;;  %v1118_v8 = vunpack.c.l.b16 %v1070_v62  ;;  %v9322_v17 = vld [vmem:[%s14444_s1 + $0x8c] sm:$0xf0]  ;;  %v9320_v18 = vld [vmem:[%s14444_s1 + $0x84] sm:$0xf] }
  0x7e   : > { %1329 = vmatpush.bf16.msra.mxu2 %v7058_v39  ;;  %1010 = vmatmul.bf16.vlgmr.msrb.gmra.mxu0 %v840_v57  ;;  %v10746_v39 = vld [vmem:[%s14444_s1 + $0xa0] sm:$0xf]  ;;  %v7234_v44 = vor.u32 %v9331_v34, %v7233_v31  ;;  %v7195_v21 = vld [vmem:[%s14444_s1 + $0x90] sm:$0xf0]  ;;  %v1122_v22 = vunpack.c.l.b16 %v1074_v2  ;;  %v9321_v31 = vld [vmem:[%s14444_s1 + $0x8c] sm:$0xf] }
  0x7f   : > { %1342 = vmatpush.bf16.msra.mxu3 %v7062_v43  ;;  %1023 = vmatmul.bf16.vlgmr.msrb.gmra.mxu1 %v840_v57  ;;  %v7230_v43 = vor.u32 %v9328_v29, %v7227_v30  ;;  %v7210_v52 = vor.u32 %v9326_v40, %v10746_v39  ;;  %v1127_v25 = vrot.slane %v1118_v8, 5  ;;  %v7194_v30 = vor.u32 %v9322_v17, %v7193_v16  ;;  %v7177_v36 = vld [vmem:[%s14444_s1 + $0x60] sm:$0xf]  ;;  %v9314_v55 = vld [vmem:[%s14444_s1 + $0x4c] sm:$0xf0] }
  0x80   : > { %1304 = vmatpush.bf16.msra.mxu0 %v7034_v47  ;;  %v7211_v47 = vld [vmem:[%s14444_s1 + $0xb0] sm:$0xf0]  ;;  %v7198_v35 = vor.u32 %v9320_v18, %v7195_v21  ;;  %v7161_v54 = vld [vmem:[%s14444_s1 + $0x40] sm:$0xf]  ;;  %v9312_v58 = vld [vmem:[%s14444_s1 + $0x44] sm:$0xf] }
  0x81   : > { %1317 = vmatpush.bf16.msra.mxu1 %v7038_v51  ;;  %v1060_v51 = vld [vmem:[%s10069_s24 + $0xa] sm:$0x1]  ;;  %v7214_v14 = vor.u32 %v9324_v46, %v7211_v47  ;;  %v7185_v46 = vld [vmem:[%s14444_s1 + $0x68] sm:$0xf]  ;;  %v7162_v2 = vor.u32 %v9314_v55, %v7161_v54  ;;  %v7147_v8 = vld [vmem:[%s14444_s1 + $0x30] sm:$0xf0] }
  0x82   : > { %1330 = vmatpush.bf16.msra.mxu2 %v7042_v56  ;;  %v1067_v56 = vpack.c.bf16 %v1059_v50, %v1059_v50  ;;  %v1068_v57 = vpack.c.bf16 %v1060_v51, %v1060_v51  ;;  %v9319_v47 = vld [vmem:[%s14444_s1 + $0x74] sm:$0xf0]  ;;  %v9317_v50 = vld [vmem:[%s14444_s1 + $0x6c] sm:$0xf]  ;;  %v7187_v51 = vld [vmem:[%s14444_s1 + $0x78] sm:$0xf0] }
  0x83   : > { %1343 = vmatpush.bf16.msra.mxu3 %v7046_v61  ;;  %v1069_v61 = vpack.c.bf16 %v1061_v53, %v1061_v53  ;;  %v7169_v62 = vld [vmem:[%s14444_s1 + $0x48] sm:$0xf]  ;;  %v9309_v16 = vld [vmem:[%s14444_s1 + $0x2c] sm:$0xf]  ;;  %v7155_v17 = vld [vmem:[%s14444_s1 + $0x38] sm:$0xf0] }
  0x84   : > { %1305 = vmatpush.bf16.msra.mxu0 %v7018_v1  ;;  %v1073_v1 = vpack.c.bf16 %v1065_v59, %v1065_v59  ;;  %v1115_v3 = vunpack.c.l.b16 %v1067_v56  ;;  %v1116_v6 = vunpack.c.l.b16 %v1068_v57  ;;  %v7186_v57 = vor.u32 %v9319_v47, %v7185_v46  ;;  %v7163_v59 = vld [vmem:[%s14444_s1 + $0x50] sm:$0xf0]  ;;  %v9304_v21 = vld [vmem:[%s14444_s1 + $0x4] sm:$0xf]  ;;  %v1357_v55 = vld [vmem:[%s10069_s24 + $0xb] sm:$0x1] }
  0x85   : > { %1318 = vmatpush.bf16.msra.mxu1 %v7022_v5  ;;  %v7219_v5 = vld [vmem:[%s14444_s1 + $0xb8] sm:$0xf0]  ;;  %v1117_v7 = vunpack.c.l.b16 %v1069_v61  ;;  %v7190_v61 = vor.u32 %v9317_v50, %v7187_v51  ;;  %v10972_v50 = vld [vmem:[%s14444_s1 + $0xd4] sm:$0xf0]  ;;  %v1356_v51 = vld [vmem:[%s10069_s24 + $0x3] sm:$0x1] }
  0x86   : > { %1331 = vmatpush.bf16.msra.mxu2 %v7026_v13  ;;  %v1119_v13 = vunpack.c.l.b16 %v1071_v63  ;;  %v1121_v20 = vunpack.c.l.b16 %v1073_v1  ;;  %v7222_v26 = vor.u32 %v9325_v4, %v7219_v5  ;;  %v9315_v63 = vld [vmem:[%s14444_s1 + $0x54] sm:$0xf0]  ;;  %v7145_v4 = vld [vmem:[%s14444_s1 + $0x20] sm:$0xf]  ;;  %v9310_v5 = vld [vmem:[%s14444_s1 + $0x2c] sm:$0xf0] }
  0x87   : > { %1344 = vmatpush.bf16.msra.mxu3 %v7030_v19  ;;  %v1120_v19 = vunpack.c.l.b16 %v1072_v0  ;;  %v1125_v24 = vrot.slane %v1117_v7, 6  ;;  %v9313_v0 = vld [vmem:[%s14444_s1 + $0x4c] sm:$0xf]  ;;  %v9308_v7 = vld [vmem:[%s14444_s1 + $0x24] sm:$0xf] }
  0x88   : > { %1306 = vmatpush.bf16.msra.mxu0 %v7002_v23  ;;  %v1123_v23 = vrot.slane %v1116_v6, 7  ;;  %v1129_v29 = vrot.slane %v1119_v13, 4  ;;  %v1133_v39 = vrot.slane %v1121_v20, 2  ;;  %v7166_v6 = vor.u32 %v9312_v58, %v7163_v59  ;;  %v7153_v13 = vld [vmem:[%s14444_s1 + $0x28] sm:$0xf] }
  0x89   : > { %1319 = vmatpush.bf16.msra.mxu1 %v7006_v27  ;;  %v7201_v27 = vld [vmem:[%s14444_s1 + $0x88] sm:$0xf]  ;;  %v1131_v34 = vrot.slane %v1120_v19, 3  ;;  %v7129_v19 = vld [vmem:[%s14444_s1] sm:$0xf]  ;;  %v1364_v58 = vpack.c.bf16 %v1356_v51, %v1356_v51 }
  0x8a   : > { %1332 = vmatpush.bf16.msra.mxu2 %v7010_v32  ;;  %v7203_v32 = vld [vmem:[%s14444_s1 + $0x98] sm:$0xf0]  ;;  %v9306_v20 = vld [vmem:[%s14444_s1 + $0xc] sm:$0xf0] }
  0x8b   : > { %1345 = vmatpush.bf16.msra.mxu3 %v7014_v37  ;;  %v9318_v37 = vld [vmem:[%s14444_s1 + $0x6c] sm:$0xf0] }
  0x8c   : > { %1596 = vmatpush.bf16.msrb.mxu0 %v7242_v28  ;;  %v9323_v28 = vld [vmem:[%s14444_s1 + $0x94] sm:$0xf0]  ;;  %v7178_v49 = vor.u32 %v9318_v37, %v7177_v36  ;;  %v10936_v36 = vld [vmem:[%s14444_s1 + $0xec] sm:$0xf]  ;;  %v7158_v37 = vor.u32 %v9309_v16, %v7155_v17 }
  0x8d   : > { %1609 = vmatpush.bf16.msrb.mxu1 %v7246_v33  ;;  %v1124_v33 = vsel %vm524_vm0, %v1123_v23, %v1115_v3  ;;  %v7202_v40 = vor.u32 %v9323_v28, %v7201_v27  ;;  %v7171_v3 = vld [vmem:[%s14444_s1 + $0x58] sm:$0xf0]  ;;  %v7146_v23 = vor.u32 %v9310_v5, %v7145_v4  ;;  %v7369_v28 = vld [vmem:[%s14444_s1 + $0xe0] sm:$0xf] }
  0x8e   : > { %1622 = vmatpush.bf16.msrb.mxu2 %v7250_v38  ;;  %v1126_v38 = vsel %vm527_vm1, %v1125_v24, %v1124_v33  ;;  %v7174_v18 = vor.u32 %v9313_v0, %v7171_v3  ;;  %v10900_v24 = vld [vmem:[%s14444_s1 + $0x8] sm:$0xf]  ;;  %v10913_v27 = vld [vmem:[%s14444_s1 + $0x18] sm:$0xf0] }
  0x8f   : > { %1635 = vmatpush.bf16.msrb.mxu3 %v7254_v41  ;;  %v9316_v41 = vld [vmem:[%s14444_s1 + $0x64] sm:$0xf] }
  0x90   : > { %1597 = vmatpush.bf16.msrb.mxu0 %v7226_v42  ;;  %v7179_v42 = vld [vmem:[%s14444_s1 + $0x70] sm:$0xf0] }
  0x91   : > { %1610 = vmatpush.bf16.msrb.mxu1 %v7230_v43  ;;  %v1128_v43 = vsel %vm530_vm2, %v1127_v25, %v1126_v38  ;;  %v7182_v53 = vor.u32 %v9316_v41, %v7179_v42  ;;  %v9307_v25 = vld [vmem:[%s14444_s1 + $0x14] sm:$0xf0]  ;;  %v7379_v38 = vld [vmem:[%s14444_s1 + $0xf8] sm:$0xf0]  ;;  %v7130_v41 = vor.u32 %v9306_v20, %v7129_v19  ;;  %v9358_v19 = vld [vmem:[%s14444_s1 + $0xac] sm:$0xf0] }
  0x92   : > { %1623 = vmatpush.bf16.msrb.mxu2 %v7234_v44  ;;  %v1135_v44 = vrot.slane %v1122_v22, 1  ;;  %v1130_v48 = vsel %vm533_vm3, %v1129_v29, %v1128_v43  ;;  %v7131_v22 = vld [vmem:[%s14444_s1 + $0x10] sm:$0xf0]  ;;  %v7150_v29 = vor.u32 %v9308_v7, %v7147_v8  ;;  %v10954_v43 = vld [vmem:[%s14444_s1 + $0xc4] sm:$0xf] }
  0x93   : > { %1636 = vmatpush.bf16.msrb.mxu3 %v7238_v45  ;;  %v7206_v45 = vor.u32 %v9321_v31, %v7203_v32  ;;  %v9364_v31 = vld [vmem:[%s14444_s1 + $0xe4] sm:$0xf]  ;;  %v7371_v32 = vld [vmem:[%s14444_s1 + $0xf0] sm:$0xf0]  ;;  %v7134_v42 = vor.u32 %v9304_v21, %v7131_v22  ;;  %v9361_v7 = vld [vmem:[%s14444_s1 + $0xcc] sm:$0xf] }
  0x94   : > { %1598 = vmatpush.bf16.msrb.mxu0 %v7210_v52  ;;  %v1132_v52 = vsel %vm536_vm4, %v1131_v34, %v1130_v48  ;;  %v7377_v34 = vld [vmem:[%s14444_s1 + $0xe8] sm:$0xf]  ;;  %v7374_v48 = vor.u32 %v9364_v31, %v7371_v32  ;;  %v7363_v8 = vld [vmem:[%s14444_s1 + $0xd8] sm:$0xf0]  ;;  %v9356_v20 = vld [vmem:[%s14444_s1 + $0xa4] sm:$0xf] }
  0x95   : > { %1611 = vmatpush.bf16.msrb.mxu1 %v7214_v14  ;;  %v1134_v56 = vsel %vm539_vm5, %v1133_v39, %v1132_v52  ;;  %v7170_v14 = vor.u32 %v9315_v63, %v7169_v62  ;;  %v10944_v39 = vld [vmem:[%s14444_s1 + $0xc0] sm:$0xf]  ;;  %v1365_v63 = vpack.c.bf16 %v1357_v55, %v1357_v55  ;;  %v9359_v31 = vld [vmem:[%s14444_s1 + $0xb4] sm:$0xf0] }
  0x96   : > { %1624 = vmatpush.bf16.msrb.mxu2 %v7218_v15  ;;  %v1136_v60 = vsel %vm542_vm6, %v1135_v44, %v1134_v56  ;;  %v9311_v15 = vld [vmem:[%s14444_s1 + $0x34] sm:$0xf0]  ;;  %v10959_v44 = vld [vmem:[%s14444_s1 + $0xd0] sm:$0xf0]  ;;  %v1358_v56 = vld [vmem:[%s10069_s24 + $0x13] sm:$0x1] }
  0x97   : > { %1637 = vmatpush.bf16.msrb.mxu3 %v7222_v26  ;;  %v1137_v1 = vpack.c.b16 %v1136_v60, %v1136_v60  ;;  %v10908_v26 = vld [vmem:[%s14444_s1 + $0xc] sm:$0xf]  ;;  %v7154_v33 = vor.u32 %v9311_v15, %v7153_v13  ;;  %v7358_v59 = vor.u32 %v10954_v43, %v10959_v44  ;;  %v1360_v60 = vld [vmem:[%s10069_s24 + $0x23] sm:$0x1]  ;;  %v1362_v62 = vld [vmem:[%s10069_s24 + $0x33] sm:$0x1]  ;;  %v1366_v0 = vpack.c.bf16 %v1358_v56, %v1358_v56 }
  0x98   : > { %1599 = vmatpush.bf16.msrb.mxu0 %v7194_v30  ;;  %v9366_v30 = vld [vmem:[%s14444_s1 + $0xec] sm:$0xf0]  ;;  %v7142_v46 = vor.u32 %v10908_v26, %v10913_v27  ;;  %v1368_v3 = vpack.c.bf16 %v1360_v60, %v1360_v60  ;;  %v1370_v5 = vpack.c.bf16 %v1362_v62, %v1362_v62  ;;  %v9352_v44 = vld [vmem:[%s14444_s1 + $0x84] sm:$0xf]  ;;  %v7307_v62 = vld [vmem:[%s14444_s1 + $0x70] sm:$0xf0] }
  0x99   : > { %1612 = vmatpush.bf16.msrb.mxu1 %v7198_v35  ;;  %1333 = vmatmul.bf16.vlgmr.msra.gmra.mxu2 %v1137_v1  ;;  %v9367_v35 = vld [vmem:[%s14444_s1 + $0xf4] sm:$0xf0]  ;;  %v7370_v47 = vor.u32 %v9366_v30, %v7369_v28  ;;  %v1414_v15 = vunpack.c.l.b16 %v1366_v0  ;;  %v7345_v30 = vld [vmem:[%s14444_s1 + $0xa8] sm:$0xf] }
  0x9a   : > { %1625 = vmatpush.bf16.msrb.mxu2 %v7202_v40  ;;  %1346 = vmatmul.bf16.vlgmr.msra.gmra.mxu3 %v1137_v1  ;;  %v10949_v40 = vld [vmem:[%s14444_s1 + $0xcc] sm:$0xf0]  ;;  %v7378_v52 = vor.u32 %v9367_v35, %v7377_v34  ;;  %v1416_v21 = vunpack.c.l.b16 %v1368_v3  ;;  %v9357_v34 = vld [vmem:[%s14444_s1 + $0xac] sm:$0xf]  ;;  %v7347_v35 = vld [vmem:[%s14444_s1 + $0xb8] sm:$0xf0]  ;;  %v7346_v43 = vor.u32 %v9359_v31, %v7345_v30 }
  0x9b   : > { %1638 = vmatpush.bf16.msrb.mxu3 %v7206_v45  ;;  %1307 = vmatmul.bf16.vlgmr.msra.gmra.mxu0 %v1137_v1  ;;  %v7138_v45 = vor.u32 %v9307_v25, %v10900_v24  ;;  %v7354_v54 = vor.u32 %v10949_v40, %v10944_v39  ;;  %v7339_v24 = vld [vmem:[%s14444_s1 + $0xb0] sm:$0xf0]  ;;  %v1422_v27 = vrot.slane %v1414_v15, 6  ;;  %v7321_v39 = vld [vmem:[%s14444_s1 + $0x80] sm:$0xf] }
  0x9c   : > { %1600 = vmatpush.bf16.msrb.mxu0 %v7178_v49  ;;  %1320 = vmatmul.bf16.vlgmr.msra.gmra.mxu1 %v1137_v1  ;;  %v10967_v49 = vld [vmem:[%s14444_s1 + $0xc8] sm:$0xf]  ;;  %v1426_v32 = vrot.slane %v1416_v21, 4  ;;  %v9354_v40 = vld [vmem:[%s14444_s1 + $0x8c] sm:$0xf0] }
  0x9d   : > { %1613 = vmatpush.bf16.msrb.mxu1 %v7182_v53  ;;  %v7382_v53 = vor.u32 %v10936_v36, %v7379_v38  ;;  %v7362_v17 = vor.u32 %v10972_v50, %v10967_v49  ;;  %v7342_v38 = vor.u32 %v9356_v20, %v7339_v24  ;;  %v7329_v49 = vld [vmem:[%s14444_s1 + $0x88] sm:$0xf]  ;;  %v9355_v50 = vld [vmem:[%s14444_s1 + $0x94] sm:$0xf0]  ;;  %v7291_v15 = vld [vmem:[%s14444_s1 + $0x50] sm:$0xf0] }
  0x9e   : > { %1626 = vmatpush.bf16.msrb.mxu2 %v7186_v57  ;;  %v1359_v57 = vld [vmem:[%s10069_s24 + $0x1b] sm:$0x1]  ;;  %v7330_v60 = vor.u32 %v9355_v50, %v7329_v49  ;;  %v7299_v21 = vld [vmem:[%s14444_s1 + $0x58] sm:$0xf0]  ;;  %v9341_v30 = vld [vmem:[%s14444_s1 + $0x2c] sm:$0xf] }
  0x9f   : > { %1639 = vmatpush.bf16.msrb.mxu3 %v7190_v61  ;;  %v1361_v61 = vld [vmem:[%s10069_s24 + $0x2b] sm:$0x1]  ;;  %v1367_v1 = vpack.c.bf16 %v1359_v57, %v1359_v57  ;;  %v7305_v57 = vld [vmem:[%s14444_s1 + $0x60] sm:$0xf]  ;;  %v7283_v31 = vld [vmem:[%s14444_s1 + $0x38] sm:$0xf0] }
  0xa0   : > { %1601 = vmatpush.bf16.msrb.mxu0 %v7162_v2  ;;  %v1363_v2 = vld [vmem:[%s10069_s24 + $0x3b] sm:$0x1]  ;;  %v1369_v4 = vpack.c.bf16 %v1361_v61, %v1361_v61  ;;  %v9348_v61 = vld [vmem:[%s14444_s1 + $0x64] sm:$0xf]  ;;  %v7286_v49 = vor.u32 %v9341_v30, %v7283_v31  ;;  %v9395_v30 = vld [vmem:[%s14444_s1 + $0xd4] sm:$0xf0] }
  0xa1   : > { %1614 = vmatpush.bf16.msrb.mxu1 %v7166_v6  ;;  %v1412_v6 = vunpack.c.l.b16 %v1364_v58  ;;  %v1371_v13 = vpack.c.bf16 %v1363_v2, %v1363_v2  ;;  %v1415_v16 = vunpack.c.l.b16 %v1367_v1  ;;  %v9350_v58 = vld [vmem:[%s14444_s1 + $0x6c] sm:$0xf0]  ;;  %v7313_v1 = vld [vmem:[%s14444_s1 + $0x68] sm:$0xf]  ;;  %v9351_v2 = vld [vmem:[%s14444_s1 + $0x74] sm:$0xf0] }
  0xa2   : > { %1627 = vmatpush.bf16.msrb.mxu2 %v7170_v14  ;;  %v1413_v14 = vunpack.c.l.b16 %v1365_v63  ;;  %v1417_v22 = vunpack.c.l.b16 %v1369_v4  ;;  %v7306_v4 = vor.u32 %v9350_v58, %v7305_v57  ;;  %v1653_v57 = vld [vmem:[%s10069_s24 + $0x4] sm:$0x1]  ;;  %v1654_v58 = vld [vmem:[%s10069_s24 + $0xc] sm:$0x1] }
  0xa3   : > { %1640 = vmatpush.bf16.msrb.mxu3 %v7174_v18  ;;  %v7337_v18 = vld [vmem:[%s14444_s1 + $0xa0] sm:$0xf]  ;;  %v1419_v25 = vunpack.c.l.b16 %v1371_v13  ;;  %v1424_v28 = vrot.slane %v1415_v16, 5  ;;  %v9346_v13 = vld [vmem:[%s14444_s1 + $0x4c] sm:$0xf0]  ;;  %v7314_v16 = vor.u32 %v9351_v2, %v7313_v1  ;;  %v1662_v1 = vpack.c.bf16 %v1654_v58, %v1654_v58 }
  0xa4   : > { %1602 = vmatpush.bf16.msrb.mxu0 %v7146_v23  ;;  %v1418_v23 = vunpack.c.l.b16 %v1370_v5  ;;  %v1420_v26 = vrot.slane %v1413_v14, 7  ;;  %v9349_v5 = vld [vmem:[%s14444_s1 + $0x6c] sm:$0xf]  ;;  %v9344_v14 = vld [vmem:[%s14444_s1 + $0x44] sm:$0xf] }
  0xa5   : > { %1615 = vmatpush.bf16.msrb.mxu1 %v7150_v29  ;;  %v7366_v29 = vor.u32 %v9361_v7, %v7363_v8  ;;  %v7289_v7 = vld [vmem:[%s14444_s1 + $0x40] sm:$0xf]  ;;  %v7310_v8 = vor.u32 %v9348_v61, %v7307_v62  ;;  %v1655_v61 = vld [vmem:[%s10069_s24 + $0x14] sm:$0x1]  ;;  %v1656_v62 = vld [vmem:[%s10069_s24 + $0x1c] sm:$0x1] }
  0xa6   : > { %1628 = vmatpush.bf16.msrb.mxu2 %v7154_v33  ;;  %v7338_v33 = vor.u32 %v9358_v19, %v7337_v18  ;;  %v1421_v36 = vsel %vm524_vm0, %v1420_v26, %v1412_v6  ;;  %v7315_v6 = vld [vmem:[%s14444_s1 + $0x78] sm:$0xf0]  ;;  %v9347_v18 = vld [vmem:[%s14444_s1 + $0x54] sm:$0xf0]  ;;  %v9345_v19 = vld [vmem:[%s14444_s1 + $0x4c] sm:$0xf]  ;;  %v7290_v24 = vor.u32 %v9346_v13, %v7289_v7  ;;  %v1664_v7 = vpack.c.bf16 %v1656_v62, %v1656_v62 }
  0xa7   : > { %1641 = vmatpush.bf16.msrb.mxu3 %v7158_v37  ;;  %v1428_v37 = vrot.slane %v1417_v22, 3  ;;  %v7318_v20 = vor.u32 %v9349_v5, %v7315_v6  ;;  %v7273_v22 = vld [vmem:[%s14444_s1 + $0x20] sm:$0xf]  ;;  %v7275_v26 = vld [vmem:[%s14444_s1 + $0x30] sm:$0xf0]  ;;  %v1663_v6 = vpack.c.bf16 %v1655_v61, %v1655_v61 }
  0xa8   : > { %1603 = vmatpush.bf16.msrb.mxu0 %v7130_v41  ;;  %v1423_v41 = vsel %vm527_vm1, %v1422_v27, %v1421_v36  ;;  %v7281_v27 = vld [vmem:[%s14444_s1 + $0x28] sm:$0xf]  ;;  %v11140_v36 = vld [vmem:[%s14444_s1 + $0x10] sm:$0xf0]  ;;  %v1660_v5 = vld [vmem:[%s10069_s24 + $0x3c] sm:$0x1] }
  0xa9   : > { %1616 = vmatpush.bf16.msrb.mxu1 %v7134_v42  ;;  %v1430_v42 = vrot.slane %v1418_v23, 2  ;;  %v9342_v23 = vld [vmem:[%s14444_s1 + $0x2c] sm:$0xf0] }
  0xaa   : > { %1629 = vmatpush.bf16.msrb.mxu2 %v7138_v45  ;;  %v7323_v45 = vld [vmem:[%s14444_s1 + $0x90] sm:$0xf0] }
  0xab   : > { %1642 = vmatpush.bf16.msrb.mxu3 %v7142_v46  ;;  %v1425_v46 = vsel %vm530_vm2, %v1424_v28, %v1423_v41  ;;  %v7326_v56 = vor.u32 %v9352_v44, %v7323_v45  ;;  %v9343_v28 = vld [vmem:[%s14444_s1 + $0x34] sm:$0xf0]  ;;  %v7274_v41 = vor.u32 %v9342_v23, %v7273_v22  ;;  %v9398_v44 = vld [vmem:[%s14444_s1 + $0xec] sm:$0xf0] }
  0xac   : > { %1893 = vmatpush.bf16.msra.mxu0 %v7370_v47  ;;  %v1432_v47 = vrot.slane %v1419_v25, 1  ;;  %v1427_v51 = vsel %vm533_vm3, %v1426_v32, %v1425_v46  ;;  %v9340_v25 = vld [vmem:[%s14444_s1 + $0x24] sm:$0xf]  ;;  %v11125_v32 = vld [vmem:[%s14444_s1] sm:$0xf]  ;;  %v7282_v46 = vor.u32 %v9343_v28, %v7281_v27 }
  0xad   : > { %1906 = vmatpush.bf16.msra.mxu1 %v7374_v48  ;;  %v7350_v48 = vor.u32 %v9357_v34, %v7347_v35  ;;  %v1429_v55 = vsel %vm536_vm4, %v1428_v37, %v1427_v51  ;;  %v11130_v34 = vld [vmem:[%s14444_s1 + $0xc] sm:$0xf0]  ;;  %v11135_v35 = vld [vmem:[%s14444_s1 + $0x4] sm:$0xf]  ;;  %v7302_v37 = vor.u32 %v9345_v19, %v7299_v21  ;;  %v7278_v45 = vor.u32 %v9340_v25, %v7275_v26  ;;  %v7483_v26 = vld [vmem:[%s14444_s1 + $0xd0] sm:$0xf0] }
  0xae   : > { %1919 = vmatpush.bf16.msra.mxu2 %v7378_v52  ;;  %v7322_v52 = vor.u32 %v9354_v40, %v7321_v39  ;;  %v11150_v39 = vld [vmem:[%s14444_s1 + $0x14] sm:$0xf0]  ;;  %v11155_v40 = vld [vmem:[%s14444_s1 + $0xc] sm:$0xf]  ;;  %v7258_v50 = vor.u32 %v11130_v34, %v11125_v32  ;;  %v7262_v51 = vor.u32 %v11135_v35, %v11140_v36  ;;  %v1710_v19 = vunpack.c.l.b16 %v1662_v1  ;;  %v9392_v25 = vld [vmem:[%s14444_s1 + $0xc4] sm:$0xf] }
  0xaf   : > { %1932 = vmatpush.bf16.msra.mxu3 %v7382_v53  ;;  %v9353_v53 = vld [vmem:[%s14444_s1 + $0x8c] sm:$0xf]  ;;  %v1712_v21 = vunpack.c.l.b16 %v1664_v7  ;;  %v7489_v27 = vld [vmem:[%s14444_s1 + $0xc8] sm:$0xf] }
  0xb0   : > { %1894 = vmatpush.bf16.msra.mxu0 %v7354_v54  ;;  %v7331_v54 = vld [vmem:[%s14444_s1 + $0x98] sm:$0xf0]  ;;  %v1717_v32 = vrot.slane %v1710_v19, 7  ;;  %v9393_v36 = vld [vmem:[%s14444_s1 + $0xcc] sm:$0xf] }
  0xb1   : > { %1907 = vmatpush.bf16.msra.mxu1 %v7358_v59  ;;  %v1431_v59 = vsel %vm539_vm5, %v1430_v42, %v1429_v55  ;;  %v7334_v0 = vor.u32 %v9353_v53, %v7331_v54  ;;  %v11160_v42 = vld [vmem:[%s14444_s1 + $0x18] sm:$0xf0]  ;;  %v7505_v53 = vld [vmem:[%s14444_s1 + $0xe8] sm:$0xf]  ;;  %v9399_v54 = vld [vmem:[%s14444_s1 + $0xf4] sm:$0xf0] }
  0xb2   : > { %1920 = vmatpush.bf16.msra.mxu2 %v7362_v17  ;;  %v1433_v63 = vsel %vm542_vm6, %v1432_v47, %v1431_v59  ;;  %v7297_v17 = vld [vmem:[%s14444_s1 + $0x48] sm:$0xf]  ;;  %v9396_v47 = vld [vmem:[%s14444_s1 + $0xe4] sm:$0xf]  ;;  %v11189_v55 = vld [vmem:[%s14444_s1 + $0xec] sm:$0xf]  ;;  %v7270_v59 = vor.u32 %v11155_v40, %v11160_v42  ;;  %v7506_v23 = vor.u32 %v9399_v54, %v7505_v53 }
  0xb3   : > { %1933 = vmatpush.bf16.msra.mxu3 %v7366_v29  ;;  %v1434_v3 = vpack.c.b16 %v1433_v63, %v1433_v63  ;;  %v7294_v29 = vor.u32 %v9344_v14, %v7291_v15  ;;  %v1657_v63 = vld [vmem:[%s10069_s24 + $0x24] sm:$0x1]  ;;  %v1668_v15 = vpack.c.bf16 %v1660_v5, %v1660_v5  ;;  %v1721_v34 = vrot.slane %v1712_v21, 5  ;;  %v7465_v40 = vld [vmem:[%s14444_s1 + $0xa0] sm:$0xf] }
  0xb4   : > { %1895 = vmatpush.bf16.msra.mxu0 %v7338_v33  ;;  %v7298_v33 = vor.u32 %v9347_v18, %v7297_v17  ;;  %v7481_v17 = vld [vmem:[%s14444_s1 + $0xc0] sm:$0xf]  ;;  %v9394_v18 = vld [vmem:[%s14444_s1 + $0xcc] sm:$0xf0]  ;;  %v9385_v7 = vld [vmem:[%s14444_s1 + $0x8c] sm:$0xf] }
  0xb5   : > { %1908 = vmatpush.bf16.msra.mxu1 %v7342_v38  ;;  %1630 = vmatmul.bf16.vlgmr.msrb.gmra.mxu2 %v1434_v3  ;;  %v11145_v38 = vld [vmem:[%s14444_s1 + $0x8] sm:$0xf]  ;;  %v1716_v31 = vunpack.c.l.b16 %v1668_v15  ;;  %v7482_v35 = vor.u32 %v9394_v18, %v7481_v17  ;;  %v7433_v15 = vld [vmem:[%s14444_s1 + $0x60] sm:$0xf]  ;;  %v9380_v18 = vld [vmem:[%s14444_s1 + $0x64] sm:$0xf] }
  0xb6   : > { %1921 = vmatpush.bf16.msra.mxu2 %v7346_v43  ;;  %1643 = vmatmul.bf16.vlgmr.msrb.gmra.mxu3 %v1434_v3  ;;  %v7497_v43 = vld [vmem:[%s14444_s1 + $0xe0] sm:$0xf]  ;;  %v7435_v19 = vld [vmem:[%s14444_s1 + $0x70] sm:$0xf0] }
  0xb7   : > { %1934 = vmatpush.bf16.msra.mxu3 %v7350_v48  ;;  %1604 = vmatmul.bf16.vlgmr.msrb.gmra.mxu0 %v1434_v3  ;;  %v7499_v48 = vld [vmem:[%s14444_s1 + $0xf0] sm:$0xf0]  ;;  %v1729_v53 = vrot.slane %v1716_v31, 1  ;;  %v7425_v31 = vld [vmem:[%s14444_s1 + $0x48] sm:$0xf] }
  0xb8   : > { %1896 = vmatpush.bf16.msra.mxu0 %v7322_v52  ;;  %1617 = vmatmul.bf16.vlgmr.msrb.gmra.mxu1 %v1434_v3  ;;  %v7266_v52 = vor.u32 %v11150_v39, %v11145_v38  ;;  %v7502_v2 = vor.u32 %v9396_v47, %v7499_v48  ;;  %v1658_v3 = vld [vmem:[%s10069_s24 + $0x2c] sm:$0x1]  ;;  %v7486_v39 = vor.u32 %v9392_v25, %v7483_v26  ;;  %v7417_v26 = vld [vmem:[%s14444_s1 + $0x40] sm:$0xf] }
  0xb9   : > { %1909 = vmatpush.bf16.msra.mxu1 %v7326_v56  ;;  %v11194_v56 = vld [vmem:[%s14444_s1 + $0xf8] sm:$0xf0]  ;;  %v1666_v13 = vpack.c.bf16 %v1658_v3, %v1658_v3  ;;  %v7457_v3 = vld [vmem:[%s14444_s1 + $0x88] sm:$0xf] }
  0xba   : > { %1922 = vmatpush.bf16.msra.mxu2 %v7330_v60  ;;  %v7498_v60 = vor.u32 %v9398_v44, %v7497_v43  ;;  %v7490_v44 = vor.u32 %v9395_v30, %v7489_v27  ;;  %v9378_v27 = vld [vmem:[%s14444_s1 + $0x4c] sm:$0xf0]  ;;  %v7419_v30 = vld [vmem:[%s14444_s1 + $0x50] sm:$0xf0] }
  0xbb   : > { %1935 = vmatpush.bf16.msra.mxu3 %v7334_v0  ;;  %v1661_v0 = vpack.c.bf16 %v1653_v57, %v1653_v57  ;;  %v1714_v28 = vunpack.c.l.b16 %v1666_v13 }
  0xbc   : > { %1897 = vmatpush.bf16.msra.mxu0 %v7306_v4  ;;  %v1659_v4 = vld [vmem:[%s10069_s24 + $0x34] sm:$0x1] }
  0xbd   : > { %1910 = vmatpush.bf16.msra.mxu1 %v7310_v8  ;;  %v1665_v8 = vpack.c.bf16 %v1657_v63, %v1657_v63  ;;  %v1667_v14 = vpack.c.bf16 %v1659_v4, %v1659_v4  ;;  %v1725_v43 = vrot.slane %v1714_v28, 3  ;;  %v9384_v63 = vld [vmem:[%s14444_s1 + $0x84] sm:$0xf]  ;;  %v9387_v4 = vld [vmem:[%s14444_s1 + $0x94] sm:$0xf0] }
  0xbe   : > { %1923 = vmatpush.bf16.msra.mxu2 %v7314_v16  ;;  %v1709_v16 = vunpack.c.l.b16 %v1661_v0  ;;  %v7451_v0 = vld [vmem:[%s14444_s1 + $0x90] sm:$0xf0]  ;;  %v7458_v17 = vor.u32 %v9387_v4, %v7457_v3  ;;  %v9376_v28 = vld [vmem:[%s14444_s1 + $0x44] sm:$0xf] }
  0xbf   : > { %1936 = vmatpush.bf16.msra.mxu3 %v7318_v20  ;;  %v1711_v20 = vunpack.c.l.b16 %v1663_v6  ;;  %v1713_v22 = vunpack.c.l.b16 %v1665_v8  ;;  %v7459_v8 = vld [vmem:[%s14444_s1 + $0x98] sm:$0xf0] }
  0xc0   : > { %1898 = vmatpush.bf16.msra.mxu0 %v7290_v24  ;;  %v7510_v24 = vor.u32 %v11189_v55, %v11194_v56  ;;  %v1718_v42 = vsel %vm524_vm0, %v1717_v32, %v1709_v16  ;;  %v9389_v55 = vld [vmem:[%s14444_s1 + $0xac] sm:$0xf]  ;;  %v7475_v56 = vld [vmem:[%s14444_s1 + $0xb8] sm:$0xf0]  ;;  %v9382_v16 = vld [vmem:[%s14444_s1 + $0x6c] sm:$0xf0]  ;;  %v7462_v21 = vor.u32 %v9385_v7, %v7459_v8 }
  0xc1   : > { %1911 = vmatpush.bf16.msra.mxu1 %v7294_v29  ;;  %v1715_v29 = vunpack.c.l.b16 %v1667_v14  ;;  %v1723_v38 = vrot.slane %v1713_v22, 4  ;;  %v7454_v14 = vor.u32 %v9384_v63, %v7451_v0  ;;  %v9383_v22 = vld [vmem:[%s14444_s1 + $0x74] sm:$0xf0]  ;;  %v7434_v25 = vor.u32 %v9382_v16, %v7433_v15  ;;  %v7411_v63 = vld [vmem:[%s14444_s1 + $0x38] sm:$0xf0] }
  0xc2   : > { %1924 = vmatpush.bf16.msra.mxu2 %v7298_v33  ;;  %v1719_v33 = vrot.slane %v1711_v20, 6  ;;  %v7441_v20 = vld [vmem:[%s14444_s1 + $0x68] sm:$0xf]  ;;  %v9379_v32 = vld [vmem:[%s14444_s1 + $0x54] sm:$0xf0] }
  0xc3   : > { %1937 = vmatpush.bf16.msra.mxu3 %v7302_v37  ;;  %v7491_v37 = vld [vmem:[%s14444_s1 + $0xd8] sm:$0xf0]  ;;  %v1727_v48 = vrot.slane %v1715_v29, 2  ;;  %v7438_v29 = vor.u32 %v9380_v18, %v7435_v19  ;;  %v7385_v0 = vld [vmem:[%s14444_s1] sm:$0xf] }
  0xc4   : > { %1899 = vmatpush.bf16.msra.mxu0 %v7274_v41  ;;  %v9390_v41 = vld [vmem:[%s14444_s1 + $0xac] sm:$0xf0]  ;;  %v1720_v47 = vsel %vm527_vm1, %v1719_v33, %v1718_v42  ;;  %v7442_v33 = vor.u32 %v9383_v22, %v7441_v20  ;;  %v11352_v42 = vld [vmem:[%s14444_s1 + $0x24] sm:$0xf]  ;;  %v7387_v7 = vld [vmem:[%s14444_s1 + $0x10] sm:$0xf0] }
  0xc5   : > { %1912 = vmatpush.bf16.msra.mxu1 %v7278_v45  ;;  %v9388_v45 = vld [vmem:[%s14444_s1 + $0xa4] sm:$0xf]  ;;  %v7466_v54 = vor.u32 %v9390_v41, %v7465_v40  ;;  %v7422_v40 = vor.u32 %v9376_v28, %v7419_v30  ;;  %v7426_v41 = vor.u32 %v9379_v32, %v7425_v31  ;;  %v9371_v18 = vld [vmem:[%s14444_s1 + $0x14] sm:$0xf0]  ;;  %v7625_v19 = vld [vmem:[%s14444_s1 + $0xe0] sm:$0xf] }
  0xc6   : > { %1925 = vmatpush.bf16.msra.mxu2 %v7282_v46  ;;  %v7467_v46 = vld [vmem:[%s14444_s1 + $0xb0] sm:$0xf0]  ;;  %v9428_v31 = vld [vmem:[%s14444_s1 + $0xe4] sm:$0xf] }
  0xc7   : > { %1938 = vmatpush.bf16.msra.mxu3 %v7286_v49  ;;  %v7494_v49 = vor.u32 %v9393_v36, %v7491_v37  ;;  %v7470_v58 = vor.u32 %v9388_v45, %v7467_v46  ;;  %v11342_v37 = vld [vmem:[%s14444_s1 + $0x20] sm:$0xf]  ;;  %v1951_v45 = vld [vmem:[%s10069_s24 + $0xd] sm:$0x1]  ;;  %v1952_v46 = vld [vmem:[%s10069_s24 + $0x15] sm:$0x1] }
  0xc8   : > { %1900 = vmatpush.bf16.msra.mxu0 %v7258_v50  ;;  %v7473_v50 = vld [vmem:[%s14444_s1 + $0xa8] sm:$0xf]  ;;  %v7627_v32 = vld [vmem:[%s14444_s1 + $0xf0] sm:$0xf0] }
  0xc9   : > { %1913 = vmatpush.bf16.msra.mxu1 %v7262_v51  ;;  %v9391_v51 = vld [vmem:[%s14444_s1 + $0xb4] sm:$0xf0] }
  0xca   : > { %1926 = vmatpush.bf16.msra.mxu2 %v7266_v52  ;;  %v1722_v52 = vsel %vm530_vm2, %v1721_v34, %v1720_v47  ;;  %v7474_v62 = vor.u32 %v9391_v51, %v7473_v50  ;;  %v11332_v34 = vld [vmem:[%s14444_s1 + $0x4c] sm:$0xf]  ;;  %v1954_v50 = vld [vmem:[%s10069_s24 + $0x25] sm:$0x1]  ;;  %v1955_v51 = vld [vmem:[%s10069_s24 + $0x2d] sm:$0x1] }
  0xcb   : > { %1939 = vmatpush.bf16.msra.mxu3 %v7270_v59  ;;  %v1724_v57 = vsel %vm533_vm3, %v1723_v38, %v1722_v52  ;;  %v7449_v59 = vld [vmem:[%s14444_s1 + $0x80] sm:$0xf]  ;;  %v11347_v38 = vld [vmem:[%s14444_s1 + $0x2c] sm:$0xf0] }
  0xcc   : > { %2190 = vmatpush.bf16.msrb.mxu0 %v7498_v60  ;;  %v9386_v60 = vld [vmem:[%s14444_s1 + $0x8c] sm:$0xf0]  ;;  %v1726_v61 = vsel %vm536_vm4, %v1725_v43, %v1724_v57  ;;  %v11357_v43 = vld [vmem:[%s14444_s1 + $0x30] sm:$0xf0]  ;;  %v1956_v57 = vld [vmem:[%s10069_s24 + $0x35] sm:$0x1] }
  0xcd   : > { %2203 = vmatpush.bf16.msrb.mxu1 %v7502_v2  ;;  %v1728_v1 = vsel %vm539_vm5, %v1727_v48, %v1726_v61  ;;  %v7478_v2 = vor.u32 %v9389_v55, %v7475_v56  ;;  %v7450_v6 = vor.u32 %v9386_v60, %v7449_v59  ;;  %v11367_v48 = vld [vmem:[%s14444_s1 + $0x28] sm:$0xf]  ;;  %v7402_v55 = vor.u32 %v11347_v38, %v11342_v37  ;;  %v9375_v56 = vld [vmem:[%s14444_s1 + $0x34] sm:$0xf0] }
  0xce   : > { %2216 = vmatpush.bf16.msrb.mxu2 %v7506_v23  ;;  %v1730_v5 = vsel %vm542_vm6, %v1729_v53, %v1728_v1  ;;  %v9381_v23 = vld [vmem:[%s14444_s1 + $0x6c] sm:$0xf]  ;;  %v1959_v53 = vpack.c.bf16 %v1951_v45, %v1951_v45  ;;  %v1962_v60 = vpack.c.bf16 %v1954_v50, %v1954_v50  ;;  %v1963_v61 = vpack.c.bf16 %v1955_v51, %v1955_v51  ;;  %v9431_v37 = vld [vmem:[%s14444_s1 + $0xf4] sm:$0xf0] }
  0xcf   : > { %2229 = vmatpush.bf16.msrb.mxu3 %v7510_v24  ;;  %v1731_v13 = vpack.c.b16 %v1730_v5, %v1730_v5  ;;  %v7443_v24 = vld [vmem:[%s14444_s1 + $0x78] sm:$0xf0]  ;;  %v1964_v1 = vpack.c.bf16 %v1956_v57, %v1956_v57  ;;  %v9370_v5 = vld [vmem:[%s14444_s1 + $0xc] sm:$0xf0]  ;;  %v7406_v16 = vor.u32 %v11352_v42, %v11357_v43  ;;  %v9429_v42 = vld [vmem:[%s14444_s1 + $0xec] sm:$0xf] }
  0xd0   : > { %2191 = vmatpush.bf16.msrb.mxu0 %v7482_v35  ;;  %v11337_v35 = vld [vmem:[%s14444_s1 + $0x58] sm:$0xf0]  ;;  %v7446_v36 = vor.u32 %v9381_v23, %v7443_v24  ;;  %v2007_v4 = vunpack.c.l.b16 %v1959_v53  ;;  %v2011_v15 = vunpack.c.l.b16 %v1963_v61  ;;  %v7410_v23 = vor.u32 %v9375_v56, %v11367_v48  ;;  %v9369_v24 = vld [vmem:[%s14444_s1 + $0xc] sm:$0xf]  ;;  %v7609_v48 = vld [vmem:[%s14444_s1 + $0xc0] sm:$0xf] }
  0xd1   : > { %2204 = vmatpush.bf16.msrb.mxu1 %v7486_v39  ;;  %1940 = vmatmul.bf16.vlgmr.msra.gmra.mxu3 %v1731_v13  ;;  %v7418_v39 = vor.u32 %v9378_v27, %v7417_v26  ;;  %v7430_v47 = vor.u32 %v11332_v34, %v11337_v35  ;;  %v2012_v20 = vunpack.c.l.b16 %v1964_v1  ;;  %v9430_v26 = vld [vmem:[%s14444_s1 + $0xec] sm:$0xf0]  ;;  %v7386_v35 = vor.u32 %v9370_v5, %v7385_v0  ;;  %v7635_v43 = vld [vmem:[%s14444_s1 + $0xf8] sm:$0xf0]  ;;  %v9424_v53 = vld [vmem:[%s14444_s1 + $0xc4] sm:$0xf] }
  0xd2   : > { %2217 = vmatpush.bf16.msrb.mxu2 %v7490_v44  ;;  %1914 = vmatmul.bf16.vlgmr.msra.gmra.mxu1 %v1731_v13  ;;  %v1950_v44 = vld [vmem:[%s10069_s24 + $0x5] sm:$0x1]  ;;  %v2014_v22 = vrot.slane %v2007_v4, 7  ;;  %v2022_v34 = vrot.slane %v2011_v15, 3  ;;  %v7638_v56 = vor.u32 %v9429_v42, %v7635_v43  ;;  %v7617_v57 = vld [vmem:[%s14444_s1 + $0xc8] sm:$0xf] }
  0xd3   : > { %2230 = vmatpush.bf16.msrb.mxu3 %v7494_v49  ;;  %1927 = vmatmul.bf16.vlgmr.msra.gmra.mxu2 %v1731_v13  ;;  %v1953_v49 = vld [vmem:[%s10069_s24 + $0x1d] sm:$0x1]  ;;  %v1958_v52 = vpack.c.bf16 %v1950_v44, %v1950_v44  ;;  %v7595_v4 = vld [vmem:[%s14444_s1 + $0xb0] sm:$0xf0]  ;;  %v7603_v15 = vld [vmem:[%s14444_s1 + $0xb8] sm:$0xf0] }
  0xd4   : > { %2192 = vmatpush.bf16.msrb.mxu0 %v7466_v54  ;;  %v1960_v54 = vpack.c.bf16 %v1952_v46, %v1952_v46  ;;  %v1961_v59 = vpack.c.bf16 %v1953_v49, %v1953_v49  ;;  %v9426_v49 = vld [vmem:[%s14444_s1 + $0xcc] sm:$0xf0]  ;;  %v9425_v61 = vld [vmem:[%s14444_s1 + $0xcc] sm:$0xf]  ;;  %v7587_v42 = vld [vmem:[%s14444_s1 + $0x98] sm:$0xf0] }
  0xd5   : > { %2205 = vmatpush.bf16.msrb.mxu1 %v7470_v58  ;;  %1901 = vmatmul.bf16.vlgmr.msra.gmra.mxu0 %v1731_v13  ;;  %v1957_v58 = vld [vmem:[%s10069_s24 + $0x3d] sm:$0x1]  ;;  %v2006_v3 = vunpack.c.l.b16 %v1958_v52 }
  0xd6   : > { %2218 = vmatpush.bf16.msrb.mxu2 %v7474_v62  ;;  %v9373_v62 = vld [vmem:[%s14444_s1 + $0x2c] sm:$0xf]  ;;  %v2008_v8 = vunpack.c.l.b16 %v1960_v54  ;;  %v2009_v13 = vunpack.c.l.b16 %v1961_v59  ;;  %v7611_v54 = vld [vmem:[%s14444_s1 + $0xd0] sm:$0xf0] }
  0xd7   : > { %2231 = vmatpush.bf16.msrb.mxu3 %v7478_v2  ;;  %v1965_v2 = vpack.c.bf16 %v1957_v58, %v1957_v58  ;;  %v7414_v30 = vor.u32 %v9373_v62, %v7411_v63  ;;  %v9427_v58 = vld [vmem:[%s14444_s1 + $0xd4] sm:$0xf0]  ;;  %v7619_v62 = vld [vmem:[%s14444_s1 + $0xd8] sm:$0xf0]  ;;  %v7593_v63 = vld [vmem:[%s14444_s1 + $0xa0] sm:$0xf]  ;;  %v7614_v1 = vor.u32 %v9424_v53, %v7611_v54 }
  0xd8   : > { %2193 = vmatpush.bf16.msrb.mxu0 %v7450_v6  ;;  %v9368_v6 = vld [vmem:[%s14444_s1 + $0x4] sm:$0xf]  ;;  %v2016_v27 = vrot.slane %v2008_v8, 6  ;;  %v2018_v28 = vrot.slane %v2009_v13, 5  ;;  %v9423_v8 = vld [vmem:[%s14444_s1 + $0xb4] sm:$0xf0] }
  0xd9   : > { %2206 = vmatpush.bf16.msrb.mxu1 %v7454_v14  ;;  %v2010_v14 = vunpack.c.l.b16 %v1962_v60  ;;  %v7610_v60 = vor.u32 %v9426_v49, %v7609_v48  ;;  %v11488_v13 = vld [vmem:[%s14444_s1 + $0xac] sm:$0xf]  ;;  %v9412_v53 = vld [vmem:[%s14444_s1 + $0x64] sm:$0xf] }
  0xda   : > { %2219 = vmatpush.bf16.msrb.mxu2 %v7458_v17  ;;  %v7393_v17 = vld [vmem:[%s14444_s1 + $0x8] sm:$0xf] }
  0xdb   : > { %2232 = vmatpush.bf16.msrb.mxu3 %v7462_v21  ;;  %v2013_v21 = vunpack.c.l.b16 %v1965_v2  ;;  %v7394_v46 = vor.u32 %v9371_v18, %v7393_v17  ;;  %v9422_v2 = vld [vmem:[%s14444_s1 + $0xac] sm:$0xf0] }
  0xdc   : > { %2194 = vmatpush.bf16.msrb.mxu0 %v7434_v25  ;;  %v7395_v25 = vld [vmem:[%s14444_s1 + $0x18] sm:$0xf0]  ;;  %v11501_v17 = vld [vmem:[%s14444_s1 + $0x8c] sm:$0xf0]  ;;  %v7594_v18 = vor.u32 %v9422_v2, %v7593_v63  ;;  %v2254_v2 = vld [vmem:[%s10069_s24 + $0x3e] sm:$0x1] }
  0xdd   : > { %2207 = vmatpush.bf16.msrb.mxu1 %v7438_v29  ;;  %v2020_v29 = vrot.slane %v2010_v14, 4  ;;  %v2026_v45 = vrot.slane %v2013_v21, 1  ;;  %v7398_v51 = vor.u32 %v9369_v24, %v7395_v25  ;;  %v7622_v14 = vor.u32 %v9425_v61, %v7619_v62  ;;  %v2247_v21 = vld [vmem:[%s10069_s24 + $0x6] sm:$0x1]  ;;  %v2249_v25 = vld [vmem:[%s10069_s24 + $0x16] sm:$0x1] }
  0xde   : > { %2220 = vmatpush.bf16.msrb.mxu2 %v7442_v33  ;;  %v2015_v33 = vsel %vm524_vm0, %v2014_v22, %v2006_v3  ;;  %v9420_v3 = vld [vmem:[%s14444_s1 + $0xa4] sm:$0xf]  ;;  %v2248_v22 = vld [vmem:[%s10069_s24 + $0xe] sm:$0x1] }
  0xdf   : > { %2233 = vmatpush.bf16.msrb.mxu3 %v7446_v36  ;;  %v7633_v36 = vld [vmem:[%s14444_s1 + $0xe8] sm:$0xf]  ;;  %v2017_v38 = vsel %vm527_vm1, %v2016_v27, %v2015_v33  ;;  %v2251_v27 = vld [vmem:[%s10069_s24 + $0x26] sm:$0x1] }
  0xe0   : > { %2195 = vmatpush.bf16.msrb.mxu0 %v7418_v39  ;;  %v2024_v39 = vrot.slane %v2012_v20, 2  ;;  %v2019_v44 = vsel %vm530_vm2, %v2018_v28, %v2017_v38  ;;  %v7634_v52 = vor.u32 %v9431_v37, %v7633_v36  ;;  %v11506_v20 = vld [vmem:[%s14444_s1 + $0x84] sm:$0xf]  ;;  %v2255_v28 = vpack.c.bf16 %v2247_v21, %v2247_v21  ;;  %v7585_v33 = vld [vmem:[%s14444_s1 + $0x88] sm:$0xf] }
  0xe1   : > { %2208 = vmatpush.bf16.msrb.mxu1 %v7422_v40  ;;  %v7390_v40 = vor.u32 %v9368_v6, %v7387_v7  ;;  %v2021_v50 = vsel %vm533_vm3, %v2020_v29, %v2019_v44  ;;  %v7618_v6 = vor.u32 %v9427_v58, %v7617_v57  ;;  %v7601_v7 = vld [vmem:[%s14444_s1 + $0xa8] sm:$0xf]  ;;  %v2256_v29 = vpack.c.bf16 %v2248_v22, %v2248_v22  ;;  %v7561_v44 = vld [vmem:[%s14444_s1 + $0x60] sm:$0xf]  ;;  %v754_v57 = vpop.f32.mrf.mxu3  ;;  %v9408_v22 = vld [vmem:[%s14444_s1 + $0x44] sm:$0xf] }
  0xe2   : > { %2221 = vmatpush.bf16.msrb.mxu2 %v7426_v41  ;;  %v7626_v41 = vor.u32 %v9430_v26, %v7625_v19  ;;  %v7598_v19 = vor.u32 %v9420_v3, %v7595_v4  ;;  %v7602_v24 = vor.u32 %v9423_v8, %v7601_v7  ;;  %v2250_v26 = vld [vmem:[%s10069_s24 + $0x1e] sm:$0x1]  ;;  %v7606_v38 = vor.u32 %v11488_v13, %v7603_v15  ;;  %v7571_v7 = vld [vmem:[%s14444_s1 + $0x78] sm:$0xf0] }
  0xe3   : > { %2234 = vmatpush.bf16.msrb.mxu3 %v7430_v47  ;;  %v7630_v47 = vor.u32 %v9428_v31, %v7627_v32  ;;  %v728_v31 = vpop.f32.mrf.mxu1  ;;  %v7579_v32 = vld [vmem:[%s14444_s1 + $0x90] sm:$0xf0]  ;;  %v2258_v36 = vpack.c.bf16 %v2250_v26, %v2250_v26  ;;  %v2259_v43 = vpack.c.bf16 %v2251_v27, %v2251_v27  ;;  %v2304_v48 = vunpack.c.l.b16 %v2256_v29  ;;  %v7553_v27 = vld [vmem:[%s14444_s1 + $0x48] sm:$0xf]  ;;  %v9409_v29 = vld [vmem:[%s14444_s1 + $0x4c] sm:$0xf] }
  0xe4   : > { %2196 = vmatpush.bf16.msrb.mxu0 %v7402_v55  ;;  %v2023_v55 = vsel %vm536_vm4, %v2022_v34, %v2021_v50  ;;  %v2252_v34 = vld [vmem:[%s10069_s24 + $0x2e] sm:$0x1]  ;;  %v729_v37 = vadd.f32 %v728_v31, %v10063_v10  ;;  %v741_v50 = vpop.f32.mrf.mxu2  ;;  %v755_v63 = vadd.f32 %v754_v57, %v10067_v12  ;;  %v7521_v57 = vld [vmem:[%s14444_s1 + $0x8] sm:$0xf] }
  0xe5   : > { %2209 = vmatpush.bf16.msrb.mxu1 %v7406_v16  ;;  %v2025_v59 = vsel %vm539_vm5, %v2024_v39, %v2023_v55  ;;  %v11496_v16 = vld [vmem:[%s14444_s1 + $0x80] sm:$0xf]  ;;  %v2306_v54 = vunpack.c.l.b16 %v2258_v36  ;;  %v2307_v55 = vunpack.c.l.b16 %v2259_v43  ;;  %v2311_v61 = vrot.slane %v2304_v48, 7  ;;  %v7537_v43 = vld [vmem:[%s14444_s1 + $0x28] sm:$0xf] }
  0xe6   : > { %2222 = vmatpush.bf16.msrb.mxu2 %v7410_v23  ;;  %v2027_v0 = vsel %vm542_vm6, %v2026_v45, %v2025_v59  ;;  %v715_v23 = vpop.f32.mrf.mxu0  ;;  %v7578_v39 = vor.u32 %v11501_v17, %v11496_v16  ;;  %v2253_v45 = vld [vmem:[%s10069_s24 + $0x36] sm:$0x1]  ;;  %759 = vst [vmem:[#allocation2 + $0x8] sm:$0xff] %v729_v37  ;;  %v7563_v59 = vld [vmem:[%s14444_s1 + $0x70] sm:$0xf0] }
  0xe7   : > { %2235 = vmatpush.bf16.msrb.mxu3 %v7414_v30  ;;  %v2028_v5 = vpack.c.b16 %v2027_v0, %v2027_v0  ;;  %v716_v30 = vadd.f32 %v715_v23, %v10061_v9  ;;  %v2261_v3 = vpack.c.bf16 %v2253_v45, %v2253_v45  ;;  %v2315_v4 = vrot.slane %v2306_v54, 5  ;;  %761 = vst [vmem:[#allocation2 + $0x18] sm:$0xff] %v755_v63  ;;  %v7545_v16 = vld [vmem:[%s14444_s1 + $0x40] sm:$0xf]  ;;  %v9410_v17 = vld [vmem:[%s14444_s1 + $0x4c] sm:$0xf0] }
  0xe8   : > { %2197 = vmatpush.bf16.msrb.mxu0 %v7386_v35  ;;  %v2257_v35 = vpack.c.bf16 %v2249_v25, %v2249_v25  ;;  %v7566_v15 = vor.u32 %v9412_v53, %v7563_v59  ;;  %v7547_v23 = vld [vmem:[%s14444_s1 + $0x50] sm:$0xf0]  ;;  %v7546_v31 = vor.u32 %v9410_v17, %v7545_v16  ;;  %v9406_v37 = vld [vmem:[%s14444_s1 + $0x2c] sm:$0xf0]  ;;  %v9405_v45 = vld [vmem:[%s14444_s1 + $0x2c] sm:$0xf] }
  0xe9   : > { %2210 = vmatpush.bf16.msrb.mxu1 %v7390_v40  ;;  %v9419_v40 = vld [vmem:[%s14444_s1 + $0x94] sm:$0xf0]  ;;  %758 = vst [vmem:[#allocation2] sm:$0xff] %v716_v30  ;;  %v2309_v30 = vunpack.c.l.b16 %v2261_v3  ;;  %v7550_v36 = vor.u32 %v9408_v22, %v7547_v23  ;;  %v7539_v48 = vld [vmem:[%s14444_s1 + $0x38] sm:$0xf0] }
  0xea   : > { %2223 = vmatpush.bf16.msrb.mxu2 %v7394_v46  ;;  %v2260_v46 = vpack.c.bf16 %v2252_v34, %v2252_v34  ;;  %v2305_v49 = vunpack.c.l.b16 %v2257_v35  ;;  %v7586_v58 = vor.u32 %v9419_v40, %v7585_v33  ;;  %v7529_v33 = vld [vmem:[%s14444_s1 + $0x20] sm:$0xf]  ;;  %v9400_v53 = vld [vmem:[%s14444_s1 + $0x4] sm:$0xf]  ;;  %v7515_v54 = vld [vmem:[%s14444_s1 + $0x10] sm:$0xf0] }
  0xeb   : > { %2236 = vmatpush.bf16.msrb.mxu3 %v7398_v51  ;;  %2198 = vmatmul.bf16.vlgmr.msrb.gmra.mxu0 %v2028_v5  ;;  %v7582_v51 = vor.u32 %v11506_v20, %v7579_v32  ;;  %v730_v20 = vpop.f32.mrf.mxu1  ;;  %v7555_v32 = vld [vmem:[%s14444_s1 + $0x58] sm:$0xf0]  ;;  %v7753_v59 = vld [vmem:[%s14444_s1 + $0xe0] sm:$0xf]  ;;  %v9462_v63 = vld [vmem:[%s14444_s1 + $0xec] sm:$0xf0]  ;;  %v7518_v16 = vor.u32 %v9400_v53, %v7515_v54 }
  0xec   : > { %2487 = vmatpush.bf16.msra.mxu0 %v7626_v41  ;;  %2211 = vmatmul.bf16.vlgmr.msrb.gmra.mxu1 %v2028_v5  ;;  %v9417_v41 = vld [vmem:[%s14444_s1 + $0x8c] sm:$0xf]  ;;  %v2313_v62 = vrot.slane %v2305_v49, 6  ;;  %v2308_v8 = vunpack.c.l.b16 %v2260_v46  ;;  %v743_v35 = vpop.f32.mrf.mxu2  ;;  %v7513_v49 = vld [vmem:[%s14444_s1] sm:$0xf]  ;;  %v7754_v17 = vor.u32 %v9462_v63, %v7753_v59 }
  0xed   : > { %2500 = vmatpush.bf16.msra.mxu1 %v7630_v47  ;;  %2224 = vmatmul.bf16.vlgmr.msrb.gmra.mxu2 %v2028_v5  ;;  %v2303_v47 = vunpack.c.l.b16 %v2255_v28  ;;  %v7590_v0 = vor.u32 %v9417_v41, %v7587_v42  ;;  %v9411_v28 = vld [vmem:[%s14444_s1 + $0x54] sm:$0xf0]  ;;  %v756_v41 = vpop.f32.mrf.mxu3  ;;  %v7755_v3 = vld [vmem:[%s14444_s1 + $0xf0] sm:$0xf0]  ;;  %v7737_v22 = vld [vmem:[%s14444_s1 + $0xc0] sm:$0xf] }
  0xee   : > { %2513 = vmatpush.bf16.msra.mxu2 %v7634_v52  ;;  %2237 = vmatmul.bf16.vlgmr.msrb.gmra.mxu3 %v2028_v5  ;;  %v9414_v52 = vld [vmem:[%s14444_s1 + $0x6c] sm:$0xf0]  ;;  %v2319_v34 = vrot.slane %v2308_v8, 3  ;;  %v7554_v42 = vor.u32 %v9411_v28, %v7553_v27  ;;  %v7761_v8 = vld [vmem:[%s14444_s1 + $0xe8] sm:$0xf] }
  0xef   : > { %2526 = vmatpush.bf16.msra.mxu3 %v7638_v56  ;;  %v742_v56 = vadd.f32 %v741_v50, %v10065_v11  ;;  %v7562_v5 = vor.u32 %v9414_v52, %v7561_v44  ;;  %v2312_v13 = vsel %vm524_vm0, %v2311_v61, %v2303_v47  ;;  %v9407_v44 = vld [vmem:[%s14444_s1 + $0x34] sm:$0xf0]  ;;  %v7558_v47 = vor.u32 %v9409_v29, %v7555_v32  ;;  %v9402_v52 = vld [vmem:[%s14444_s1 + $0xc] sm:$0xf0]  ;;  %v9401_v61 = vld [vmem:[%s14444_s1 + $0xc] sm:$0xf] }
  0xf0   : > { %2488 = vmatpush.bf16.msra.mxu0 %v7610_v60  ;;  %v7569_v60 = vld [vmem:[%s14444_s1 + $0x68] sm:$0xf]  ;;  %v2321_v50 = vrot.slane %v2309_v30, 2  ;;  %v9458_v23 = vld [vmem:[%s14444_s1 + $0xcc] sm:$0xf0] }
  0xf1   : > { %2501 = vmatpush.bf16.msra.mxu1 %v7614_v1  ;;  %v9415_v1 = vld [vmem:[%s14444_s1 + $0x74] sm:$0xf0]  ;;  %760 = vst [vmem:[#allocation2 + $0x10] sm:$0xff] %v742_v56  ;;  %v9456_v29 = vld [vmem:[%s14444_s1 + $0xc4] sm:$0xf] }
  0xf2   : > { %2514 = vmatpush.bf16.msra.mxu2 %v7618_v6  ;;  %v9413_v6 = vld [vmem:[%s14444_s1 + $0x6c] sm:$0xf]  ;;  %v7570_v21 = vor.u32 %v9415_v1, %v7569_v60  ;;  %v7538_v60 = vor.u32 %v9407_v44, %v7537_v43  ;;  %v7739_v30 = vld [vmem:[%s14444_s1 + $0xd0] sm:$0xf0]  ;;  %v9459_v35 = vld [vmem:[%s14444_s1 + $0xd4] sm:$0xf0] }
  0xf3   : > { %2527 = vmatpush.bf16.msra.mxu3 %v7622_v14  ;;  %v717_v14 = vpop.f32.mrf.mxu0  ;;  %v7574_v26 = vor.u32 %v9413_v6, %v7571_v7  ;;  %v2546_v6 = vld [vmem:[%s10069_s24 + $0x17] sm:$0x1]  ;;  %v7514_v7 = vor.u32 %v9402_v52, %v7513_v49  ;;  %v7721_v43 = vld [vmem:[%s14444_s1 + $0xa0] sm:$0xf]  ;;  %v9454_v44 = vld [vmem:[%s14444_s1 + $0xac] sm:$0xf0] }
  0xf4   : > { %2489 = vmatpush.bf16.msra.mxu0 %v7594_v18  ;;  %v2314_v18 = vsel %vm527_vm1, %v2313_v62, %v2312_v13  ;;  %v7523_v62 = vld [vmem:[%s14444_s1 + $0x18] sm:$0xf0]  ;;  %v9463_v13 = vld [vmem:[%s14444_s1 + $0xf4] sm:$0xf0]  ;;  %v2544_v14 = vld [vmem:[%s10069_s24 + $0x7] sm:$0x1] }
  0xf5   : > { %2502 = vmatpush.bf16.msra.mxu1 %v7598_v19  ;;  %v2317_v19 = vrot.slane %v2307_v55, 4  ;;  %v2316_v25 = vsel %vm530_vm2, %v2315_v4, %v2314_v18  ;;  %v9461_v18 = vld [vmem:[%s14444_s1 + $0xec] sm:$0xf]  ;;  %v7526_v27 = vor.u32 %v9401_v61, %v7523_v62  ;;  %v7762_v28 = vor.u32 %v9463_v13, %v7761_v8  ;;  %v7723_v49 = vld [vmem:[%s14444_s1 + $0xb0] sm:$0xf0] }
  0xf6   : > { %2515 = vmatpush.bf16.msra.mxu2 %v7602_v24  ;;  %v2262_v24 = vpack.c.bf16 %v2254_v2, %v2254_v2  ;;  %v7542_v2 = vor.u32 %v9405_v45, %v7539_v48  ;;  %v9452_v48 = vld [vmem:[%s14444_s1 + $0xa4] sm:$0xf]  ;;  %v9453_v61 = vld [vmem:[%s14444_s1 + $0xac] sm:$0xf]  ;;  %v7731_v62 = vld [vmem:[%s14444_s1 + $0xb8] sm:$0xf0] }
  0xf7   : > { %2528 = vmatpush.bf16.msra.mxu3 %v7606_v38  ;;  %v9404_v38 = vld [vmem:[%s14444_s1 + $0x24] sm:$0xf]  ;;  %v2318_v40 = vsel %vm533_vm3, %v2317_v19, %v2316_v25  ;;  %v7763_v19 = vld [vmem:[%s14444_s1 + $0xf8] sm:$0xf0]  ;;  %v2547_v25 = vld [vmem:[%s10069_s24 + $0x1f] sm:$0x1] }
  0xf8   : > { %2490 = vmatpush.bf16.msra.mxu0 %v7578_v39  ;;  %v7531_v39 = vld [vmem:[%s14444_s1 + $0x30] sm:$0xf0]  ;;  %v2310_v46 = vunpack.c.l.b16 %v2262_v24  ;;  %v2320_v55 = vsel %vm536_vm4, %v2319_v34, %v2318_v40  ;;  %v7745_v34 = vld [vmem:[%s14444_s1 + $0xc8] sm:$0xf]  ;;  %v2555_v41 = vpack.c.bf16 %v2547_v25, %v2547_v25  ;;  %v7705_v63 = vld [vmem:[%s14444_s1 + $0x80] sm:$0xf] }
  0xf9   : > { %2503 = vmatpush.bf16.msra.mxu1 %v7582_v51  ;;  %v7530_v51 = vor.u32 %v9406_v37, %v7529_v33  ;;  %v7534_v56 = vor.u32 %v9404_v38, %v7531_v39  ;;  %v2322_v4 = vsel %vm539_vm5, %v2321_v50, %v2320_v55  ;;  %v7766_v33 = vor.u32 %v9461_v18, %v7763_v19  ;;  %v9457_v37 = vld [vmem:[%s14444_s1 + $0xcc] sm:$0xf]  ;;  %v7747_v38 = vld [vmem:[%s14444_s1 + $0xd8] sm:$0xf0]  ;;  %v2548_v40 = vld [vmem:[%s10069_s24 + $0x27] sm:$0x1] }
  0xfa   : > { %2516 = vmatpush.bf16.msra.mxu2 %v7586_v58  ;;  %v9403_v58 = vld [vmem:[%s14444_s1 + $0x14] sm:$0xf0]  ;;  %v2323_v1 = vrot.slane %v2310_v46, 1  ;;  %v7746_v46 = vor.u32 %v9459_v35, %v7745_v34  ;;  %v7750_v52 = vor.u32 %v9457_v37, %v7747_v38  ;;  %v7729_v55 = vld [vmem:[%s14444_s1 + $0xa8] sm:$0xf] }
  0xfb   : > { %2529 = vmatpush.bf16.msra.mxu3 %v7590_v0  ;;  %v9460_v0 = vld [vmem:[%s14444_s1 + $0xe4] sm:$0xf]  ;;  %v7522_v20 = vor.u32 %v9403_v58, %v7521_v57  ;;  %v2549_v57 = vld [vmem:[%s10069_s24 + $0x2f] sm:$0x1]  ;;  %v2556_v58 = vpack.c.bf16 %v2548_v40, %v2548_v40  ;;  %v7713_v18 = vld [vmem:[%s14444_s1 + $0x88] sm:$0xf] }
  0xfc   : > { %2491 = vmatpush.bf16.msra.mxu0 %v7562_v5  ;;  %v2545_v5 = vld [vmem:[%s10069_s24 + $0xf] sm:$0x1]  ;;  %v2324_v24 = vsel %vm542_vm6, %v2323_v1, %v2322_v4  ;;  %v1024_v54 = vpop.f32.mrf.mxu1  ;;  %v7726_v1 = vor.u32 %v9452_v48, %v7723_v49  ;;  %v2550_v8 = vld [vmem:[%s10069_s24 + $0x37] sm:$0x1]  ;;  %v2557_v13 = vpack.c.bf16 %v2549_v57, %v2549_v57  ;;  %v9451_v19 = vld [vmem:[%s14444_s1 + $0x94] sm:$0xf0] }
  0xfd   : > { %2504 = vmatpush.bf16.msra.mxu1 %v7566_v15  ;;  %v2553_v15 = vpack.c.bf16 %v2545_v5, %v2545_v5  ;;  %v2325_v39 = vpack.c.b16 %v2324_v24, %v2324_v24  ;;  %v1025_v59 = vadd.f32 %v1024_v54, %v10063_v10  ;;  %v7715_v24 = vld [vmem:[%s14444_s1 + $0x98] sm:$0xf0]  ;;  %v7689_v25 = vld [vmem:[%s14444_s1 + $0x60] sm:$0xf]  ;;  %v9444_v34 = vld [vmem:[%s14444_s1 + $0x64] sm:$0xf] }
  0xfe   : > { %2517 = vmatpush.bf16.msra.mxu2 %v7570_v21  ;;  %v7758_v21 = vor.u32 %v9460_v0, %v7755_v3  ;;  %v2603_v0 = vunpack.c.l.b16 %v2555_v41  ;;  %v9448_v3 = vld [vmem:[%s14444_s1 + $0x84] sm:$0xf]  ;;  %v7691_v35 = vld [vmem:[%s14444_s1 + $0x70] sm:$0xf0]  ;;  %v9447_v40 = vld [vmem:[%s14444_s1 + $0x74] sm:$0xf0] }
  0xff   : > { %2530 = vmatpush.bf16.msra.mxu3 %v7574_v26  ;;  %v2554_v26 = vpack.c.bf16 %v2546_v6, %v2546_v6  ;;  %v2601_v32 = vunpack.c.l.b16 %v2553_v15  ;;  %1056 = vst [vmem:[#allocation2 + $0x28] sm:$0xff] %v1025_v59  ;;  %v1037_v5 = vpop.f32.mrf.mxu2  ;;  %v7673_v48 = vld [vmem:[%s14444_s1 + $0x40] sm:$0xf]  ;;  %v9442_v49 = vld [vmem:[%s14444_s1 + $0x4c] sm:$0xf0] }
 0x100   : > { %2492 = vmatpush.bf16.msra.mxu0 %v7546_v31  ;;  %v2552_v31 = vpack.c.bf16 %v2544_v14, %v2544_v14  ;;  %v1038_v15 = vadd.f32 %v1037_v5, %v10065_v11  ;;  %v7675_v54 = vld [vmem:[%s14444_s1 + $0x50] sm:$0xf0]  ;;  %v9443_v59 = vld [vmem:[%s14444_s1 + $0x54] sm:$0xf0] }
 0x101   : > { %2505 = vmatpush.bf16.msra.mxu1 %v7550_v36  ;;  %v7738_v36 = vor.u32 %v9458_v23, %v7737_v22  ;;  %v11701_v45 = vunpack.c.l.b16 %v2554_v26  ;;  %v2612_v26 = vrot.slane %v2603_v0, 5 }
 0x102   : > { %2518 = vmatpush.bf16.msra.mxu2 %v7554_v42  ;;  %v7742_v42 = vor.u32 %v9456_v29, %v7739_v30  ;;  %v2600_v50 = vunpack.c.l.b16 %v2552_v31  ;;  %1057 = vst [vmem:[#allocation2 + $0x30] sm:$0xff] %v1038_v15  ;;  %v2551_v29 = vld [vmem:[%s10069_s24 + $0x3f] sm:$0x1]  ;;  %v2558_v30 = vpack.c.bf16 %v2550_v8, %v2550_v8  ;;  %v9439_v15 = vld [vmem:[%s14444_s1 + $0x34] sm:$0xf0] }
 0x103   : > { %2531 = vmatpush.bf16.msra.mxu3 %v7558_v47  ;;  %v1011_v47 = vpop.f32.mrf.mxu0  ;;  %v2610_v4 = vrot.slane %v11701_v45, 6  ;;  %v2559_v45 = vpack.c.bf16 %v2551_v29, %v2551_v29  ;;  %v9435_v29 = vld [vmem:[%s14444_s1 + $0x14] sm:$0xf0] }
 0x104   : > { %2493 = vmatpush.bf16.msra.mxu0 %v7530_v51  ;;  %v2608_v51 = vrot.slane %v2601_v32, 7  ;;  %v1012_v53 = vadd.f32 %v1011_v47, %v10061_v9  ;;  %v7714_v32 = vor.u32 %v9451_v19, %v7713_v18  ;;  %v1026_v38 = vpop.f32.mrf.mxu1  ;;  %v7694_v47 = vor.u32 %v9444_v34, %v7691_v35  ;;  %v7667_v18 = vld [vmem:[%s14444_s1 + $0x38] sm:$0xf0] }
 0x105   : > { %2506 = vmatpush.bf16.msra.mxu1 %v7534_v56  ;;  %v9455_v56 = vld [vmem:[%s14444_s1 + $0xb4] sm:$0xf0]  ;;  %v2607_v0 = vunpack.c.l.b16 %v2559_v45 }
 0x106   : > { %2519 = vmatpush.bf16.msra.mxu2 %v7538_v60  ;;  %v7722_v60 = vor.u32 %v9454_v44, %v7721_v43  ;;  %1055 = vst [vmem:[#allocation2 + $0x20] sm:$0xff] %v1012_v53  ;;  %v7730_v6 = vor.u32 %v9455_v56, %v7729_v55  ;;  %v2609_v14 = vsel %vm524_vm0, %v2608_v51, %v2600_v50  ;;  %v9445_v43 = vld [vmem:[%s14444_s1 + $0x6c] sm:$0xf]  ;;  %v7699_v44 = vld [vmem:[%s14444_s1 + $0x78] sm:$0xf0]  ;;  %v2606_v50 = vunpack.c.l.b16 %v2558_v30 }
 0x107   : > { %2532 = vmatpush.bf16.msra.mxu3 %v7542_v2  ;;  %v9450_v2 = vld [vmem:[%s14444_s1 + $0x8c] sm:$0xf0]  ;;  %v2611_v31 = vsel %vm527_vm1, %v2610_v4, %v2609_v14  ;;  %v1039_v51 = vpop.f32.mrf.mxu2  ;;  %v9440_v53 = vld [vmem:[%s14444_s1 + $0x44] sm:$0xf]  ;;  %v7702_v57 = vor.u32 %v9445_v43, %v7699_v44  ;;  %v7665_v14 = vld [vmem:[%s14444_s1 + $0x28] sm:$0xf] }
 0x108   : > { %2494 = vmatpush.bf16.msra.mxu0 %v7514_v7  ;;  %v7707_v7 = vld [vmem:[%s14444_s1 + $0x90] sm:$0xf0]  ;;  %v7706_v23 = vor.u32 %v9450_v2, %v7705_v63  ;;  %v7683_v63 = vld [vmem:[%s14444_s1 + $0x58] sm:$0xf0]  ;;  %v7657_v2 = vld [vmem:[%s14444_s1 + $0x20] sm:$0xf] }
 0x109   : > { %2507 = vmatpush.bf16.msra.mxu1 %v7518_v16  ;;  %v1050_v16 = vpop.f32.mrf.mxu3  ;;  %v2618_v4 = vrot.slane %v2606_v50, 2  ;;  %v2620_v19 = vrot.slane %v2607_v0, 1 }
 0x10a   : > { %2520 = vmatpush.bf16.msra.mxu2 %v7522_v20  ;;  %v9449_v20 = vld [vmem:[%s14444_s1 + $0x8c] sm:$0xf]  ;;  %v1051_v22 = vadd.f32 %v1050_v16, %v10067_v12 }
 0x10b   : > { %2533 = vmatpush.bf16.msra.mxu3 %v7526_v27  ;;  %2495 = vmatmul.bf16.vlgmr.msra.gmra.mxu0 %v2325_v39  ;;  %v7710_v27 = vor.u32 %v9448_v3, %v7707_v7  ;;  %v7718_v37 = vor.u32 %v9449_v20, %v7715_v24  ;;  %v9438_v3 = vld [vmem:[%s14444_s1 + $0x2c] sm:$0xf0]  ;;  %v7659_v7 = vld [vmem:[%s14444_s1 + $0x30] sm:$0xf0]  ;;  %v7666_v24 = vor.u32 %v9439_v15, %v7665_v14 }
 0x10c   : > { %2784 = vmatpush.bf16.msrb.mxu0 %v7754_v17  ;;  %2508 = vmatmul.bf16.vlgmr.msra.gmra.mxu1 %v2325_v39  ;;  %v7734_v17 = vor.u32 %v9453_v61, %v7731_v62  ;;  %1058 = vst [vmem:[#allocation2 + $0x38] sm:$0xff] %v1051_v22  ;;  %v7674_v61 = vor.u32 %v9442_v49, %v7673_v48  ;;  %v9441_v62 = vld [vmem:[%s14444_s1 + $0x4c] sm:$0xf]  ;;  %v9434_v22 = vld [vmem:[%s14444_s1 + $0xc] sm:$0xf0] }
 0x10d   : > { %2797 = vmatpush.bf16.msrb.mxu1 %v7758_v21  ;;  %2521 = vmatmul.bf16.vlgmr.msra.gmra.mxu2 %v2325_v39  ;;  %v2604_v21 = vunpack.c.l.b16 %v2556_v58  ;;  %v7681_v58 = vld [vmem:[%s14444_s1 + $0x48] sm:$0xf]  ;;  %v7658_v16 = vor.u32 %v9438_v3, %v7657_v2 }
 0x10e   : > { %2810 = vmatpush.bf16.msrb.mxu2 %v7762_v28  ;;  %2534 = vmatmul.bf16.vlgmr.msra.gmra.mxu3 %v2325_v39  ;;  %v9446_v28 = vld [vmem:[%s14444_s1 + $0x6c] sm:$0xf0]  ;;  %v7697_v39 = vld [vmem:[%s14444_s1 + $0x68] sm:$0xf]  ;;  %v7682_v5 = vor.u32 %v9443_v59, %v7681_v58 }
 0x10f   : > { %2823 = vmatpush.bf16.msrb.mxu3 %v7766_v33  ;;  %v1013_v33 = vpop.f32.mrf.mxu0  ;;  %v2614_v41 = vrot.slane %v2604_v21, 4  ;;  %v7641_v21 = vld [vmem:[%s14444_s1] sm:$0xf] }
 0x110   : > { %2785 = vmatpush.bf16.msrb.mxu0 %v7738_v36  ;;  %v2605_v36 = vunpack.c.l.b16 %v2557_v13  ;;  %v7686_v13 = vor.u32 %v9441_v62, %v7683_v63  ;;  %v7642_v30 = vor.u32 %v9434_v22, %v7641_v21 }
 0x111   : > { %2798 = vmatpush.bf16.msrb.mxu1 %v7742_v42  ;;  %v7690_v42 = vor.u32 %v9446_v28, %v7689_v25  ;;  %v1052_v56 = vpop.f32.mrf.mxu3  ;;  %v9432_v25 = vld [vmem:[%s14444_s1 + $0x4] sm:$0xf]  ;;  %v7649_v28 = vld [vmem:[%s14444_s1 + $0x8] sm:$0xf] }
 0x112   : > { %2811 = vmatpush.bf16.msrb.mxu2 %v7746_v46  ;;  %v2613_v46 = vsel %vm530_vm2, %v2612_v26, %v2611_v31  ;;  %v2616_v55 = vrot.slane %v2605_v36, 3  ;;  %v7643_v26 = vld [vmem:[%s14444_s1 + $0x10] sm:$0xf0]  ;;  %v9433_v31 = vld [vmem:[%s14444_s1 + $0xc] sm:$0xf]  ;;  %v7650_v35 = vor.u32 %v9435_v29, %v7649_v28 }
 0x113   : > { %2824 = vmatpush.bf16.msrb.mxu3 %v7750_v52  ;;  %v7698_v52 = vor.u32 %v9447_v40, %v7697_v39  ;;  %v7646_v34 = vor.u32 %v9432_v25, %v7643_v26 }
 0x114   : > { %2786 = vmatpush.bf16.msrb.mxu0 %v7722_v60  ;;  %v2615_v60 = vsel %vm533_vm3, %v2614_v41, %v2613_v46 }
 0x115   : > { %2799 = vmatpush.bf16.msrb.mxu1 %v7726_v1  ;;  %v7678_v1 = vor.u32 %v9440_v53, %v7675_v54  ;;  %v2617_v8 = vsel %vm536_vm4, %v2616_v55, %v2615_v60 }
 0x116   : > { %2812 = vmatpush.bf16.msrb.mxu2 %v7730_v6  ;;  %v9436_v6 = vld [vmem:[%s14444_s1 + $0x24] sm:$0xf] }
 0x117   : > { %2825 = vmatpush.bf16.msrb.mxu3 %v7734_v17  ;;  %v9437_v17 = vld [vmem:[%s14444_s1 + $0x2c] sm:$0xf]  ;;  %v7662_v20 = vor.u32 %v9436_v6, %v7659_v7 }
 0x118   : > { %2787 = vmatpush.bf16.msrb.mxu0 %v7706_v23  ;;  %v2619_v23 = vsel %vm539_vm5, %v2618_v4, %v2617_v8  ;;  %v1308_v38 = vpop.f32.mrf.mxu0 }
 0x119   : > { %2800 = vmatpush.bf16.msrb.mxu1 %v7710_v27  ;;  %v7670_v27 = vor.u32 %v9437_v17, %v7667_v18  ;;  %v2621_v33 = vsel %vm542_vm6, %v2620_v19, %v2619_v23  ;;  %v1309_v39 = vadd.f32 %v1308_v38, %v10061_v9  ;;  %v1321_v40 = vpop.f32.mrf.mxu1 }
 0x11a   : > { %2813 = vmatpush.bf16.msrb.mxu2 %v7714_v32  ;;  %v7651_v32 = vld [vmem:[%s14444_s1 + $0x18] sm:$0xf0]  ;;  %v1322_v41 = vadd.f32 %v1321_v40, %v10063_v10 }
 0x11b   : > { %2826 = vmatpush.bf16.msrb.mxu3 %v7718_v37  ;;  %v7654_v36 = vor.u32 %v9433_v31, %v7651_v32  ;;  %v2622_v37 = vpack.c.b16 %v2621_v33, %v2621_v33  ;;  %1352 = vst [vmem:[#allocation2 + $0x40] sm:$0xff] %v1309_v39 }
 0x11c   : > { %2788 = vmatpush.bf16.msrb.mxu0 %v7690_v42  ;;  %1353 = vst [vmem:[#allocation2 + $0x48] sm:$0xff] %v1322_v41  ;;  %v1334_v42 = vpop.f32.mrf.mxu2 }
 0x11d   : > { %2801 = vmatpush.bf16.msrb.mxu1 %v7694_v47  ;;  %v1335_v43 = vadd.f32 %v1334_v42, %v10065_v11  ;;  %v1347_v44 = vpop.f32.mrf.mxu3 }
 0x11e   : > { %2814 = vmatpush.bf16.msrb.mxu2 %v7698_v52  ;;  %v1348_v45 = vadd.f32 %v1347_v44, %v10067_v12 }
 0x11f   : > { %2827 = vmatpush.bf16.msrb.mxu3 %v7702_v57  ;;  %1354 = vst [vmem:[#allocation2 + $0x50] sm:$0xff] %v1335_v43 }
 0x120   : > { %2789 = vmatpush.bf16.msrb.mxu0 %v7674_v61  ;;  %1355 = vst [vmem:[#allocation2 + $0x58] sm:$0xff] %v1348_v45  ;;  %v1310_v46 = vpop.f32.mrf.mxu0 }
 0x121   : > { %2802 = vmatpush.bf16.msrb.mxu1 %v7678_v1  ;;  %v1323_v47 = vpop.f32.mrf.mxu1 }
 0x122   : > { %2815 = vmatpush.bf16.msrb.mxu2 %v7682_v5 }
 0x123   : > { %2828 = vmatpush.bf16.msrb.mxu3 %v7686_v13 }
 0x124   : > { %2790 = vmatpush.bf16.msrb.mxu0 %v7658_v16  ;;  %v1336_v48 = vpop.f32.mrf.mxu2 }
 0x125   : > { %2803 = vmatpush.bf16.msrb.mxu1 %v7662_v20  ;;  %v1349_v49 = vpop.f32.mrf.mxu3 }
 0x126   : > { %2816 = vmatpush.bf16.msrb.mxu2 %v7666_v24 }
 0x127   : > { %2829 = vmatpush.bf16.msrb.mxu3 %v7670_v27 }
 0x128   : > { %2791 = vmatpush.bf16.msrb.mxu0 %v7642_v30 }
 0x129   : > { %2804 = vmatpush.bf16.msrb.mxu1 %v7646_v34 }
 0x12a   : > { %2817 = vmatpush.bf16.msrb.mxu2 %v7650_v35 }
 0x12b   : > { %2830 = vmatpush.bf16.msrb.mxu3 %v7654_v36  ;;  %2792 = vmatmul.bf16.vlgmr.msrb.gmra.mxu0 %v2622_v37 }
 0x12c   : > { %2805 = vmatmul.bf16.vlgmr.msrb.gmra.mxu1 %v2622_v37 }
 0x12d   : > { %2818 = vmatmul.bf16.vlgmr.msrb.gmra.mxu2 %v2622_v37 }
 0x12e   : > { %2831 = vmatmul.bf16.vlgmr.msrb.gmra.mxu3 %v2622_v37 }
 0x134   : > { %v1605_v50 = vpop.f32.mrf.mxu0 }
 0x135   : > { %v1606_v51 = vadd.f32 %v1605_v50, %v10061_v9  ;;  %v1618_v52 = vpop.f32.mrf.mxu1 }
 0x136   : > { %v1619_v53 = vadd.f32 %v1618_v52, %v10063_v10 }
 0x137   : > { %1649 = vst [vmem:[#allocation2 + $0x60] sm:$0xff] %v1606_v51 }
 0x138   : > { %1650 = vst [vmem:[#allocation2 + $0x68] sm:$0xff] %v1619_v53  ;;  %v1631_v54 = vpop.f32.mrf.mxu2 }
 0x139   : > { %v1632_v55 = vadd.f32 %v1631_v54, %v10065_v11  ;;  %v1644_v56 = vpop.f32.mrf.mxu3 }
 0x13a   : > { %v1645_v57 = vadd.f32 %v1644_v56, %v10067_v12 }
 0x13b   : > { %1651 = vst [vmem:[#allocation2 + $0x70] sm:$0xff] %v1632_v55 }
 0x13c   : > { %1652 = vst [vmem:[#allocation2 + $0x78] sm:$0xff] %v1645_v57  ;;  %v1607_v58 = vpop.f32.mrf.mxu0 }
 0x13d   : > { %v1620_v59 = vpop.f32.mrf.mxu1 }
 0x140   : > { %v1633_v60 = vpop.f32.mrf.mxu2 }
 0x141   : > { %v1646_v61 = vpop.f32.mrf.mxu3 }
 0x14f   : > { %v1915_v62 = vpop.f32.mrf.mxu1 }
 0x150   : > { %v1916_v0 = vadd.f32 %v1915_v62, %v10063_v10 }
 0x152   : > { %v1902_v63 = vpop.f32.mrf.mxu0  ;;  %1947 = vst [vmem:[#allocation2 + $0x88] sm:$0xff] %v1916_v0 }
 0x153   : > { %v1903_v1 = vadd.f32 %v1902_v63, %v10061_v9 }
 0x154   : > { %v1941_v2 = vpop.f32.mrf.mxu3 }
 0x155   : > { %1946 = vst [vmem:[#allocation2 + $0x80] sm:$0xff] %v1903_v1  ;;  %v1942_v4 = vadd.f32 %v1941_v2, %v10067_v12 }
 0x156   : > { %v1928_v3 = vpop.f32.mrf.mxu2 }
 0x157   : > { %v1929_v5 = vadd.f32 %v1928_v3, %v10065_v11  ;;  %1949 = vst [vmem:[#allocation2 + $0x98] sm:$0xff] %v1942_v4  ;;  %v1917_v6 = vpop.f32.mrf.mxu1 }
 0x159   : > { %1948 = vst [vmem:[#allocation2 + $0x90] sm:$0xff] %v1929_v5 }
 0x15a   : > { %v1904_v7 = vpop.f32.mrf.mxu0 }
 0x15c   : > { %v1943_v8 = vpop.f32.mrf.mxu3 }
 0x15e   : > { %v1930_v13 = vpop.f32.mrf.mxu2 }
 0x168   : > { %v2199_v14 = vpop.f32.mrf.mxu0 }
 0x169   : > { %v2200_v15 = vadd.f32 %v2199_v14, %v10061_v9  ;;  %v2212_v16 = vpop.f32.mrf.mxu1 }
 0x16a   : > { %v2213_v17 = vadd.f32 %v2212_v16, %v10063_v10 }
 0x16b   : > { %2243 = vst [vmem:[#allocation2 + $0xa0] sm:$0xff] %v2200_v15 }
 0x16c   : > { %2244 = vst [vmem:[#allocation2 + $0xa8] sm:$0xff] %v2213_v17 }
 0x170   : > { %v2225_v18 = vpop.f32.mrf.mxu2  ;;  %v2201_v21 = vpop.f32.mrf.mxu0 }
 0x171   : > { %v2226_v19 = vadd.f32 %v2225_v18, %v10065_v11  ;;  %v2238_v20 = vpop.f32.mrf.mxu3  ;;  %v2214_v23 = vpop.f32.mrf.mxu1 }
 0x172   : > { %v2239_v22 = vadd.f32 %v2238_v20, %v10067_v12 }
 0x173   : > { %2245 = vst [vmem:[#allocation2 + $0xb0] sm:$0xff] %v2226_v19 }
 0x174   : > { %2246 = vst [vmem:[#allocation2 + $0xb8] sm:$0xff] %v2239_v22 }
 0x178   : > { %v2227_v24 = vpop.f32.mrf.mxu2 }
 0x179   : > { %v2240_v25 = vpop.f32.mrf.mxu3 }
 0x188   : > { %v2496_v26 = vpop.f32.mrf.mxu0 }
 0x189   : > { %v2497_v27 = vadd.f32 %v2496_v26, %v10061_v9  ;;  %v2509_v28 = vpop.f32.mrf.mxu1 }
 0x18a   : > { %v2510_v29 = vadd.f32 %v2509_v28, %v10063_v10 }
 0x18b   : > { %2540 = vst [vmem:[#allocation2 + $0xc0] sm:$0xff] %v2497_v27 }
 0x18c   : > { %2541 = vst [vmem:[#allocation2 + $0xc8] sm:$0xff] %v2510_v29 }
 0x190   : > { %v2522_v30 = vpop.f32.mrf.mxu2  ;;  %v2498_v33 = vpop.f32.mrf.mxu0 }
 0x191   : > { %v2523_v31 = vadd.f32 %v2522_v30, %v10065_v11  ;;  %v2535_v32 = vpop.f32.mrf.mxu3  ;;  %v2511_v35 = vpop.f32.mrf.mxu1 }
 0x192   : > { %v2536_v34 = vadd.f32 %v2535_v32, %v10067_v12 }
 0x193   : > { %2542 = vst [vmem:[#allocation2 + $0xd0] sm:$0xff] %v2523_v31 }
 0x194   : > { %2543 = vst [vmem:[#allocation2 + $0xd8] sm:$0xff] %v2536_v34 }
 0x198   : > { %v2524_v36 = vpop.f32.mrf.mxu2 }
 0x199   : > { %v2537_v37 = vpop.f32.mrf.mxu3 }
 0x1a8   : > { %v2793_v38 = vpop.f32.mrf.mxu0 }
 0x1a9   : > { %v2794_v39 = vadd.f32 %v2793_v38, %v10061_v9  ;;  %v2806_v40 = vpop.f32.mrf.mxu1 }
 0x1aa   : > { %v2807_v41 = vadd.f32 %v2806_v40, %v10063_v10 }
 0x1ab   : > { %2837 = vst [vmem:[#allocation2 + $0xe0] sm:$0xff] %v2794_v39 }
 0x1ac   : > { %2838 = vst [vmem:[#allocation2 + $0xe8] sm:$0xff] %v2807_v41 }
 0x1b0   : > { %v2819_v42 = vpop.f32.mrf.mxu2  ;;  %v2795_v43 = vpop.f32.mrf.mxu0 }
 0x1b1   : > { %v2820_v44 = vadd.f32 %v2819_v42, %v10065_v11  ;;  %v2832_v45 = vpop.f32.mrf.mxu3  ;;  %v2808_v46 = vpop.f32.mrf.mxu1 }
 0x1b2   : > { %v2833_v47 = vadd.f32 %v2832_v45, %v10067_v12 }
 0x1b3   : > { %2839 = vst [vmem:[#allocation2 + $0xf0] sm:$0xff] %v2820_v44 }
 0x1b4   : > { %2840 = vst [vmem:[#allocation2 + $0xf8] sm:$0xff] %v2833_v47 }
 0x1b8   : > { %v2821_v48 = vpop.f32.mrf.mxu2 }
 0x1b9   : > { %v2834_v49 = vpop.f32.mrf.mxu3 }
 0x1ba PF: > { %p7767_p11 = scmp.le.s32.totalorder %s10034_s20, 0 }
 0x1bb   : > { %s2846_s30 = ssub.s32 (!%p7767_p11), 0, %s10034_s20  ;;  %p2845_p12 = scmp.lt.s32.totalorder (!%p7767_p11), %s10034_s20, 0 }
 0x1bc   : > { %2844 = sbr.rel (%p7767_p11) target bundleno = 2204 (0x89c), region = 110  ;;  %s7768_s12 = smin.u32 (!%p7767_p11), %s10034_s20, %s2846_s30 }
 0x1bd   : > { %s2848_s13 = sand.u32 (!%p7767_p11), 1, %s7768_s12   ;;  %p9013_p0 = scmp.ne.s32.totalorder (!%p7767_p11), %s10034_s20, 3 }
 0x1be   : > { %s2849_s14 = ssub.s32 (!%p7767_p11), 0, %s2848_s13 }
 0x1c1   : > { %v7888_v50 = vld [vmem:[%s14446_s3 + $0xe0] sm:$0xf]  ;;  %v9494_v51 = vld [vmem:[%s14446_s3 + $0xec] sm:$0xf0]  ;;  %v9492_v52 = vld [vmem:[%s14446_s3 + $0xe4] sm:$0xf]  ;;  %s14459_s14 = smov (!%p2845_p12, %s2849_s14), %s2848_s13 }
 0x1c2   : > { %v11890_v53 = vor.u32 %v9494_v51, %v7888_v50  ;;  %v7890_v54 = vld [vmem:[%s14446_s3 + $0xf0] sm:$0xf0]  ;;  %v7896_v55 = vld [vmem:[%s14446_s3 + $0xe8] sm:$0xf]  ;;  %v9495_v56 = vld [vmem:[%s14446_s3 + $0xf4] sm:$0xf0] }
 0x1c3   : > { %v11901_v57 = vor.u32 %v9492_v52, %v7890_v54  ;;  %v11903_v58 = vor.u32 %v9495_v56, %v7896_v55  ;;  %v9493_v59 = vld [vmem:[%s14446_s3 + $0xec] sm:$0xf]  ;;  %v7898_v60 = vld [vmem:[%s14446_s3 + $0xf8] sm:$0xf0]  ;;  %v7872_v61 = vld [vmem:[%s14446_s3 + $0xc0] sm:$0xf] }
 0x1c4   : > { %3061 = vmatpush.bf16.msra.mxu0 %v11890_v53  ;;  %v11915_v62 = vor.u32 %v9493_v59, %v7898_v60  ;;  %v9490_v63 = vld [vmem:[%s14446_s3 + $0xcc] sm:$0xf0]  ;;  %v9488_v0 = vld [vmem:[%s14446_s3 + $0xc4] sm:$0xf]  ;;  %v7874_v1 = vld [vmem:[%s14446_s3 + $0xd0] sm:$0xf0] }
 0x1c5   : > { %3074 = vmatpush.bf16.msra.mxu1 %v11901_v57  ;;  %3087 = vmatpush.bf16.msra.mxu2 %v11903_v58  ;;  %v11928_v2 = vor.u32 %v9490_v63, %v7872_v61  ;;  %v11930_v3 = vor.u32 %v9488_v0, %v7874_v1  ;;  %v7880_v4 = vld [vmem:[%s14446_s3 + $0xc8] sm:$0xf]  ;;  %v9491_v5 = vld [vmem:[%s14446_s3 + $0xd4] sm:$0xf0]  ;;  %v9489_v6 = vld [vmem:[%s14446_s3 + $0xcc] sm:$0xf] }
 0x1c6   : > { %3100 = vmatpush.bf16.msra.mxu3 %v11915_v62  ;;  %v11942_v7 = vor.u32 %v9491_v5, %v7880_v4  ;;  %v7882_v8 = vld [vmem:[%s14446_s3 + $0xd8] sm:$0xf0]  ;;  %v7856_v13 = vld [vmem:[%s14446_s3 + $0xa0] sm:$0xf]  ;;  %v9486_v14 = vld [vmem:[%s14446_s3 + $0xac] sm:$0xf0] }
 0x1c7   : > { %v11953_v15 = vor.u32 %v9489_v6, %v7882_v8  ;;  %v9484_v16 = vld [vmem:[%s14446_s3 + $0xa4] sm:$0xf]  ;;  %v7858_v17 = vld [vmem:[%s14446_s3 + $0xb0] sm:$0xf0]  ;;  %v7864_v18 = vld [vmem:[%s14446_s3 + $0xa8] sm:$0xf]  ;;  %v11965_v19 = vor.u32 %v9486_v14, %v7856_v13 }
 0x1c8   : > { %3062 = vmatpush.bf16.msra.mxu0 %v11928_v2  ;;  %v9487_v20 = vld [vmem:[%s14446_s3 + $0xb4] sm:$0xf0]  ;;  %v9485_v21 = vld [vmem:[%s14446_s3 + $0xac] sm:$0xf]  ;;  %v7866_v22 = vld [vmem:[%s14446_s3 + $0xb8] sm:$0xf0]  ;;  %v11978_v23 = vor.u32 %v9484_v16, %v7858_v17 }
 0x1c9   : > { %3075 = vmatpush.bf16.msra.mxu1 %v11930_v3  ;;  %3088 = vmatpush.bf16.msra.mxu2 %v11942_v7  ;;  %v11980_v24 = vor.u32 %v9487_v20, %v7864_v18  ;;  %v7840_v25 = vld [vmem:[%s14446_s3 + $0x80] sm:$0xf]  ;;  %v9482_v26 = vld [vmem:[%s14446_s3 + $0x8c] sm:$0xf0]  ;;  %v9480_v27 = vld [vmem:[%s14446_s3 + $0x84] sm:$0xf]  ;;  %v11992_v28 = vor.u32 %v9485_v21, %v7866_v22 }
 0x1ca   : > { %3101 = vmatpush.bf16.msra.mxu3 %v11953_v15  ;;  %v7842_v29 = vld [vmem:[%s14446_s3 + $0x90] sm:$0xf0]  ;;  %v7848_v30 = vld [vmem:[%s14446_s3 + $0x88] sm:$0xf]  ;;  %v9483_v31 = vld [vmem:[%s14446_s3 + $0x94] sm:$0xf0]  ;;  %v12010_v34 = vor.u32 %v9482_v26, %v7840_v25 }
 0x1cb   : > { %v9481_v32 = vld [vmem:[%s14446_s3 + $0x8c] sm:$0xf]  ;;  %v7850_v33 = vld [vmem:[%s14446_s3 + $0x98] sm:$0xf0]  ;;  %v12014_v35 = vor.u32 %v9480_v27, %v7842_v29  ;;  %v12016_v36 = vor.u32 %v9483_v31, %v7848_v30  ;;  %v7824_v37 = vld [vmem:[%s14446_s3 + $0x60] sm:$0xf] }
 0x1cc   : > { %3063 = vmatpush.bf16.msra.mxu0 %v11965_v19  ;;  %v9478_v38 = vld [vmem:[%s14446_s3 + $0x6c] sm:$0xf0]  ;;  %v9476_v39 = vld [vmem:[%s14446_s3 + $0x64] sm:$0xf]  ;;  %v12028_v40 = vor.u32 %v9481_v32, %v7850_v33  ;;  %v7826_v41 = vld [vmem:[%s14446_s3 + $0x70] sm:$0xf0] }
 0x1cd   : > { %3076 = vmatpush.bf16.msra.mxu1 %v11978_v23  ;;  %3089 = vmatpush.bf16.msra.mxu2 %v11980_v24  ;;  %v7832_v42 = vld [vmem:[%s14446_s3 + $0x68] sm:$0xf]  ;;  %v9479_v43 = vld [vmem:[%s14446_s3 + $0x74] sm:$0xf0]  ;;  %v9477_v44 = vld [vmem:[%s14446_s3 + $0x6c] sm:$0xf]  ;;  %v12046_v46 = vor.u32 %v9478_v38, %v7824_v37  ;;  %v12050_v47 = vor.u32 %v9476_v39, %v7826_v41 }
 0x1ce   : > { %3102 = vmatpush.bf16.msra.mxu3 %v11992_v28  ;;  %v7834_v45 = vld [vmem:[%s14446_s3 + $0x78] sm:$0xf0]  ;;  %v12052_v48 = vor.u32 %v9479_v43, %v7832_v42  ;;  %v7808_v49 = vld [vmem:[%s14446_s3 + $0x40] sm:$0xf]  ;;  %v9474_v50 = vld [vmem:[%s14446_s3 + $0x4c] sm:$0xf0] }
 0x1cf   : > { %v9472_v51 = vld [vmem:[%s14446_s3 + $0x44] sm:$0xf]  ;;  %v12064_v52 = vor.u32 %v9477_v44, %v7834_v45  ;;  %v7810_v54 = vld [vmem:[%s14446_s3 + $0x50] sm:$0xf0]  ;;  %v7816_v55 = vld [vmem:[%s14446_s3 + $0x48] sm:$0xf]  ;;  %v12082_v61 = vor.u32 %v9474_v50, %v7808_v49 }
 0x1d0   : > { %3064 = vmatpush.bf16.msra.mxu0 %v12010_v34  ;;  %v9475_v56 = vld [vmem:[%s14446_s3 + $0x54] sm:$0xf0]  ;;  %v9473_v59 = vld [vmem:[%s14446_s3 + $0x4c] sm:$0xf]  ;;  %v7818_v60 = vld [vmem:[%s14446_s3 + $0x58] sm:$0xf0]  ;;  %v12086_v63 = vor.u32 %v9472_v51, %v7810_v54 }
 0x1d1   : > { %3077 = vmatpush.bf16.msra.mxu1 %v12014_v35  ;;  %3090 = vmatpush.bf16.msra.mxu2 %v12016_v36  ;;  %v12088_v0 = vor.u32 %v9475_v56, %v7816_v55  ;;  %v7792_v1 = vld [vmem:[%s14446_s3 + $0x20] sm:$0xf]  ;;  %v9470_v4 = vld [vmem:[%s14446_s3 + $0x2c] sm:$0xf0]  ;;  %v9468_v5 = vld [vmem:[%s14446_s3 + $0x24] sm:$0xf]  ;;  %v12100_v6 = vor.u32 %v9473_v59, %v7818_v60 }
 0x1d2   : > { %3103 = vmatpush.bf16.msra.mxu3 %v12028_v40  ;;  %v7794_v8 = vld [vmem:[%s14446_s3 + $0x30] sm:$0xf0]  ;;  %v7800_v13 = vld [vmem:[%s14446_s3 + $0x28] sm:$0xf]  ;;  %v9471_v14 = vld [vmem:[%s14446_s3 + $0x34] sm:$0xf0]  ;;  %v12118_v18 = vor.u32 %v9470_v4, %v7792_v1 }
 0x1d3   : > { %v9469_v16 = vld [vmem:[%s14446_s3 + $0x2c] sm:$0xf]  ;;  %v7802_v17 = vld [vmem:[%s14446_s3 + $0x38] sm:$0xf0]  ;;  %v7776_v20 = vld [vmem:[%s14446_s3] sm:$0xf]  ;;  %v12125_v21 = vor.u32 %v9468_v5, %v7794_v8  ;;  %v12127_v22 = vor.u32 %v9471_v14, %v7800_v13 }
 0x1d4   : > { %3065 = vmatpush.bf16.msra.mxu0 %v12046_v46  ;;  %v9466_v25 = vld [vmem:[%s14446_s3 + $0xc] sm:$0xf0]  ;;  %v9464_v26 = vld [vmem:[%s14446_s3 + $0x4] sm:$0xf]  ;;  %v7778_v27 = vld [vmem:[%s14446_s3 + $0x10] sm:$0xf0]  ;;  %v12139_v29 = vor.u32 %v9469_v16, %v7802_v17 }
 0x1d5   : > { %3078 = vmatpush.bf16.msra.mxu1 %v12050_v47  ;;  %3091 = vmatpush.bf16.msra.mxu2 %v12052_v48  ;;  %v7784_v30 = vld [vmem:[%s14446_s3 + $0x8] sm:$0xf]  ;;  %v9467_v31 = vld [vmem:[%s14446_s3 + $0x14] sm:$0xf0]  ;;  %v9465_v32 = vld [vmem:[%s14446_s3 + $0xc] sm:$0xf]  ;;  %v12160_v39 = vor.u32 %v9466_v25, %v7776_v20  ;;  %v12170_v44 = vor.u32 %v9464_v26, %v7778_v27 }
 0x1d6   : > { %3104 = vmatpush.bf16.msra.mxu3 %v12064_v52  ;;  %v7786_v33 = vld [vmem:[%s14446_s3 + $0x18] sm:$0xf0]  ;;  %v8016_v37 = vld [vmem:[%s14444_s1 + $0xe0] sm:$0xf]  ;;  %v9528_v38 = vld [vmem:[%s14444_s1 + $0xec] sm:$0xf0]  ;;  %v12172_v45 = vor.u32 %v9467_v31, %v7784_v30 }
 0x1d7   : > { %v2890_v41 = vld [vmem:[#allocation3] sm:$0xff]  ;;  %v8018_v43 = vld [vmem:[%s14444_s1 + $0xf0] sm:$0xf0]  ;;  %v12175_v49 = vor.u32 %v9465_v32, %v7786_v33  ;;  %v8017_v50 = vor.u32 %v9528_v38, %v8016_v37  ;;  %v8024_v51 = vld [vmem:[%s14444_s1 + $0xe8] sm:$0xf]  ;;  %vm3200_vm7 = vcmask 1041409  }
 0x1d8   : > { %3066 = vmatpush.bf16.msra.mxu0 %v12082_v61  ;;  %v9526_v42 = vld [vmem:[%s14444_s1 + $0xe4] sm:$0xf]  ;;  %v9529_v54 = vld [vmem:[%s14444_s1 + $0xf4] sm:$0xf0]  ;;  %v9527_v55 = vld [vmem:[%s14444_s1 + $0xec] sm:$0xf]  ;;  %v2900_v56 = vpack.c.bf16 %v2890_v41, %v2890_v41 }
 0x1d9   : > { %3079 = vmatpush.bf16.msra.mxu1 %v12086_v63  ;;  %3092 = vmatpush.bf16.msra.mxu2 %v12088_v0  ;;  %v8021_v59 = vor.u32 %v9526_v42, %v8018_v43  ;;  %v8026_v60 = vld [vmem:[%s14444_s1 + $0xf8] sm:$0xf0]  ;;  %v8000_v1 = vld [vmem:[%s14444_s1 + $0xc0] sm:$0xf]  ;;  %v9524_v4 = vld [vmem:[%s14444_s1 + $0xcc] sm:$0xf0]  ;;  %v8025_v13 = vor.u32 %v9529_v54, %v8024_v51 }
 0x1da   : > { %3105 = vmatpush.bf16.msra.mxu3 %v12100_v6  ;;  %v9522_v5 = vld [vmem:[%s14444_s1 + $0xc4] sm:$0xf]  ;;  %v8002_v8 = vld [vmem:[%s14444_s1 + $0xd0] sm:$0xf0]  ;;  %v8029_v14 = vor.u32 %v9527_v55, %v8026_v60  ;;  %v8001_v16 = vor.u32 %v9524_v4, %v8000_v1  ;;  %v8008_v17 = vld [vmem:[%s14444_s1 + $0xc8] sm:$0xf] }
 0x1db   : > { %v9525_v20 = vld [vmem:[%s14444_s1 + $0xd4] sm:$0xf0]  ;;  %v9523_v25 = vld [vmem:[%s14444_s1 + $0xcc] sm:$0xf]  ;;  %v8005_v26 = vor.u32 %v9522_v5, %v8002_v8  ;;  %v8010_v27 = vld [vmem:[%s14444_s1 + $0xd8] sm:$0xf0] }
 0x1dc   : > { %3067 = vmatpush.bf16.msra.mxu0 %v12118_v18  ;;  %v7984_v30 = vld [vmem:[%s14444_s1 + $0xa0] sm:$0xf]  ;;  %v9520_v31 = vld [vmem:[%s14444_s1 + $0xac] sm:$0xf0]  ;;  %v9518_v32 = vld [vmem:[%s14444_s1 + $0xa4] sm:$0xf]  ;;  %v8009_v37 = vor.u32 %v9525_v20, %v8008_v17  ;;  %v8013_v38 = vor.u32 %v9523_v25, %v8010_v27 }
 0x1dd   : > { %3080 = vmatpush.bf16.msra.mxu1 %v12125_v21  ;;  %3093 = vmatpush.bf16.msra.mxu2 %v12127_v22  ;;  %v7986_v33 = vld [vmem:[%s14444_s1 + $0xb0] sm:$0xf0]  ;;  %v7985_v41 = vor.u32 %v9520_v31, %v7984_v30  ;;  %v7992_v42 = vld [vmem:[%s14444_s1 + $0xa8] sm:$0xf]  ;;  %v9521_v43 = vld [vmem:[%s14444_s1 + $0xb4] sm:$0xf0] }
 0x1de   : > { %3106 = vmatpush.bf16.msra.mxu3 %v12139_v29  ;;  %v7989_v51 = vor.u32 %v9518_v32, %v7986_v33  ;;  %v7994_v54 = vld [vmem:[%s14444_s1 + $0xb8] sm:$0xf0]  ;;  %v7968_v55 = vld [vmem:[%s14444_s1 + $0x80] sm:$0xf]  ;;  %v7970_v60 = vld [vmem:[%s14444_s1 + $0x90] sm:$0xf0]  ;;  %v7993_v1 = vor.u32 %v9521_v43, %v7992_v42 }
 0x1df   : > { %v7976_v8 = vld [vmem:[%s14444_s1 + $0x88] sm:$0xf]  ;;  %v7978_v17 = vld [vmem:[%s14444_s1 + $0x98] sm:$0xf0]  ;;  %v7952_v20 = vld [vmem:[%s14444_s1 + $0x60] sm:$0xf] }
 0x1e0   : > { %3068 = vmatpush.bf16.msra.mxu0 %v12160_v39  ;;  %v9512_v25 = vld [vmem:[%s14444_s1 + $0x6c] sm:$0xf0]  ;;  %v7954_v27 = vld [vmem:[%s14444_s1 + $0x70] sm:$0xf0]  ;;  %v7960_v33 = vld [vmem:[%s14444_s1 + $0x68] sm:$0xf] }
 0x1e1   : > { %3081 = vmatpush.bf16.msra.mxu1 %v12170_v44  ;;  %3094 = vmatpush.bf16.msra.mxu2 %v12172_v45  ;;  %v7953_v32 = vor.u32 %v9512_v25, %v7952_v20  ;;  %v7962_v42 = vld [vmem:[%s14444_s1 + $0x78] sm:$0xf0]  ;;  %v7936_v43 = vld [vmem:[%s14444_s1 + $0x40] sm:$0xf]  ;;  %vm3203_vm8 = vcmask 1042434   ;;  %vm3206_vm9 = vcmask 1043459  }
 0x1e2   : > { %3107 = vmatpush.bf16.msra.mxu3 %v12175_v49  ;;  %vm3209_vm10 = vcmask 1044484   ;;  %vm3212_vm11 = vcmask 1045509   ;;  %vm3215_vm12 = vcmask 1046534   ;;  %vm3218_vm13 = vcmask 1047559   ;;  %p7770_p13 = scmp.lt.s32.totalorder %s14459_s14, 0  ;;  %s2855_s15 = sadd.s32 2, %s14459_s14 }
 0x1e3   : > { %3069 = vmatmul.bf16.vlgmr.msra.gmra.mxu0 %v2900_v56 }
 0x1e4   : > { %3382 = vmatpush.bf16.msrb.mxu0 %v8017_v50  ;;  %3082 = vmatmul.bf16.vlgmr.msra.gmra.mxu1 %v2900_v56  ;;  %v9519_v50 = vld [vmem:[%s14444_s1 + $0xac] sm:$0xf]  ;;  %s14461_s15 = smov (!%p7770_p13, %s2855_s15), %s14459_s14 }
 0x1e5   : > { %3395 = vmatpush.bf16.msrb.mxu1 %v8021_v59  ;;  %3095 = vmatmul.bf16.vlgmr.msra.gmra.mxu2 %v2900_v56  ;;  %v9514_v59 = vld [vmem:[%s14444_s1 + $0x84] sm:$0xf]  ;;  %v7997_v4 = vor.u32 %v9519_v50, %v7994_v54  ;;  %v9508_v50 = vld [vmem:[%s14444_s1 + $0x4c] sm:$0xf0]  ;;  %v7938_v54 = vld [vmem:[%s14444_s1 + $0x50] sm:$0xf0] }
 0x1e6   : > { %3108 = vmatmul.bf16.vlgmr.msra.gmra.mxu3 %v2900_v56  ;;  %3408 = vmatpush.bf16.msrb.mxu2 %v8025_v13  ;;  %v9516_v56 = vld [vmem:[%s14444_s1 + $0x8c] sm:$0xf0]  ;;  %v9517_v13 = vld [vmem:[%s14444_s1 + $0x94] sm:$0xf0]  ;;  %s2857_s16 = ssub.s32 1, %s14461_s15  ;;  %s9531_s13 = sshll.u32 %s14461_s15, 8 }
 0x1e7   : > { %3421 = vmatpush.bf16.msrb.mxu3 %v8029_v14  ;;  %v7969_v5 = vor.u32 %v9516_v56, %v7968_v55  ;;  %v9515_v14 = vld [vmem:[%s14444_s1 + $0x8c] sm:$0xf]  ;;  %v7977_v30 = vor.u32 %v9517_v13, %v7976_v8  ;;  %v7946_v8 = vld [vmem:[%s14444_s1 + $0x58] sm:$0xf0]  ;;  %v7920_v13 = vld [vmem:[%s14444_s1 + $0x20] sm:$0xf] }
 0x1e8   : > { %3383 = vmatpush.bf16.msrb.mxu0 %v8001_v16  ;;  %v7973_v16 = vor.u32 %v9514_v59, %v7970_v60  ;;  %v7981_v31 = vor.u32 %v9515_v14, %v7978_v17  ;;  %v7937_v59 = vor.u32 %v9508_v50, %v7936_v43  ;;  %v7944_v60 = vld [vmem:[%s14444_s1 + $0x48] sm:$0xf]  ;;  %v9504_v14 = vld [vmem:[%s14444_s1 + $0x2c] sm:$0xf0]  ;;  %v7922_v17 = vld [vmem:[%s14444_s1 + $0x30] sm:$0xf0] }
 0x1e9   : > { %3396 = vmatpush.bf16.msrb.mxu1 %v8005_v26  ;;  %v9510_v26 = vld [vmem:[%s14444_s1 + $0x64] sm:$0xf]  ;;  %s9497_s22 = sshll.u32 %s2857_s16, 8  ;;  %s12622_s14 = scalar_lea.vmem [#allocation2], %s9531_s13 }
 0x1ea   : > { %3409 = vmatpush.bf16.msrb.mxu2 %v8009_v37  ;;  %v9513_v37 = vld [vmem:[%s14444_s1 + $0x74] sm:$0xf0]  ;;  %s12414_s23 = scalar_lea.vmem [#allocation2], %s9497_s22 }
 0x1eb   : > { %3422 = vmatpush.bf16.msrb.mxu3 %v8013_v38  ;;  %v9511_v38 = vld [vmem:[%s14444_s1 + $0x6c] sm:$0xf]  ;;  %v7961_v55 = vor.u32 %v9513_v37, %v7960_v33  ;;  %v7930_v33 = vld [vmem:[%s14444_s1 + $0x38] sm:$0xf0]  ;;  %v7904_v37 = vld [vmem:[%s14444_s1] sm:$0xf] }
 0x1ec   : > { %3384 = vmatpush.bf16.msrb.mxu0 %v7985_v41  ;;  %v7957_v41 = vor.u32 %v9510_v26, %v7954_v27  ;;  %v7965_v56 = vor.u32 %v9511_v38, %v7962_v42  ;;  %v7921_v26 = vor.u32 %v9504_v14, %v7920_v13  ;;  %v7928_v27 = vld [vmem:[%s14444_s1 + $0x28] sm:$0xf]  ;;  %v9500_v38 = vld [vmem:[%s14444_s1 + $0xc] sm:$0xf0]  ;;  %v7906_v42 = vld [vmem:[%s14444_s1 + $0x10] sm:$0xf0] }
 0x1ed   : > { %3397 = vmatpush.bf16.msrb.mxu1 %v7989_v51  ;;  %v9506_v51 = vld [vmem:[%s14444_s1 + $0x44] sm:$0xf]  ;;  %v3135_v14 = vld [vmem:[%s10069_s24] sm:$0x1] }
 0x1ee   : > { %3410 = vmatpush.bf16.msrb.mxu2 %v7993_v1  ;;  %v9509_v1 = vld [vmem:[%s14444_s1 + $0x54] sm:$0xf0] }
 0x1ef   : > { %3423 = vmatpush.bf16.msrb.mxu3 %v7997_v4  ;;  %v9507_v4 = vld [vmem:[%s14444_s1 + $0x4c] sm:$0xf]  ;;  %v7945_v20 = vor.u32 %v9509_v1, %v7944_v60  ;;  %v7914_v60 = vld [vmem:[%s14444_s1 + $0x18] sm:$0xf0] }
 0x1f0   : > { %3385 = vmatpush.bf16.msrb.mxu0 %v7969_v5  ;;  %v7941_v5 = vor.u32 %v9506_v51, %v7938_v54  ;;  %v7949_v25 = vor.u32 %v9507_v4, %v7946_v8  ;;  %v7905_v51 = vor.u32 %v9500_v38, %v7904_v37  ;;  %v7912_v54 = vld [vmem:[%s14444_s1 + $0x8] sm:$0xf]  ;;  %v3137_v8 = vld [vmem:[%s10069_s24 + $0x10] sm:$0x1] }
 0x1f1   : > { %3398 = vmatpush.bf16.msrb.mxu1 %v7973_v16  ;;  %v9502_v16 = vld [vmem:[%s14444_s1 + $0x24] sm:$0xf] }
 0x1f2   : > { %3411 = vmatpush.bf16.msrb.mxu2 %v7977_v30  ;;  %v9505_v30 = vld [vmem:[%s14444_s1 + $0x34] sm:$0xf0] }
 0x1f3   : > { %3424 = vmatpush.bf16.msrb.mxu3 %v7981_v31  ;;  %v9503_v31 = vld [vmem:[%s14444_s1 + $0x2c] sm:$0xf]  ;;  %v7929_v43 = vor.u32 %v9505_v30, %v7928_v27  ;;  %v3140_v30 = vld [vmem:[%s10069_s24 + $0x28] sm:$0x1] }
 0x1f4   : > { %3386 = vmatpush.bf16.msrb.mxu0 %v7953_v32  ;;  %v7925_v32 = vor.u32 %v9502_v16, %v7922_v17  ;;  %v7933_v50 = vor.u32 %v9503_v31, %v7930_v33  ;;  %v3138_v16 = vld [vmem:[%s10069_s24 + $0x18] sm:$0x1]  ;;  %v3145_v17 = vpack.c.bf16 %v3137_v8, %v3137_v8  ;;  %v3141_v33 = vld [vmem:[%s10069_s24 + $0x30] sm:$0x1]  ;;  %v3148_v37 = vpack.c.bf16 %v3140_v30, %v3140_v30 }
 0x1f5   : > { %3399 = vmatpush.bf16.msrb.mxu1 %v7957_v41  ;;  %v9498_v41 = vld [vmem:[%s14444_s1 + $0x4] sm:$0xf] }
 0x1f6   : > { %3412 = vmatpush.bf16.msrb.mxu2 %v7961_v55  ;;  %v9501_v55 = vld [vmem:[%s14444_s1 + $0x14] sm:$0xf0] }
 0x1f7   : > { %3425 = vmatpush.bf16.msrb.mxu3 %v7965_v56  ;;  %v7909_v56 = vor.u32 %v9498_v41, %v7906_v42  ;;  %v7913_v1 = vor.u32 %v9501_v55, %v7912_v54 }
 0x1f8   : > { %3387 = vmatpush.bf16.msrb.mxu0 %v7937_v59  ;;  %v9499_v59 = vld [vmem:[%s14444_s1 + $0xc] sm:$0xf] }
 0x1f9   : > { %3400 = vmatpush.bf16.msrb.mxu1 %v7941_v5  ;;  %v7917_v4 = vor.u32 %v9499_v59, %v7914_v60  ;;  %v3136_v5 = vld [vmem:[%s10069_s24 + $0x8] sm:$0x1] }
 0x1fa   : > { %3413 = vmatpush.bf16.msrb.mxu2 %v7945_v20  ;;  %v3144_v13 = vpack.c.bf16 %v3136_v5, %v3136_v5  ;;  %v3139_v20 = vld [vmem:[%s10069_s24 + $0x20] sm:$0x1] }
 0x1fb   : > { %3426 = vmatpush.bf16.msrb.mxu3 %v7949_v25  ;;  %v3143_v25 = vpack.c.bf16 %v3135_v14, %v3135_v14  ;;  %v3147_v31 = vpack.c.bf16 %v3139_v20, %v3139_v20 }
 0x1fc   : > { %3388 = vmatpush.bf16.msrb.mxu0 %v7921_v26  ;;  %v3146_v26 = vpack.c.bf16 %v3138_v16, %v3138_v16  ;;  %v3192_v27 = vunpack.c.l.b16 %v3144_v13 }
 0x1fd   : > { %3401 = vmatpush.bf16.msrb.mxu1 %v7925_v32  ;;  %v3193_v32 = vunpack.c.l.b16 %v3145_v17  ;;  %v3191_v38 = vunpack.c.l.b16 %v3143_v25 }
 0x1fe   : > { %3414 = vmatpush.bf16.msrb.mxu2 %v7929_v43  ;;  %v3194_v41 = vunpack.c.l.b16 %v3146_v26  ;;  %v3199_v42 = vrot.slane %v3192_v27, 7  ;;  %v3142_v43 = vld [vmem:[%s10069_s24 + $0x38] sm:$0x1] }
 0x1ff   : > { %3427 = vmatpush.bf16.msrb.mxu3 %v7933_v50  ;;  %v3149_v50 = vpack.c.bf16 %v3141_v33, %v3141_v33  ;;  %v3202_v54 = vrot.slane %v3193_v32, 6  ;;  %v3150_v55 = vpack.c.bf16 %v3142_v43, %v3142_v43  ;;  %v2897_v32 = vld [vmem:[%s12414_s23 + $0x8] sm:$0xff]  ;;  %v9563_v43 = vld [vmem:[%s14444_s1 + $0xec] sm:$0xf0] }
 0x200   : > { %3389 = vmatpush.bf16.msrb.mxu0 %v7905_v51  ;;  %v3195_v51 = vunpack.c.l.b16 %v3147_v31  ;;  %v3201_v59 = vsel %vm3200_vm7, %v3199_v42, %v3191_v38  ;;  %v2896_v31 = vld [vmem:[%s12414_s23] sm:$0xff] }
 0x201   : > { %3402 = vmatpush.bf16.msrb.mxu1 %v7909_v56  ;;  %v3196_v56 = vunpack.c.l.b16 %v3148_v37  ;;  %v3197_v60 = vunpack.c.l.b16 %v3149_v50  ;;  %v3198_v5 = vunpack.c.l.b16 %v3150_v55  ;;  %v8153_v42 = vld [vmem:[%s14444_s1 + $0xe0] sm:$0xf]  ;;  %v9561_v50 = vld [vmem:[%s14444_s1 + $0xe4] sm:$0xf]  ;;  %v8155_v55 = vld [vmem:[%s14444_s1 + $0xf0] sm:$0xf0] }
 0x202   : > { %3415 = vmatpush.bf16.msrb.mxu2 %v7913_v1  ;;  %v3204_v1 = vsel %vm3203_vm8, %v3202_v54, %v3201_v59  ;;  %v3208_v8 = vrot.slane %v3195_v51, 4  ;;  %v8154_v54 = vor.u32 %v9563_v43, %v8153_v42 }
 0x203   : > { %3428 = vmatpush.bf16.msrb.mxu3 %v7917_v4  ;;  %v3205_v4 = vrot.slane %v3194_v41, 5  ;;  %v3211_v13 = vrot.slane %v3196_v56, 3  ;;  %v3214_v16 = vrot.slane %v3197_v60, 2  ;;  %v3217_v20 = vrot.slane %v3198_v5, 1  ;;  %v8161_v56 = vld [vmem:[%s14444_s1 + $0xe8] sm:$0xf] }
 0x204   : > { %3451 = vmatpush.bf16.msra.mxu0 %v11890_v53  ;;  %v2898_v60 = vld [vmem:[%s12414_s23 + $0x10] sm:$0xff]  ;;  %v9564_v5 = vld [vmem:[%s14444_s1 + $0xf4] sm:$0xf0] }
 0x205   : > { %3464 = vmatpush.bf16.msra.mxu1 %v11901_v57  ;;  %v3207_v14 = vsel %vm3206_vm9, %v3205_v4, %v3204_v1  ;;  %v2899_v1 = vld [vmem:[%s12414_s23 + $0x18] sm:$0xff]  ;;  %v8158_v4 = vor.u32 %v9561_v50, %v8155_v55 }
 0x206   : > { %3477 = vmatpush.bf16.msra.mxu2 %v11903_v58  ;;  %v3210_v17 = vsel %vm3209_vm10, %v3208_v8, %v3207_v14  ;;  %v9562_v8 = vld [vmem:[%s14444_s1 + $0xec] sm:$0xf]  ;;  %v8163_v14 = vld [vmem:[%s14444_s1 + $0xf8] sm:$0xf0] }
 0x207   : > { %3490 = vmatpush.bf16.msra.mxu3 %v11915_v62  ;;  %v3213_v25 = vsel %vm3212_vm11, %v3211_v13, %v3210_v17  ;;  %v8162_v13 = vor.u32 %v9564_v5, %v8161_v56  ;;  %v9559_v17 = vld [vmem:[%s14444_s1 + $0xcc] sm:$0xf0] }
 0x208   : > { %3452 = vmatpush.bf16.msra.mxu0 %v11928_v2  ;;  %v3216_v26 = vsel %vm3215_vm12, %v3214_v16, %v3213_v25  ;;  %v8137_v16 = vld [vmem:[%s14444_s1 + $0xc0] sm:$0xf] }
 0x209   : > { %3465 = vmatpush.bf16.msra.mxu1 %v11930_v3  ;;  %v3219_v27 = vsel %vm3218_vm13, %v3217_v20, %v3216_v26  ;;  %v8166_v20 = vor.u32 %v9562_v8, %v8163_v14  ;;  %v8138_v25 = vor.u32 %v9559_v17, %v8137_v16  ;;  %v9557_v26 = vld [vmem:[%s14444_s1 + $0xc4] sm:$0xf] }
 0x20a   : > { %3478 = vmatpush.bf16.msra.mxu2 %v11942_v7  ;;  %v3220_v30 = vpack.c.b16 %v3219_v27, %v3219_v27  ;;  %v8139_v27 = vld [vmem:[%s14444_s1 + $0xd0] sm:$0xf0] }
 0x20b   : > { %3491 = vmatpush.bf16.msra.mxu3 %v11953_v15 }
 0x20c   : > { %3453 = vmatpush.bf16.msra.mxu0 %v11965_v19  ;;  %3403 = vmatmul.bf16.vlgmr.msrb.gmra.mxu1 %v3220_v30 }
 0x20d   : > { %3466 = vmatpush.bf16.msra.mxu1 %v11978_v23  ;;  %3390 = vmatmul.bf16.vlgmr.msrb.gmra.mxu0 %v3220_v30 }
 0x20e   : > { %3479 = vmatpush.bf16.msra.mxu2 %v11980_v24  ;;  %3429 = vmatmul.bf16.vlgmr.msrb.gmra.mxu3 %v3220_v30 }
 0x20f   : > { %3492 = vmatpush.bf16.msra.mxu3 %v11992_v28  ;;  %3416 = vmatmul.bf16.vlgmr.msrb.gmra.mxu2 %v3220_v30  ;;  %v8145_v30 = vld [vmem:[%s14444_s1 + $0xc8] sm:$0xf] }
 0x210   : > { %3454 = vmatpush.bf16.msra.mxu0 %v12010_v34 }
 0x211   : > { %3467 = vmatpush.bf16.msra.mxu1 %v12014_v35 }
 0x212   : > { %3480 = vmatpush.bf16.msra.mxu2 %v12016_v36 }
 0x213   : > { %3493 = vmatpush.bf16.msra.mxu3 %v12028_v40 }
 0x214   : > { %3455 = vmatpush.bf16.msra.mxu0 %v12046_v46 }
 0x215   : > { %3468 = vmatpush.bf16.msra.mxu1 %v12050_v47 }
 0x216   : > { %3481 = vmatpush.bf16.msra.mxu2 %v12052_v48 }
 0x217   : > { %3494 = vmatpush.bf16.msra.mxu3 %v12064_v52 }
 0x218   : > { %3456 = vmatpush.bf16.msra.mxu0 %v12082_v61 }
 0x219   : > { %3469 = vmatpush.bf16.msra.mxu1 %v12086_v63 }
 0x21a   : > { %3482 = vmatpush.bf16.msra.mxu2 %v12088_v0 }
 0x21b   : > { %3495 = vmatpush.bf16.msra.mxu3 %v12100_v6 }
 0x21c   : > { %3457 = vmatpush.bf16.msra.mxu0 %v12118_v18 }
 0x21d   : > { %3470 = vmatpush.bf16.msra.mxu1 %v12125_v21 }
 0x21e   : > { %3483 = vmatpush.bf16.msra.mxu2 %v12127_v22 }
 0x21f   : > { %3496 = vmatpush.bf16.msra.mxu3 %v12139_v29 }
 0x220   : > { %3458 = vmatpush.bf16.msra.mxu0 %v12160_v39 }
 0x221   : > { %3471 = vmatpush.bf16.msra.mxu1 %v12170_v44 }
 0x222   : > { %3484 = vmatpush.bf16.msra.mxu2 %v12172_v45 }
 0x223   : > { %3497 = vmatpush.bf16.msra.mxu3 %v12175_v49 }
 0x224   : > { %3765 = vmatpush.bf16.msrb.mxu0 %v8154_v54 }
 0x225   : > { %3778 = vmatpush.bf16.msrb.mxu1 %v8158_v4 }
 0x226   : > { %3791 = vmatpush.bf16.msrb.mxu2 %v8162_v13 }
 0x227   : > { %3804 = vmatpush.bf16.msrb.mxu3 %v8166_v20 }
 0x228   : > { %3766 = vmatpush.bf16.msrb.mxu0 %v8138_v25 }
 0x260   : > { %v3070_v33 = vpop.f32.mrf.mxu0 }
 0x261   : > { %v3113_v37 = vadd.f32 %v3070_v33, %v2896_v31  ;;  %v3083_v38 = vpop.f32.mrf.mxu1  ;;  %v9560_v33 = vld [vmem:[%s14444_s1 + $0xd4] sm:$0xf0] }
 0x262   : > { %v3114_v41 = vadd.f32 %v3083_v38, %v2897_v32  ;;  %v8142_v32 = vor.u32 %v9557_v26, %v8139_v27  ;;  %v8147_v38 = vld [vmem:[%s14444_s1 + $0xd8] sm:$0xf0]  ;;  %v8146_v50 = vor.u32 %v9560_v33, %v8145_v30 }
 0x263   : > { %v3117_v51 = vmul.f32 0.5, %v3113_v37  ;;  %v9558_v37 = vld [vmem:[%s14444_s1 + $0xcc] sm:$0xf] }
 0x264   : > { %v3118_v59 = vmul.f32 0.5, %v3114_v41  ;;  %3779 = vmatpush.bf16.msrb.mxu1 %v8142_v32  ;;  %3792 = vmatpush.bf16.msrb.mxu2 %v8146_v50  ;;  %v8123_v50 = vld [vmem:[%s14444_s1 + $0xb0] sm:$0xf0] }
 0x265   : > { %9843 = vtanh.f32 %v3117_v51  ;;  %v8150_v51 = vor.u32 %v9558_v37, %v8147_v38  ;;  %v8121_v38 = vld [vmem:[%s14444_s1 + $0xa0] sm:$0xf] }
 0x266   : > { %9845 = vtanh.f32 %v3118_v59 }
 0x267   : > { %3805 = vmatpush.bf16.msrb.mxu3 %v8150_v51  ;;  %v8129_v51 = vld [vmem:[%s14444_s1 + $0xa8] sm:$0xf] }
 0x268   : > { %v3096_v31 = vpop.f32.mrf.mxu2  ;;  %v3072_v43 = vpop.f32.mrf.mxu0 }
 0x269   : > { %v3115_v41 = vadd.f32 %v3096_v31, %v2898_v60  ;;  %v3109_v42 = vpop.f32.mrf.mxu3  ;;  %v3085_v55 = vpop.f32.mrf.mxu1  ;;  %v2891_v60 = vld [vmem:[#allocation4] sm:$0xff] }
 0x26a   : > { %v3116_v54 = vadd.f32 %v3109_v42, %v2899_v1  ;;  %v9553_v42 = vld [vmem:[%s14444_s1 + $0xa4] sm:$0xf] }
 0x26b   : > { %v3119_v56 = vmul.f32 0.5, %v3115_v41  ;;  %v9844_v59 = vpop.eup %9843  ;;  %v9555_v41 = vld [vmem:[%s14444_s1 + $0xac] sm:$0xf0]  ;;  %v8126_v55 = vor.u32 %v9553_v42, %v8123_v50  ;;  %v9548_v50 = vld [vmem:[%s14444_s1 + $0x74] sm:$0xf0] }
 0x26c   : > { %9847 = vtanh.f32 %v3116_v54  ;;  %v9846_v4 = vpop.eup %9845  ;;  %v3123_v5 = vmul.f32 0.5, %v9844_v59  ;;  %v8122_v43 = vor.u32 %v9555_v41, %v8121_v38  ;;  %v9556_v54 = vld [vmem:[%s14444_s1 + $0xb4] sm:$0xf0]  ;;  %v9554_v59 = vld [vmem:[%s14444_s1 + $0xac] sm:$0xf] }
 0x26d   : > { %9849 = vtanh.f32 %v3119_v56  ;;  %v3124_v8 = vmul.f32 0.5, %v9846_v4  ;;  %v8130_v56 = vor.u32 %v9556_v54, %v8129_v51  ;;  %v8131_v4 = vld [vmem:[%s14444_s1 + $0xb8] sm:$0xf0]  ;;  %3780 = vmatpush.bf16.msrb.mxu1 %v8126_v55  ;;  %v8091_v38 = vld [vmem:[%s14444_s1 + $0x70] sm:$0xf0] }
 0x26e   : > { %v3126_v13 = vadd.f32 0.5, %v3123_v5  ;;  %3767 = vmatpush.bf16.msrb.mxu0 %v8122_v43  ;;  %v8134_v5 = vor.u32 %v9554_v59, %v8131_v4  ;;  %v8097_v43 = vld [vmem:[%s14444_s1 + $0x68] sm:$0xf]  ;;  %v9546_v51 = vld [vmem:[%s14444_s1 + $0x6c] sm:$0xf] }
 0x26f   : > { %v3127_v14 = vadd.f32 0.5, %v3124_v8  ;;  %3793 = vmatpush.bf16.msrb.mxu2 %v8130_v56  ;;  %v8105_v8 = vld [vmem:[%s14444_s1 + $0x80] sm:$0xf]  ;;  %v8098_v54 = vor.u32 %v9548_v50, %v8097_v43  ;;  %v8099_v55 = vld [vmem:[%s14444_s1 + $0x78] sm:$0xf0] }
 0x270   : > { %v3098_v16 = vpop.f32.mrf.mxu2  ;;  %3806 = vmatpush.bf16.msrb.mxu3 %v8134_v5  ;;  %v8073_v56 = vld [vmem:[%s14444_s1 + $0x40] sm:$0xf]  ;;  %v9543_v59 = vld [vmem:[%s14444_s1 + $0x4c] sm:$0xf0]  ;;  %v8102_v4 = vor.u32 %v9546_v51, %v8099_v55  ;;  %v9541_v5 = vld [vmem:[%s14444_s1 + $0x44] sm:$0xf] }
 0x271   : > { %v3111_v17 = vpop.f32.mrf.mxu3  ;;  %v3130_v26 = vmul.f32 %v3127_v14, %v2891_v60  ;;  %v9549_v60 = vld [vmem:[%s14444_s1 + $0x84] sm:$0xf]  ;;  %v8107_v16 = vld [vmem:[%s14444_s1 + $0x90] sm:$0xf0]  ;;  %v8041_v51 = vld [vmem:[%s14444_s1] sm:$0xf] }
 0x272   : > { %v9848_v20 = vpop.eup %9847  ;;  %v8113_v17 = vld [vmem:[%s14444_s1 + $0x88] sm:$0xf]  ;;  %v9533_v55 = vld [vmem:[%s14444_s1 + $0x4] sm:$0xf] }
 0x273   : > { %v9850_v1 = vpop.eup %9849  ;;  %v3131_v27 = vmul.f32 %v9848_v20, %v3126_v13  ;;  %v9551_v13 = vld [vmem:[%s14444_s1 + $0x8c] sm:$0xf0]  ;;  %v9552_v20 = vld [vmem:[%s14444_s1 + $0x94] sm:$0xf0] }
 0x274   : > { %v3125_v30 = vmul.f32 0.5, %v9850_v1  ;;  %v8106_v14 = vor.u32 %v9551_v13, %v8105_v8  ;;  %v8114_v1 = vor.u32 %v9552_v20, %v8113_v17  ;;  %v8075_v8 = vld [vmem:[%s14444_s1 + $0x50] sm:$0xf0]  ;;  %v8081_v13 = vld [vmem:[%s14444_s1 + $0x48] sm:$0xf] }
 0x275   : > { %v12468_v25 = vadd.f32 %v3131_v27, %v3130_v26  ;;  %v8110_v26 = vor.u32 %v9549_v60, %v8107_v16  ;;  %v9550_v27 = vld [vmem:[%s14444_s1 + $0x8c] sm:$0xf]  ;;  %v8074_v60 = vor.u32 %v9543_v59, %v8073_v56  ;;  %v8083_v17 = vld [vmem:[%s14444_s1 + $0x58] sm:$0xf0]  ;;  %v8078_v20 = vor.u32 %v9541_v5, %v8075_v8  ;;  %v8043_v59 = vld [vmem:[%s14444_s1 + $0x10] sm:$0xf0] }
 0x276   : > { %v3128_v31 = vadd.f32 0.5, %v3125_v30  ;;  %v8115_v30 = vld [vmem:[%s14444_s1 + $0x98] sm:$0xf0]  ;;  %3768 = vmatpush.bf16.msrb.mxu0 %v8106_v14  ;;  %3794 = vmatpush.bf16.msrb.mxu2 %v8114_v1  ;;  %v9544_v14 = vld [vmem:[%s14444_s1 + $0x54] sm:$0xf0] }
 0x277   : > { %9851 = vtanh.f32 %v12468_v25  ;;  %3781 = vmatpush.bf16.msrb.mxu1 %v8110_v26  ;;  %v9542_v16 = vld [vmem:[%s14444_s1 + $0x4c] sm:$0xf]  ;;  %v8082_v26 = vor.u32 %v9544_v14, %v8081_v13  ;;  %v8057_v1 = vld [vmem:[%s14444_s1 + $0x20] sm:$0xf]  ;;  %v9536_v5 = vld [vmem:[%s14444_s1 + $0x14] sm:$0xf0]  ;;  %v8046_v14 = vor.u32 %v9533_v55, %v8043_v59 }
 0x278   : > { %v9534_v8 = vld [vmem:[%s14444_s1 + $0xc] sm:$0xf]  ;;  %v8051_v13 = vld [vmem:[%s14444_s1 + $0x18] sm:$0xf0]  ;;  %v3528_v55 = vld [vmem:[%s10069_s24 + $0x19] sm:$0x1] }
 0x279   : > { %v3529_v59 = vld [vmem:[%s10069_s24 + $0x21] sm:$0x1] }
 0x27a   : > { %3795 = vmatpush.bf16.msrb.mxu2 %v8098_v54  ;;  %v9535_v54 = vld [vmem:[%s14444_s1 + $0xc] sm:$0xf0] }
 0x27d   : > { %v9852_v32 = vpop.eup %9851 }
 0x27e   : > { %v3134_v33 = vmul.f32 %v9852_v32, %v3128_v31  ;;  %v8089_v31 = vld [vmem:[%s14444_s1 + $0x60] sm:$0xf]  ;;  %v8118_v32 = vor.u32 %v9550_v27, %v8115_v30  ;;  %v9539_v27 = vld [vmem:[%s14444_s1 + $0x2c] sm:$0xf0]  ;;  %v9537_v30 = vld [vmem:[%s14444_s1 + $0x24] sm:$0xf]  ;;  %3796 = vmatpush.bf16.msrb.mxu2 %v8082_v26 }
 0x280   : > { %v3450_v37 = vpack.c.bf16 %v3134_v33, %v3134_v33  ;;  %v9547_v33 = vld [vmem:[%s14444_s1 + $0x6c] sm:$0xf0]  ;;  %3807 = vmatpush.bf16.msrb.mxu3 %v8118_v32  ;;  %v8059_v32 = vld [vmem:[%s14444_s1 + $0x30] sm:$0xf0] }
 0x281   : > { %v8090_v41 = vor.u32 %v9547_v33, %v8089_v31  ;;  %v8086_v31 = vor.u32 %v9542_v16, %v8083_v17  ;;  %v8065_v33 = vld [vmem:[%s14444_s1 + $0x28] sm:$0xf]  ;;  %v8062_v43 = vor.u32 %v9537_v30, %v8059_v32  ;;  %v8054_v17 = vor.u32 %v9534_v8, %v8051_v13  ;;  %v3530_v13 = vld [vmem:[%s10069_s24 + $0x29] sm:$0x1] }
 0x282   : > { %3459 = vmatmul.bf16.vlgmr.msra.gmra.mxu0 %v3450_v37  ;;  %3472 = vmatmul.bf16.vlgmr.msra.gmra.mxu1 %v3450_v37 }
 0x283   : > { %3485 = vmatmul.bf16.vlgmr.msra.gmra.mxu2 %v3450_v37  ;;  %3498 = vmatmul.bf16.vlgmr.msra.gmra.mxu3 %v3450_v37  ;;  %v9545_v37 = vld [vmem:[%s14444_s1 + $0x64] sm:$0xf] }
 0x284   : > { %v8094_v42 = vor.u32 %v9545_v37, %v8091_v38  ;;  %3769 = vmatpush.bf16.msrb.mxu0 %v8090_v41  ;;  %3808 = vmatpush.bf16.msrb.mxu3 %v8102_v4  ;;  %v9540_v37 = vld [vmem:[%s14444_s1 + $0x34] sm:$0xf0]  ;;  %v9538_v38 = vld [vmem:[%s14444_s1 + $0x2c] sm:$0xf]  ;;  %v8067_v41 = vld [vmem:[%s14444_s1 + $0x38] sm:$0xf0] }
 0x285   : > { %v8066_v50 = vor.u32 %v9540_v37, %v8065_v33  ;;  %v8070_v56 = vor.u32 %v9538_v38, %v8067_v41  ;;  %v8049_v4 = vld [vmem:[%s14444_s1 + $0x8] sm:$0xf] }
 0x286   : > { %3782 = vmatpush.bf16.msrb.mxu1 %v8094_v42  ;;  %v8058_v42 = vor.u32 %v9539_v27, %v8057_v1  ;;  %v8050_v16 = vor.u32 %v9536_v5, %v8049_v4  ;;  %v3536_v5 = vpack.c.bf16 %v3528_v55, %v3528_v55 }
 0x287   : > { %3797 = vmatpush.bf16.msrb.mxu2 %v8066_v50  ;;  %v3527_v50 = vld [vmem:[%s10069_s24 + $0x11] sm:$0x1] }
 0x288   : > { %3770 = vmatpush.bf16.msrb.mxu0 %v8074_v60  ;;  %3809 = vmatpush.bf16.msrb.mxu3 %v8086_v31  ;;  %v8042_v60 = vor.u32 %v9535_v54, %v8041_v51  ;;  %v3525_v54 = vld [vmem:[%s10069_s24 + $0x1] sm:$0x1] }
 0x289   : > { %v3404_v26 = vpop.f32.mrf.mxu1  ;;  %v3533_v4 = vpack.c.bf16 %v3525_v54, %v3525_v54 }
 0x28a   : > { %3783 = vmatpush.bf16.msrb.mxu1 %v8078_v20  ;;  %v3391_v20 = vpop.f32.mrf.mxu0  ;;  %v3405_v27 = vadd.f32 %v3404_v26, %v10063_v10  ;;  %v3584_v26 = vunpack.c.l.b16 %v3536_v5 }
 0x28b   : > { %3798 = vmatpush.bf16.msrb.mxu2 %v8050_v16  ;;  %v3392_v1 = vadd.f32 %v3391_v20, %v10061_v9  ;;  %v3531_v16 = vld [vmem:[%s10069_s24 + $0x31] sm:$0x1]  ;;  %v3581_v20 = vunpack.c.l.b16 %v3533_v4 }
 0x28c   : > { %3771 = vmatpush.bf16.msrb.mxu0 %v8058_v42  ;;  %3810 = vmatpush.bf16.msrb.mxu3 %v8070_v56  ;;  %3439 = vst [vmem:[%s12622_s14 + $0x8] sm:$0xff] %v3405_v27  ;;  %v3535_v56 = vpack.c.bf16 %v3527_v50, %v3527_v50  ;;  %v3532_v27 = vld [vmem:[%s10069_s24 + $0x39] sm:$0x1] }
 0x28d   : > { %3438 = vst [vmem:[%s12622_s14] sm:$0xff] %v3392_v1 }
 0x28e   : > { %3784 = vmatpush.bf16.msrb.mxu1 %v8062_v43  ;;  %v3526_v43 = vld [vmem:[%s10069_s24 + $0x9] sm:$0x1] }
 0x28f   : > { %3860 = vmatpush.bf16.msra.mxu2 %v11903_v58  ;;  %v3534_v51 = vpack.c.bf16 %v3526_v43, %v3526_v43 }
 0x290   : > { %3772 = vmatpush.bf16.msrb.mxu0 %v8042_v60  ;;  %3811 = vmatpush.bf16.msrb.mxu3 %v8054_v17  ;;  %v3537_v60 = vpack.c.bf16 %v3529_v59, %v3529_v59  ;;  %v3538_v17 = vpack.c.bf16 %v3530_v13, %v3530_v13 }
 0x291   : > { %v3430_v30 = vpop.f32.mrf.mxu3  ;;  %v3406_v37 = vpop.f32.mrf.mxu1  ;;  %v3582_v8 = vunpack.c.l.b16 %v3534_v51 }
 0x292   : > { %3785 = vmatpush.bf16.msrb.mxu1 %v8046_v14  ;;  %v3417_v31 = vpop.f32.mrf.mxu2  ;;  %v3431_v32 = vadd.f32 %v3430_v30, %v10067_v12  ;;  %v3393_v33 = vpop.f32.mrf.mxu0  ;;  %v3583_v14 = vunpack.c.l.b16 %v3535_v56  ;;  %v3539_v30 = vpack.c.bf16 %v3531_v16, %v3531_v16  ;;  %v3586_v37 = vunpack.c.l.b16 %v3538_v17 }
 0x293   : > { %3861 = vmatpush.bf16.msra.mxu2 %v11942_v7  ;;  %v3418_v38 = vadd.f32 %v3417_v31, %v10065_v11  ;;  %v3589_v1 = vrot.slane %v3582_v8, 7  ;;  %v3585_v31 = vunpack.c.l.b16 %v3537_v60  ;;  %v3540_v33 = vpack.c.bf16 %v3532_v27, %v3532_v27  ;;  %v8293_v27 = vld [vmem:[%s14444_s1 + $0xe0] sm:$0xf] }
 0x294   : > { %3834 = vmatpush.bf16.msra.mxu0 %v11890_v53  ;;  %3873 = vmatpush.bf16.msra.mxu3 %v11915_v62  ;;  %3441 = vst [vmem:[%s12622_s14 + $0x18] sm:$0xff] %v3431_v32  ;;  %v3591_v32 = vrot.slane %v3583_v14, 6  ;;  %v3597_v55 = vrot.slane %v3586_v37, 3  ;;  %v8301_v37 = vld [vmem:[%s14444_s1 + $0xe8] sm:$0xf] }
 0x295   : > { %3440 = vst [vmem:[%s12622_s14 + $0x10] sm:$0xff] %v3418_v38  ;;  %v3590_v38 = vsel %vm3200_vm7, %v3589_v1, %v3581_v20  ;;  %v3595_v50 = vrot.slane %v3585_v31, 4  ;;  %v3588_v51 = vunpack.c.l.b16 %v3540_v33  ;;  %v9595_v31 = vld [vmem:[%s14444_s1 + $0xe4] sm:$0xf]  ;;  %v8295_v33 = vld [vmem:[%s14444_s1 + $0xf0] sm:$0xf0] }
 0x296   : > { %3847 = vmatpush.bf16.msra.mxu1 %v11901_v57  ;;  %v3592_v43 = vsel %vm3203_vm8, %v3591_v32, %v3590_v38  ;;  %v9598_v38 = vld [vmem:[%s14444_s1 + $0xf4] sm:$0xf0] }
 0x297   : > { %3862 = vmatpush.bf16.msra.mxu2 %v11980_v24  ;;  %v3601_v5 = vrot.slane %v3588_v51, 1  ;;  %v8298_v51 = vor.u32 %v9595_v31, %v8295_v33 }
 0x298   : > { %3835 = vmatpush.bf16.msra.mxu0 %v11928_v2  ;;  %3874 = vmatpush.bf16.msra.mxu3 %v11953_v15 }
 0x299   : > { %v3432_v41 = vpop.f32.mrf.mxu3 }
 0x29a   : > { %3848 = vmatpush.bf16.msra.mxu1 %v11930_v3  ;;  %v3419_v42 = vpop.f32.mrf.mxu2  ;;  %v3593_v41 = vrot.slane %v3584_v26, 5 }
 0x29b   : > { %3863 = vmatpush.bf16.msra.mxu2 %v12016_v36  ;;  %v3587_v42 = vunpack.c.l.b16 %v3539_v30  ;;  %v9597_v30 = vld [vmem:[%s14444_s1 + $0xec] sm:$0xf0] }
 0x29c   : > { %3836 = vmatpush.bf16.msra.mxu0 %v11965_v19  ;;  %3875 = vmatpush.bf16.msra.mxu3 %v11992_v28  ;;  %v3594_v54 = vsel %vm3206_vm9, %v3593_v41, %v3592_v43  ;;  %v8035_v14 = vld [vmem:[%s12414_s23 + $0x20] sm:$0xff]  ;;  %v8036_v16 = vld [vmem:[%s12414_s23 + $0x28] sm:$0xff]  ;;  %v8294_v32 = vor.u32 %v9597_v30, %v8293_v27  ;;  %v8037_v43 = vld [vmem:[%s12414_s23 + $0x30] sm:$0xff] }
 0x29d   : > { %v3596_v56 = vsel %vm3209_vm10, %v3595_v50, %v3594_v54  ;;  %v3599_v59 = vrot.slane %v3587_v42, 2  ;;  %v8038_v50 = vld [vmem:[%s12414_s23 + $0x38] sm:$0xff]  ;;  %v8302_v54 = vor.u32 %v9598_v38, %v8301_v37 }
 0x29e   : > { %3849 = vmatpush.bf16.msra.mxu1 %v11978_v23  ;;  %v3598_v4 = vsel %vm3212_vm11, %v3597_v55, %v3596_v56  ;;  %v9596_v55 = vld [vmem:[%s14444_s1 + $0xec] sm:$0xf]  ;;  %v8303_v56 = vld [vmem:[%s14444_s1 + $0xf8] sm:$0xf0] }
 0x29f   : > { %3864 = vmatpush.bf16.msra.mxu2 %v12052_v48  ;;  %v3600_v8 = vsel %vm3215_vm12, %v3599_v59, %v3598_v4  ;;  %v8306_v59 = vor.u32 %v9596_v55, %v8303_v56  ;;  %v8277_v4 = vld [vmem:[%s14444_s1 + $0xc0] sm:$0xf] }
 0x2a0   : > { %3837 = vmatpush.bf16.msra.mxu0 %v12010_v34  ;;  %3876 = vmatpush.bf16.msra.mxu3 %v12028_v40  ;;  %v3602_v13 = vsel %vm3218_vm13, %v3601_v5, %v3600_v8  ;;  %v9593_v5 = vld [vmem:[%s14444_s1 + $0xcc] sm:$0xf0]  ;;  %v9591_v8 = vld [vmem:[%s14444_s1 + $0xc4] sm:$0xf] }
 0x2a1   : > { %v3603_v60 = vpack.c.b16 %v3602_v13, %v3602_v13  ;;  %v8278_v13 = vor.u32 %v9593_v5, %v8277_v4 }
 0x2a2   : > { %3850 = vmatpush.bf16.msra.mxu1 %v12014_v35 }
 0x2a3   : > { %3865 = vmatpush.bf16.msra.mxu2 %v12088_v0  ;;  %3773 = vmatmul.bf16.vlgmr.msrb.gmra.mxu0 %v3603_v60 }
 0x2a4   : > { %3838 = vmatpush.bf16.msra.mxu0 %v12046_v46  ;;  %3877 = vmatpush.bf16.msra.mxu3 %v12064_v52 }
 0x2a5   : > { %3786 = vmatmul.bf16.vlgmr.msrb.gmra.mxu1 %v3603_v60  ;;  %3812 = vmatmul.bf16.vlgmr.msrb.gmra.mxu3 %v3603_v60 }
 0x2a6   : > { %3851 = vmatpush.bf16.msra.mxu1 %v12050_v47  ;;  %3799 = vmatmul.bf16.vlgmr.msrb.gmra.mxu2 %v3603_v60  ;;  %v8279_v60 = vld [vmem:[%s14444_s1 + $0xd0] sm:$0xf0] }
 0x2a7   : > { %3866 = vmatpush.bf16.msra.mxu2 %v12127_v22 }
 0x2a8   : > { %3839 = vmatpush.bf16.msra.mxu0 %v12082_v61  ;;  %3878 = vmatpush.bf16.msra.mxu3 %v12100_v6 }
 0x2aa   : > { %3852 = vmatpush.bf16.msra.mxu1 %v12086_v63 }
 0x2ab   : > { %3867 = vmatpush.bf16.msra.mxu2 %v12172_v45 }
 0x2ac   : > { %3840 = vmatpush.bf16.msra.mxu0 %v12118_v18  ;;  %3879 = vmatpush.bf16.msra.mxu3 %v12139_v29 }
 0x2ae   : > { %3853 = vmatpush.bf16.msra.mxu1 %v12125_v21 }
 0x2af   : > { %4174 = vmatpush.bf16.msrb.mxu2 %v8302_v54 }
 0x2b0   : > { %3841 = vmatpush.bf16.msra.mxu0 %v12160_v39  ;;  %3880 = vmatpush.bf16.msra.mxu3 %v12175_v49 }
 0x2b2   : > { %3854 = vmatpush.bf16.msra.mxu1 %v12170_v44 }
 0x2b4   : > { %4148 = vmatpush.bf16.msrb.mxu0 %v8294_v32  ;;  %4187 = vmatpush.bf16.msrb.mxu3 %v8306_v59 }
 0x2b6   : > { %4161 = vmatpush.bf16.msrb.mxu1 %v8298_v51 }
 0x2b8   : > { %4149 = vmatpush.bf16.msrb.mxu0 %v8278_v13 }
 0x2ff   : > { %v3460_v17 = vpop.f32.mrf.mxu0  ;;  %v3473_v20 = vpop.f32.mrf.mxu1 }
 0x300   : > { %v3503_v26 = vadd.f32 %v8035_v14, %v3460_v17  ;;  %v3504_v1 = vadd.f32 %v8036_v16, %v3473_v20  ;;  %v8285_v14 = vld [vmem:[%s14444_s1 + $0xc8] sm:$0xf]  ;;  %v9594_v16 = vld [vmem:[%s14444_s1 + $0xd4] sm:$0xf0]  ;;  %v8282_v17 = vor.u32 %v9591_v8, %v8279_v60 }
 0x301   : > { %v8286_v20 = vor.u32 %v9594_v16, %v8285_v14 }
 0x302   : > { %v3507_v41 = vmul.f32 0.5, %v3503_v26  ;;  %v3508_v42 = vmul.f32 0.5, %v3504_v1  ;;  %v9592_v26 = vld [vmem:[%s14444_s1 + $0xcc] sm:$0xf]  ;;  %v8287_v1 = vld [vmem:[%s14444_s1 + $0xd8] sm:$0xf0]  ;;  %4162 = vmatpush.bf16.msrb.mxu1 %v8282_v17 }
 0x303   : > { %v8290_v31 = vor.u32 %v9592_v26, %v8287_v1  ;;  %4175 = vmatpush.bf16.msrb.mxu2 %v8286_v20  ;;  %v8261_v1 = vld [vmem:[%s14444_s1 + $0xa0] sm:$0xf] }
 0x304   : > { %9853 = vtanh.f32 %v3507_v41 }
 0x305   : > { %9855 = vtanh.f32 %v3508_v42  ;;  %4188 = vmatpush.bf16.msrb.mxu3 %v8290_v31  ;;  %v8263_v31 = vld [vmem:[%s14444_s1 + $0xb0] sm:$0xf0] }
 0x306   : > { %v3486_v27 = vpop.f32.mrf.mxu2  ;;  %v3499_v30 = vpop.f32.mrf.mxu3 }
 0x307   : > { %v3505_v32 = vadd.f32 %v8037_v43, %v3486_v27  ;;  %v3506_v33 = vadd.f32 %v8038_v50, %v3499_v30  ;;  %v3462_v37 = vpop.f32.mrf.mxu0  ;;  %v3475_v38 = vpop.f32.mrf.mxu1  ;;  %v9587_v27 = vld [vmem:[%s14444_s1 + $0xa4] sm:$0xf] }
 0x308   : > { %v8266_v37 = vor.u32 %v9587_v27, %v8263_v31  ;;  %v9582_v31 = vld [vmem:[%s14444_s1 + $0x74] sm:$0xf0] }
 0x309   : > { %v3509_v41 = vmul.f32 0.5, %v3505_v32  ;;  %9857 = vtanh.f32 %v3506_v33  ;;  %v8269_v32 = vld [vmem:[%s14444_s1 + $0xa8] sm:$0xf]  ;;  %v9590_v33 = vld [vmem:[%s14444_s1 + $0xb4] sm:$0xf0] }
 0x30a   : > { %v9854_v42 = vpop.eup %9853  ;;  %v8270_v38 = vor.u32 %v9590_v33, %v8269_v32  ;;  %4163 = vmatpush.bf16.msrb.mxu1 %v8266_v37  ;;  %v9580_v32 = vld [vmem:[%s14444_s1 + $0x6c] sm:$0xf]  ;;  %v8239_v37 = vld [vmem:[%s14444_s1 + $0x78] sm:$0xf0] }
 0x30b   : > { %v9856_v51 = vpop.eup %9855  ;;  %v3513_v54 = vmul.f32 0.5, %v9854_v42  ;;  %9859 = vtanh.f32 %v3509_v41  ;;  %v9588_v41 = vld [vmem:[%s14444_s1 + $0xac] sm:$0xf]  ;;  %v8271_v42 = vld [vmem:[%s14444_s1 + $0xb8] sm:$0xf0] }
 0x30c   : > { %v3514_v55 = vmul.f32 0.5, %v9856_v51  ;;  %v8274_v51 = vor.u32 %v9588_v41, %v8271_v42  ;;  %4176 = vmatpush.bf16.msrb.mxu2 %v8270_v38  ;;  %v8213_v38 = vld [vmem:[%s14444_s1 + $0x40] sm:$0xf]  ;;  %v9577_v41 = vld [vmem:[%s14444_s1 + $0x4c] sm:$0xf0]  ;;  %v8242_v42 = vor.u32 %v9580_v32, %v8239_v37 }
 0x30d   : > { %v3516_v56 = vadd.f32 0.5, %v3513_v54  ;;  %v8245_v54 = vld [vmem:[%s14444_s1 + $0x80] sm:$0xf]  ;;  %v9567_v37 = vld [vmem:[%s14444_s1 + $0x4] sm:$0xf] }
 0x30e   : > { %v3517_v59 = vadd.f32 0.5, %v3514_v55  ;;  %v3488_v4 = vpop.f32.mrf.mxu2  ;;  %v3501_v5 = vpop.f32.mrf.mxu3  ;;  %4189 = vmatpush.bf16.msrb.mxu3 %v8274_v51  ;;  %v9585_v55 = vld [vmem:[%s14444_s1 + $0x8c] sm:$0xf0]  ;;  %v9575_v51 = vld [vmem:[%s14444_s1 + $0x44] sm:$0xf] }
 0x30f   : > { %v9858_v8 = vpop.eup %9857  ;;  %v8247_v4 = vld [vmem:[%s14444_s1 + $0x90] sm:$0xf0]  ;;  %v8253_v5 = vld [vmem:[%s14444_s1 + $0x88] sm:$0xf]  ;;  %v8181_v32 = vld [vmem:[%s14444_s1] sm:$0xf] }
 0x310   : > { %v3520_v43 = vmul.f32 %v3517_v59, %v12468_v25  ;;  %v3521_v50 = vmul.f32 %v9858_v8, %v3516_v56  ;;  %v9589_v25 = vld [vmem:[%s14444_s1 + $0xac] sm:$0xf0]  ;;  %v9583_v56 = vld [vmem:[%s14444_s1 + $0x84] sm:$0xf]  ;;  %v8246_v59 = vor.u32 %v9585_v55, %v8245_v54  ;;  %v9586_v8 = vld [vmem:[%s14444_s1 + $0x94] sm:$0xf0] }
 0x311   : > { %v9860_v60 = vpop.eup %9859  ;;  %v8262_v30 = vor.u32 %v9589_v25, %v8261_v1  ;;  %v8231_v1 = vld [vmem:[%s14444_s1 + $0x70] sm:$0xf0]  ;;  %v8221_v55 = vld [vmem:[%s14444_s1 + $0x48] sm:$0xf] }
 0x312   : > { %v12726_v13 = vadd.f32 %v3521_v50, %v3520_v43  ;;  %v3515_v14 = vmul.f32 0.5, %v9860_v60  ;;  %v8250_v43 = vor.u32 %v9583_v56, %v8247_v4  ;;  %v8254_v50 = vor.u32 %v9586_v8, %v8253_v5  ;;  %v9584_v60 = vld [vmem:[%s14444_s1 + $0x8c] sm:$0xf]  ;;  %v8215_v54 = vld [vmem:[%s14444_s1 + $0x50] sm:$0xf0] }
 0x313   : > { %4150 = vmatpush.bf16.msrb.mxu0 %v8262_v30  ;;  %v8237_v30 = vld [vmem:[%s14444_s1 + $0x68] sm:$0xf]  ;;  %v8214_v56 = vor.u32 %v9577_v41, %v8213_v38  ;;  %v9576_v4 = vld [vmem:[%s14444_s1 + $0x4c] sm:$0xf]  ;;  %v8223_v5 = vld [vmem:[%s14444_s1 + $0x58] sm:$0xf0]  ;;  %v8218_v8 = vor.u32 %v9575_v51, %v8215_v54 }
 0x314   : > { %9861 = vtanh.f32 %v12726_v13  ;;  %v3518_v16 = vadd.f32 0.5, %v3515_v14  ;;  %v8255_v14 = vld [vmem:[%s14444_s1 + $0x98] sm:$0xf0]  ;;  %4164 = vmatpush.bf16.msrb.mxu1 %v8250_v43  ;;  %4177 = vmatpush.bf16.msrb.mxu2 %v8254_v50  ;;  %v8238_v33 = vor.u32 %v9582_v31, %v8237_v30  ;;  %v8197_v50 = vld [vmem:[%s14444_s1 + $0x20] sm:$0xf] }
 0x315   : > { %v8183_v41 = vld [vmem:[%s14444_s1 + $0x10] sm:$0xf0]  ;;  %v9570_v51 = vld [vmem:[%s14444_s1 + $0x14] sm:$0xf0]  ;;  %v9568_v54 = vld [vmem:[%s14444_s1 + $0xc] sm:$0xf] }
 0x317   : > { %4151 = vmatpush.bf16.msrb.mxu0 %v8246_v59  ;;  %v9578_v59 = vld [vmem:[%s14444_s1 + $0x54] sm:$0xf0] }
 0x318   : > { %4178 = vmatpush.bf16.msrb.mxu2 %v8238_v33  ;;  %v8222_v43 = vor.u32 %v9578_v59, %v8221_v55  ;;  %v9569_v33 = vld [vmem:[%s14444_s1 + $0xc] sm:$0xf0]  ;;  %v8191_v55 = vld [vmem:[%s14444_s1 + $0x18] sm:$0xf0]  ;;  %v8186_v59 = vor.u32 %v9567_v37, %v8183_v41  ;;  %v3911_v37 = vld [vmem:[%s10069_s24 + $0x1a] sm:$0x1] }
 0x319   : > { %v3912_v41 = vld [vmem:[%s10069_s24 + $0x22] sm:$0x1] }
 0x31a   : > { %v9862_v17 = vpop.eup %9861 }
 0x31b   : > { %v3524_v20 = vmul.f32 %v9862_v17, %v3518_v16  ;;  %v8229_v16 = vld [vmem:[%s14444_s1 + $0x60] sm:$0xf]  ;;  %v8258_v17 = vor.u32 %v9584_v60, %v8255_v14  ;;  %v9573_v60 = vld [vmem:[%s14444_s1 + $0x2c] sm:$0xf0]  ;;  %v9571_v14 = vld [vmem:[%s14444_s1 + $0x24] sm:$0xf] }
 0x31c   : > { %4179 = vmatpush.bf16.msrb.mxu2 %v8222_v43 }
 0x31d   : > { %v3833_v26 = vpack.c.bf16 %v3524_v20, %v3524_v20  ;;  %v9581_v20 = vld [vmem:[%s14444_s1 + $0x6c] sm:$0xf0]  ;;  %4190 = vmatpush.bf16.msrb.mxu3 %v8258_v17  ;;  %v8199_v17 = vld [vmem:[%s14444_s1 + $0x30] sm:$0xf0] }
 0x31e   : > { %v8230_v25 = vor.u32 %v9581_v20, %v8229_v16  ;;  %v8226_v16 = vor.u32 %v9576_v4, %v8223_v5  ;;  %v8205_v20 = vld [vmem:[%s14444_s1 + $0x28] sm:$0xf]  ;;  %v8202_v30 = vor.u32 %v9571_v14, %v8199_v17  ;;  %v8194_v5 = vor.u32 %v9568_v54, %v8191_v55  ;;  %v3913_v55 = vld [vmem:[%s10069_s24 + $0x2a] sm:$0x1] }
 0x31f   : > { %3842 = vmatmul.bf16.vlgmr.msra.gmra.mxu0 %v3833_v26  ;;  %3855 = vmatmul.bf16.vlgmr.msra.gmra.mxu1 %v3833_v26 }
 0x320   : > { %3868 = vmatmul.bf16.vlgmr.msra.gmra.mxu2 %v3833_v26  ;;  %3881 = vmatmul.bf16.vlgmr.msra.gmra.mxu3 %v3833_v26  ;;  %v9579_v26 = vld [vmem:[%s14444_s1 + $0x64] sm:$0xf] }
 0x321   : > { %v8234_v27 = vor.u32 %v9579_v26, %v8231_v1  ;;  %4152 = vmatpush.bf16.msrb.mxu0 %v8230_v25  ;;  %4191 = vmatpush.bf16.msrb.mxu3 %v8242_v42  ;;  %v9574_v26 = vld [vmem:[%s14444_s1 + $0x34] sm:$0xf0]  ;;  %v9572_v1 = vld [vmem:[%s14444_s1 + $0x2c] sm:$0xf]  ;;  %v8207_v25 = vld [vmem:[%s14444_s1 + $0x38] sm:$0xf0] }
 0x322   : > { %v8206_v31 = vor.u32 %v9574_v26, %v8205_v20  ;;  %v8210_v38 = vor.u32 %v9572_v1, %v8207_v25  ;;  %v8189_v42 = vld [vmem:[%s14444_s1 + $0x8] sm:$0xf]  ;;  %v3787_v43 = vpop.f32.mrf.mxu1 }
 0x323   : > { %4165 = vmatpush.bf16.msrb.mxu1 %v8234_v27  ;;  %v8198_v27 = vor.u32 %v9573_v60, %v8197_v50  ;;  %v8190_v4 = vor.u32 %v9570_v51, %v8189_v42  ;;  %v3788_v60 = vadd.f32 %v3787_v43, %v10063_v10  ;;  %v3919_v51 = vpack.c.bf16 %v3911_v37, %v3911_v37 }
 0x324   : > { %4180 = vmatpush.bf16.msrb.mxu2 %v8206_v31  ;;  %v3910_v31 = vld [vmem:[%s10069_s24 + $0x12] sm:$0x1] }
 0x325   : > { %4153 = vmatpush.bf16.msrb.mxu0 %v8214_v56  ;;  %4192 = vmatpush.bf16.msrb.mxu3 %v8226_v16  ;;  %v8182_v56 = vor.u32 %v9569_v33, %v8181_v32  ;;  %8170 = vst [vmem:[%s12622_s14 + $0x28] sm:$0xff] %v3788_v60  ;;  %v3908_v33 = vld [vmem:[%s10069_s24 + $0x2] sm:$0x1]  ;;  %v3967_v43 = vunpack.c.l.b16 %v3919_v51  ;;  %v3915_v60 = vld [vmem:[%s10069_s24 + $0x3a] sm:$0x1] }
 0x326   : > { %v3916_v42 = vpack.c.bf16 %v3908_v33, %v3908_v33 }
 0x327   : > { %4166 = vmatpush.bf16.msrb.mxu1 %v8218_v8  ;;  %v3774_v8 = vpop.f32.mrf.mxu0 }
 0x328   : > { %4181 = vmatpush.bf16.msrb.mxu2 %v8190_v4  ;;  %v3775_v50 = vadd.f32 %v3774_v8, %v10061_v9  ;;  %v3813_v14 = vpop.f32.mrf.mxu3  ;;  %v3914_v4 = vld [vmem:[%s10069_s24 + $0x32] sm:$0x1]  ;;  %v3964_v8 = vunpack.c.l.b16 %v3916_v42 }
 0x329   : > { %4154 = vmatpush.bf16.msrb.mxu0 %v8198_v27  ;;  %4193 = vmatpush.bf16.msrb.mxu3 %v8210_v38  ;;  %v3800_v16 = vpop.f32.mrf.mxu2  ;;  %v3814_v17 = vadd.f32 %v3813_v14, %v10067_v12  ;;  %v3918_v38 = vpack.c.bf16 %v3910_v31, %v3910_v31  ;;  %v3922_v14 = vpack.c.bf16 %v3914_v4, %v3914_v4 }
 0x32a   : > { %8169 = vst [vmem:[%s12622_s14 + $0x20] sm:$0xff] %v3775_v50  ;;  %v3789_v26 = vpop.f32.mrf.mxu1  ;;  %v3801_v1 = vadd.f32 %v3800_v16, %v10065_v11 }
 0x32b   : > { %4167 = vmatpush.bf16.msrb.mxu1 %v8202_v30  ;;  %8172 = vst [vmem:[%s12622_s14 + $0x38] sm:$0xff] %v3814_v17  ;;  %v3909_v30 = vld [vmem:[%s10069_s24 + $0xa] sm:$0x1] }
 0x32c   : > { %4243 = vmatpush.bf16.msra.mxu2 %v11903_v58  ;;  %8171 = vst [vmem:[%s12622_s14 + $0x30] sm:$0xff] %v3801_v1  ;;  %v3917_v32 = vpack.c.bf16 %v3909_v30, %v3909_v30 }
 0x32d   : > { %4155 = vmatpush.bf16.msrb.mxu0 %v8182_v56  ;;  %4194 = vmatpush.bf16.msrb.mxu3 %v8194_v5  ;;  %v3920_v56 = vpack.c.bf16 %v3912_v41, %v3912_v41  ;;  %v3921_v5 = vpack.c.bf16 %v3913_v55, %v3913_v55 }
 0x32e   : > { %v3965_v54 = vunpack.c.l.b16 %v3917_v32 }
 0x32f   : > { %4168 = vmatpush.bf16.msrb.mxu1 %v8186_v59  ;;  %v3776_v20 = vpop.f32.mrf.mxu0  ;;  %v3966_v59 = vunpack.c.l.b16 %v3918_v38  ;;  %v3968_v16 = vunpack.c.l.b16 %v3920_v56  ;;  %v3969_v26 = vunpack.c.l.b16 %v3921_v5 }
 0x330   : > { %4244 = vmatpush.bf16.msra.mxu2 %v11942_v7  ;;  %v3815_v25 = vpop.f32.mrf.mxu3  ;;  %v3972_v50 = vrot.slane %v3965_v54, 7  ;;  %v3923_v20 = vpack.c.bf16 %v3915_v60, %v3915_v60  ;;  %v8433_v60 = vld [vmem:[%s14444_s1 + $0xe0] sm:$0xf] }
 0x331   : > { %4217 = vmatpush.bf16.msra.mxu0 %v11890_v53  ;;  %4256 = vmatpush.bf16.msra.mxu3 %v11915_v62  ;;  %v3802_v27 = vpop.f32.mrf.mxu2  ;;  %v3974_v17 = vrot.slane %v3966_v59, 6  ;;  %v3976_v25 = vrot.slane %v3967_v43, 5  ;;  %v3978_v31 = vrot.slane %v3968_v16, 4  ;;  %v3980_v37 = vrot.slane %v3969_v26, 3  ;;  %v9629_v16 = vld [vmem:[%s14444_s1 + $0xe4] sm:$0xf] }
 0x332   : > { %v3973_v1 = vsel %vm3200_vm7, %v3972_v50, %v3964_v8  ;;  %v3970_v27 = vunpack.c.l.b16 %v3922_v14  ;;  %v3971_v32 = vunpack.c.l.b16 %v3923_v20  ;;  %v9631_v14 = vld [vmem:[%s14444_s1 + $0xec] sm:$0xf0]  ;;  %v8435_v20 = vld [vmem:[%s14444_s1 + $0xf0] sm:$0xf0]  ;;  %v8441_v26 = vld [vmem:[%s14444_s1 + $0xe8] sm:$0xf] }
 0x333   : > { %4230 = vmatpush.bf16.msra.mxu1 %v11901_v57  ;;  %v3975_v30 = vsel %vm3203_vm8, %v3974_v17, %v3973_v1  ;;  %v8175_v59 = vld [vmem:[%s12414_s23 + $0x40] sm:$0xff]  ;;  %v8176_v4 = vld [vmem:[%s12414_s23 + $0x48] sm:$0xff]  ;;  %v8434_v17 = vor.u32 %v9631_v14, %v8433_v60  ;;  %v9632_v1 = vld [vmem:[%s14444_s1 + $0xf4] sm:$0xf0] }
 0x334   : > { %4245 = vmatpush.bf16.msra.mxu2 %v11980_v24  ;;  %v3977_v33 = vsel %vm3206_vm9, %v3976_v25, %v3975_v30  ;;  %v3982_v41 = vrot.slane %v3970_v27, 2  ;;  %v3984_v51 = vrot.slane %v3971_v32, 1  ;;  %v8177_v30 = vld [vmem:[%s12414_s23 + $0x50] sm:$0xff]  ;;  %v8438_v32 = vor.u32 %v9629_v16, %v8435_v20 }
 0x335   : > { %4218 = vmatpush.bf16.msra.mxu0 %v11928_v2  ;;  %4257 = vmatpush.bf16.msra.mxu3 %v11953_v15  ;;  %v3979_v38 = vsel %vm3209_vm10, %v3978_v31, %v3977_v33  ;;  %v8178_v31 = vld [vmem:[%s12414_s23 + $0x58] sm:$0xff]  ;;  %v8442_v33 = vor.u32 %v9632_v1, %v8441_v26 }
 0x336   : > { %v3981_v42 = vsel %vm3212_vm11, %v3980_v37, %v3979_v38  ;;  %v9630_v37 = vld [vmem:[%s14444_s1 + $0xec] sm:$0xf]  ;;  %v8443_v38 = vld [vmem:[%s14444_s1 + $0xf8] sm:$0xf0] }
 0x337   : > { %4231 = vmatpush.bf16.msra.mxu1 %v11930_v3  ;;  %v3983_v54 = vsel %vm3215_vm12, %v3982_v41, %v3981_v42  ;;  %v8446_v41 = vor.u32 %v9630_v37, %v8443_v38  ;;  %v8417_v42 = vld [vmem:[%s14444_s1 + $0xc0] sm:$0xf] }
 0x338   : > { %4246 = vmatpush.bf16.msra.mxu2 %v12016_v36  ;;  %v3985_v55 = vsel %vm3218_vm13, %v3984_v51, %v3983_v54  ;;  %v9627_v51 = vld [vmem:[%s14444_s1 + $0xcc] sm:$0xf0]  ;;  %v9625_v54 = vld [vmem:[%s14444_s1 + $0xc4] sm:$0xf] }
 0x339   : > { %4219 = vmatpush.bf16.msra.mxu0 %v11965_v19  ;;  %4258 = vmatpush.bf16.msra.mxu3 %v11992_v28  ;;  %v3986_v56 = vpack.c.b16 %v3985_v55, %v3985_v55  ;;  %v8418_v55 = vor.u32 %v9627_v51, %v8417_v42 }
 0x33b   : > { %4232 = vmatpush.bf16.msra.mxu1 %v11978_v23  ;;  %4156 = vmatmul.bf16.vlgmr.msrb.gmra.mxu0 %v3986_v56 }
 0x33c   : > { %4247 = vmatpush.bf16.msra.mxu2 %v12052_v48  ;;  %4169 = vmatmul.bf16.vlgmr.msrb.gmra.mxu1 %v3986_v56 }
 0x33d   : > { %4220 = vmatpush.bf16.msra.mxu0 %v12010_v34  ;;  %4259 = vmatpush.bf16.msra.mxu3 %v12028_v40 }
 0x33e   : > { %4195 = vmatmul.bf16.vlgmr.msrb.gmra.mxu3 %v3986_v56  ;;  %4182 = vmatmul.bf16.vlgmr.msrb.gmra.mxu2 %v3986_v56  ;;  %v8419_v56 = vld [vmem:[%s14444_s1 + $0xd0] sm:$0xf0] }
 0x33f   : > { %4233 = vmatpush.bf16.msra.mxu1 %v12014_v35 }
 0x340   : > { %4248 = vmatpush.bf16.msra.mxu2 %v12088_v0 }
 0x341   : > { %4221 = vmatpush.bf16.msra.mxu0 %v12046_v46  ;;  %4260 = vmatpush.bf16.msra.mxu3 %v12064_v52 }
 0x343   : > { %4234 = vmatpush.bf16.msra.mxu1 %v12050_v47 }
 0x344   : > { %4249 = vmatpush.bf16.msra.mxu2 %v12127_v22 }
 0x345   : > { %4222 = vmatpush.bf16.msra.mxu0 %v12082_v61  ;;  %4261 = vmatpush.bf16.msra.mxu3 %v12100_v6 }
 0x347   : > { %4235 = vmatpush.bf16.msra.mxu1 %v12086_v63 }
 0x348   : > { %4250 = vmatpush.bf16.msra.mxu2 %v12172_v45 }
 0x349   : > { %4223 = vmatpush.bf16.msra.mxu0 %v12118_v18  ;;  %4262 = vmatpush.bf16.msra.mxu3 %v12139_v29 }
 0x34b   : > { %4236 = vmatpush.bf16.msra.mxu1 %v12125_v21 }
 0x34c   : > { %4557 = vmatpush.bf16.msrb.mxu2 %v8442_v33 }
 0x34d   : > { %4224 = vmatpush.bf16.msra.mxu0 %v12160_v39  ;;  %4263 = vmatpush.bf16.msra.mxu3 %v12175_v49 }
 0x34f   : > { %4237 = vmatpush.bf16.msra.mxu1 %v12170_v44 }
 0x351   : > { %4531 = vmatpush.bf16.msrb.mxu0 %v8434_v17  ;;  %4570 = vmatpush.bf16.msrb.mxu3 %v8446_v41 }
 0x353   : > { %4544 = vmatpush.bf16.msrb.mxu1 %v8438_v32 }
 0x355   : > { %4532 = vmatpush.bf16.msrb.mxu0 %v8418_v55 }
 0x39c   : > { %v3843_v5 = vpop.f32.mrf.mxu0  ;;  %v3856_v8 = vpop.f32.mrf.mxu1 }
 0x39d   : > { %v3886_v43 = vadd.f32 %v8175_v59, %v3843_v5  ;;  %v3887_v50 = vadd.f32 %v8176_v4, %v3856_v8  ;;  %v8425_v59 = vld [vmem:[%s14444_s1 + $0xc8] sm:$0xf]  ;;  %v9628_v4 = vld [vmem:[%s14444_s1 + $0xd4] sm:$0xf0]  ;;  %v8422_v5 = vor.u32 %v9625_v54, %v8419_v56 }
 0x39e   : > { %v8426_v8 = vor.u32 %v9628_v4, %v8425_v59 }
 0x39f   : > { %v3890_v25 = vmul.f32 0.5, %v3886_v43  ;;  %v3891_v27 = vmul.f32 0.5, %v3887_v50  ;;  %v9626_v43 = vld [vmem:[%s14444_s1 + $0xcc] sm:$0xf]  ;;  %v8427_v50 = vld [vmem:[%s14444_s1 + $0xd8] sm:$0xf0]  ;;  %4545 = vmatpush.bf16.msrb.mxu1 %v8422_v5 }
 0x3a0   : > { %v8430_v16 = vor.u32 %v9626_v43, %v8427_v50  ;;  %4558 = vmatpush.bf16.msrb.mxu2 %v8426_v8  ;;  %v8401_v50 = vld [vmem:[%s14444_s1 + $0xa0] sm:$0xf] }
 0x3a1   : > { %9863 = vtanh.f32 %v3890_v25 }
 0x3a2   : > { %9865 = vtanh.f32 %v3891_v27  ;;  %4571 = vmatpush.bf16.msrb.mxu3 %v8430_v16  ;;  %v8403_v16 = vld [vmem:[%s14444_s1 + $0xb0] sm:$0xf0] }
 0x3a3   : > { %v3869_v60 = vpop.f32.mrf.mxu2  ;;  %v3882_v14 = vpop.f32.mrf.mxu3 }
 0x3a4   : > { %v3888_v17 = vadd.f32 %v8177_v30, %v3869_v60  ;;  %v3889_v20 = vadd.f32 %v8178_v31, %v3882_v14  ;;  %v3845_v26 = vpop.f32.mrf.mxu0  ;;  %v3858_v1 = vpop.f32.mrf.mxu1  ;;  %v9621_v60 = vld [vmem:[%s14444_s1 + $0xa4] sm:$0xf] }
 0x3a5   : > { %v8406_v26 = vor.u32 %v9621_v60, %v8403_v16  ;;  %v9616_v16 = vld [vmem:[%s14444_s1 + $0x74] sm:$0xf0] }
 0x3a6   : > { %v3892_v25 = vmul.f32 0.5, %v3888_v17  ;;  %9867 = vtanh.f32 %v3889_v20  ;;  %v8409_v17 = vld [vmem:[%s14444_s1 + $0xa8] sm:$0xf]  ;;  %v9624_v20 = vld [vmem:[%s14444_s1 + $0xb4] sm:$0xf0] }
 0x3a7   : > { %v9864_v27 = vpop.eup %9863  ;;  %v8410_v1 = vor.u32 %v9624_v20, %v8409_v17  ;;  %4546 = vmatpush.bf16.msrb.mxu1 %v8406_v26  ;;  %v9614_v17 = vld [vmem:[%s14444_s1 + $0x6c] sm:$0xf]  ;;  %v8379_v26 = vld [vmem:[%s14444_s1 + $0x78] sm:$0xf0] }
 0x3a8   : > { %v9866_v32 = vpop.eup %9865  ;;  %v3896_v33 = vmul.f32 0.5, %v9864_v27  ;;  %9869 = vtanh.f32 %v3892_v25  ;;  %v9622_v25 = vld [vmem:[%s14444_s1 + $0xac] sm:$0xf]  ;;  %v8411_v27 = vld [vmem:[%s14444_s1 + $0xb8] sm:$0xf0] }
 0x3a9   : > { %v3897_v37 = vmul.f32 0.5, %v9866_v32  ;;  %v8414_v32 = vor.u32 %v9622_v25, %v8411_v27  ;;  %4559 = vmatpush.bf16.msrb.mxu2 %v8410_v1  ;;  %v8353_v1 = vld [vmem:[%s14444_s1 + $0x40] sm:$0xf]  ;;  %v9611_v25 = vld [vmem:[%s14444_s1 + $0x4c] sm:$0xf0]  ;;  %v8382_v27 = vor.u32 %v9614_v17, %v8379_v26 }
 0x3aa   : > { %v3899_v38 = vadd.f32 0.5, %v3896_v33  ;;  %v8385_v33 = vld [vmem:[%s14444_s1 + $0x80] sm:$0xf]  ;;  %v9601_v26 = vld [vmem:[%s14444_s1 + $0x4] sm:$0xf] }
 0x3ab   : > { %v3900_v41 = vadd.f32 0.5, %v3897_v37  ;;  %v3871_v42 = vpop.f32.mrf.mxu2  ;;  %v3884_v51 = vpop.f32.mrf.mxu3  ;;  %4572 = vmatpush.bf16.msrb.mxu3 %v8414_v32  ;;  %v9619_v37 = vld [vmem:[%s14444_s1 + $0x8c] sm:$0xf0]  ;;  %v9609_v32 = vld [vmem:[%s14444_s1 + $0x44] sm:$0xf] }
 0x3ac   : > { %v9868_v54 = vpop.eup %9867  ;;  %v8387_v42 = vld [vmem:[%s14444_s1 + $0x90] sm:$0xf0]  ;;  %v8393_v51 = vld [vmem:[%s14444_s1 + $0x88] sm:$0xf]  ;;  %v8321_v17 = vld [vmem:[%s14444_s1] sm:$0xf] }
 0x3ad   : > { %v3903_v30 = vmul.f32 %v3900_v41, %v12726_v13  ;;  %v3904_v31 = vmul.f32 %v9868_v54, %v3899_v38  ;;  %v9623_v13 = vld [vmem:[%s14444_s1 + $0xac] sm:$0xf0]  ;;  %v9617_v38 = vld [vmem:[%s14444_s1 + $0x84] sm:$0xf]  ;;  %v8386_v41 = vor.u32 %v9619_v37, %v8385_v33  ;;  %v9620_v54 = vld [vmem:[%s14444_s1 + $0x94] sm:$0xf0] }
 0x3ae   : > { %v9870_v56 = vpop.eup %9869  ;;  %v8402_v14 = vor.u32 %v9623_v13, %v8401_v50  ;;  %v8371_v50 = vld [vmem:[%s14444_s1 + $0x70] sm:$0xf0]  ;;  %v8361_v37 = vld [vmem:[%s14444_s1 + $0x48] sm:$0xf] }
 0x3af   : > { %v12981_v55 = vadd.f32 %v3904_v31, %v3903_v30  ;;  %v3898_v59 = vmul.f32 0.5, %v9870_v56  ;;  %v8390_v30 = vor.u32 %v9617_v38, %v8387_v42  ;;  %v8394_v31 = vor.u32 %v9620_v54, %v8393_v51  ;;  %v9618_v56 = vld [vmem:[%s14444_s1 + $0x8c] sm:$0xf]  ;;  %v8355_v33 = vld [vmem:[%s14444_s1 + $0x50] sm:$0xf0] }
 0x3b0   : > { %4533 = vmatpush.bf16.msrb.mxu0 %v8402_v14  ;;  %v8377_v14 = vld [vmem:[%s14444_s1 + $0x68] sm:$0xf]  ;;  %v8354_v38 = vor.u32 %v9611_v25, %v8353_v1  ;;  %v9610_v42 = vld [vmem:[%s14444_s1 + $0x4c] sm:$0xf]  ;;  %v8363_v51 = vld [vmem:[%s14444_s1 + $0x58] sm:$0xf0]  ;;  %v8358_v54 = vor.u32 %v9609_v32, %v8355_v33 }
 0x3b1   : > { %9871 = vtanh.f32 %v12981_v55  ;;  %v3901_v4 = vadd.f32 0.5, %v3898_v59  ;;  %v8395_v59 = vld [vmem:[%s14444_s1 + $0x98] sm:$0xf0]  ;;  %4547 = vmatpush.bf16.msrb.mxu1 %v8390_v30  ;;  %4560 = vmatpush.bf16.msrb.mxu2 %v8394_v31  ;;  %v8378_v20 = vor.u32 %v9616_v16, %v8377_v14  ;;  %v8337_v31 = vld [vmem:[%s14444_s1 + $0x20] sm:$0xf] }
 0x3b2   : > { %v8323_v25 = vld [vmem:[%s14444_s1 + $0x10] sm:$0xf0]  ;;  %v9604_v32 = vld [vmem:[%s14444_s1 + $0x14] sm:$0xf0]  ;;  %v9602_v33 = vld [vmem:[%s14444_s1 + $0xc] sm:$0xf] }
 0x3b4   : > { %4534 = vmatpush.bf16.msrb.mxu0 %v8386_v41  ;;  %v9612_v41 = vld [vmem:[%s14444_s1 + $0x54] sm:$0xf0] }
 0x3b5   : > { %4561 = vmatpush.bf16.msrb.mxu2 %v8378_v20  ;;  %v8362_v30 = vor.u32 %v9612_v41, %v8361_v37  ;;  %v9603_v20 = vld [vmem:[%s14444_s1 + $0xc] sm:$0xf0]  ;;  %v8331_v37 = vld [vmem:[%s14444_s1 + $0x18] sm:$0xf0]  ;;  %v8326_v41 = vor.u32 %v9601_v26, %v8323_v25  ;;  %v4294_v26 = vld [vmem:[%s10069_s24 + $0x1b] sm:$0x1] }
 0x3b6   : > { %v4295_v25 = vld [vmem:[%s10069_s24 + $0x23] sm:$0x1] }
 0x3b7   : > { %v9872_v5 = vpop.eup %9871 }
 0x3b8   : > { %v3907_v8 = vmul.f32 %v9872_v5, %v3901_v4  ;;  %v8369_v4 = vld [vmem:[%s14444_s1 + $0x60] sm:$0xf]  ;;  %v8398_v5 = vor.u32 %v9618_v56, %v8395_v59  ;;  %v9607_v56 = vld [vmem:[%s14444_s1 + $0x2c] sm:$0xf0]  ;;  %v9605_v59 = vld [vmem:[%s14444_s1 + $0x24] sm:$0xf] }
 0x3b9   : > { %4562 = vmatpush.bf16.msrb.mxu2 %v8362_v30  ;;  %v4170_v30 = vpop.f32.mrf.mxu1 }
 0x3ba   : > { %v4216_v43 = vpack.c.bf16 %v3907_v8, %v3907_v8  ;;  %v9615_v8 = vld [vmem:[%s14444_s1 + $0x6c] sm:$0xf0]  ;;  %4573 = vmatpush.bf16.msrb.mxu3 %v8398_v5  ;;  %v8339_v5 = vld [vmem:[%s14444_s1 + $0x30] sm:$0xf0] }
 0x3bb   : > { %v8370_v13 = vor.u32 %v9615_v8, %v8369_v4  ;;  %v8366_v4 = vor.u32 %v9610_v42, %v8363_v51  ;;  %v8345_v8 = vld [vmem:[%s14444_s1 + $0x28] sm:$0xf]  ;;  %v8342_v14 = vor.u32 %v9605_v59, %v8339_v5  ;;  %v8334_v51 = vor.u32 %v9602_v33, %v8331_v37  ;;  %v4296_v37 = vld [vmem:[%s10069_s24 + $0x2b] sm:$0x1] }
 0x3bc   : > { %4225 = vmatmul.bf16.vlgmr.msra.gmra.mxu0 %v4216_v43  ;;  %4238 = vmatmul.bf16.vlgmr.msra.gmra.mxu1 %v4216_v43 }
 0x3bd   : > { %4251 = vmatmul.bf16.vlgmr.msra.gmra.mxu2 %v4216_v43  ;;  %4264 = vmatmul.bf16.vlgmr.msra.gmra.mxu3 %v4216_v43  ;;  %v9613_v43 = vld [vmem:[%s14444_s1 + $0x64] sm:$0xf] }
 0x3be   : > { %v8374_v60 = vor.u32 %v9613_v43, %v8371_v50  ;;  %4535 = vmatpush.bf16.msrb.mxu0 %v8370_v13  ;;  %4574 = vmatpush.bf16.msrb.mxu3 %v8382_v27  ;;  %v9608_v43 = vld [vmem:[%s14444_s1 + $0x34] sm:$0xf0]  ;;  %v9606_v50 = vld [vmem:[%s14444_s1 + $0x2c] sm:$0xf]  ;;  %v8347_v13 = vld [vmem:[%s14444_s1 + $0x38] sm:$0xf0] }
 0x3bf   : > { %v8346_v16 = vor.u32 %v9608_v43, %v8345_v8  ;;  %v8350_v1 = vor.u32 %v9606_v50, %v8347_v13  ;;  %v8329_v27 = vld [vmem:[%s14444_s1 + $0x8] sm:$0xf] }
 0x3c0   : > { %4548 = vmatpush.bf16.msrb.mxu1 %v8374_v60  ;;  %v8338_v60 = vor.u32 %v9607_v56, %v8337_v31  ;;  %v8330_v42 = vor.u32 %v9604_v32, %v8329_v27  ;;  %v4171_v56 = vadd.f32 %v4170_v30, %v10063_v10  ;;  %v4302_v32 = vpack.c.bf16 %v4294_v26, %v4294_v26 }
 0x3c1   : > { %4563 = vmatpush.bf16.msrb.mxu2 %v8346_v16  ;;  %v4196_v59 = vpop.f32.mrf.mxu3  ;;  %v4172_v43 = vpop.f32.mrf.mxu1  ;;  %v4293_v16 = vld [vmem:[%s10069_s24 + $0x13] sm:$0x1] }
 0x3c2   : > { %4536 = vmatpush.bf16.msrb.mxu0 %v8354_v38  ;;  %4575 = vmatpush.bf16.msrb.mxu3 %v8366_v4  ;;  %v8322_v38 = vor.u32 %v9603_v20, %v8321_v17  ;;  %8310 = vst [vmem:[%s12622_s14 + $0x48] sm:$0xff] %v4171_v56  ;;  %v4183_v4 = vpop.f32.mrf.mxu2  ;;  %v4197_v5 = vadd.f32 %v4196_v59, %v10067_v12  ;;  %v4291_v20 = vld [vmem:[%s10069_s24 + $0x3] sm:$0x1]  ;;  %v4350_v30 = vunpack.c.l.b16 %v4302_v32  ;;  %v4298_v56 = vld [vmem:[%s10069_s24 + $0x3b] sm:$0x1] }
 0x3c3   : > { %v4184_v50 = vadd.f32 %v4183_v4, %v10065_v11  ;;  %v4299_v27 = vpack.c.bf16 %v4291_v20, %v4291_v20 }
 0x3c4   : > { %4549 = vmatpush.bf16.msrb.mxu1 %v8358_v54  ;;  %v4157_v54 = vpop.f32.mrf.mxu0  ;;  %8312 = vst [vmem:[%s12622_s14 + $0x58] sm:$0xff] %v4197_v5 }
 0x3c5   : > { %4564 = vmatpush.bf16.msrb.mxu2 %v8330_v42  ;;  %v4158_v31 = vadd.f32 %v4157_v54, %v10061_v9  ;;  %8311 = vst [vmem:[%s12622_s14 + $0x50] sm:$0xff] %v4184_v50  ;;  %v4297_v42 = vld [vmem:[%s10069_s24 + $0x33] sm:$0x1]  ;;  %v4347_v54 = vunpack.c.l.b16 %v4299_v27 }
 0x3c6   : > { %4537 = vmatpush.bf16.msrb.mxu0 %v8338_v60  ;;  %4576 = vmatpush.bf16.msrb.mxu3 %v8350_v1  ;;  %v4301_v1 = vpack.c.bf16 %v4293_v16, %v4293_v16  ;;  %v4305_v59 = vpack.c.bf16 %v4297_v42, %v4297_v42 }
 0x3c7   : > { %8309 = vst [vmem:[%s12622_s14 + $0x40] sm:$0xff] %v4158_v31 }
 0x3c8   : > { %4550 = vmatpush.bf16.msrb.mxu1 %v8342_v14  ;;  %v4292_v14 = vld [vmem:[%s10069_s24 + $0xb] sm:$0x1] }
 0x3c9   : > { %4626 = vmatpush.bf16.msra.mxu2 %v11903_v58  ;;  %v4198_v13 = vpop.f32.mrf.mxu3  ;;  %v4300_v17 = vpack.c.bf16 %v4292_v14, %v4292_v14 }
 0x3ca   : > { %4538 = vmatpush.bf16.msrb.mxu0 %v8322_v38  ;;  %4577 = vmatpush.bf16.msrb.mxu3 %v8334_v51  ;;  %v4185_v60 = vpop.f32.mrf.mxu2  ;;  %v4303_v38 = vpack.c.bf16 %v4295_v25, %v4295_v25  ;;  %v4304_v51 = vpack.c.bf16 %v4296_v37, %v4296_v37  ;;  %v4359_v13 = vrot.slane %v4350_v30, 5 }
 0x3cb   : > { %v4348_v33 = vunpack.c.l.b16 %v4300_v17  ;;  %v4353_v60 = vunpack.c.l.b16 %v4305_v59  ;;  %v9665_v59 = vld [vmem:[%s14444_s1 + $0xec] sm:$0xf0] }
 0x3cc   : > { %4551 = vmatpush.bf16.msrb.mxu1 %v8326_v41  ;;  %v4159_v8 = vpop.f32.mrf.mxu0  ;;  %v4349_v41 = vunpack.c.l.b16 %v4301_v1  ;;  %v4351_v4 = vunpack.c.l.b16 %v4303_v38  ;;  %v4352_v43 = vunpack.c.l.b16 %v4304_v51 }
 0x3cd   : > { %4627 = vmatpush.bf16.msra.mxu2 %v11942_v7  ;;  %v4355_v31 = vrot.slane %v4348_v33, 7  ;;  %v4306_v8 = vpack.c.bf16 %v4298_v56, %v4298_v56  ;;  %v4365_v25 = vrot.slane %v4353_v60, 2  ;;  %v8573_v56 = vld [vmem:[%s14444_s1 + $0xe0] sm:$0xf] }
 0x3ce   : > { %4600 = vmatpush.bf16.msra.mxu0 %v11890_v53  ;;  %4639 = vmatpush.bf16.msra.mxu3 %v11915_v62  ;;  %v4357_v5 = vrot.slane %v4349_v41, 6  ;;  %v4361_v16 = vrot.slane %v4351_v4, 4  ;;  %v4363_v26 = vrot.slane %v4352_v43, 3  ;;  %v8315_v41 = vld [vmem:[%s12414_s23 + $0x60] sm:$0xff]  ;;  %v8316_v42 = vld [vmem:[%s12414_s23 + $0x68] sm:$0xff] }
 0x3cf   : > { %v4356_v50 = vsel %vm3200_vm7, %v4355_v31, %v4347_v54  ;;  %v4354_v17 = vunpack.c.l.b16 %v4306_v8  ;;  %v9663_v4 = vld [vmem:[%s14444_s1 + $0xe4] sm:$0xf]  ;;  %v8575_v8 = vld [vmem:[%s14444_s1 + $0xf0] sm:$0xf0]  ;;  %v8581_v43 = vld [vmem:[%s14444_s1 + $0xe8] sm:$0xf] }
 0x3d0   : > { %4613 = vmatpush.bf16.msra.mxu1 %v11901_v57  ;;  %v4358_v14 = vsel %vm3203_vm8, %v4357_v5, %v4356_v50  ;;  %v8574_v5 = vor.u32 %v9665_v59, %v8573_v56  ;;  %v9666_v50 = vld [vmem:[%s14444_s1 + $0xf4] sm:$0xf0] }
 0x3d1   : > { %4628 = vmatpush.bf16.msra.mxu2 %v11980_v24  ;;  %v4360_v20 = vsel %vm3206_vm9, %v4359_v13, %v4358_v14  ;;  %v4367_v32 = vrot.slane %v4354_v17, 1  ;;  %v8317_v14 = vld [vmem:[%s12414_s23 + $0x70] sm:$0xff]  ;;  %v8578_v17 = vor.u32 %v9663_v4, %v8575_v8 }
 0x3d2   : > { %4601 = vmatpush.bf16.msra.mxu0 %v11928_v2  ;;  %4640 = vmatpush.bf16.msra.mxu3 %v11953_v15  ;;  %v4362_v1 = vsel %vm3209_vm10, %v4361_v16, %v4360_v20  ;;  %v8318_v16 = vld [vmem:[%s12414_s23 + $0x78] sm:$0xff]  ;;  %v8582_v20 = vor.u32 %v9666_v50, %v8581_v43 }
 0x3d3   : > { %v4364_v27 = vsel %vm3212_vm11, %v4363_v26, %v4362_v1  ;;  %v9664_v26 = vld [vmem:[%s14444_s1 + $0xec] sm:$0xf]  ;;  %v8583_v1 = vld [vmem:[%s14444_s1 + $0xf8] sm:$0xf0] }
 0x3d4   : > { %4614 = vmatpush.bf16.msra.mxu1 %v11930_v3  ;;  %v4366_v33 = vsel %vm3215_vm12, %v4365_v25, %v4364_v27  ;;  %v8586_v25 = vor.u32 %v9664_v26, %v8583_v1  ;;  %v8557_v27 = vld [vmem:[%s14444_s1 + $0xc0] sm:$0xf] }
 0x3d5   : > { %4629 = vmatpush.bf16.msra.mxu2 %v12016_v36  ;;  %v4368_v37 = vsel %vm3218_vm13, %v4367_v32, %v4366_v33  ;;  %v9661_v32 = vld [vmem:[%s14444_s1 + $0xcc] sm:$0xf0]  ;;  %v9659_v33 = vld [vmem:[%s14444_s1 + $0xc4] sm:$0xf] }
 0x3d6   : > { %4602 = vmatpush.bf16.msra.mxu0 %v11965_v19  ;;  %4641 = vmatpush.bf16.msra.mxu3 %v11992_v28  ;;  %v4369_v38 = vpack.c.b16 %v4368_v37, %v4368_v37  ;;  %v8558_v37 = vor.u32 %v9661_v32, %v8557_v27 }
 0x3d8   : > { %4615 = vmatpush.bf16.msra.mxu1 %v11978_v23  ;;  %4539 = vmatmul.bf16.vlgmr.msrb.gmra.mxu0 %v4369_v38 }
 0x3d9   : > { %4630 = vmatpush.bf16.msra.mxu2 %v12052_v48  ;;  %4552 = vmatmul.bf16.vlgmr.msrb.gmra.mxu1 %v4369_v38 }
 0x3da   : > { %4603 = vmatpush.bf16.msra.mxu0 %v12010_v34  ;;  %4642 = vmatpush.bf16.msra.mxu3 %v12028_v40 }
 0x3db   : > { %4578 = vmatmul.bf16.vlgmr.msrb.gmra.mxu3 %v4369_v38  ;;  %4565 = vmatmul.bf16.vlgmr.msrb.gmra.mxu2 %v4369_v38  ;;  %v8559_v38 = vld [vmem:[%s14444_s1 + $0xd0] sm:$0xf0] }
 0x3dc   : > { %4616 = vmatpush.bf16.msra.mxu1 %v12014_v35 }
 0x3dd   : > { %4631 = vmatpush.bf16.msra.mxu2 %v12088_v0 }
 0x3de   : > { %4604 = vmatpush.bf16.msra.mxu0 %v12046_v46  ;;  %4643 = vmatpush.bf16.msra.mxu3 %v12064_v52 }
 0x3e0   : > { %4617 = vmatpush.bf16.msra.mxu1 %v12050_v47 }
 0x3e1   : > { %4632 = vmatpush.bf16.msra.mxu2 %v12127_v22 }
 0x3e2   : > { %4605 = vmatpush.bf16.msra.mxu0 %v12082_v61  ;;  %4644 = vmatpush.bf16.msra.mxu3 %v12100_v6 }
 0x3e4   : > { %4618 = vmatpush.bf16.msra.mxu1 %v12086_v63 }
 0x3e5   : > { %4633 = vmatpush.bf16.msra.mxu2 %v12172_v45 }
 0x3e6   : > { %4606 = vmatpush.bf16.msra.mxu0 %v12118_v18  ;;  %4645 = vmatpush.bf16.msra.mxu3 %v12139_v29 }
 0x3e8   : > { %4619 = vmatpush.bf16.msra.mxu1 %v12125_v21 }
 0x3e9   : > { %4940 = vmatpush.bf16.msrb.mxu2 %v8582_v20 }
 0x3ea   : > { %4607 = vmatpush.bf16.msra.mxu0 %v12160_v39  ;;  %4646 = vmatpush.bf16.msra.mxu3 %v12175_v49 }
 0x3ec   : > { %4620 = vmatpush.bf16.msra.mxu1 %v12170_v44 }
 0x3ee   : > { %4914 = vmatpush.bf16.msrb.mxu0 %v8574_v5  ;;  %4953 = vmatpush.bf16.msrb.mxu3 %v8586_v25 }
 0x3f0   : > { %4927 = vmatpush.bf16.msrb.mxu1 %v8578_v17 }
 0x3f2   : > { %4915 = vmatpush.bf16.msrb.mxu0 %v8558_v37 }
 0x439   : > { %v4226_v51 = vpop.f32.mrf.mxu0  ;;  %v4239_v54 = vpop.f32.mrf.mxu1 }
 0x43a   : > { %v4269_v30 = vadd.f32 %v8315_v41, %v4226_v51  ;;  %v4270_v31 = vadd.f32 %v8316_v42, %v4239_v54  ;;  %v8565_v41 = vld [vmem:[%s14444_s1 + $0xc8] sm:$0xf]  ;;  %v9662_v42 = vld [vmem:[%s14444_s1 + $0xd4] sm:$0xf0]  ;;  %v8562_v51 = vor.u32 %v9659_v33, %v8559_v38 }
 0x43b   : > { %v8566_v54 = vor.u32 %v9662_v42, %v8565_v41 }
 0x43c   : > { %v4273_v13 = vmul.f32 0.5, %v4269_v30  ;;  %v4274_v60 = vmul.f32 0.5, %v4270_v31  ;;  %v9660_v30 = vld [vmem:[%s14444_s1 + $0xcc] sm:$0xf]  ;;  %v8567_v31 = vld [vmem:[%s14444_s1 + $0xd8] sm:$0xf0]  ;;  %4928 = vmatpush.bf16.msrb.mxu1 %v8562_v51 }
 0x43d   : > { %v8570_v4 = vor.u32 %v9660_v30, %v8567_v31  ;;  %4941 = vmatpush.bf16.msrb.mxu2 %v8566_v54  ;;  %v8541_v31 = vld [vmem:[%s14444_s1 + $0xa0] sm:$0xf] }
 0x43e   : > { %9873 = vtanh.f32 %v4273_v13 }
 0x43f   : > { %9875 = vtanh.f32 %v4274_v60  ;;  %4954 = vmatpush.bf16.msrb.mxu3 %v8570_v4  ;;  %v8543_v4 = vld [vmem:[%s14444_s1 + $0xb0] sm:$0xf0] }
 0x440   : > { %v4252_v56 = vpop.f32.mrf.mxu2  ;;  %v4265_v59 = vpop.f32.mrf.mxu3 }
 0x441   : > { %v4271_v5 = vadd.f32 %v8317_v14, %v4252_v56  ;;  %v4272_v8 = vadd.f32 %v8318_v16, %v4265_v59  ;;  %v4228_v43 = vpop.f32.mrf.mxu0  ;;  %v4241_v50 = vpop.f32.mrf.mxu1  ;;  %v9655_v56 = vld [vmem:[%s14444_s1 + $0xa4] sm:$0xf] }
 0x442   : > { %v8546_v43 = vor.u32 %v9655_v56, %v8543_v4  ;;  %v9650_v4 = vld [vmem:[%s14444_s1 + $0x74] sm:$0xf0] }
 0x443   : > { %v4275_v13 = vmul.f32 0.5, %v4271_v5  ;;  %9877 = vtanh.f32 %v4272_v8  ;;  %v8549_v5 = vld [vmem:[%s14444_s1 + $0xa8] sm:$0xf]  ;;  %v9658_v8 = vld [vmem:[%s14444_s1 + $0xb4] sm:$0xf0] }
 0x444   : > { %v9874_v60 = vpop.eup %9873  ;;  %v8550_v50 = vor.u32 %v9658_v8, %v8549_v5  ;;  %4929 = vmatpush.bf16.msrb.mxu1 %v8546_v43  ;;  %v9648_v5 = vld [vmem:[%s14444_s1 + $0x6c] sm:$0xf]  ;;  %v8519_v43 = vld [vmem:[%s14444_s1 + $0x78] sm:$0xf0] }
 0x445   : > { %v9876_v17 = vpop.eup %9875  ;;  %v4279_v20 = vmul.f32 0.5, %v9874_v60  ;;  %9879 = vtanh.f32 %v4275_v13  ;;  %v9656_v13 = vld [vmem:[%s14444_s1 + $0xac] sm:$0xf]  ;;  %v8551_v60 = vld [vmem:[%s14444_s1 + $0xb8] sm:$0xf0] }
 0x446   : > { %v4280_v26 = vmul.f32 0.5, %v9876_v17  ;;  %v8554_v17 = vor.u32 %v9656_v13, %v8551_v60  ;;  %4942 = vmatpush.bf16.msrb.mxu2 %v8550_v50  ;;  %v8493_v50 = vld [vmem:[%s14444_s1 + $0x40] sm:$0xf]  ;;  %v9645_v13 = vld [vmem:[%s14444_s1 + $0x4c] sm:$0xf0]  ;;  %v8522_v60 = vor.u32 %v9648_v5, %v8519_v43 }
 0x447   : > { %v4282_v1 = vadd.f32 0.5, %v4279_v20  ;;  %v8525_v20 = vld [vmem:[%s14444_s1 + $0x80] sm:$0xf]  ;;  %v9635_v43 = vld [vmem:[%s14444_s1 + $0x4] sm:$0xf] }
 0x448   : > { %v4283_v25 = vadd.f32 0.5, %v4280_v26  ;;  %v4254_v27 = vpop.f32.mrf.mxu2  ;;  %v4267_v32 = vpop.f32.mrf.mxu3  ;;  %4955 = vmatpush.bf16.msrb.mxu3 %v8554_v17  ;;  %v9653_v26 = vld [vmem:[%s14444_s1 + $0x8c] sm:$0xf0]  ;;  %v9643_v17 = vld [vmem:[%s14444_s1 + $0x44] sm:$0xf] }
 0x449   : > { %v9878_v33 = vpop.eup %9877  ;;  %v8527_v27 = vld [vmem:[%s14444_s1 + $0x90] sm:$0xf0]  ;;  %v8533_v32 = vld [vmem:[%s14444_s1 + $0x88] sm:$0xf]  ;;  %v8461_v5 = vld [vmem:[%s14444_s1] sm:$0xf] }
 0x44a   : > { %v4286_v14 = vmul.f32 %v4283_v25, %v12981_v55  ;;  %v4287_v16 = vmul.f32 %v9878_v33, %v4282_v1  ;;  %v9657_v55 = vld [vmem:[%s14444_s1 + $0xac] sm:$0xf0]  ;;  %v9651_v1 = vld [vmem:[%s14444_s1 + $0x84] sm:$0xf]  ;;  %v8526_v25 = vor.u32 %v9653_v26, %v8525_v20  ;;  %v9654_v33 = vld [vmem:[%s14444_s1 + $0x94] sm:$0xf0] }
 0x44b   : > { %v9880_v38 = vpop.eup %9879  ;;  %v8542_v59 = vor.u32 %v9657_v55, %v8541_v31  ;;  %v8511_v31 = vld [vmem:[%s14444_s1 + $0x70] sm:$0xf0]  ;;  %v8501_v26 = vld [vmem:[%s14444_s1 + $0x48] sm:$0xf] }
 0x44c   : > { %v13236_v37 = vadd.f32 %v4287_v16, %v4286_v14  ;;  %v4281_v41 = vmul.f32 0.5, %v9880_v38  ;;  %v8530_v14 = vor.u32 %v9651_v1, %v8527_v27  ;;  %v8534_v16 = vor.u32 %v9654_v33, %v8533_v32  ;;  %v9652_v38 = vld [vmem:[%s14444_s1 + $0x8c] sm:$0xf]  ;;  %v8495_v20 = vld [vmem:[%s14444_s1 + $0x50] sm:$0xf0] }
 0x44d   : > { %4916 = vmatpush.bf16.msrb.mxu0 %v8542_v59  ;;  %v8517_v59 = vld [vmem:[%s14444_s1 + $0x68] sm:$0xf]  ;;  %v8494_v1 = vor.u32 %v9645_v13, %v8493_v50  ;;  %v9644_v27 = vld [vmem:[%s14444_s1 + $0x4c] sm:$0xf]  ;;  %v8503_v32 = vld [vmem:[%s14444_s1 + $0x58] sm:$0xf0]  ;;  %v8498_v33 = vor.u32 %v9643_v17, %v8495_v20 }
 0x44e   : > { %9881 = vtanh.f32 %v13236_v37  ;;  %v4284_v42 = vadd.f32 0.5, %v4281_v41  ;;  %v8535_v41 = vld [vmem:[%s14444_s1 + $0x98] sm:$0xf0]  ;;  %4930 = vmatpush.bf16.msrb.mxu1 %v8530_v14  ;;  %4943 = vmatpush.bf16.msrb.mxu2 %v8534_v16  ;;  %v8518_v8 = vor.u32 %v9650_v4, %v8517_v59  ;;  %v8477_v16 = vld [vmem:[%s14444_s1 + $0x20] sm:$0xf] }
 0x44f   : > { %v8463_v13 = vld [vmem:[%s14444_s1 + $0x10] sm:$0xf0]  ;;  %v9638_v17 = vld [vmem:[%s14444_s1 + $0x14] sm:$0xf0]  ;;  %v9636_v20 = vld [vmem:[%s14444_s1 + $0xc] sm:$0xf] }
 0x451   : > { %4917 = vmatpush.bf16.msrb.mxu0 %v8526_v25  ;;  %v9646_v25 = vld [vmem:[%s14444_s1 + $0x54] sm:$0xf0] }
 0x452   : > { %4944 = vmatpush.bf16.msrb.mxu2 %v8518_v8  ;;  %v8502_v14 = vor.u32 %v9646_v25, %v8501_v26  ;;  %v9637_v8 = vld [vmem:[%s14444_s1 + $0xc] sm:$0xf0]  ;;  %v8471_v26 = vld [vmem:[%s14444_s1 + $0x18] sm:$0xf0]  ;;  %v8466_v25 = vor.u32 %v9635_v43, %v8463_v13  ;;  %v4677_v43 = vld [vmem:[%s10069_s24 + $0x1c] sm:$0x1] }
 0x453   : > { %v4678_v13 = vld [vmem:[%s10069_s24 + $0x24] sm:$0x1] }
 0x454   : > { %v9882_v51 = vpop.eup %9881 }
 0x455   : > { %v4290_v54 = vmul.f32 %v9882_v51, %v4284_v42  ;;  %v8509_v42 = vld [vmem:[%s14444_s1 + $0x60] sm:$0xf]  ;;  %v8538_v51 = vor.u32 %v9652_v38, %v8535_v41  ;;  %v9641_v38 = vld [vmem:[%s14444_s1 + $0x2c] sm:$0xf0]  ;;  %v9639_v41 = vld [vmem:[%s14444_s1 + $0x24] sm:$0xf] }
 0x456   : > { %4945 = vmatpush.bf16.msrb.mxu2 %v8502_v14  ;;  %v4553_v14 = vpop.f32.mrf.mxu1 }
 0x457   : > { %v4599_v30 = vpack.c.bf16 %v4290_v54, %v4290_v54  ;;  %v9649_v54 = vld [vmem:[%s14444_s1 + $0x6c] sm:$0xf0]  ;;  %4956 = vmatpush.bf16.msrb.mxu3 %v8538_v51  ;;  %v8479_v51 = vld [vmem:[%s14444_s1 + $0x30] sm:$0xf0] }
 0x458   : > { %v8510_v55 = vor.u32 %v9649_v54, %v8509_v42  ;;  %v8506_v42 = vor.u32 %v9644_v27, %v8503_v32  ;;  %v8485_v54 = vld [vmem:[%s14444_s1 + $0x28] sm:$0xf]  ;;  %v8482_v59 = vor.u32 %v9639_v41, %v8479_v51  ;;  %v8474_v32 = vor.u32 %v9636_v20, %v8471_v26  ;;  %v4679_v26 = vld [vmem:[%s10069_s24 + $0x2c] sm:$0x1] }
 0x459   : > { %4608 = vmatmul.bf16.vlgmr.msra.gmra.mxu0 %v4599_v30  ;;  %4621 = vmatmul.bf16.vlgmr.msra.gmra.mxu1 %v4599_v30 }
 0x45a   : > { %4634 = vmatmul.bf16.vlgmr.msra.gmra.mxu2 %v4599_v30  ;;  %4647 = vmatmul.bf16.vlgmr.msra.gmra.mxu3 %v4599_v30  ;;  %v9647_v30 = vld [vmem:[%s14444_s1 + $0x64] sm:$0xf] }
 0x45b   : > { %v8514_v56 = vor.u32 %v9647_v30, %v8511_v31  ;;  %4918 = vmatpush.bf16.msrb.mxu0 %v8510_v55  ;;  %4957 = vmatpush.bf16.msrb.mxu3 %v8522_v60  ;;  %v9642_v30 = vld [vmem:[%s14444_s1 + $0x34] sm:$0xf0]  ;;  %v9640_v31 = vld [vmem:[%s14444_s1 + $0x2c] sm:$0xf]  ;;  %v8487_v55 = vld [vmem:[%s14444_s1 + $0x38] sm:$0xf0] }
 0x45c   : > { %v8486_v4 = vor.u32 %v9642_v30, %v8485_v54  ;;  %v8490_v50 = vor.u32 %v9640_v31, %v8487_v55  ;;  %v8469_v60 = vld [vmem:[%s14444_s1 + $0x8] sm:$0xf] }
 0x45d   : > { %4931 = vmatpush.bf16.msrb.mxu1 %v8514_v56  ;;  %v8478_v56 = vor.u32 %v9641_v38, %v8477_v16  ;;  %v8470_v27 = vor.u32 %v9638_v17, %v8469_v60  ;;  %v4554_v38 = vadd.f32 %v4553_v14, %v10063_v10  ;;  %v4685_v17 = vpack.c.bf16 %v4677_v43, %v4677_v43 }
 0x45e   : > { %4946 = vmatpush.bf16.msrb.mxu2 %v8486_v4  ;;  %v4579_v41 = vpop.f32.mrf.mxu3  ;;  %v4555_v30 = vpop.f32.mrf.mxu1  ;;  %v4676_v4 = vld [vmem:[%s10069_s24 + $0x14] sm:$0x1] }
 0x45f   : > { %4919 = vmatpush.bf16.msrb.mxu0 %v8494_v1  ;;  %4958 = vmatpush.bf16.msrb.mxu3 %v8506_v42  ;;  %v8462_v1 = vor.u32 %v9637_v8, %v8461_v5  ;;  %8450 = vst [vmem:[%s12622_s14 + $0x68] sm:$0xff] %v4554_v38  ;;  %v4566_v42 = vpop.f32.mrf.mxu2  ;;  %v4580_v51 = vadd.f32 %v4579_v41, %v10067_v12  ;;  %v4674_v8 = vld [vmem:[%s10069_s24 + $0x4] sm:$0x1]  ;;  %v4733_v14 = vunpack.c.l.b16 %v4685_v17  ;;  %v4681_v38 = vld [vmem:[%s10069_s24 + $0x3c] sm:$0x1] }
 0x460   : > { %v4567_v31 = vadd.f32 %v4566_v42, %v10065_v11  ;;  %v4682_v60 = vpack.c.bf16 %v4674_v8, %v4674_v8 }
 0x461   : > { %4932 = vmatpush.bf16.msrb.mxu1 %v8498_v33  ;;  %v4540_v33 = vpop.f32.mrf.mxu0  ;;  %8452 = vst [vmem:[%s12622_s14 + $0x78] sm:$0xff] %v4580_v51 }
 0x462   : > { %4947 = vmatpush.bf16.msrb.mxu2 %v8470_v27  ;;  %v4541_v16 = vadd.f32 %v4540_v33, %v10061_v9  ;;  %8451 = vst [vmem:[%s12622_s14 + $0x70] sm:$0xff] %v4567_v31  ;;  %v4680_v27 = vld [vmem:[%s10069_s24 + $0x34] sm:$0x1]  ;;  %v4730_v33 = vunpack.c.l.b16 %v4682_v60 }
 0x463   : > { %4920 = vmatpush.bf16.msrb.mxu0 %v8478_v56  ;;  %4959 = vmatpush.bf16.msrb.mxu3 %v8490_v50  ;;  %v4684_v50 = vpack.c.bf16 %v4676_v4, %v4676_v4  ;;  %v4688_v41 = vpack.c.bf16 %v4680_v27, %v4680_v27 }
 0x464   : > { %8449 = vst [vmem:[%s12622_s14 + $0x60] sm:$0xff] %v4541_v16 }
 0x465   : > { %4933 = vmatpush.bf16.msrb.mxu1 %v8482_v59  ;;  %v4675_v59 = vld [vmem:[%s10069_s24 + $0xc] sm:$0x1] }
 0x466   : > { %5009 = vmatpush.bf16.msra.mxu2 %v11903_v58  ;;  %v4581_v55 = vpop.f32.mrf.mxu3  ;;  %v4683_v5 = vpack.c.bf16 %v4675_v59, %v4675_v59 }
 0x467   : > { %4921 = vmatpush.bf16.msrb.mxu0 %v8462_v1  ;;  %4960 = vmatpush.bf16.msrb.mxu3 %v8474_v32  ;;  %v4568_v56 = vpop.f32.mrf.mxu2  ;;  %v4686_v1 = vpack.c.bf16 %v4678_v13, %v4678_v13  ;;  %v4687_v32 = vpack.c.bf16 %v4679_v26, %v4679_v26  ;;  %v4742_v55 = vrot.slane %v4733_v14, 5 }
 0x468   : > { %v4731_v20 = vunpack.c.l.b16 %v4683_v5  ;;  %v4736_v56 = vunpack.c.l.b16 %v4688_v41  ;;  %v9699_v41 = vld [vmem:[%s14444_s1 + $0xec] sm:$0xf0] }
 0x469   : > { %4934 = vmatpush.bf16.msrb.mxu1 %v8466_v25  ;;  %v4542_v54 = vpop.f32.mrf.mxu0  ;;  %v4732_v25 = vunpack.c.l.b16 %v4684_v50  ;;  %v4734_v42 = vunpack.c.l.b16 %v4686_v1  ;;  %v4735_v30 = vunpack.c.l.b16 %v4687_v32 }
 0x46a   : > { %5010 = vmatpush.bf16.msra.mxu2 %v11942_v7  ;;  %v4738_v16 = vrot.slane %v4731_v20, 7  ;;  %v4689_v54 = vpack.c.bf16 %v4681_v38, %v4681_v38  ;;  %v4748_v13 = vrot.slane %v4736_v56, 2  ;;  %v8713_v38 = vld [vmem:[%s14444_s1 + $0xe0] sm:$0xf] }
 0x46b   : > { %4983 = vmatpush.bf16.msra.mxu0 %v11890_v53  ;;  %5022 = vmatpush.bf16.msra.mxu3 %v11915_v62  ;;  %v4740_v51 = vrot.slane %v4732_v25, 6  ;;  %v4744_v4 = vrot.slane %v4734_v42, 4  ;;  %v4746_v43 = vrot.slane %v4735_v30, 3  ;;  %v8455_v25 = vld [vmem:[%s12414_s23 + $0x80] sm:$0xff]  ;;  %v8456_v27 = vld [vmem:[%s12414_s23 + $0x88] sm:$0xff] }
 0x46c   : > { %v4739_v31 = vsel %vm3200_vm7, %v4738_v16, %v4730_v33  ;;  %v4737_v5 = vunpack.c.l.b16 %v4689_v54  ;;  %v9697_v42 = vld [vmem:[%s14444_s1 + $0xe4] sm:$0xf]  ;;  %v8715_v54 = vld [vmem:[%s14444_s1 + $0xf0] sm:$0xf0]  ;;  %v8721_v30 = vld [vmem:[%s14444_s1 + $0xe8] sm:$0xf] }
 0x46d   : > { %4996 = vmatpush.bf16.msra.mxu1 %v11901_v57  ;;  %v4741_v59 = vsel %vm3203_vm8, %v4740_v51, %v4739_v31  ;;  %v8714_v51 = vor.u32 %v9699_v41, %v8713_v38  ;;  %v9700_v31 = vld [vmem:[%s14444_s1 + $0xf4] sm:$0xf0] }
 0x46e   : > { %5011 = vmatpush.bf16.msra.mxu2 %v11980_v24  ;;  %v4743_v8 = vsel %vm3206_vm9, %v4742_v55, %v4741_v59  ;;  %v4750_v17 = vrot.slane %v4737_v5, 1  ;;  %v8457_v59 = vld [vmem:[%s12414_s23 + $0x90] sm:$0xff]  ;;  %v8718_v5 = vor.u32 %v9697_v42, %v8715_v54 }
 0x46f   : > { %4984 = vmatpush.bf16.msra.mxu0 %v11928_v2  ;;  %5023 = vmatpush.bf16.msra.mxu3 %v11953_v15  ;;  %v4745_v50 = vsel %vm3209_vm10, %v4744_v4, %v4743_v8  ;;  %v8458_v4 = vld [vmem:[%s12414_s23 + $0x98] sm:$0xff]  ;;  %v8722_v8 = vor.u32 %v9700_v31, %v8721_v30 }
 0x470   : > { %v4747_v60 = vsel %vm3212_vm11, %v4746_v43, %v4745_v50  ;;  %v9698_v43 = vld [vmem:[%s14444_s1 + $0xec] sm:$0xf]  ;;  %v8723_v50 = vld [vmem:[%s14444_s1 + $0xf8] sm:$0xf0] }
 0x471   : > { %4997 = vmatpush.bf16.msra.mxu1 %v11930_v3  ;;  %v4749_v20 = vsel %vm3215_vm12, %v4748_v13, %v4747_v60  ;;  %v8726_v13 = vor.u32 %v9698_v43, %v8723_v50  ;;  %v8697_v60 = vld [vmem:[%s14444_s1 + $0xc0] sm:$0xf] }
 0x472   : > { %5012 = vmatpush.bf16.msra.mxu2 %v12016_v36  ;;  %v4751_v26 = vsel %vm3218_vm13, %v4750_v17, %v4749_v20  ;;  %v9695_v17 = vld [vmem:[%s14444_s1 + $0xcc] sm:$0xf0]  ;;  %v9693_v20 = vld [vmem:[%s14444_s1 + $0xc4] sm:$0xf] }
 0x473   : > { %4985 = vmatpush.bf16.msra.mxu0 %v11965_v19  ;;  %5024 = vmatpush.bf16.msra.mxu3 %v11992_v28  ;;  %v4752_v1 = vpack.c.b16 %v4751_v26, %v4751_v26  ;;  %v8698_v26 = vor.u32 %v9695_v17, %v8697_v60 }
 0x475   : > { %4998 = vmatpush.bf16.msra.mxu1 %v11978_v23  ;;  %4922 = vmatmul.bf16.vlgmr.msrb.gmra.mxu0 %v4752_v1 }
 0x476   : > { %5013 = vmatpush.bf16.msra.mxu2 %v12052_v48  ;;  %4935 = vmatmul.bf16.vlgmr.msrb.gmra.mxu1 %v4752_v1 }
 0x477   : > { %4986 = vmatpush.bf16.msra.mxu0 %v12010_v34  ;;  %5025 = vmatpush.bf16.msra.mxu3 %v12028_v40 }
 0x478   : > { %4961 = vmatmul.bf16.vlgmr.msrb.gmra.mxu3 %v4752_v1  ;;  %4948 = vmatmul.bf16.vlgmr.msrb.gmra.mxu2 %v4752_v1  ;;  %v8699_v1 = vld [vmem:[%s14444_s1 + $0xd0] sm:$0xf0] }
 0x479   : > { %4999 = vmatpush.bf16.msra.mxu1 %v12014_v35 }
 0x47a   : > { %5014 = vmatpush.bf16.msra.mxu2 %v12088_v0 }
 0x47b   : > { %4987 = vmatpush.bf16.msra.mxu0 %v12046_v46  ;;  %5026 = vmatpush.bf16.msra.mxu3 %v12064_v52 }
 0x47d   : > { %5000 = vmatpush.bf16.msra.mxu1 %v12050_v47 }
 0x47e   : > { %5015 = vmatpush.bf16.msra.mxu2 %v12127_v22 }
 0x47f   : > { %4988 = vmatpush.bf16.msra.mxu0 %v12082_v61  ;;  %5027 = vmatpush.bf16.msra.mxu3 %v12100_v6 }
 0x481   : > { %5001 = vmatpush.bf16.msra.mxu1 %v12086_v63 }
 0x482   : > { %5016 = vmatpush.bf16.msra.mxu2 %v12172_v45 }
 0x483   : > { %4989 = vmatpush.bf16.msra.mxu0 %v12118_v18  ;;  %5028 = vmatpush.bf16.msra.mxu3 %v12139_v29 }
 0x485   : > { %5002 = vmatpush.bf16.msra.mxu1 %v12125_v21 }
 0x486   : > { %5323 = vmatpush.bf16.msrb.mxu2 %v8722_v8 }
 0x487   : > { %4990 = vmatpush.bf16.msra.mxu0 %v12160_v39  ;;  %5029 = vmatpush.bf16.msra.mxu3 %v12175_v49 }
 0x489   : > { %5003 = vmatpush.bf16.msra.mxu1 %v12170_v44 }
 0x48b   : > { %5297 = vmatpush.bf16.msrb.mxu0 %v8714_v51  ;;  %5336 = vmatpush.bf16.msrb.mxu3 %v8726_v13 }
 0x48d   : > { %5310 = vmatpush.bf16.msrb.mxu1 %v8718_v5 }
 0x48f   : > { %5298 = vmatpush.bf16.msrb.mxu0 %v8698_v26 }
 0x4d6   : > { %v4609_v32 = vpop.f32.mrf.mxu0  ;;  %v4622_v33 = vpop.f32.mrf.mxu1 }
 0x4d7   : > { %v4652_v14 = vadd.f32 %v8455_v25, %v4609_v32  ;;  %v4653_v16 = vadd.f32 %v8456_v27, %v4622_v33  ;;  %v8705_v25 = vld [vmem:[%s14444_s1 + $0xc8] sm:$0xf]  ;;  %v9696_v27 = vld [vmem:[%s14444_s1 + $0xd4] sm:$0xf0]  ;;  %v8702_v32 = vor.u32 %v9693_v20, %v8699_v1 }
 0x4d8   : > { %v8706_v33 = vor.u32 %v9696_v27, %v8705_v25 }
 0x4d9   : > { %v4656_v55 = vmul.f32 0.5, %v4652_v14  ;;  %v4657_v56 = vmul.f32 0.5, %v4653_v16  ;;  %v9694_v14 = vld [vmem:[%s14444_s1 + $0xcc] sm:$0xf]  ;;  %v8707_v16 = vld [vmem:[%s14444_s1 + $0xd8] sm:$0xf0]  ;;  %5311 = vmatpush.bf16.msrb.mxu1 %v8702_v32 }
 0x4da   : > { %v8710_v42 = vor.u32 %v9694_v14, %v8707_v16  ;;  %5324 = vmatpush.bf16.msrb.mxu2 %v8706_v33  ;;  %v8681_v16 = vld [vmem:[%s14444_s1 + $0xa0] sm:$0xf] }
 0x4db   : > { %9883 = vtanh.f32 %v4656_v55 }
 0x4dc   : > { %9885 = vtanh.f32 %v4657_v56  ;;  %5337 = vmatpush.bf16.msrb.mxu3 %v8710_v42  ;;  %v8683_v42 = vld [vmem:[%s14444_s1 + $0xb0] sm:$0xf0] }
 0x4dd   : > { %v4635_v38 = vpop.f32.mrf.mxu2  ;;  %v4648_v41 = vpop.f32.mrf.mxu3 }
 0x4de   : > { %v4654_v51 = vadd.f32 %v8457_v59, %v4635_v38  ;;  %v4655_v54 = vadd.f32 %v8458_v4, %v4648_v41  ;;  %v4611_v30 = vpop.f32.mrf.mxu0  ;;  %v4624_v31 = vpop.f32.mrf.mxu1  ;;  %v9689_v38 = vld [vmem:[%s14444_s1 + $0xa4] sm:$0xf] }
 0x4df   : > { %v8686_v30 = vor.u32 %v9689_v38, %v8683_v42  ;;  %v9684_v42 = vld [vmem:[%s14444_s1 + $0x74] sm:$0xf0] }
 0x4e0   : > { %v4658_v55 = vmul.f32 0.5, %v4654_v51  ;;  %9887 = vtanh.f32 %v4655_v54  ;;  %v8689_v51 = vld [vmem:[%s14444_s1 + $0xa8] sm:$0xf]  ;;  %v9692_v54 = vld [vmem:[%s14444_s1 + $0xb4] sm:$0xf0] }
 0x4e1   : > { %v9884_v56 = vpop.eup %9883  ;;  %v8690_v31 = vor.u32 %v9692_v54, %v8689_v51  ;;  %5312 = vmatpush.bf16.msrb.mxu1 %v8686_v30  ;;  %v9682_v51 = vld [vmem:[%s14444_s1 + $0x6c] sm:$0xf]  ;;  %v8659_v30 = vld [vmem:[%s14444_s1 + $0x78] sm:$0xf0] }
 0x4e2   : > { %v9886_v5 = vpop.eup %9885  ;;  %v4662_v8 = vmul.f32 0.5, %v9884_v56  ;;  %9889 = vtanh.f32 %v4658_v55  ;;  %v9690_v55 = vld [vmem:[%s14444_s1 + $0xac] sm:$0xf]  ;;  %v8691_v56 = vld [vmem:[%s14444_s1 + $0xb8] sm:$0xf0] }
 0x4e3   : > { %v4663_v43 = vmul.f32 0.5, %v9886_v5  ;;  %v8694_v5 = vor.u32 %v9690_v55, %v8691_v56  ;;  %5325 = vmatpush.bf16.msrb.mxu2 %v8690_v31  ;;  %v8633_v31 = vld [vmem:[%s14444_s1 + $0x40] sm:$0xf]  ;;  %v9679_v55 = vld [vmem:[%s14444_s1 + $0x4c] sm:$0xf0]  ;;  %v8662_v56 = vor.u32 %v9682_v51, %v8659_v30 }
 0x4e4   : > { %v4665_v50 = vadd.f32 0.5, %v4662_v8  ;;  %v8665_v8 = vld [vmem:[%s14444_s1 + $0x80] sm:$0xf]  ;;  %v9669_v30 = vld [vmem:[%s14444_s1 + $0x4] sm:$0xf] }
 0x4e5   : > { %v4666_v13 = vadd.f32 0.5, %v4663_v43  ;;  %v4637_v60 = vpop.f32.mrf.mxu2  ;;  %v4650_v17 = vpop.f32.mrf.mxu3  ;;  %5338 = vmatpush.bf16.msrb.mxu3 %v8694_v5  ;;  %v9687_v43 = vld [vmem:[%s14444_s1 + $0x8c] sm:$0xf0]  ;;  %v9677_v5 = vld [vmem:[%s14444_s1 + $0x44] sm:$0xf] }
 0x4e6   : > { %v9888_v20 = vpop.eup %9887  ;;  %v8667_v60 = vld [vmem:[%s14444_s1 + $0x90] sm:$0xf0]  ;;  %v8673_v17 = vld [vmem:[%s14444_s1 + $0x88] sm:$0xf]  ;;  %v8601_v51 = vld [vmem:[%s14444_s1] sm:$0xf] }
 0x4e7   : > { %v4669_v59 = vmul.f32 %v4666_v13, %v13236_v37  ;;  %v4670_v4 = vmul.f32 %v9888_v20, %v4665_v50  ;;  %v9691_v37 = vld [vmem:[%s14444_s1 + $0xac] sm:$0xf0]  ;;  %v9685_v50 = vld [vmem:[%s14444_s1 + $0x84] sm:$0xf]  ;;  %v8666_v13 = vor.u32 %v9687_v43, %v8665_v8  ;;  %v9688_v20 = vld [vmem:[%s14444_s1 + $0x94] sm:$0xf0] }
 0x4e8   : > { %v9890_v1 = vpop.eup %9889  ;;  %v8682_v41 = vor.u32 %v9691_v37, %v8681_v16  ;;  %v8651_v16 = vld [vmem:[%s14444_s1 + $0x70] sm:$0xf0]  ;;  %v8641_v43 = vld [vmem:[%s14444_s1 + $0x48] sm:$0xf] }
 0x4e9   : > { %v13491_v26 = vadd.f32 %v4670_v4, %v4669_v59  ;;  %v4664_v25 = vmul.f32 0.5, %v9890_v1  ;;  %v8670_v59 = vor.u32 %v9685_v50, %v8667_v60  ;;  %v8674_v4 = vor.u32 %v9688_v20, %v8673_v17  ;;  %v9686_v1 = vld [vmem:[%s14444_s1 + $0x8c] sm:$0xf]  ;;  %v8635_v8 = vld [vmem:[%s14444_s1 + $0x50] sm:$0xf0] }
 0x4ea   : > { %5299 = vmatpush.bf16.msrb.mxu0 %v8682_v41  ;;  %v8657_v41 = vld [vmem:[%s14444_s1 + $0x68] sm:$0xf]  ;;  %v8634_v50 = vor.u32 %v9679_v55, %v8633_v31  ;;  %v9678_v60 = vld [vmem:[%s14444_s1 + $0x4c] sm:$0xf]  ;;  %v8643_v17 = vld [vmem:[%s14444_s1 + $0x58] sm:$0xf0]  ;;  %v8638_v20 = vor.u32 %v9677_v5, %v8635_v8 }
 0x4eb   : > { %9891 = vtanh.f32 %v13491_v26  ;;  %v4667_v27 = vadd.f32 0.5, %v4664_v25  ;;  %v8675_v25 = vld [vmem:[%s14444_s1 + $0x98] sm:$0xf0]  ;;  %5313 = vmatpush.bf16.msrb.mxu1 %v8670_v59  ;;  %5326 = vmatpush.bf16.msrb.mxu2 %v8674_v4  ;;  %v8658_v54 = vor.u32 %v9684_v42, %v8657_v41  ;;  %v8617_v4 = vld [vmem:[%s14444_s1 + $0x20] sm:$0xf] }
 0x4ec   : > { %v8603_v55 = vld [vmem:[%s14444_s1 + $0x10] sm:$0xf0]  ;;  %v9672_v5 = vld [vmem:[%s14444_s1 + $0x14] sm:$0xf0]  ;;  %v9670_v8 = vld [vmem:[%s14444_s1 + $0xc] sm:$0xf] }
 0x4ee   : > { %5300 = vmatpush.bf16.msrb.mxu0 %v8666_v13  ;;  %v9680_v13 = vld [vmem:[%s14444_s1 + $0x54] sm:$0xf0] }
 0x4ef   : > { %5327 = vmatpush.bf16.msrb.mxu2 %v8658_v54  ;;  %v8642_v59 = vor.u32 %v9680_v13, %v8641_v43  ;;  %v9671_v54 = vld [vmem:[%s14444_s1 + $0xc] sm:$0xf0]  ;;  %v8611_v43 = vld [vmem:[%s14444_s1 + $0x18] sm:$0xf0]  ;;  %v8606_v13 = vor.u32 %v9669_v30, %v8603_v55  ;;  %v5060_v30 = vld [vmem:[%s10069_s24 + $0x1d] sm:$0x1] }
 0x4f0   : > { %v5061_v55 = vld [vmem:[%s10069_s24 + $0x25] sm:$0x1] }
 0x4f1   : > { %v9892_v32 = vpop.eup %9891 }
 0x4f2   : > { %v4673_v33 = vmul.f32 %v9892_v32, %v4667_v27  ;;  %v8649_v27 = vld [vmem:[%s14444_s1 + $0x60] sm:$0xf]  ;;  %v8678_v32 = vor.u32 %v9686_v1, %v8675_v25  ;;  %v9675_v1 = vld [vmem:[%s14444_s1 + $0x2c] sm:$0xf0]  ;;  %v9673_v25 = vld [vmem:[%s14444_s1 + $0x24] sm:$0xf] }
 0x4f3   : > { %5328 = vmatpush.bf16.msrb.mxu2 %v8642_v59  ;;  %v4936_v59 = vpop.f32.mrf.mxu1 }
 0x4f4   : > { %v4982_v14 = vpack.c.bf16 %v4673_v33, %v4673_v33  ;;  %v9683_v33 = vld [vmem:[%s14444_s1 + $0x6c] sm:$0xf0]  ;;  %5339 = vmatpush.bf16.msrb.mxu3 %v8678_v32  ;;  %v8619_v32 = vld [vmem:[%s14444_s1 + $0x30] sm:$0xf0] }
 0x4f5   : > { %v8650_v37 = vor.u32 %v9683_v33, %v8649_v27  ;;  %v8646_v27 = vor.u32 %v9678_v60, %v8643_v17  ;;  %v8625_v33 = vld [vmem:[%s14444_s1 + $0x28] sm:$0xf]  ;;  %v8622_v41 = vor.u32 %v9673_v25, %v8619_v32  ;;  %v8614_v17 = vor.u32 %v9670_v8, %v8611_v43  ;;  %v5062_v43 = vld [vmem:[%s10069_s24 + $0x2d] sm:$0x1] }
 0x4f6   : > { %4991 = vmatmul.bf16.vlgmr.msra.gmra.mxu0 %v4982_v14  ;;  %5004 = vmatmul.bf16.vlgmr.msra.gmra.mxu1 %v4982_v14 }
 0x4f7   : > { %5017 = vmatmul.bf16.vlgmr.msra.gmra.mxu2 %v4982_v14  ;;  %5030 = vmatmul.bf16.vlgmr.msra.gmra.mxu3 %v4982_v14  ;;  %v9681_v14 = vld [vmem:[%s14444_s1 + $0x64] sm:$0xf] }
 0x4f8   : > { %v8654_v38 = vor.u32 %v9681_v14, %v8651_v16  ;;  %5301 = vmatpush.bf16.msrb.mxu0 %v8650_v37  ;;  %5340 = vmatpush.bf16.msrb.mxu3 %v8662_v56  ;;  %v9676_v14 = vld [vmem:[%s14444_s1 + $0x34] sm:$0xf0]  ;;  %v9674_v16 = vld [vmem:[%s14444_s1 + $0x2c] sm:$0xf]  ;;  %v8627_v37 = vld [vmem:[%s14444_s1 + $0x38] sm:$0xf0] }
 0x4f9   : > { %v8626_v42 = vor.u32 %v9676_v14, %v8625_v33  ;;  %v8630_v31 = vor.u32 %v9674_v16, %v8627_v37  ;;  %v8609_v56 = vld [vmem:[%s14444_s1 + $0x8] sm:$0xf] }
 0x4fa   : > { %5314 = vmatpush.bf16.msrb.mxu1 %v8654_v38  ;;  %v8618_v38 = vor.u32 %v9675_v1, %v8617_v4  ;;  %v8610_v60 = vor.u32 %v9672_v5, %v8609_v56  ;;  %v4937_v1 = vadd.f32 %v4936_v59, %v10063_v10  ;;  %v5068_v5 = vpack.c.bf16 %v5060_v30, %v5060_v30 }
 0x4fb   : > { %5329 = vmatpush.bf16.msrb.mxu2 %v8626_v42  ;;  %v4962_v25 = vpop.f32.mrf.mxu3  ;;  %v4938_v14 = vpop.f32.mrf.mxu1  ;;  %v5059_v42 = vld [vmem:[%s10069_s24 + $0x15] sm:$0x1] }
 0x4fc   : > { %5302 = vmatpush.bf16.msrb.mxu0 %v8634_v50  ;;  %5341 = vmatpush.bf16.msrb.mxu3 %v8646_v27  ;;  %v8602_v50 = vor.u32 %v9671_v54, %v8601_v51  ;;  %8590 = vst [vmem:[%s12622_s14 + $0x88] sm:$0xff] %v4937_v1  ;;  %v4949_v27 = vpop.f32.mrf.mxu2  ;;  %v4963_v32 = vadd.f32 %v4962_v25, %v10067_v12  ;;  %v5057_v54 = vld [vmem:[%s10069_s24 + $0x5] sm:$0x1]  ;;  %v5116_v59 = vunpack.c.l.b16 %v5068_v5  ;;  %v5064_v1 = vld [vmem:[%s10069_s24 + $0x3d] sm:$0x1] }
 0x4fd   : > { %v4950_v16 = vadd.f32 %v4949_v27, %v10065_v11  ;;  %v5065_v56 = vpack.c.bf16 %v5057_v54, %v5057_v54 }
 0x4fe   : > { %5315 = vmatpush.bf16.msrb.mxu1 %v8638_v20  ;;  %v4923_v20 = vpop.f32.mrf.mxu0  ;;  %8592 = vst [vmem:[%s12622_s14 + $0x98] sm:$0xff] %v4963_v32 }
 0x4ff   : > { %5330 = vmatpush.bf16.msrb.mxu2 %v8610_v60  ;;  %v4924_v4 = vadd.f32 %v4923_v20, %v10061_v9  ;;  %8591 = vst [vmem:[%s12622_s14 + $0x90] sm:$0xff] %v4950_v16  ;;  %v5063_v60 = vld [vmem:[%s10069_s24 + $0x35] sm:$0x1]  ;;  %v5113_v20 = vunpack.c.l.b16 %v5065_v56 }
 0x500   : > { %5303 = vmatpush.bf16.msrb.mxu0 %v8618_v38  ;;  %5342 = vmatpush.bf16.msrb.mxu3 %v8630_v31  ;;  %v5067_v31 = vpack.c.bf16 %v5059_v42, %v5059_v42  ;;  %v5071_v25 = vpack.c.bf16 %v5063_v60, %v5063_v60 }
 0x501   : > { %8589 = vst [vmem:[%s12622_s14 + $0x80] sm:$0xff] %v4924_v4 }
 0x502   : > { %5316 = vmatpush.bf16.msrb.mxu1 %v8622_v41  ;;  %v5058_v41 = vld [vmem:[%s10069_s24 + $0xd] sm:$0x1] }
 0x503   : > { %5392 = vmatpush.bf16.msra.mxu2 %v11903_v58  ;;  %v4964_v37 = vpop.f32.mrf.mxu3  ;;  %v5066_v51 = vpack.c.bf16 %v5058_v41, %v5058_v41 }
 0x504   : > { %5304 = vmatpush.bf16.msrb.mxu0 %v8602_v50  ;;  %5343 = vmatpush.bf16.msrb.mxu3 %v8614_v17  ;;  %v4951_v38 = vpop.f32.mrf.mxu2  ;;  %v5069_v50 = vpack.c.bf16 %v5061_v55, %v5061_v55  ;;  %v5070_v17 = vpack.c.bf16 %v5062_v43, %v5062_v43  ;;  %v5125_v37 = vrot.slane %v5116_v59, 5 }
 0x505   : > { %v5114_v8 = vunpack.c.l.b16 %v5066_v51  ;;  %v5119_v38 = vunpack.c.l.b16 %v5071_v25  ;;  %v9733_v25 = vld [vmem:[%s14444_s1 + $0xec] sm:$0xf0] }
 0x506   : > { %5317 = vmatpush.bf16.msrb.mxu1 %v8606_v13  ;;  %v4925_v33 = vpop.f32.mrf.mxu0  ;;  %v5115_v13 = vunpack.c.l.b16 %v5067_v31  ;;  %v5117_v27 = vunpack.c.l.b16 %v5069_v50  ;;  %v5118_v14 = vunpack.c.l.b16 %v5070_v17 }
 0x507   : > { %5393 = vmatpush.bf16.msra.mxu2 %v11942_v7  ;;  %v5121_v4 = vrot.slane %v5114_v8, 7  ;;  %v5072_v33 = vpack.c.bf16 %v5064_v1, %v5064_v1  ;;  %v5131_v55 = vrot.slane %v5119_v38, 2  ;;  %v8853_v1 = vld [vmem:[%s14444_s1 + $0xe0] sm:$0xf] }
 0x508   : > { %5366 = vmatpush.bf16.msra.mxu0 %v11890_v53  ;;  %5405 = vmatpush.bf16.msra.mxu3 %v11915_v62  ;;  %v5123_v32 = vrot.slane %v5115_v13, 6  ;;  %v5127_v42 = vrot.slane %v5117_v27, 4  ;;  %v5129_v30 = vrot.slane %v5118_v14, 3  ;;  %v8595_v13 = vld [vmem:[%s12414_s23 + $0xa0] sm:$0xff]  ;;  %v8596_v60 = vld [vmem:[%s12414_s23 + $0xa8] sm:$0xff] }
 0x509   : > { %v5122_v16 = vsel %vm3200_vm7, %v5121_v4, %v5113_v20  ;;  %v5120_v51 = vunpack.c.l.b16 %v5072_v33  ;;  %v9731_v27 = vld [vmem:[%s14444_s1 + $0xe4] sm:$0xf]  ;;  %v8855_v33 = vld [vmem:[%s14444_s1 + $0xf0] sm:$0xf0]  ;;  %v8861_v14 = vld [vmem:[%s14444_s1 + $0xe8] sm:$0xf] }
 0x50a   : > { %5379 = vmatpush.bf16.msra.mxu1 %v11901_v57  ;;  %v5124_v41 = vsel %vm3203_vm8, %v5123_v32, %v5122_v16  ;;  %v8854_v32 = vor.u32 %v9733_v25, %v8853_v1  ;;  %v9734_v16 = vld [vmem:[%s14444_s1 + $0xf4] sm:$0xf0]  ;;  %v8821_v1 = vld [vmem:[%s14444_s1 + $0xa0] sm:$0xf] }
 0x50b   : > { %5394 = vmatpush.bf16.msra.mxu2 %v11980_v24  ;;  %v5126_v54 = vsel %vm3206_vm9, %v5125_v37, %v5124_v41  ;;  %v5133_v5 = vrot.slane %v5120_v51, 1  ;;  %v8597_v41 = vld [vmem:[%s12414_s23 + $0xb0] sm:$0xff]  ;;  %v8858_v51 = vor.u32 %v9731_v27, %v8855_v33 }
 0x50c   : > { %5367 = vmatpush.bf16.msra.mxu0 %v11928_v2  ;;  %5406 = vmatpush.bf16.msra.mxu3 %v11953_v15  ;;  %v5128_v31 = vsel %vm3209_vm10, %v5127_v42, %v5126_v54  ;;  %v8598_v42 = vld [vmem:[%s12414_s23 + $0xb8] sm:$0xff]  ;;  %v8862_v54 = vor.u32 %v9734_v16, %v8861_v14  ;;  %v9725_v33 = vld [vmem:[%s14444_s1 + $0xac] sm:$0xf0]  ;;  %v9723_v14 = vld [vmem:[%s14444_s1 + $0xa4] sm:$0xf] }
 0x50d   : > { %v5130_v56 = vsel %vm3212_vm11, %v5129_v30, %v5128_v31  ;;  %v9732_v30 = vld [vmem:[%s14444_s1 + $0xec] sm:$0xf]  ;;  %v8863_v31 = vld [vmem:[%s14444_s1 + $0xf8] sm:$0xf0]  ;;  %v8823_v16 = vld [vmem:[%s14444_s1 + $0xb0] sm:$0xf0] }
 0x50e   : > { %5380 = vmatpush.bf16.msra.mxu1 %v11930_v3  ;;  %v5132_v8 = vsel %vm3215_vm12, %v5131_v55, %v5130_v56  ;;  %v8866_v55 = vor.u32 %v9732_v30, %v8863_v31  ;;  %v8837_v56 = vld [vmem:[%s14444_s1 + $0xc0] sm:$0xf]  ;;  %v8822_v30 = vor.u32 %v9725_v33, %v8821_v1  ;;  %v8829_v31 = vld [vmem:[%s14444_s1 + $0xa8] sm:$0xf]  ;;  %v9720_v1 = vld [vmem:[%s14444_s1 + $0x8c] sm:$0xf] }
 0x50f   : > { %5395 = vmatpush.bf16.msra.mxu2 %v12016_v36  ;;  %v5134_v43 = vsel %vm3218_vm13, %v5133_v5, %v5132_v8  ;;  %v9729_v5 = vld [vmem:[%s14444_s1 + $0xcc] sm:$0xf0]  ;;  %v9727_v8 = vld [vmem:[%s14444_s1 + $0xc4] sm:$0xf]  ;;  %v8815_v33 = vld [vmem:[%s14444_s1 + $0x98] sm:$0xf0] }
 0x510   : > { %5368 = vmatpush.bf16.msra.mxu0 %v11965_v19  ;;  %5407 = vmatpush.bf16.msra.mxu3 %v11992_v28  ;;  %v5135_v50 = vpack.c.b16 %v5134_v43, %v5134_v43  ;;  %v8838_v43 = vor.u32 %v9729_v5, %v8837_v56  ;;  %v9724_v56 = vld [vmem:[%s14444_s1 + $0xac] sm:$0xf]  ;;  %v8831_v5 = vld [vmem:[%s14444_s1 + $0xb8] sm:$0xf0] }
 0x512   : > { %5381 = vmatpush.bf16.msra.mxu1 %v11978_v23  ;;  %5305 = vmatmul.bf16.vlgmr.msrb.gmra.mxu0 %v5135_v50 }
 0x513   : > { %5396 = vmatpush.bf16.msra.mxu2 %v12052_v48  ;;  %5318 = vmatmul.bf16.vlgmr.msrb.gmra.mxu1 %v5135_v50 }
 0x514   : > { %5369 = vmatpush.bf16.msra.mxu0 %v12010_v34  ;;  %5408 = vmatpush.bf16.msra.mxu3 %v12028_v40 }
 0x515   : > { %5344 = vmatmul.bf16.vlgmr.msrb.gmra.mxu3 %v5135_v50  ;;  %5331 = vmatmul.bf16.vlgmr.msrb.gmra.mxu2 %v5135_v50  ;;  %v8839_v50 = vld [vmem:[%s14444_s1 + $0xd0] sm:$0xf0] }
 0x516   : > { %5382 = vmatpush.bf16.msra.mxu1 %v12014_v35 }
 0x517   : > { %5397 = vmatpush.bf16.msra.mxu2 %v12088_v0 }
 0x518   : > { %5370 = vmatpush.bf16.msra.mxu0 %v12046_v46  ;;  %5409 = vmatpush.bf16.msra.mxu3 %v12064_v52 }
 0x51a   : > { %5383 = vmatpush.bf16.msra.mxu1 %v12050_v47 }
 0x51b   : > { %5398 = vmatpush.bf16.msra.mxu2 %v12127_v22 }
 0x51c   : > { %5371 = vmatpush.bf16.msra.mxu0 %v12082_v61  ;;  %5410 = vmatpush.bf16.msra.mxu3 %v12100_v6 }
 0x51e   : > { %5384 = vmatpush.bf16.msra.mxu1 %v12086_v63 }
 0x51f   : > { %5399 = vmatpush.bf16.msra.mxu2 %v12172_v45 }
 0x520   : > { %5372 = vmatpush.bf16.msra.mxu0 %v12118_v18  ;;  %5411 = vmatpush.bf16.msra.mxu3 %v12139_v29 }
 0x522   : > { %5385 = vmatpush.bf16.msra.mxu1 %v12125_v21 }
 0x523   : > { %5706 = vmatpush.bf16.msrb.mxu2 %v8862_v54 }
 0x524   : > { %5373 = vmatpush.bf16.msra.mxu0 %v12160_v39  ;;  %5412 = vmatpush.bf16.msra.mxu3 %v12175_v49 }
 0x526   : > { %5386 = vmatpush.bf16.msra.mxu1 %v12170_v44 }
 0x528   : > { %5680 = vmatpush.bf16.msrb.mxu0 %v8854_v32  ;;  %5719 = vmatpush.bf16.msrb.mxu3 %v8866_v55  ;;  %v9726_v55 = vld [vmem:[%s14444_s1 + $0xb4] sm:$0xf0] }
 0x52a   : > { %5693 = vmatpush.bf16.msrb.mxu1 %v8858_v51 }
 0x52c   : > { %5681 = vmatpush.bf16.msrb.mxu0 %v8838_v43  ;;  %v9721_v43 = vld [vmem:[%s14444_s1 + $0x8c] sm:$0xf0] }
 0x530   : > { %5682 = vmatpush.bf16.msrb.mxu0 %v8822_v30 }
 0x573   : > { %v4992_v17 = vpop.f32.mrf.mxu0  ;;  %v5005_v20 = vpop.f32.mrf.mxu1 }
 0x574   : > { %v5035_v59 = vadd.f32 %v8595_v13, %v4992_v17  ;;  %v5036_v4 = vadd.f32 %v8596_v60, %v5005_v20  ;;  %v8845_v13 = vld [vmem:[%s14444_s1 + $0xc8] sm:$0xf]  ;;  %v9730_v60 = vld [vmem:[%s14444_s1 + $0xd4] sm:$0xf0]  ;;  %v8842_v17 = vor.u32 %v9727_v8, %v8839_v50  ;;  %v8805_v8 = vld [vmem:[%s14444_s1 + $0x80] sm:$0xf] }
 0x575   : > { %v8846_v20 = vor.u32 %v9730_v60, %v8845_v13  ;;  %v8834_v13 = vor.u32 %v9724_v56, %v8831_v5  ;;  %v9719_v60 = vld [vmem:[%s14444_s1 + $0x84] sm:$0xf]  ;;  %v8797_v56 = vld [vmem:[%s14444_s1 + $0x68] sm:$0xf] }
 0x576   : > { %v5039_v37 = vmul.f32 0.5, %v5035_v59  ;;  %v5040_v38 = vmul.f32 0.5, %v5036_v4  ;;  %v9728_v59 = vld [vmem:[%s14444_s1 + $0xcc] sm:$0xf]  ;;  %v8847_v4 = vld [vmem:[%s14444_s1 + $0xd8] sm:$0xf0]  ;;  %5694 = vmatpush.bf16.msrb.mxu1 %v8842_v17 }
 0x577   : > { %v8850_v32 = vor.u32 %v9728_v59, %v8847_v4  ;;  %5707 = vmatpush.bf16.msrb.mxu2 %v8846_v20  ;;  %v8807_v17 = vld [vmem:[%s14444_s1 + $0x90] sm:$0xf0]  ;;  %v8813_v59 = vld [vmem:[%s14444_s1 + $0x88] sm:$0xf]  ;;  %v9722_v4 = vld [vmem:[%s14444_s1 + $0x94] sm:$0xf0] }
 0x578   : > { %9893 = vtanh.f32 %v5039_v37 }
 0x579   : > { %9895 = vtanh.f32 %v5040_v38  ;;  %5720 = vmatpush.bf16.msrb.mxu3 %v8850_v32  ;;  %v8806_v32 = vor.u32 %v9721_v43, %v8805_v8  ;;  %v9718_v8 = vld [vmem:[%s14444_s1 + $0x74] sm:$0xf0]  ;;  %v9716_v43 = vld [vmem:[%s14444_s1 + $0x6c] sm:$0xf] }
 0x57a   : > { %v5018_v25 = vpop.f32.mrf.mxu2  ;;  %v5031_v27 = vpop.f32.mrf.mxu3 }
 0x57b   : > { %v5037_v37 = vadd.f32 %v8597_v41, %v5018_v25  ;;  %v5038_v38 = vadd.f32 %v8598_v42, %v5031_v27  ;;  %v4994_v51 = vpop.f32.mrf.mxu0  ;;  %v5007_v54 = vpop.f32.mrf.mxu1  ;;  %v8826_v41 = vor.u32 %v9723_v14, %v8823_v16  ;;  %v8830_v42 = vor.u32 %v9726_v55, %v8829_v31  ;;  %v8789_v14 = vld [vmem:[%s14444_s1 + $0x60] sm:$0xf]  ;;  %v8791_v55 = vld [vmem:[%s14444_s1 + $0x70] sm:$0xf0]  ;;  %5683 = vmatpush.bf16.msrb.mxu0 %v8806_v32 }
 0x57c   : > { %v9717_v51 = vld [vmem:[%s14444_s1 + $0x6c] sm:$0xf0]  ;;  %v9715_v54 = vld [vmem:[%s14444_s1 + $0x64] sm:$0xf]  ;;  %v8818_v31 = vor.u32 %v9720_v1, %v8815_v33 }
 0x57d   : > { %v5041_v50 = vmul.f32 0.5, %v5037_v37  ;;  %9897 = vtanh.f32 %v5038_v38  ;;  %5695 = vmatpush.bf16.msrb.mxu1 %v8826_v41  ;;  %5708 = vmatpush.bf16.msrb.mxu2 %v8830_v42  ;;  %v8810_v37 = vor.u32 %v9719_v60, %v8807_v17  ;;  %v8814_v38 = vor.u32 %v9722_v4, %v8813_v59  ;;  %v8799_v17 = vld [vmem:[%s14444_s1 + $0x78] sm:$0xf0] }
 0x57e   : > { %v9894_v20 = vpop.eup %9893  ;;  %5721 = vmatpush.bf16.msrb.mxu3 %v8834_v13  ;;  %v8790_v13 = vor.u32 %v9717_v51, %v8789_v14  ;;  %v8794_v60 = vor.u32 %v9715_v54, %v8791_v55  ;;  %v8798_v4 = vor.u32 %v9718_v8, %v8797_v56  ;;  %v8802_v1 = vor.u32 %v9716_v43, %v8799_v17  ;;  %v9711_v51 = vld [vmem:[%s14444_s1 + $0x44] sm:$0xf]  ;;  %v9714_v55 = vld [vmem:[%s14444_s1 + $0x54] sm:$0xf0]  ;;  %v8757_v43 = vld [vmem:[%s14444_s1 + $0x20] sm:$0xf] }
 0x57f   : > { %v9896_v25 = vpop.eup %9895  ;;  %v5045_v27 = vmul.f32 0.5, %v9894_v20  ;;  %9899 = vtanh.f32 %v5041_v50  ;;  %v8759_v17 = vld [vmem:[%s14444_s1 + $0x30] sm:$0xf0] }
 0x580   : > { %v5046_v16 = vmul.f32 0.5, %v9896_v25  ;;  %5684 = vmatpush.bf16.msrb.mxu0 %v8790_v13  ;;  %v9707_v13 = vld [vmem:[%s14444_s1 + $0x24] sm:$0xf] }
 0x581   : > { %v5048_v30 = vadd.f32 0.5, %v5045_v27  ;;  %5696 = vmatpush.bf16.msrb.mxu1 %v8810_v37  ;;  %5709 = vmatpush.bf16.msrb.mxu2 %v8814_v38  ;;  %v8773_v37 = vld [vmem:[%s14444_s1 + $0x40] sm:$0xf]  ;;  %v9713_v38 = vld [vmem:[%s14444_s1 + $0x4c] sm:$0xf0] }
 0x582   : > { %v5049_v41 = vadd.f32 0.5, %v5046_v16  ;;  %v5020_v42 = vpop.f32.mrf.mxu2  ;;  %v5033_v5 = vpop.f32.mrf.mxu3  ;;  %5722 = vmatpush.bf16.msrb.mxu3 %v8818_v31  ;;  %v8774_v54 = vor.u32 %v9713_v38, %v8773_v37  ;;  %v8781_v31 = vld [vmem:[%s14444_s1 + $0x48] sm:$0xf]  ;;  %v8743_v37 = vld [vmem:[%s14444_s1 + $0x10] sm:$0xf0] }
 0x583   : > { %v9898_v50 = vpop.eup %9897  ;;  %v9712_v42 = vld [vmem:[%s14444_s1 + $0x4c] sm:$0xf]  ;;  %v8783_v5 = vld [vmem:[%s14444_s1 + $0x58] sm:$0xf0] }
 0x584   : > { %v5052_v20 = vmul.f32 %v5049_v41, %v13491_v26  ;;  %v5053_v59 = vmul.f32 %v9898_v50, %v5048_v30  ;;  %v8775_v30 = vld [vmem:[%s14444_s1 + $0x50] sm:$0xf0]  ;;  %v8782_v41 = vor.u32 %v9714_v55, %v8781_v31  ;;  %5685 = vmatpush.bf16.msrb.mxu0 %v8774_v54  ;;  %v8786_v8 = vor.u32 %v9712_v42, %v8783_v5  ;;  %v9709_v50 = vld [vmem:[%s14444_s1 + $0x2c] sm:$0xf0]  ;;  %v8749_v54 = vld [vmem:[%s14444_s1 + $0x8] sm:$0xf] }
 0x585   : > { %v9900_v25 = vpop.eup %9899  ;;  %5697 = vmatpush.bf16.msrb.mxu1 %v8794_v60  ;;  %5710 = vmatpush.bf16.msrb.mxu2 %v8798_v4  ;;  %v8778_v56 = vor.u32 %v9711_v51, %v8775_v30  ;;  %v8758_v60 = vor.u32 %v9709_v50, %v8757_v43  ;;  %v8762_v4 = vor.u32 %v9707_v13, %v8759_v17  ;;  %v9706_v30 = vld [vmem:[%s14444_s1 + $0x14] sm:$0xf0]  ;;  %v9704_v31 = vld [vmem:[%s14444_s1 + $0xc] sm:$0xf] }
 0x586   : > { %v13818_v27 = vadd.f32 %v5053_v59, %v5052_v20  ;;  %v5047_v32 = vmul.f32 0.5, %v9900_v25  ;;  %5723 = vmatpush.bf16.msrb.mxu3 %v8802_v1  ;;  %v8765_v20 = vld [vmem:[%s14444_s1 + $0x28] sm:$0xf]  ;;  %v9710_v59 = vld [vmem:[%s14444_s1 + $0x34] sm:$0xf0]  ;;  %v8750_v55 = vor.u32 %v9706_v30, %v8749_v54 }
 0x587   : > { %v8766_v1 = vor.u32 %v9710_v59, %v8765_v20  ;;  %v9708_v25 = vld [vmem:[%s14444_s1 + $0x2c] sm:$0xf]  ;;  %v9765_v54 = vld [vmem:[%s14444_s1 + $0xe4] sm:$0xf] }
 0x588   : > { %9901 = vtanh.f32 %v13818_v27  ;;  %v5050_v33 = vadd.f32 0.5, %v5047_v32  ;;  %v8767_v32 = vld [vmem:[%s14444_s1 + $0x38] sm:$0xf0]  ;;  %5686 = vmatpush.bf16.msrb.mxu0 %v8758_v60 }
 0x589   : > { %5698 = vmatpush.bf16.msrb.mxu1 %v8778_v56  ;;  %5711 = vmatpush.bf16.msrb.mxu2 %v8782_v41  ;;  %v8751_v56 = vld [vmem:[%s14444_s1 + $0x18] sm:$0xf0] }
 0x58a   : > { %5724 = vmatpush.bf16.msrb.mxu3 %v8786_v8  ;;  %v8754_v41 = vor.u32 %v9704_v31, %v8751_v56  ;;  %v8995_v31 = vld [vmem:[%s14444_s1 + $0xf0] sm:$0xf0]  ;;  %v9768_v56 = vld [vmem:[%s14444_s1 + $0xf4] sm:$0xf0] }
 0x58d   : > { %5699 = vmatpush.bf16.msrb.mxu1 %v8762_v4  ;;  %5712 = vmatpush.bf16.msrb.mxu2 %v8766_v1 }
 0x58e   : > { %v9902_v14 = vpop.eup %9901 }
 0x58f   : > { %v5056_v16 = vmul.f32 %v9902_v14, %v5050_v33  ;;  %v8741_v33 = vld [vmem:[%s14444_s1] sm:$0xf]  ;;  %v8770_v14 = vor.u32 %v9708_v25, %v8767_v32 }
 0x591   : > { %v5365_v26 = vpack.c.bf16 %v5056_v16, %v5056_v16  ;;  %v9705_v16 = vld [vmem:[%s14444_s1 + $0xc] sm:$0xf0]  ;;  %5725 = vmatpush.bf16.msrb.mxu3 %v8770_v14  ;;  %5713 = vmatpush.bf16.msrb.mxu2 %v8750_v55  ;;  %v9001_v55 = vld [vmem:[%s14444_s1 + $0xe8] sm:$0xf] }
 0x592   : > { %v8742_v38 = vor.u32 %v9705_v16, %v8741_v33 }
 0x593   : > { %5374 = vmatmul.bf16.vlgmr.msra.gmra.mxu0 %v5365_v26  ;;  %5387 = vmatmul.bf16.vlgmr.msra.gmra.mxu1 %v5365_v26 }
 0x594   : > { %5400 = vmatmul.bf16.vlgmr.msra.gmra.mxu2 %v5365_v26  ;;  %5413 = vmatmul.bf16.vlgmr.msra.gmra.mxu3 %v5365_v26  ;;  %v9703_v26 = vld [vmem:[%s14444_s1 + $0x4] sm:$0xf] }
 0x595   : > { %v8746_v51 = vor.u32 %v9703_v26, %v8743_v37  ;;  %5687 = vmatpush.bf16.msrb.mxu0 %v8742_v38  ;;  %5726 = vmatpush.bf16.msrb.mxu3 %v8754_v41  ;;  %v8993_v38 = vld [vmem:[%s14444_s1 + $0xe0] sm:$0xf]  ;;  %v8998_v41 = vor.u32 %v9765_v54, %v8995_v31  ;;  %v9750_v31 = vld [vmem:[%s14444_s1 + $0x6c] sm:$0xf] }
 0x596   : > { %5775 = vmatpush.bf16.msra.mxu2 %v11903_v58 }
 0x597   : > { %5700 = vmatpush.bf16.msrb.mxu1 %v8746_v51  ;;  %v9767_v51 = vld [vmem:[%s14444_s1 + $0xec] sm:$0xf0] }
 0x598   : > { %v8994_v30 = vor.u32 %v9767_v51, %v8993_v38 }
 0x599   : > { %5749 = vmatpush.bf16.msra.mxu0 %v11890_v53  ;;  %5788 = vmatpush.bf16.msra.mxu3 %v11915_v62  ;;  %v5306_v53 = vpop.f32.mrf.mxu0 }
 0x59a   : > { %5776 = vmatpush.bf16.msra.mxu2 %v11942_v7  ;;  %v5307_v58 = vadd.f32 %v5306_v53, %v10061_v9  ;;  %v9002_v53 = vor.u32 %v9768_v56, %v9001_v55  ;;  %v8939_v55 = vld [vmem:[%s14444_s1 + $0x78] sm:$0xf0]  ;;  %v8913_v56 = vld [vmem:[%s14444_s1 + $0x40] sm:$0xf] }
 0x59b   : > { %5762 = vmatpush.bf16.msra.mxu1 %v11901_v57  ;;  %v5319_v57 = vpop.f32.mrf.mxu1 }
 0x59c   : > { %v5320_v62 = vadd.f32 %v5319_v57, %v10063_v10  ;;  %8729 = vst [vmem:[%s12622_s14 + $0xa0] sm:$0xff] %v5307_v58  ;;  %v9766_v57 = vld [vmem:[%s14444_s1 + $0xec] sm:$0xf]  ;;  %v9003_v58 = vld [vmem:[%s14444_s1 + $0xf8] sm:$0xf0] }
 0x59d   : > { %5750 = vmatpush.bf16.msra.mxu0 %v11928_v2  ;;  %5789 = vmatpush.bf16.msra.mxu3 %v11953_v15  ;;  %v5345_v2 = vpop.f32.mrf.mxu3 }
 0x59e   : > { %5777 = vmatpush.bf16.msra.mxu2 %v11980_v24  ;;  %8730 = vst [vmem:[%s12622_s14 + $0xa8] sm:$0xff] %v5320_v62  ;;  %v5346_v7 = vadd.f32 %v5345_v2, %v10067_v12  ;;  %v9006_v62 = vor.u32 %v9766_v57, %v9003_v58  ;;  %v8977_v2 = vld [vmem:[%s14444_s1 + $0xc0] sm:$0xf]  ;;  %v9745_v57 = vld [vmem:[%s14444_s1 + $0x44] sm:$0xf] }
 0x59f   : > { %5763 = vmatpush.bf16.msra.mxu1 %v11930_v3  ;;  %v5332_v3 = vpop.f32.mrf.mxu2  ;;  %v8915_v58 = vld [vmem:[%s14444_s1 + $0x50] sm:$0xf0] }
 0x5a0   : > { %8732 = vst [vmem:[%s12622_s14 + $0xb8] sm:$0xff] %v5346_v7  ;;  %v9761_v7 = vld [vmem:[%s14444_s1 + $0xc4] sm:$0xf] }
 0x5a1   : > { %5751 = vmatpush.bf16.msra.mxu0 %v11965_v19  ;;  %5790 = vmatpush.bf16.msra.mxu3 %v11992_v28  ;;  %v5308_v15 = vpop.f32.mrf.mxu0 }
 0x5a2   : > { %5778 = vmatpush.bf16.msra.mxu2 %v12016_v36 }
 0x5a3   : > { %5764 = vmatpush.bf16.msra.mxu1 %v11978_v23  ;;  %v5321_v19 = vpop.f32.mrf.mxu1  ;;  %v5333_v23 = vadd.f32 %v5332_v3, %v10065_v11  ;;  %v9763_v3 = vld [vmem:[%s14444_s1 + $0xcc] sm:$0xf0] }
 0x5a4   : > { %v8978_v15 = vor.u32 %v9763_v3, %v8977_v2  ;;  %v8979_v19 = vld [vmem:[%s14444_s1 + $0xd0] sm:$0xf0] }
 0x5a5   : > { %5752 = vmatpush.bf16.msra.mxu0 %v12010_v34  ;;  %5791 = vmatpush.bf16.msra.mxu3 %v12028_v40  ;;  %8731 = vst [vmem:[%s12622_s14 + $0xb0] sm:$0xff] %v5333_v23  ;;  %v5347_v24 = vpop.f32.mrf.mxu3  ;;  %v5441_v34 = vld [vmem:[%s10069_s24 + $0xe] sm:$0x1]  ;;  %v5440_v40 = vld [vmem:[%s10069_s24 + $0x6] sm:$0x1] }
 0x5a6   : > { %5779 = vmatpush.bf16.msra.mxu2 %v12052_v48  ;;  %v5449_v36 = vpack.c.bf16 %v5441_v34, %v5441_v34  ;;  %v5444_v48 = vld [vmem:[%s10069_s24 + $0x26] sm:$0x1]  ;;  %v8985_v23 = vld [vmem:[%s14444_s1 + $0xc8] sm:$0xf]  ;;  %v9764_v24 = vld [vmem:[%s14444_s1 + $0xd4] sm:$0xf0] }
 0x5a7   : > { %5765 = vmatpush.bf16.msra.mxu1 %v12014_v35  ;;  %v5334_v28 = vpop.f32.mrf.mxu2  ;;  %v5442_v35 = vld [vmem:[%s10069_s24 + $0x16] sm:$0x1]  ;;  %v8986_v34 = vor.u32 %v9764_v24, %v8985_v23  ;;  %v8921_v23 = vld [vmem:[%s14444_s1 + $0x48] sm:$0xf]  ;;  %v9748_v24 = vld [vmem:[%s14444_s1 + $0x54] sm:$0xf0] }
 0x5a8   : > { %v8982_v28 = vor.u32 %v9761_v7, %v8979_v19  ;;  %v8918_v19 = vor.u32 %v9745_v57, %v8915_v58 }
 0x5a9   : > { %5753 = vmatpush.bf16.msra.mxu0 %v12046_v46  ;;  %5792 = vmatpush.bf16.msra.mxu3 %v12064_v52  ;;  %v5443_v46 = vld [vmem:[%s10069_s24 + $0x1e] sm:$0x1]  ;;  %v5448_v52 = vpack.c.bf16 %v5440_v40, %v5440_v40 }
 0x5aa   : > { %5780 = vmatpush.bf16.msra.mxu2 %v12088_v0  ;;  %v5445_v0 = vld [vmem:[%s10069_s24 + $0x2e] sm:$0x1] }
 0x5ab   : > { %5766 = vmatpush.bf16.msra.mxu1 %v12050_v47  ;;  %v5450_v47 = vpack.c.bf16 %v5442_v35, %v5442_v35  ;;  %v9762_v35 = vld [vmem:[%s14444_s1 + $0xcc] sm:$0xf] }
 0x5ac   : > { %v8737_v3 = vld [vmem:[%s12414_s23 + $0xd0] sm:$0xff]  ;;  %v8738_v7 = vld [vmem:[%s12414_s23 + $0xd8] sm:$0xff] }
 0x5ad   : > { %5754 = vmatpush.bf16.msra.mxu0 %v12082_v61  ;;  %5793 = vmatpush.bf16.msra.mxu3 %v12100_v6  ;;  %v5451_v61 = vpack.c.bf16 %v5443_v46, %v5443_v46  ;;  %v5452_v6 = vpack.c.bf16 %v5444_v48, %v5444_v48  ;;  %v8961_v46 = vld [vmem:[%s14444_s1 + $0xa0] sm:$0xf]  ;;  %v9757_v48 = vld [vmem:[%s14444_s1 + $0xa4] sm:$0xf] }
 0x5ae   : > { %5781 = vmatpush.bf16.msra.mxu2 %v12127_v22  ;;  %v5453_v22 = vpack.c.bf16 %v5445_v0, %v5445_v0  ;;  %v9760_v0 = vld [vmem:[%s14444_s1 + $0xb4] sm:$0xf0] }
 0x5af   : > { %5767 = vmatpush.bf16.msra.mxu1 %v12086_v63  ;;  %v5497_v63 = vunpack.c.l.b16 %v5449_v36  ;;  %v5500_v5 = vunpack.c.l.b16 %v5452_v6  ;;  %v8987_v36 = vld [vmem:[%s14444_s1 + $0xd8] sm:$0xf0] }
 0x5b0   : > { %v5501_v43 = vunpack.c.l.b16 %v5453_v22  ;;  %v8990_v40 = vor.u32 %v9762_v35, %v8987_v36  ;;  %v8971_v22 = vld [vmem:[%s14444_s1 + $0xb8] sm:$0xf0]  ;;  %v8897_v36 = vld [vmem:[%s14444_s1 + $0x20] sm:$0xf] }
 0x5b1   : > { %5755 = vmatpush.bf16.msra.mxu0 %v12118_v18  ;;  %5794 = vmatpush.bf16.msra.mxu3 %v12139_v29  ;;  %v5498_v18 = vunpack.c.l.b16 %v5450_v47  ;;  %v5496_v29 = vunpack.c.l.b16 %v5448_v52  ;;  %v5510_v20 = vrot.slane %v5500_v5, 4  ;;  %v9759_v47 = vld [vmem:[%s14444_s1 + $0xac] sm:$0xf0]  ;;  %v8923_v35 = vld [vmem:[%s14444_s1 + $0x58] sm:$0xf0] }
 0x5b2   : > { %5782 = vmatpush.bf16.msra.mxu2 %v12172_v45  ;;  %v5447_v45 = vld [vmem:[%s10069_s24 + $0x3e] sm:$0x1]  ;;  %v5512_v1 = vrot.slane %v5501_v43, 3  ;;  %v8962_v52 = vor.u32 %v9759_v47, %v8961_v46  ;;  %v9743_v46 = vld [vmem:[%s14444_s1 + $0x2c] sm:$0xf0] }
 0x5b3   : > { %5768 = vmatpush.bf16.msra.mxu1 %v12125_v21  ;;  %v5446_v21 = vld [vmem:[%s10069_s24 + $0x36] sm:$0x1]  ;;  %v5455_v8 = vpack.c.bf16 %v5447_v45, %v5447_v45  ;;  %v9754_v43 = vld [vmem:[%s14444_s1 + $0x8c] sm:$0xf] }
 0x5b4   : > { %v5454_v42 = vpack.c.bf16 %v5446_v21, %v5446_v21  ;;  %v9758_v21 = vld [vmem:[%s14444_s1 + $0xac] sm:$0xf]  ;;  %v9753_v45 = vld [vmem:[%s14444_s1 + $0x84] sm:$0xf] }
 0x5b5   : > { %5756 = vmatpush.bf16.msra.mxu0 %v12160_v39  ;;  %5795 = vmatpush.bf16.msra.mxu3 %v12175_v49  ;;  %v5499_v39 = vunpack.c.l.b16 %v5451_v61  ;;  %v5506_v49 = vrot.slane %v5498_v18, 6  ;;  %v5503_v59 = vunpack.c.l.b16 %v5455_v8  ;;  %v8963_v61 = vld [vmem:[%s14444_s1 + $0xb0] sm:$0xf0]  ;;  %v9756_v8 = vld [vmem:[%s14444_s1 + $0x94] sm:$0xf0] }
 0x5b6   : > { %v5502_v60 = vunpack.c.l.b16 %v5454_v42  ;;  %v8966_v6 = vor.u32 %v9757_v48, %v8963_v61  ;;  %v8947_v42 = vld [vmem:[%s14444_s1 + $0x90] sm:$0xf0]  ;;  %v9741_v47 = vld [vmem:[%s14444_s1 + $0x24] sm:$0xf]  ;;  %v8905_v61 = vld [vmem:[%s14444_s1 + $0x28] sm:$0xf] }
 0x5b7   : > { %5769 = vmatpush.bf16.msra.mxu1 %v12170_v44  ;;  %v5504_v44 = vrot.slane %v5497_v63, 7  ;;  %v5508_v13 = vrot.slane %v5499_v39, 5  ;;  %v5516_v14 = vrot.slane %v5503_v59, 1  ;;  %v8969_v63 = vld [vmem:[%s14444_s1 + $0xa8] sm:$0xf]  ;;  %v8974_v39 = vor.u32 %v9758_v21, %v8971_v22 }
 0x5b8   : > { %v5514_v32 = vrot.slane %v5502_v60, 2  ;;  %v8970_v18 = vor.u32 %v9760_v0, %v8969_v63  ;;  %v8955_v60 = vld [vmem:[%s14444_s1 + $0x98] sm:$0xf0]  ;;  %v8736_v59 = vld [vmem:[%s12414_s23 + $0xc8] sm:$0xff]  ;;  %v8899_v48 = vld [vmem:[%s14444_s1 + $0x30] sm:$0xf0] }
 0x5b9   : > { %v5505_v50 = vsel %vm3200_vm7, %v5504_v44, %v5496_v29  ;;  %v8945_v29 = vld [vmem:[%s14444_s1 + $0x80] sm:$0xf]  ;;  %v9755_v44 = vld [vmem:[%s14444_s1 + $0x8c] sm:$0xf0]  ;;  %v9744_v63 = vld [vmem:[%s14444_s1 + $0x34] sm:$0xf0]  ;;  %v8902_v21 = vor.u32 %v9741_v47, %v8899_v48 }
 0x5ba   : > { %v5507_v17 = vsel %vm3203_vm8, %v5506_v49, %v5505_v50  ;;  %v8946_v5 = vor.u32 %v9755_v44, %v8945_v29  ;;  %v8953_v49 = vld [vmem:[%s14444_s1 + $0x88] sm:$0xf]  ;;  %v8950_v50 = vor.u32 %v9753_v45, %v8947_v42  ;;  %v9742_v0 = vld [vmem:[%s14444_s1 + $0x2c] sm:$0xf]  ;;  %v8906_v22 = vor.u32 %v9744_v63, %v8905_v61  ;;  %v8907_v29 = vld [vmem:[%s14444_s1 + $0x38] sm:$0xf0] }
 0x5bb   : > { %v5509_v4 = vsel %vm3206_vm9, %v5508_v13, %v5507_v17  ;;  %v8954_v13 = vor.u32 %v9756_v8, %v8953_v49  ;;  %v8958_v17 = vor.u32 %v9754_v43, %v8955_v60  ;;  %v9739_v44 = vld [vmem:[%s14444_s1 + $0xc] sm:$0xf0]  ;;  %v8910_v8 = vor.u32 %v9742_v0, %v8907_v29  ;;  %v9737_v43 = vld [vmem:[%s14444_s1 + $0x4] sm:$0xf]  ;;  %v9740_v60 = vld [vmem:[%s14444_s1 + $0x14] sm:$0xf0] }
 0x5bc   : > { %v5511_v25 = vsel %vm3209_vm10, %v5510_v20, %v5509_v4  ;;  %v8735_v20 = vld [vmem:[%s12414_s23 + $0xc0] sm:$0xff] }
 0x5bd   : > { %v5513_v33 = vsel %vm3212_vm11, %v5512_v1, %v5511_v25  ;;  %v8929_v4 = vld [vmem:[%s14444_s1 + $0x60] sm:$0xf]  ;;  %v9751_v1 = vld [vmem:[%s14444_s1 + $0x6c] sm:$0xf0]  ;;  %v9749_v25 = vld [vmem:[%s14444_s1 + $0x64] sm:$0xf] }
 0x5be   : > { %v5515_v16 = vsel %vm3215_vm12, %v5514_v32, %v5513_v33  ;;  %v5829_v48 = vld [vmem:[%s10069_s24 + $0x37] sm:$0x1] }
 0x5bf   : > { %v5517_v26 = vsel %vm3218_vm13, %v5516_v14, %v5515_v16  ;;  %v8930_v14 = vor.u32 %v9751_v1, %v8929_v4  ;;  %v8931_v16 = vld [vmem:[%s14444_s1 + $0x70] sm:$0xf0]  ;;  %v5824_v1 = vld [vmem:[%s10069_s24 + $0xf] sm:$0x1] }
 0x5c0   : > { %v5518_v37 = vpack.c.b16 %v5517_v26, %v5517_v26  ;;  %v8937_v26 = vld [vmem:[%s14444_s1 + $0x68] sm:$0xf]  ;;  %v8934_v54 = vor.u32 %v9749_v25, %v8931_v16  ;;  %v5832_v16 = vpack.c.bf16 %v5824_v1, %v5824_v1 }
 0x5c2   : > { %5714 = vmatmul.bf16.vlgmr.msrb.gmra.mxu2 %v5518_v37  ;;  %5727 = vmatmul.bf16.vlgmr.msrb.gmra.mxu3 %v5518_v37  ;;  %v5880_v58 = vunpack.c.l.b16 %v5832_v16 }
 0x5c3   : > { %5688 = vmatmul.bf16.vlgmr.msrb.gmra.mxu0 %v5518_v37  ;;  %5701 = vmatmul.bf16.vlgmr.msrb.gmra.mxu1 %v5518_v37  ;;  %v9752_v37 = vld [vmem:[%s14444_s1 + $0x74] sm:$0xf0] }
 0x5c4   : > { %6063 = vmatpush.bf16.msrb.mxu0 %v8994_v30  ;;  %6076 = vmatpush.bf16.msrb.mxu1 %v8998_v41  ;;  %v8938_v30 = vor.u32 %v9752_v37, %v8937_v26  ;;  %v8942_v41 = vor.u32 %v9750_v31, %v8939_v55  ;;  %v5826_v31 = vld [vmem:[%s10069_s24 + $0x1f] sm:$0x1] }
 0x5c5   : > { %6089 = vmatpush.bf16.msrb.mxu2 %v9002_v53  ;;  %6102 = vmatpush.bf16.msrb.mxu3 %v9006_v62  ;;  %v9747_v53 = vld [vmem:[%s14444_s1 + $0x4c] sm:$0xf0] }
 0x5c8   : > { %6064 = vmatpush.bf16.msrb.mxu0 %v8978_v15  ;;  %6077 = vmatpush.bf16.msrb.mxu1 %v8982_v28  ;;  %v8914_v15 = vor.u32 %v9747_v53, %v8913_v56  ;;  %v8922_v28 = vor.u32 %v9748_v24, %v8921_v23 }
 0x5c9   : > { %6090 = vmatpush.bf16.msrb.mxu2 %v8986_v34  ;;  %6103 = vmatpush.bf16.msrb.mxu3 %v8990_v40  ;;  %v9746_v34 = vld [vmem:[%s14444_s1 + $0x4c] sm:$0xf] }
 0x5ca   : > { %v8926_v40 = vor.u32 %v9746_v34, %v8923_v35  ;;  %v5887_v34 = vrot.slane %v5880_v58, 7  ;;  %v5828_v35 = vld [vmem:[%s10069_s24 + $0x2f] sm:$0x1] }
 0x5cc   : > { %6065 = vmatpush.bf16.msrb.mxu0 %v8962_v52  ;;  %6078 = vmatpush.bf16.msrb.mxu1 %v8966_v6  ;;  %v8898_v52 = vor.u32 %v9743_v46, %v8897_v36 }
 0x5cd   : > { %6091 = vmatpush.bf16.msrb.mxu2 %v8970_v18  ;;  %6104 = vmatpush.bf16.msrb.mxu3 %v8974_v39  ;;  %v8881_v39 = vld [vmem:[%s14444_s1] sm:$0xf] }
 0x5ce   : > { %v8882_v4 = vor.u32 %v9739_v44, %v8881_v39 }
 0x5d0   : > { %6066 = vmatpush.bf16.msrb.mxu0 %v8946_v5  ;;  %6079 = vmatpush.bf16.msrb.mxu1 %v8950_v50  ;;  %v8883_v50 = vld [vmem:[%s14444_s1 + $0x10] sm:$0xf0] }
 0x5d1   : > { %6092 = vmatpush.bf16.msrb.mxu2 %v8954_v13  ;;  %6105 = vmatpush.bf16.msrb.mxu3 %v8958_v17  ;;  %v8889_v13 = vld [vmem:[%s14444_s1 + $0x8] sm:$0xf]  ;;  %v9738_v17 = vld [vmem:[%s14444_s1 + $0xc] sm:$0xf] }
 0x5d4   : > { %6067 = vmatpush.bf16.msrb.mxu0 %v8930_v14  ;;  %6080 = vmatpush.bf16.msrb.mxu1 %v8934_v54  ;;  %v5825_v14 = vld [vmem:[%s10069_s24 + $0x17] sm:$0x1] }
 0x5d5   : > { %6093 = vmatpush.bf16.msrb.mxu2 %v8938_v30  ;;  %6106 = vmatpush.bf16.msrb.mxu3 %v8942_v41  ;;  %v5833_v55 = vpack.c.bf16 %v5825_v14, %v5825_v14 }
 0x5d8   : > { %6068 = vmatpush.bf16.msrb.mxu0 %v8914_v15  ;;  %6081 = vmatpush.bf16.msrb.mxu1 %v8918_v19  ;;  %v5834_v15 = vpack.c.bf16 %v5826_v31, %v5826_v31  ;;  %v5881_v19 = vunpack.c.l.b16 %v5833_v55 }
 0x5d9   : > { %6094 = vmatpush.bf16.msrb.mxu2 %v8922_v28  ;;  %6107 = vmatpush.bf16.msrb.mxu3 %v8926_v40 }
 0x5da   : > { %v5882_v40 = vunpack.c.l.b16 %v5834_v15  ;;  %v5889_v47 = vrot.slane %v5881_v19, 6 }
 0x5dc   : > { %6069 = vmatpush.bf16.msrb.mxu0 %v8898_v52  ;;  %6082 = vmatpush.bf16.msrb.mxu1 %v8902_v21  ;;  %v5836_v52 = vpack.c.bf16 %v5828_v35, %v5828_v35  ;;  %v5891_v63 = vrot.slane %v5882_v40, 5 }
 0x5dd   : > { %6095 = vmatpush.bf16.msrb.mxu2 %v8906_v22  ;;  %6108 = vmatpush.bf16.msrb.mxu3 %v8910_v8 }
 0x5de   : > { %v5884_v29 = vunpack.c.l.b16 %v5836_v52 }
 0x5e0   : > { %6070 = vmatpush.bf16.msrb.mxu0 %v8882_v4  ;;  %v5895_v8 = vrot.slane %v5884_v29, 3 }
 0x610   : > { %v5375_v32 = vpop.f32.mrf.mxu0  ;;  %v5388_v33 = vpop.f32.mrf.mxu1 }
 0x611   : > { %v5418_v38 = vadd.f32 %v8735_v20, %v5375_v32  ;;  %v5419_v51 = vadd.f32 %v8736_v59, %v5388_v33  ;;  %v8891_v20 = vld [vmem:[%s14444_s1 + $0x18] sm:$0xf0]  ;;  %v8886_v32 = vor.u32 %v9737_v43, %v8883_v50  ;;  %v8890_v33 = vor.u32 %v9740_v60, %v8889_v13 }
 0x613   : > { %v5422_v62 = vmul.f32 0.5, %v5418_v38  ;;  %v5423_v2 = vmul.f32 0.5, %v5419_v51  ;;  %v8894_v38 = vor.u32 %v9738_v17, %v8891_v20  ;;  %v5823_v51 = vld [vmem:[%s10069_s24 + $0x7] sm:$0x1]  ;;  %6083 = vmatpush.bf16.msrb.mxu1 %v8886_v32  ;;  %6096 = vmatpush.bf16.msrb.mxu2 %v8890_v33 }
 0x614   : > { %v5831_v57 = vpack.c.bf16 %v5823_v51, %v5823_v51 }
 0x615   : > { %9903 = vtanh.f32 %v5422_v62  ;;  %6109 = vmatpush.bf16.msrb.mxu3 %v8894_v38 }
 0x616   : > { %9905 = vtanh.f32 %v5423_v2  ;;  %v5879_v28 = vunpack.c.l.b16 %v5831_v57 }
 0x617   : > { %v5401_v6 = vpop.f32.mrf.mxu2  ;;  %v5414_v18 = vpop.f32.mrf.mxu3 }
 0x618   : > { %v5420_v45 = vadd.f32 %v8737_v3, %v5401_v6  ;;  %v5421_v42 = vadd.f32 %v8738_v7, %v5414_v18  ;;  %v5377_v5 = vpop.f32.mrf.mxu0  ;;  %v5390_v49 = vpop.f32.mrf.mxu1  ;;  %v5827_v7 = vld [vmem:[%s10069_s24 + $0x27] sm:$0x1]  ;;  %v5830_v6 = vld [vmem:[%s10069_s24 + $0x3f] sm:$0x1]  ;;  %v5837_v18 = vpack.c.bf16 %v5829_v48, %v5829_v48 }
 0x619   : > { %v5835_v36 = vpack.c.bf16 %v5827_v7, %v5827_v7 }
 0x61a   : > { %v5424_v59 = vmul.f32 0.5, %v5420_v45  ;;  %9907 = vtanh.f32 %v5421_v42  ;;  %v5838_v45 = vpack.c.bf16 %v5830_v6, %v5830_v6  ;;  %v5885_v49 = vunpack.c.l.b16 %v5837_v18 }
 0x61b   : > { %v9904_v25 = vpop.eup %9903  ;;  %v5883_v61 = vunpack.c.l.b16 %v5835_v36 }
 0x61c   : > { %v9906_v26 = vpop.eup %9905  ;;  %v5428_v37 = vmul.f32 0.5, %v9904_v25  ;;  %9909 = vtanh.f32 %v5424_v59  ;;  %v5886_v50 = vunpack.c.l.b16 %v5838_v45  ;;  %v5897_v13 = vrot.slane %v5885_v49, 2 }
 0x61d   : > { %v5429_v54 = vmul.f32 0.5, %v9906_v26  ;;  %v5893_v44 = vrot.slane %v5883_v61, 4 }
 0x61e   : > { %v5431_v30 = vadd.f32 0.5, %v5428_v37  ;;  %v5899_v17 = vrot.slane %v5886_v50, 1 }
 0x61f   : > { %v5432_v56 = vadd.f32 0.5, %v5429_v54  ;;  %v5403_v41 = vpop.f32.mrf.mxu2  ;;  %v5416_v53 = vpop.f32.mrf.mxu3 }
 0x620   : > { %v9908_v62 = vpop.eup %9907 }
 0x621   : > { %v5435_v2 = vmul.f32 %v5432_v56, %v13818_v27  ;;  %v5436_v3 = vmul.f32 %v9908_v62, %v5431_v30  ;;  %v5888_v27 = vsel %vm3200_vm7, %v5887_v34, %v5879_v28 }
 0x622   : > { %v9910_v23 = vpop.eup %9909  ;;  %v5890_v21 = vsel %vm3203_vm8, %v5889_v47, %v5888_v27 }
 0x623   : > { %v14150_v24 = vadd.f32 %v5436_v3, %v5435_v2  ;;  %v5430_v46 = vmul.f32 0.5, %v9910_v23  ;;  %v5892_v42 = vsel %vm3206_vm9, %v5891_v63, %v5890_v21 }
 0x624   : > { %v5894_v43 = vsel %vm3209_vm10, %v5893_v44, %v5892_v42 }
 0x625   : > { %9911 = vtanh.f32 %v14150_v24  ;;  %v5433_v0 = vadd.f32 0.5, %v5430_v46  ;;  %v5896_v60 = vsel %vm3212_vm11, %v5895_v8, %v5894_v43 }
 0x626   : > { %v5898_v20 = vsel %vm3215_vm12, %v5897_v13, %v5896_v60 }
 0x627   : > { %v5900_v59 = vsel %vm3218_vm13, %v5899_v17, %v5898_v20 }
 0x628   : > { %v5901_v4 = vpack.c.b16 %v5900_v59, %v5900_v59 }
 0x62b   : > { %v9912_v22 = vpop.eup %9911 }
 0x62c   : > { %v5439_v39 = vmul.f32 %v9912_v22, %v5433_v0 }
 0x62e   : > { %v5748_v5 = vpack.c.bf16 %v5439_v39, %v5439_v39 }
 0x630   : > { %5757 = vmatmul.bf16.vlgmr.msra.gmra.mxu0 %v5748_v5  ;;  %5770 = vmatmul.bf16.vlgmr.msra.gmra.mxu1 %v5748_v5 }
 0x631   : > { %5783 = vmatmul.bf16.vlgmr.msra.gmra.mxu2 %v5748_v5  ;;  %5796 = vmatmul.bf16.vlgmr.msra.gmra.mxu3 %v5748_v5 }
 0x640   : > { %6071 = vmatmul.bf16.vlgmr.msrb.gmra.mxu0 %v5901_v4  ;;  %6084 = vmatmul.bf16.vlgmr.msrb.gmra.mxu1 %v5901_v4  ;;  %v5689_v1 = vpop.f32.mrf.mxu0  ;;  %v5702_v25 = vpop.f32.mrf.mxu1 }
 0x641   : > { %6097 = vmatmul.bf16.vlgmr.msrb.gmra.mxu2 %v5901_v4  ;;  %6110 = vmatmul.bf16.vlgmr.msrb.gmra.mxu3 %v5901_v4  ;;  %v5690_v32 = vadd.f32 %v5689_v1, %v10061_v9  ;;  %v5703_v33 = vadd.f32 %v5702_v25, %v10063_v10 }
 0x643   : > { %8869 = vst [vmem:[%s12622_s14 + $0xc0] sm:$0xff] %v5690_v32 }
 0x644   : > { %8870 = vst [vmem:[%s12622_s14 + $0xc8] sm:$0xff] %v5703_v33 }
 0x645   : > { %v5715_v14 = vpop.f32.mrf.mxu2  ;;  %v5728_v16 = vpop.f32.mrf.mxu3 }
 0x646   : > { %v5716_v26 = vadd.f32 %v5715_v14, %v10065_v11  ;;  %v5729_v37 = vadd.f32 %v5728_v16, %v10067_v12 }
 0x648   : > { %8871 = vst [vmem:[%s12622_s14 + $0xd0] sm:$0xff] %v5716_v26  ;;  %v5691_v38 = vpop.f32.mrf.mxu0  ;;  %v5704_v51 = vpop.f32.mrf.mxu1 }
 0x649   : > { %8872 = vst [vmem:[%s12622_s14 + $0xd8] sm:$0xff] %v5729_v37 }
 0x64d   : > { %v5717_v54 = vpop.f32.mrf.mxu2  ;;  %v5730_v30 = vpop.f32.mrf.mxu3 }
 0x650   : > { %v8875_v31 = vld [vmem:[%s12414_s23 + $0xe0] sm:$0xff]  ;;  %v8876_v55 = vld [vmem:[%s12414_s23 + $0xe8] sm:$0xff]  ;;  %v8877_v2 = vld [vmem:[%s12414_s23 + $0xf0] sm:$0xff] }
 0x651   : > { %v8878_v3 = vld [vmem:[%s12414_s23 + $0xf8] sm:$0xff] }
 0x6ad   : > { %v5758_v56 = vpop.f32.mrf.mxu0  ;;  %v5771_v41 = vpop.f32.mrf.mxu1 }
 0x6ae   : > { %v5801_v53 = vadd.f32 %v8875_v31, %v5758_v56  ;;  %v5802_v57 = vadd.f32 %v8876_v55, %v5771_v41 }
 0x6b0   : > { %v5805_v58 = vmul.f32 0.5, %v5801_v53  ;;  %v5806_v62 = vmul.f32 0.5, %v5802_v57 }
 0x6b2   : > { %9913 = vtanh.f32 %v5805_v58 }
 0x6b3   : > { %9915 = vtanh.f32 %v5806_v62 }
 0x6b4   : > { %v5784_v7 = vpop.f32.mrf.mxu2  ;;  %v5797_v15 = vpop.f32.mrf.mxu3 }
 0x6b5   : > { %v5803_v19 = vadd.f32 %v8877_v2, %v5784_v7  ;;  %v5804_v23 = vadd.f32 %v8878_v3, %v5797_v15  ;;  %v5760_v28 = vpop.f32.mrf.mxu0  ;;  %v5773_v34 = vpop.f32.mrf.mxu1 }
 0x6b7   : > { %v5807_v35 = vmul.f32 0.5, %v5803_v19  ;;  %9917 = vtanh.f32 %v5804_v23 }
 0x6b8   : > { %v9914_v36 = vpop.eup %9913 }
 0x6b9   : > { %v9916_v40 = vpop.eup %9915  ;;  %v5811_v46 = vmul.f32 0.5, %v9914_v36  ;;  %9919 = vtanh.f32 %v5807_v35 }
 0x6ba   : > { %v5812_v47 = vmul.f32 0.5, %v9916_v40 }
 0x6bb   : > { %v5814_v48 = vadd.f32 0.5, %v5811_v46 }
 0x6bc   : > { %v5815_v52 = vadd.f32 0.5, %v5812_v47  ;;  %v5786_v27 = vpop.f32.mrf.mxu2  ;;  %v5799_v61 = vpop.f32.mrf.mxu3 }
 0x6bd   : > { %v9918_v63 = vpop.eup %9917  ;;  %v6072_v0 = vpop.f32.mrf.mxu0 }
 0x6be   : > { %v6085_v6 = vpop.f32.mrf.mxu1  ;;  %v5818_v18 = vmul.f32 %v5815_v52, %v14150_v24  ;;  %v5819_v21 = vmul.f32 %v9918_v63, %v5814_v48  ;;  %v6073_v22 = vadd.f32 %v6072_v0, %v10061_v9 }
 0x6bf   : > { %v6086_v29 = vadd.f32 %v6085_v6, %v10063_v10  ;;  %v9920_v39 = vpop.eup %9919 }
 0x6c0   : > { %v5820_v44 = vadd.f32 %v5819_v21, %v5818_v18  ;;  %9009 = vst [vmem:[%s12622_s14 + $0xe0] sm:$0xff] %v6073_v22  ;;  %v5813_v45 = vmul.f32 0.5, %v9920_v39 }
 0x6c1   : > { %9010 = vst [vmem:[%s12622_s14 + $0xe8] sm:$0xff] %v6086_v29 }
 0x6c2   : > { %9921 = vtanh.f32 %v5820_v44  ;;  %6124 = vst [vmem:[#allocation4] sm:$0xff] %v5820_v44  ;;  %v5816_v9 = vadd.f32 0.5, %v5813_v45 }
 0x6c4   : > { %v6098_v42 = vpop.f32.mrf.mxu2  ;;  %v6111_v5 = vpop.f32.mrf.mxu3 }
 0x6c5   : > { %v6099_v49 = vadd.f32 %v6098_v42, %v10065_v11  ;;  %v6112_v24 = vadd.f32 %v6111_v5, %v10067_v12  ;;  %v6074_v8 = vpop.f32.mrf.mxu0 }
 0x6c6   : > { %v6087_v43 = vpop.f32.mrf.mxu1 }
 0x6c7   : > { %9011 = vst [vmem:[%s12622_s14 + $0xf0] sm:$0xff] %v6099_v49 }
 0x6c8   : > { %v9922_v50 = vpop.eup %9921  ;;  %9012 = vst [vmem:[%s12622_s14 + $0xf8] sm:$0xff] %v6112_v24  ;;  %6128 = sbr.rel (%p9013_p0) target bundleno = 2204 (0x89c), region = 114 }
 0x6c9   : > { %v14184_v10 = vmul.f32 %v9922_v50, %v5816_v9 }
 0x6cb   : > { %6123 = vst [vmem:[#allocation3] sm:$0xff] %v14184_v10 }
 0x6cc   : > { %v6100_v13 = vpop.f32.mrf.mxu2  ;;  %v6113_v60 = vpop.f32.mrf.mxu3 }
 0x6cd   : > { %v9100_v11 = vld [vmem:[%s14447_s4 + $0xe0] sm:$0xf]  ;;  %v9792_v12 = vld [vmem:[%s14447_s4 + $0xec] sm:$0xf0]  ;;  %v9791_v17 = vld [vmem:[%s14447_s4 + $0xec] sm:$0xf] }
 0x6ce   : > { %v9101_v20 = vor.u32 %v9792_v12, %v9100_v11  ;;  %v9106_v59 = vld [vmem:[%s14447_s4 + $0xf8] sm:$0xf0]  ;;  %v9104_v4 = vld [vmem:[%s14447_s4 + $0xe8] sm:$0xf]  ;;  %v9793_v1 = vld [vmem:[%s14447_s4 + $0xf4] sm:$0xf0] }
 0x6cf   : > { %v9109_v25 = vor.u32 %v9791_v17, %v9106_v59  ;;  %v9105_v32 = vor.u32 %v9793_v1, %v9104_v4  ;;  %v9088_v33 = vld [vmem:[%s14447_s4 + $0xc0] sm:$0xf]  ;;  %v9789_v14 = vld [vmem:[%s14447_s4 + $0xcc] sm:$0xf0]  ;;  %v9788_v16 = vld [vmem:[%s14447_s4 + $0xcc] sm:$0xf] }
 0x6d0   : > { %6345 = vmatpush.bf16.msra.mxu0 %v9101_v20  ;;  %v9089_v26 = vor.u32 %v9789_v14, %v9088_v33  ;;  %v9094_v37 = vld [vmem:[%s14447_s4 + $0xd8] sm:$0xf0]  ;;  %v9092_v38 = vld [vmem:[%s14447_s4 + $0xc8] sm:$0xf]  ;;  %v9790_v51 = vld [vmem:[%s14447_s4 + $0xd4] sm:$0xf0] }
 0x6d1   : > { %6371 = vmatpush.bf16.msra.mxu2 %v9109_v25  ;;  %6358 = vmatpush.bf16.msra.mxu1 %v9105_v32  ;;  %v9097_v54 = vor.u32 %v9788_v16, %v9094_v37  ;;  %v9093_v30 = vor.u32 %v9790_v51, %v9092_v38  ;;  %v9076_v31 = vld [vmem:[%s14447_s4 + $0xa0] sm:$0xf]  ;;  %v9786_v55 = vld [vmem:[%s14447_s4 + $0xac] sm:$0xf0]  ;;  %v9785_v56 = vld [vmem:[%s14447_s4 + $0xac] sm:$0xf] }
 0x6d2   : > { %v9082_v41 = vld [vmem:[%s14447_s4 + $0xb8] sm:$0xf0]  ;;  %v9080_v53 = vld [vmem:[%s14447_s4 + $0xa8] sm:$0xf]  ;;  %v9787_v57 = vld [vmem:[%s14447_s4 + $0xb4] sm:$0xf0]  ;;  %v9077_v58 = vor.u32 %v9786_v55, %v9076_v31 }
 0x6d3   : > { %v9085_v62 = vor.u32 %v9785_v56, %v9082_v41  ;;  %v9081_v2 = vor.u32 %v9787_v57, %v9080_v53  ;;  %v9064_v3 = vld [vmem:[%s14447_s4 + $0x80] sm:$0xf]  ;;  %v9783_v7 = vld [vmem:[%s14447_s4 + $0x8c] sm:$0xf0]  ;;  %v9782_v15 = vld [vmem:[%s14447_s4 + $0x8c] sm:$0xf] }
 0x6d4   : > { %6346 = vmatpush.bf16.msra.mxu0 %v9089_v26  ;;  %v9070_v19 = vld [vmem:[%s14447_s4 + $0x98] sm:$0xf0]  ;;  %v9068_v23 = vld [vmem:[%s14447_s4 + $0x88] sm:$0xf]  ;;  %v9784_v28 = vld [vmem:[%s14447_s4 + $0x94] sm:$0xf0]  ;;  %v9065_v34 = vor.u32 %v9783_v7, %v9064_v3 }
 0x6d5   : > { %6372 = vmatpush.bf16.msra.mxu2 %v9097_v54  ;;  %6359 = vmatpush.bf16.msra.mxu1 %v9093_v30  ;;  %v9052_v35 = vld [vmem:[%s14447_s4 + $0x60] sm:$0xf]  ;;  %v9780_v36 = vld [vmem:[%s14447_s4 + $0x6c] sm:$0xf0]  ;;  %v9073_v40 = vor.u32 %v9782_v15, %v9070_v19  ;;  %v9069_v46 = vor.u32 %v9784_v28, %v9068_v23  ;;  %v9779_v47 = vld [vmem:[%s14447_s4 + $0x6c] sm:$0xf] }
 0x6d6   : > { %v9058_v48 = vld [vmem:[%s14447_s4 + $0x78] sm:$0xf0]  ;;  %v9056_v52 = vld [vmem:[%s14447_s4 + $0x68] sm:$0xf]  ;;  %v9781_v27 = vld [vmem:[%s14447_s4 + $0x74] sm:$0xf0]  ;;  %v9053_v18 = vor.u32 %v9780_v36, %v9052_v35 }
 0x6d7   : > { %v9040_v61 = vld [vmem:[%s14447_s4 + $0x40] sm:$0xf]  ;;  %v9777_v63 = vld [vmem:[%s14447_s4 + $0x4c] sm:$0xf0]  ;;  %v9776_v0 = vld [vmem:[%s14447_s4 + $0x4c] sm:$0xf]  ;;  %v9061_v29 = vor.u32 %v9779_v47, %v9058_v48  ;;  %v9057_v39 = vor.u32 %v9781_v27, %v9056_v52 }
 0x6d8   : > { %6347 = vmatpush.bf16.msra.mxu0 %v9077_v58  ;;  %v9046_v6 = vld [vmem:[%s14447_s4 + $0x58] sm:$0xf0]  ;;  %v9044_v21 = vld [vmem:[%s14447_s4 + $0x48] sm:$0xf]  ;;  %v9778_v22 = vld [vmem:[%s14447_s4 + $0x54] sm:$0xf0]  ;;  %v9041_v44 = vor.u32 %v9777_v63, %v9040_v61 }
 0x6d9   : > { %6373 = vmatpush.bf16.msra.mxu2 %v9085_v62  ;;  %6360 = vmatpush.bf16.msra.mxu1 %v9081_v2  ;;  %v6129_v45 = vld [vmem:[%s10069_s24 + $0x7] sm:$0x1]  ;;  %v6130_v42 = vld [vmem:[%s10069_s24 + $0xf] sm:$0x1]  ;;  %v6131_v5 = vld [vmem:[%s10069_s24 + $0x17] sm:$0x1]  ;;  %v9049_v49 = vor.u32 %v9776_v0, %v9046_v6  ;;  %v9045_v60 = vor.u32 %v9778_v22, %v9044_v21 }
 0x6da   : > { %v6132_v24 = vld [vmem:[%s10069_s24 + $0x1f] sm:$0x1]  ;;  %v6133_v8 = vld [vmem:[%s10069_s24 + $0x27] sm:$0x1]  ;;  %v6134_v43 = vld [vmem:[%s10069_s24 + $0x2f] sm:$0x1]  ;;  %v6137_v9 = vpack.c.bf16 %v6129_v45, %v6129_v45  ;;  %v6138_v50 = vpack.c.bf16 %v6130_v42, %v6130_v42  ;;  %v6139_v13 = vpack.c.bf16 %v6131_v5, %v6131_v5 }
 0x6db   : > { %v9028_v11 = vld [vmem:[%s14447_s4 + $0x20] sm:$0xf]  ;;  %v6135_v12 = vld [vmem:[%s10069_s24 + $0x37] sm:$0x1]  ;;  %v6136_v17 = vld [vmem:[%s10069_s24 + $0x3f] sm:$0x1]  ;;  %v6140_v20 = vpack.c.bf16 %v6132_v24, %v6132_v24  ;;  %v6141_v59 = vpack.c.bf16 %v6133_v8, %v6133_v8  ;;  %v6142_v4 = vpack.c.bf16 %v6134_v43, %v6134_v43 }
 0x6dc   : > { %6348 = vmatpush.bf16.msra.mxu0 %v9065_v34  ;;  %v9774_v1 = vld [vmem:[%s14447_s4 + $0x2c] sm:$0xf0]  ;;  %v6143_v25 = vpack.c.bf16 %v6135_v12, %v6135_v12  ;;  %v6144_v32 = vpack.c.bf16 %v6136_v17, %v6136_v17  ;;  %v6193_v33 = vunpack.c.l.b16 %v6137_v9  ;;  %v6194_v14 = vunpack.c.l.b16 %v6138_v50  ;;  %v9809_v16 = vld [vmem:[%s14450_s7 + $0x38] sm:$0xff]  ;;  %v9773_v26 = vld [vmem:[%s14447_s4 + $0x2c] sm:$0xf] }
 0x6dd   : > { %6374 = vmatpush.bf16.msra.mxu2 %v9073_v40  ;;  %6361 = vmatpush.bf16.msra.mxu1 %v9069_v46  ;;  %v9034_v37 = vld [vmem:[%s14447_s4 + $0x38] sm:$0xf0]  ;;  %v6195_v38 = vunpack.c.l.b16 %v6139_v13  ;;  %v6196_v51 = vunpack.c.l.b16 %v6140_v20  ;;  %v6197_v54 = vunpack.c.l.b16 %v6141_v59  ;;  %v6198_v30 = vunpack.c.l.b16 %v6142_v4  ;;  %v9032_v31 = vld [vmem:[%s14447_s4 + $0x28] sm:$0xf]  ;;  %v9775_v55 = vld [vmem:[%s14447_s4 + $0x34] sm:$0xf0] }
 0x6de   : > { %v6199_v56 = vunpack.c.l.b16 %v6143_v25  ;;  %v6200_v41 = vunpack.c.l.b16 %v6144_v32  ;;  %v6201_v53 = vrot.slane %v6194_v14, 7  ;;  %6478 = vmatpush.bf16.msra.mxu3 %v9809_v16  ;;  %v9029_v2 = vor.u32 %v9774_v1, %v9028_v11  ;;  %v9016_v3 = vld [vmem:[%s14447_s4] sm:$0xf]  ;;  %v9771_v7 = vld [vmem:[%s14447_s4 + $0xc] sm:$0xf0]  ;;  %v9801_v22 = vld [vmem:[%s14449_s6 + $0x38] sm:$0xff] }
 0x6df   : > { %v6203_v57 = vrot.slane %v6195_v38, 6  ;;  %v6205_v58 = vrot.slane %v6196_v51, 5  ;;  %v6207_v62 = vrot.slane %v6197_v54, 4  ;;  %v6209_v19 = vrot.slane %v6198_v30, 3  ;;  %v9770_v34 = vld [vmem:[%s14447_s4 + $0xc] sm:$0xf] }
 0x6e0   : > { %6349 = vmatpush.bf16.msra.mxu0 %v9053_v18  ;;  %v6202_v15 = vsel %vm3200_vm7, %v6201_v53, %v6193_v33  ;;  %v9037_v23 = vor.u32 %v9773_v26, %v9034_v37  ;;  %v9033_v28 = vor.u32 %v9775_v55, %v9032_v31  ;;  %v9022_v35 = vld [vmem:[%s14447_s4 + $0x18] sm:$0xf0]  ;;  %v6211_v40 = vrot.slane %v6199_v56, 2  ;;  %v9020_v46 = vld [vmem:[%s14447_s4 + $0x8] sm:$0xf]  ;;  %v9798_v5 = vld [vmem:[%s14449_s6 + $0x20] sm:$0xff] }
 0x6e1   : > { %6375 = vmatpush.bf16.msra.mxu2 %v9061_v29  ;;  %6362 = vmatpush.bf16.msra.mxu1 %v9057_v39  ;;  %v6204_v36 = vsel %vm3203_vm8, %v6203_v57, %v6202_v15  ;;  %v9772_v47 = vld [vmem:[%s14447_s4 + $0x14] sm:$0xf0]  ;;  %v6213_v52 = vrot.slane %v6200_v41, 1  ;;  %v9017_v61 = vor.u32 %v9771_v7, %v9016_v3  ;;  %v9025_v0 = vor.u32 %v9770_v34, %v9022_v35  ;;  %v9800_v39 = vld [vmem:[%s14449_s6 + $0x30] sm:$0xff]  ;;  %v9799_v45 = vld [vmem:[%s14449_s6 + $0x28] sm:$0xff] }
 0x6e2   : > { %v6206_v48 = vsel %vm3206_vm9, %v6205_v58, %v6204_v36  ;;  %v9021_v6 = vor.u32 %v9772_v47, %v9020_v46  ;;  %v9807_v42 = vld [vmem:[%s14450_s7 + $0x28] sm:$0xff]  ;;  %v9797_v24 = vld [vmem:[%s14449_s6 + $0x18] sm:$0xff]  ;;  %v9796_v43 = vld [vmem:[%s14449_s6 + $0x10] sm:$0xff]  ;;  %v6396_v12 = vpack.c.bf16 %v14184_v10, %v14184_v10 }
 0x6e3   : > { %v6208_v27 = vsel %vm3209_vm10, %v6207_v62, %v6206_v48  ;;  %v9805_v8 = vld [vmem:[%s14450_s7 + $0x18] sm:$0xff]  ;;  %v9804_v9 = vld [vmem:[%s14450_s7 + $0x10] sm:$0xff]  ;;  %v9795_v50 = vld [vmem:[%s14449_s6 + $0x8] sm:$0xff] }
 0x6e4   : > { %6350 = vmatpush.bf16.msra.mxu0 %v9041_v44  ;;  %v6210_v63 = vsel %vm3212_vm11, %v6209_v19, %v6208_v27  ;;  %v9808_v44 = vld [vmem:[%s14450_s7 + $0x30] sm:$0xff]  ;;  %v9803_v13 = vld [vmem:[%s14450_s7 + $0x8] sm:$0xff]  ;;  %v9802_v11 = vld [vmem:[%s14450_s7] sm:$0xff] }
 0x6e5   : > { %6376 = vmatpush.bf16.msra.mxu2 %v9049_v49  ;;  %6363 = vmatpush.bf16.msra.mxu1 %v9045_v60  ;;  %v6212_v18 = vsel %vm3215_vm12, %v6211_v40, %v6210_v63  ;;  %v9806_v49 = vld [vmem:[%s14450_s7 + $0x20] sm:$0xff]  ;;  %v9817_v4 = vld [vmem:[%s14452_s9 + $0x38] sm:$0xff]  ;;  %v9816_v25 = vld [vmem:[%s14452_s9 + $0x30] sm:$0xff] }
 0x6e6   : > { %v6214_v21 = vsel %vm3218_vm13, %v6213_v52, %v6212_v18  ;;  %6479 = vmatpush.bf16.msra.mxu3 %v9808_v44  ;;  %v9794_v60 = vld [vmem:[%s14449_s6] sm:$0xff]  ;;  %v9815_v26 = vld [vmem:[%s14452_s9 + $0x28] sm:$0xff] }
 0x6e7   : > { %v6215_v29 = vpack.c.b16 %v6214_v21, %v6214_v21  ;;  %v6177_v17 = vld [vmem:[%s14448_s5] sm:$0xf]  ;;  %v9811_v36 = vld [vmem:[%s14452_s9 + $0x8] sm:$0xff] }
 0x6e8   : > { %6351 = vmatpush.bf16.msra.mxu0 %v9029_v2  ;;  %v6179_v20 = vperm.slane %v6177_v17, 0  ;;  %v6180_v59 = vperm.slane %v6177_v17, 2  ;;  %v6181_v16 = vperm.slane %v6177_v17, 3  ;;  %v9814_v30 = vld [vmem:[%s14452_s9 + $0x20] sm:$0xff] }
 0x6e9   : > { %6377 = vmatpush.bf16.msra.mxu2 %v9037_v23  ;;  %6364 = vmatpush.bf16.msra.mxu1 %v9033_v28  ;;  %v9813_v23 = vld [vmem:[%s14452_s9 + $0x18] sm:$0xff]  ;;  %v9812_v28 = vld [vmem:[%s14452_s9 + $0x10] sm:$0xff]  ;;  %v9810_v40 = vld [vmem:[%s14452_s9] sm:$0xff] }
 0x6ea   : > { %6480 = vmatpush.bf16.msra.mxu3 %v9807_v42  ;;  %v9923_v46 = vld [vmem:[%s14451_s8] ss:$0 sm:$0xff] }
 0x6ec   : > { %6352 = vmatpush.bf16.msra.mxu0 %v9017_v61 }
 0x6ed   : > { %6378 = vmatpush.bf16.msra.mxu2 %v9025_v0  ;;  %6365 = vmatpush.bf16.msra.mxu1 %v9021_v6  ;;  %v9924_v0 = vld [vmem:[%s14453_s10] ss:$0 sm:$0xff] }
 0x6ee   : > { %6481 = vmatpush.bf16.msra.mxu3 %v9806_v49 }
 0x6ef   : > { %6353 = vmatmul.bf16.vlgmr.msra.gmra.mxu0 %v6215_v29 }
 0x6f0   : > { %6539 = vmatpush.bf16.msrb.mxu0 %v9801_v22  ;;  %6379 = vmatmul.bf16.vlgmr.msra.gmra.mxu2 %v6215_v29 }
 0x6f1   : > { %6366 = vmatmul.bf16.vlgmr.msra.gmra.mxu1 %v6215_v29 }
 0x6f2   : > { %6482 = vmatpush.bf16.msra.mxu3 %v9805_v8  ;;  %6627 = vmatpush.bf16.msrb.mxu1 %v9817_v4 }
 0x6f4   : > { %6540 = vmatpush.bf16.msrb.mxu0 %v9800_v39 }
 0x6f6   : > { %6483 = vmatpush.bf16.msra.mxu3 %v9804_v9  ;;  %6628 = vmatpush.bf16.msrb.mxu1 %v9816_v25 }
 0x6f8   : > { %6541 = vmatpush.bf16.msrb.mxu0 %v9799_v45 }
 0x6fa   : > { %6484 = vmatpush.bf16.msra.mxu3 %v9803_v13  ;;  %6629 = vmatpush.bf16.msrb.mxu1 %v9815_v26 }
 0x6fc   : > { %6542 = vmatpush.bf16.msrb.mxu0 %v9798_v5 }
 0x6fe   : > { %6485 = vmatpush.bf16.msra.mxu3 %v9802_v11  ;;  %6630 = vmatpush.bf16.msrb.mxu1 %v9814_v30 }
 0x700   : > { %6543 = vmatpush.bf16.msrb.mxu0 %v9797_v24 }
 0x702   : > { %6631 = vmatpush.bf16.msrb.mxu1 %v9813_v23 }
 0x704   : > { %6544 = vmatpush.bf16.msrb.mxu0 %v9796_v43 }
 0x706   : > { %6632 = vmatpush.bf16.msrb.mxu1 %v9812_v28 }
 0x708   : > { %6545 = vmatpush.bf16.msrb.mxu0 %v9795_v50 }
 0x70a   : > { %6633 = vmatpush.bf16.msrb.mxu1 %v9811_v36 }
 0x70c   : > { %6546 = vmatpush.bf16.msrb.mxu0 %v9794_v60 }
 0x70e   : > { %6634 = vmatpush.bf16.msrb.mxu1 %v9810_v40 }
 0x70f   : > { %6547 = vmatmul.bf16.vlgmr.msrb.gmra.mxu0 %v6396_v12 }
 0x76c   : > { %v6354_v1 = vpop.f32.mrf.mxu0 }
 0x76d   : > { %v6355_v10 = vadd.f32 %v6354_v1, %v6179_v20 }
 0x76e   : > { %v6367_v32 = vpop.f32.mrf.mxu1 }
 0x76f   : > { %v6368_v33 = vadd.f32 %v6367_v32, %v6180_v59  ;;  %v6384_v14 = vmul.f32 0.5, %v6355_v10 }
 0x771   : > { %9925 = vtanh.f32 %v6384_v14  ;;  %v6385_v37 = vmul.f32 0.5, %v6368_v33 }
 0x773   : > { %v6380_v38 = vpop.f32.mrf.mxu2  ;;  %9927 = vtanh.f32 %v6385_v37 }
 0x774   : > { %v6381_v51 = vadd.f32 %v6380_v38, %v6181_v16  ;;  %v6356_v54 = vpop.f32.mrf.mxu0 }
 0x776   : > { %v6369_v31 = vpop.f32.mrf.mxu1  ;;  %9929 = vtanh.f32 %v6381_v51 }
 0x777   : > { %v9926_v55 = vpop.eup %9925 }
 0x778   : > { %v6388_v56 = vmul.f32 0.5, %v9926_v55 }
 0x779   : > { %v9928_v53 = vpop.eup %9927 }
 0x77a   : > { %v6390_v41 = vadd.f32 0.5, %v6388_v56  ;;  %v6389_v2 = vmul.f32 0.5, %v9928_v53 }
 0x77b   : > { %v6382_v57 = vpop.f32.mrf.mxu2 }
 0x77c   : > { %v9930_v58 = vpop.eup %9929  ;;  %v6391_v3 = vadd.f32 0.5, %v6389_v2 }
 0x77d   : > { %v6393_v62 = vmul.f32 %v9930_v58, %v6390_v41 }
 0x77f   : > { %9931 = vtanh.f32 %v6393_v62 }
 0x785   : > { %v9932_v7 = vpop.eup %9931 }
 0x786   : > { %v6395_v15 = vmul.f32 %v9932_v7, %v6391_v3 }
 0x788   : > { %v6413_v19 = vpack.c.bf16 %v6395_v15, %v6395_v15 }
 0x78a   : > { %6486 = vmatmul.bf16.vlgmr.msra.gmra.mxu3 %v6413_v19 }
 0x78c   : > { %v6548_v34 = vpop.f32.mrf.mxu0 }
 0x794   : > { %v6550_v35 = vpop.f32.mrf.mxu0 }
 0x80d   : > { %v6487_v47 = vpop.f32.mrf.mxu3 }
 0x80e   : > { %v6549_v48 = vadd.f32 %v6548_v34, %v6487_v47 }
 0x810   : > { %v6556_v52 = vadd.f32 %v9923_v46, %v6549_v48 }
 0x812   : > { %v6557_v27 = vmax.f32 %v6556_v52, 0.0 }
 0x814   : > { %v6558_v61 = vpack.c.bf16 %v6557_v27, %v6557_v27 }
 0x815   : > { %v6489_v63 = vpop.f32.mrf.mxu3 }
 0x816   : > { %6635 = vmatmul.bf16.vlgmr.msrb.gmra.mxu1 %v6558_v61 }
 0x893   : > { %v6636_v6 = vpop.f32.mrf.mxu1 }
 0x894   : > { %v6637_v18 = vadd.f32 %v9924_v0, %v6636_v6 }
 0x896   : > { %6640 = vst [vmem:[%s14454_s11] sm:$0xff] %v6637_v18 }
 0x89b   : > { %v6638_v21 = vpop.f32.mrf.mxu1 }
 0x89c PF: > { %p18_p1 = scmp.ge.s32.totalorder %s10037_s21, 6   ;;  %s14455_s17 = smov %s9951_s18 }
 0x89d   : > { %s14456_s18 = smov %s10048_s26  ;;  %s14457_s19 = smov %s10037_s21 }
 0x89e   :  { %20 = sbr.rel (!%p18_p1) target bundleno = 2 (0x2), region = 168 }

</bundles_post_ra>
